<compile_context>
chip_gen: v7x
topology: tpu7x:2x2x1
jax: 0.10.0
libtpu: 0.0.40
codegen_flags: <defaults>
</compile_context>

<pallas_src>
import functools

import jax
import jax.numpy as jnp
from jax.experimental import pallas as pl
from jax.experimental.pallas import tpu as pltpu

VMEM_SPEC = pl.BlockSpec(memory_space=pltpu.MemorySpace.VMEM)
COMPILER_PARAMS = pltpu.CompilerParams(vmem_limit_bytes=32 * 1024 * 1024)

ENC_PADS = (1, 1, 1, 0)   # paddings of the 4 encoder Conv2d(k=4, s=2) layers
DEC_PADS = (0, 1, 1, 1)   # paddings of the 4 decoder ConvTranspose2d(k=4, s=2)
BN_EPS = 1e-5


# ----------------------------- Pallas kernels ------------------------------

def _conv_bn_act_kernel(cols_ref, w_ref, g_ref, b_ref, o_ref, *, eps, slope):
    """Fused Conv-as-GEMM + BatchNorm (batch stats) + LeakyReLU(slope).

    The conv bias is omitted on purpose: a per-channel bias added before the
    mean subtraction of BatchNorm cancels exactly.
    """
    y = jnp.dot(cols_ref[...], w_ref[...],
                preferred_element_type=jnp.float32)            # (M, N) f32
    m = y.shape[0]
    mean = jnp.sum(y, axis=0, keepdims=True) * (1.0 / m)
    yc = y - mean
    var = jnp.sum(yc * yc, axis=0, keepdims=True) * (1.0 / m)  # biased variance
    scale = jax.lax.rsqrt(var + eps) * g_ref[...]              # fold gamma (1,N)
    yn = yc * scale + b_ref[...]
    o_ref[...] = jnp.where(yn >= 0.0, yn, slope * yn)


def conv_bn_act(cols, wmat, gamma, beta, slope, eps=BN_EPS):
    M = cols.shape[0]
    N = wmat.shape[1]
    return pl.pallas_call(
        functools.partial(_conv_bn_act_kernel, eps=eps, slope=slope),
        out_shape=jax.ShapeDtypeStruct((M, N), jnp.float32),
        in_specs=[VMEM_SPEC] * 4,
        out_specs=VMEM_SPEC,
        compiler_params=COMPILER_PARAMS,
    )(cols.astype(jnp.bfloat16), wmat.astype(jnp.bfloat16),
      gamma.reshape(1, N), beta.reshape(1, N))


def _deconv_bn_relu_kernel(cols_ref, w_ref, g_ref, b_ref, o_ref, *, eps):
    """Fused stride-2 ConvTranspose (as 4 per-parity stride-1 GEMMs, no
    zero-dilation work) + BatchNorm over all output positions + ReLU."""
    outs = []
    for par in range(4):                                       # static unroll
        outs.append(jnp.dot(cols_ref[par], w_ref[par],
                            preferred_element_type=jnp.float32))
    y = jnp.concatenate(outs, axis=0)                          # (4*Mp, N) f32
    m = y.shape[0]
    mean = jnp.sum(y, axis=0, keepdims=True) * (1.0 / m)
    yc = y - mean
    var = jnp.sum(yc * yc, axis=0, keepdims=True) * (1.0 / m)
    scale = jax.lax.rsqrt(var + eps) * g_ref[...]
    yn = yc * scale + b_ref[...]
    o_ref[...] = jnp.maximum(yn, 0.0)


def deconv_bn_relu(cols, wsub, gamma, beta, eps=BN_EPS):
    _, Mp, _ = cols.shape
    N = wsub.shape[2]
    return pl.pallas_call(
        functools.partial(_deconv_bn_relu_kernel, eps=eps),
        out_shape=jax.ShapeDtypeStruct((4 * Mp, N), jnp.float32),
        in_specs=[VMEM_SPEC] * 4,
        out_specs=VMEM_SPEC,
        compiler_params=COMPILER_PARAMS,
    )(cols.astype(jnp.bfloat16), wsub.astype(jnp.bfloat16),
      gamma.reshape(1, N), beta.reshape(1, N))


def _deconv_bias_tanh_kernel(cols_ref, w_ref, b_ref, o_ref):
    """Final decoder block: ConvTranspose (parity GEMMs) + bias + tanh."""
    outs = []
    for par in range(4):
        outs.append(jnp.dot(cols_ref[par], w_ref[par],
                            preferred_element_type=jnp.float32))
    y = jnp.concatenate(outs, axis=0) + b_ref[...]
    o_ref[...] = jnp.tanh(y)
    # TODO(synk): Cout=2 output is lane-masked on store; a transposed GEMM
    # would make it lane-dense but the absolute store cost here is ~16 KB.


def deconv_bias_tanh(cols, wsub, bias):
    _, Mp, _ = cols.shape
    N = wsub.shape[2]
    return pl.pallas_call(
        _deconv_bias_tanh_kernel,
        out_shape=jax.ShapeDtypeStruct((4 * Mp, N), jnp.float32),
        in_specs=[VMEM_SPEC] * 3,
        out_specs=VMEM_SPEC,
        compiler_params=COMPILER_PARAMS,
    )(cols.astype(jnp.bfloat16), wsub.astype(jnp.bfloat16), bias.reshape(1, N))


def _fc_reparam_kernel(x_ref, w_ref, b_ref, eps_ref, mulv_ref, z_ref, *, z_dim):
    """fc_mu and fc_logvar merged into one GEMM (N = 2*z_dim), with the
    reparameterization fused in.  f32 GEMM: the tensors are tiny."""
    acc = jnp.dot(x_ref[...], w_ref[...],
                  preferred_element_type=jnp.float32) + b_ref[...]
    mulv_ref[...] = acc
    mu = acc[:, :z_dim]
    lv = acc[:, z_dim:]
    z_ref[...] = mu + eps_ref[...] * jnp.exp(0.5 * lv)


def fc_reparam(out_enc, wcat, bcat, eps, z_dim):
    B = out_enc.shape[0]
    return pl.pallas_call(
        functools.partial(_fc_reparam_kernel, z_dim=z_dim),
        out_shape=(jax.ShapeDtypeStruct((B, 2 * z_dim), jnp.float32),
                   jax.ShapeDtypeStruct((B, z_dim), jnp.float32)),
        in_specs=[VMEM_SPEC] * 4,
        out_specs=(VMEM_SPEC, VMEM_SPEC),
        compiler_params=COMPILER_PARAMS,
    )(out_enc, wcat, bcat.reshape(1, 2 * z_dim), eps)


# ------------------------------- JAX glue ----------------------------------

def conv_cols_nhwc(x, k, s, pad):
    """NHWC im2col -> (B*Ho*Wo, k*k*C); column order (kh, kw, c)."""
    if pad:
        x = jnp.pad(x, ((0, 0), (pad, pad), (pad, pad), (0, 0)))
    B, Hp, Wp, C = x.shape
    Ho = (Hp - k) // s + 1
    Wo = (Wp - k) // s + 1
    taps = [x[:, kh:kh + (Ho - 1) * s + 1:s, kw:kw + (Wo - 1) * s + 1:s, :]
            for kh in range(k) for kw in range(k)]
    cols = jnp.stack(taps, axis=3).reshape(B * Ho * Wo, k * k * C)
    return cols, Ho, Wo


def conv_block(x, layer, padding, slope):
    """Conv2d(k=4, s=2, padding) -> BatchNorm2d -> LeakyReLU(slope), NHWC in/out."""
    w = layer["w"]                               # (Cout, Cin, 4, 4)
    cout, cin, k, _ = w.shape
    cols, Ho, Wo = conv_cols_nhwc(x, k, 2, padding)
    wmat = w.transpose(2, 3, 1, 0).reshape(k * k * cin, cout)   # rows (kh, kw, ci)
    y = conv_bn_act(cols, wmat, layer["gamma"], layer["beta"], slope)
    B = x.shape[0]
    return y.reshape(B, Ho, Wo, cout)


def _parity_meta(r, pad):
    """For ConvTranspose2d(k=4, s=2, padding=pad), output parity r along one
    spatial axis: returns (k0, lo_pad) where the nonzero kernel taps are
    {k0, k0+2} and the original input must be padded by lo_pad on the low side."""
    k0 = (r + pad) % 2
    d = (r + pad - k0) // 2
    return k0, 1 - d


def deconv_parity_cols(x, pad):
    """Per output-pixel parity (r, s), build the k=2, s=1 im2col of the ORIGINAL
    (undilated) NHWC input -> (4, B*Mh*Mw, 4*C); no structurally-zero columns."""
    B, H, W, C = x.shape
    Hout = (H - 1) * 2 - 2 * pad + 4
    Wout = (W - 1) * 2 - 2 * pad + 4
    Mh, Mw = Hout // 2, Wout // 2
    cols = []
    for r in range(2):
        _, pt = _parity_meta(r, pad)
        pb = Mh + 1 - pt - H
        for s in range(2):
            _, pleft = _parity_meta(s, pad)
            pright = Mw + 1 - pleft - W
            xp = jnp.pad(x, ((0, 0), (pt, pb), (pleft, pright), (0, 0)))
            taps = [xp[:, jh:jh + Mh, jw:jw + Mw, :]
                    for jh in range(2) for jw in range(2)]
            cols.append(jnp.stack(taps, axis=3).reshape(B * Mh * Mw, 4 * C))
    return jnp.stack(cols, axis=0), Hout, Wout


def deconv_parity_weights(w, pad):
    """ConvTranspose weight (Cin, Cout, 4, 4) -> (4, 4*Cin, Cout) stride-1
    2x2 sub-kernels; row order (jh, jw, ci) matches deconv_parity_cols."""
    cin, cout, _, _ = w.shape
    ws = []
    for r in range(2):
        kh0, _ = _parity_meta(r, pad)
        for s in range(2):
            kw0, _ = _parity_meta(s, pad)
            sub = jnp.stack(
                [jnp.stack([w[:, :, kh0 + 2 * (1 - jh), kw0 + 2 * (1 - jw)]
                            for jw in range(2)], axis=0)
                 for jh in range(2)], axis=0)                 # (2, 2, Cin, Cout)
            ws.append(sub.reshape(4 * cin, cout))
    return jnp.stack(ws, axis=0)


def parity_interleave(y, B, Mh, Mw, cout):
    """(4*Mh*Mw*B, Cout) parity-major rows -> NHWC (B, 2*Mh, 2*Mw, Cout)."""
    y = y.reshape(2, 2, B, Mh, Mw, cout)
    return y.transpose(2, 3, 0, 4, 1, 5).reshape(B, 2 * Mh, 2 * Mw, cout)


def convT_block(x, layer, padding, final):
    """ConvTranspose2d(k=4, s=2, padding) -> [BN + ReLU] or [bias + Tanh]."""
    w = layer["w"]                               # (Cin, Cout, 4, 4)
    cin, cout, _, _ = w.shape
    cols, Hout, Wout = deconv_parity_cols(x, padding)
    wsub = deconv_parity_weights(w, padding)
    if final:
        y = deconv_bias_tanh(cols, wsub, layer["b"])
    else:
        y = deconv_bn_relu(cols, wsub, layer["gamma"], layer["beta"])
    B = x.shape[0]
    return parity_interleave(y, B, Hout // 2, Wout // 2, cout)


def vae_forward(params, x, eps):
    B = x.shape[0]
    h = x.transpose(0, 2, 3, 1)                       # NCHW -> NHWC (once)
    for i in range(4):
        h = conv_block(h, params["enc"][i], ENC_PADS[i], slope=0.2)
    out_enc = h.reshape(B, -1)                        # (B, 8*hidden); == NCHW flatten (H=W=1)
    z_dim = params["fc_mu"]["w"].shape[0]
    wcat = jnp.concatenate([params["fc_mu"]["w"].T, params["fc_logvar"]["w"].T], axis=1)
    bcat = jnp.concatenate([params["fc_mu"]["b"], params["fc_logvar"]["b"]], axis=0)
    mulv, z = fc_reparam(out_enc, wcat, bcat, eps, z_dim)
    mu, logvar = mulv[:, :z_dim], mulv[:, z_dim:]
    d = z.reshape(B, 1, 1, z_dim)                     # NHWC bottleneck
    for i in range(4):
        d = convT_block(d, params["dec"][i], DEC_PADS[i], final=(i == 3))
    recon = d.transpose(0, 3, 1, 2)                   # NHWC -> NCHW (once)
    return recon, mu, logvar, (z, out_enc)


# --------------------------- deterministic init -----------------------------

def init_params(key, z_dim, im_chan):
    h = z_dim // 8
    enc_ch = [(im_chan, 2 * h), (2 * h, 4 * h), (4 * h, 8 * h), (8 * h, 8 * h)]
    dec_ch = [(8 * h, 8 * h), (8 * h, 4 * h), (4 * h, 2 * h), (2 * h, im_chan)]
    keys = iter(jax.random.split(key, 40))

    def nrm(shape, scale):
        return scale * jax.random.normal(next(keys), shape, jnp.float32)

    enc = []
    for cin, cout in enc_ch:
        # Conv bias kept for spec parity but unused: it is mathematically
        # annihilated by the following BatchNorm mean-subtraction.
        enc.append(dict(w=nrm((cout, cin, 4, 4), 0.1),
                        b=nrm((cout,), 0.05),
                        gamma=1.0 + nrm((cout,), 0.05),
                        beta=nrm((cout,), 0.05)))
    dec = []
    for i, (cin, cout) in enumerate(dec_ch):
        layer = dict(w=nrm((cin, cout, 4, 4), 0.1), b=nrm((cout,), 0.05))
        if i != 3:                                   # final layer has no BN
            layer["gamma"] = 1.0 + nrm((cout,), 0.05)
            layer["beta"] = nrm((cout,), 0.05)
        dec.append(layer)
    fc_mu = dict(w=nrm((z_dim, 8 * h), 0.1), b=nrm((z_dim,), 0.05))
    fc_logvar = dict(w=nrm((z_dim, 8 * h), 0.1), b=nrm((z_dim,), 0.05))
    return dict(enc=enc, dec=dec, fc_mu=fc_mu, fc_logvar=fc_logvar)


# ---------------------------------- main ------------------------------------

if __name__ == "__main__":
    # Small config consistent with the module: z_dim=64 -> hidden_dim=8;
    # the encoder architecture (k=4, s=2 x4, last pad=0) implies 32x32 input
    # to reach the 1x1 bottleneck required by fc_mu/fc_logvar.
    Z_DIM, IM_CHAN, B = 64, 2, 2

    key = jax.random.PRNGKey(0)
    kx, keps, kparams = jax.random.split(key, 3)
    x = jax.random.normal(kx, (B, IM_CHAN, 32, 32), jnp.float32)
    # TODO(synk): torch.randn_like RNG stream is not reproducible; eps drawn with jax.random.
    eps = jax.random.normal(keps, (B, Z_DIM), jnp.float32)
    params = init_params(kparams, Z_DIM, IM_CHAN)

    fwd = jax.jit(vae_forward)
    recon, mu, logvar, (z, out_enc) = fwd(params, x, eps)
    jax.block_until_ready((recon, mu, logvar, z, out_enc))

    assert recon.shape == (B, IM_CHAN, 32, 32)
    assert mu.shape == (B, Z_DIM) and logvar.shape == (B, Z_DIM)
    assert z.shape == (B, Z_DIM) and out_enc.shape == (B, 8 * (Z_DIM // 8))
    assert jnp.all(jnp.isfinite(recon))
    assert jnp.all(jnp.isfinite(mu)) and jnp.all(jnp.isfinite(logvar))
    print("KERNEL_OK")
</pallas_src>

<mosaic_0001>
module attributes {stable_mosaic.version = 11 : i64} {
  func.func @_conv_bn_act_kernel(%arg0: memref<512x32xbf16, #tpu.memory_space<vmem>>, %arg1: memref<32x16xbf16, #tpu.memory_space<vmem>>, %arg2: memref<1x16xf32, #tpu.memory_space<vmem>>, %arg3: memref<1x16xf32, #tpu.memory_space<vmem>>, %arg4: memref<512x16xf32, #tpu.memory_space<vmem>>) attributes {dimension_semantics = [], scalar_prefetch = 0 : i64, scratch_operands = 0 : i64, tpu.core_type = #tpu.core_type<tc>} {
    %c0 = arith.constant 0 : index
    %c0_0 = arith.constant 0 : index
    %0 = vector.load %arg0[%c0, %c0_0] : memref<512x32xbf16, #tpu.memory_space<vmem>>, vector<512x32xbf16>
    %c0_1 = arith.constant 0 : index
    %c0_2 = arith.constant 0 : index
    %1 = vector.load %arg1[%c0_1, %c0_2] : memref<32x16xbf16, #tpu.memory_space<vmem>>, vector<32x16xbf16>
    %cst = arith.constant dense<0.000000e+00> : vector<512x16xf32>
    %2 = tpu.matmul %0, %1, %cst {dimension_numbers = #tpu.dot_dimension_numbers<[1], [0], [0], [1], [0, 0, 1, 1], [], []>} : vector<512x32xbf16>, vector<32x16xbf16>, vector<512x16xf32> -> vector<512x16xf32>
    %cst_3 = arith.constant dense<0.000000e+00> : vector<16xf32>
    %3 = vector.multi_reduction <add>, %2, %cst_3 [0] : vector<512x16xf32> to vector<16xf32>
    %4 = vector.shape_cast %3 : vector<16xf32> to vector<1x16xf32>
    %cst_4 = arith.constant 0.001953125 : f32
    %5 = vector.broadcast %cst_4 : f32 to vector<1x16xf32>
    %6 = arith.mulf %4, %5 : vector<1x16xf32>
    %7 = vector.broadcast %6 : vector<1x16xf32> to vector<512x16xf32>
    %8 = arith.subf %2, %7 : vector<512x16xf32>
    %9 = arith.mulf %8, %8 : vector<512x16xf32>
    %cst_5 = arith.constant dense<0.000000e+00> : vector<16xf32>
    %10 = vector.multi_reduction <add>, %9, %cst_5 [0] : vector<512x16xf32> to vector<16xf32>
    %11 = vector.shape_cast %10 : vector<16xf32> to vector<1x16xf32>
    %cst_6 = arith.constant 0.001953125 : f32
    %12 = vector.broadcast %cst_6 : f32 to vector<1x16xf32>
    %13 = arith.mulf %11, %12 : vector<1x16xf32>
    %cst_7 = arith.constant 9.99999974E-6 : f32
    %14 = vector.broadcast %cst_7 : f32 to vector<1x16xf32>
    %15 = arith.addf %13, %14 : vector<1x16xf32>
    %16 = math.rsqrt %15 : vector<1x16xf32>
    %c0_8 = arith.constant 0 : index
    %c0_9 = arith.constant 0 : index
    %17 = vector.load %arg2[%c0_8, %c0_9] : memref<1x16xf32, #tpu.memory_space<vmem>>, vector<1x16xf32>
    %18 = arith.mulf %16, %17 : vector<1x16xf32>
    %19 = vector.broadcast %18 : vector<1x16xf32> to vector<512x16xf32>
    %20 = arith.mulf %8, %19 : vector<512x16xf32>
    %c0_10 = arith.constant 0 : index
    %c0_11 = arith.constant 0 : index
    %21 = vector.load %arg3[%c0_10, %c0_11] : memref<1x16xf32, #tpu.memory_space<vmem>>, vector<1x16xf32>
    %22 = vector.broadcast %21 : vector<1x16xf32> to vector<512x16xf32>
    %23 = arith.addf %20, %22 : vector<512x16xf32>
    %cst_12 = arith.constant 0.000000e+00 : f32
    %24 = vector.broadcast %cst_12 : f32 to vector<512x16xf32>
    %25 = arith.cmpf oge, %23, %24 : vector<512x16xf32>
    %cst_13 = arith.constant 2.000000e-01 : f32
    %26 = vector.broadcast %cst_13 : f32 to vector<512x16xf32>
    %27 = arith.mulf %26, %23 : vector<512x16xf32>
    %28 = arith.select %25, %23, %27 : vector<512x16xi1>, vector<512x16xf32>
    %c0_14 = arith.constant 0 : index
    %c0_15 = arith.constant 0 : index
    %29 = vector.load %arg4[%c0_14, %c0_15] : memref<512x16xf32, #tpu.memory_space<vmem>>, vector<512x16xf32>
    tpu.vector_store %arg4[%c0_14, %c0_15], %28 {strides = array<i32>} : memref<512x16xf32, #tpu.memory_space<vmem>>, vector<512x16xf32>,
    return
  }
}

module attributes {stable_mosaic.version = 11 : i64} {
  func.func @_conv_bn_act_kernel(%arg0: memref<128x256xbf16, #tpu.memory_space<vmem>>, %arg1: memref<256x32xbf16, #tpu.memory_space<vmem>>, %arg2: memref<1x32xf32, #tpu.memory_space<vmem>>, %arg3: memref<1x32xf32, #tpu.memory_space<vmem>>, %arg4: memref<128x32xf32, #tpu.memory_space<vmem>>) attributes {dimension_semantics = [], scalar_prefetch = 0 : i64, scratch_operands = 0 : i64, tpu.core_type = #tpu.core_type<tc>} {
    %c0 = arith.constant 0 : index
    %c0_0 = arith.constant 0 : index
    %0 = vector.load %arg0[%c0, %c0_0] : memref<128x256xbf16, #tpu.memory_space<vmem>>, vector<128x256xbf16>
    %c0_1 = arith.constant 0 : index
    %c0_2 = arith.constant 0 : index
    %1 = vector.load %arg1[%c0_1, %c0_2] : memref<256x32xbf16, #tpu.memory_space<vmem>>, vector<256x32xbf16>
    %cst = arith.constant dense<0.000000e+00> : vector<128x32xf32>
    %2 = tpu.matmul %0, %1, %cst {dimension_numbers = #tpu.dot_dimension_numbers<[1], [0], [0], [1], [0, 0, 1, 1], [], []>} : vector<128x256xbf16>, vector<256x32xbf16>, vector<128x32xf32> -> vector<128x32xf32>
    %cst_3 = arith.constant dense<0.000000e+00> : vector<32xf32>
    %3 = vector.multi_reduction <add>, %2, %cst_3 [0] : vector<128x32xf32> to vector<32xf32>
    %4 = vector.shape_cast %3 : vector<32xf32> to vector<1x32xf32>
    %cst_4 = arith.constant 7.812500e-03 : f32
    %5 = vector.broadcast %cst_4 : f32 to vector<1x32xf32>
    %6 = arith.mulf %4, %5 : vector<1x32xf32>
    %7 = vector.broadcast %6 : vector<1x32xf32> to vector<128x32xf32>
    %8 = arith.subf %2, %7 : vector<128x32xf32>
    %9 = arith.mulf %8, %8 : vector<128x32xf32>
    %cst_5 = arith.constant dense<0.000000e+00> : vector<32xf32>
    %10 = vector.multi_reduction <add>, %9, %cst_5 [0] : vector<128x32xf32> to vector<32xf32>
    %11 = vector.shape_cast %10 : vector<32xf32> to vector<1x32xf32>
    %cst_6 = arith.constant 7.812500e-03 : f32
    %12 = vector.broadcast %cst_6 : f32 to vector<1x32xf32>
    %13 = arith.mulf %11, %12 : vector<1x32xf32>
    %cst_7 = arith.constant 9.99999974E-6 : f32
    %14 = vector.broadcast %cst_7 : f32 to vector<1x32xf32>
    %15 = arith.addf %13, %14 : vector<1x32xf32>
    %16 = math.rsqrt %15 : vector<1x32xf32>
    %c0_8 = arith.constant 0 : index
    %c0_9 = arith.constant 0 : index
    %17 = vector.load %arg2[%c0_8, %c0_9] : memref<1x32xf32, #tpu.memory_space<vmem>>, vector<1x32xf32>
    %18 = arith.mulf %16, %17 : vector<1x32xf32>
    %19 = vector.broadcast %18 : vector<1x32xf32> to vector<128x32xf32>
    %20 = arith.mulf %8, %19 : vector<128x32xf32>
    %c0_10 = arith.constant 0 : index
    %c0_11 = arith.constant 0 : index
    %21 = vector.load %arg3[%c0_10, %c0_11] : memref<1x32xf32, #tpu.memory_space<vmem>>, vector<1x32xf32>
    %22 = vector.broadcast %21 : vector<1x32xf32> to vector<128x32xf32>
    %23 = arith.addf %20, %22 : vector<128x32xf32>
    %cst_12 = arith.constant 0.000000e+00 : f32
    %24 = vector.broadcast %cst_12 : f32 to vector<128x32xf32>
    %25 = arith.cmpf oge, %23, %24 : vector<128x32xf32>
    %cst_13 = arith.constant 2.000000e-01 : f32
    %26 = vector.broadcast %cst_13 : f32 to vector<128x32xf32>
    %27 = arith.mulf %26, %23 : vector<128x32xf32>
    %28 = arith.select %25, %23, %27 : vector<128x32xi1>, vector<128x32xf32>
    %c0_14 = arith.constant 0 : index
    %c0_15 = arith.constant 0 : index
    %29 = vector.load %arg4[%c0_14, %c0_15] : memref<128x32xf32, #tpu.memory_space<vmem>>, vector<128x32xf32>
    tpu.vector_store %arg4[%c0_14, %c0_15], %28 {strides = array<i32>} : memref<128x32xf32, #tpu.memory_space<vmem>>, vector<128x32xf32>,
    return
  }
}

module attributes {stable_mosaic.version = 11 : i64} {
  func.func @_conv_bn_act_kernel(%arg0: memref<32x512xbf16, #tpu.memory_space<vmem>>, %arg1: memref<512x64xbf16, #tpu.memory_space<vmem>>, %arg2: memref<1x64xf32, #tpu.memory_space<vmem>>, %arg3: memref<1x64xf32, #tpu.memory_space<vmem>>, %arg4: memref<32x64xf32, #tpu.memory_space<vmem>>) attributes {dimension_semantics = [], scalar_prefetch = 0 : i64, scratch_operands = 0 : i64, tpu.core_type = #tpu.core_type<tc>} {
    %c0 = arith.constant 0 : index
    %c0_0 = arith.constant 0 : index
    %0 = vector.load %arg0[%c0, %c0_0] : memref<32x512xbf16, #tpu.memory_space<vmem>>, vector<32x512xbf16>
    %c0_1 = arith.constant 0 : index
    %c0_2 = arith.constant 0 : index
    %1 = vector.load %arg1[%c0_1, %c0_2] : memref<512x64xbf16, #tpu.memory_space<vmem>>, vector<512x64xbf16>
    %cst = arith.constant dense<0.000000e+00> : vector<32x64xf32>
    %2 = tpu.matmul %0, %1, %cst {dimension_numbers = #tpu.dot_dimension_numbers<[1], [0], [0], [1], [0, 0, 1, 1], [], []>} : vector<32x512xbf16>, vector<512x64xbf16>, vector<32x64xf32> -> vector<32x64xf32>
    %cst_3 = arith.constant dense<0.000000e+00> : vector<64xf32>
    %3 = vector.multi_reduction <add>, %2, %cst_3 [0] : vector<32x64xf32> to vector<64xf32>
    %4 = vector.shape_cast %3 : vector<64xf32> to vector<1x64xf32>
    %cst_4 = arith.constant 3.125000e-02 : f32
    %5 = vector.broadcast %cst_4 : f32 to vector<1x64xf32>
    %6 = arith.mulf %4, %5 : vector<1x64xf32>
    %7 = vector.broadcast %6 : vector<1x64xf32> to vector<32x64xf32>
    %8 = arith.subf %2, %7 : vector<32x64xf32>
    %9 = arith.mulf %8, %8 : vector<32x64xf32>
    %cst_5 = arith.constant dense<0.000000e+00> : vector<64xf32>
    %10 = vector.multi_reduction <add>, %9, %cst_5 [0] : vector<32x64xf32> to vector<64xf32>
    %11 = vector.shape_cast %10 : vector<64xf32> to vector<1x64xf32>
    %cst_6 = arith.constant 3.125000e-02 : f32
    %12 = vector.broadcast %cst_6 : f32 to vector<1x64xf32>
    %13 = arith.mulf %11, %12 : vector<1x64xf32>
    %cst_7 = arith.constant 9.99999974E-6 : f32
    %14 = vector.broadcast %cst_7 : f32 to vector<1x64xf32>
    %15 = arith.addf %13, %14 : vector<1x64xf32>
    %16 = math.rsqrt %15 : vector<1x64xf32>
    %c0_8 = arith.constant 0 : index
    %c0_9 = arith.constant 0 : index
    %17 = vector.load %arg2[%c0_8, %c0_9] : memref<1x64xf32, #tpu.memory_space<vmem>>, vector<1x64xf32>
    %18 = arith.mulf %16, %17 : vector<1x64xf32>
    %19 = vector.broadcast %18 : vector<1x64xf32> to vector<32x64xf32>
    %20 = arith.mulf %8, %19 : vector<32x64xf32>
    %c0_10 = arith.constant 0 : index
    %c0_11 = arith.constant 0 : index
    %21 = vector.load %arg3[%c0_10, %c0_11] : memref<1x64xf32, #tpu.memory_space<vmem>>, vector<1x64xf32>
    %22 = vector.broadcast %21 : vector<1x64xf32> to vector<32x64xf32>
    %23 = arith.addf %20, %22 : vector<32x64xf32>
    %cst_12 = arith.constant 0.000000e+00 : f32
    %24 = vector.broadcast %cst_12 : f32 to vector<32x64xf32>
    %25 = arith.cmpf oge, %23, %24 : vector<32x64xf32>
    %cst_13 = arith.constant 2.000000e-01 : f32
    %26 = vector.broadcast %cst_13 : f32 to vector<32x64xf32>
    %27 = arith.mulf %26, %23 : vector<32x64xf32>
    %28 = arith.select %25, %23, %27 : vector<32x64xi1>, vector<32x64xf32>
    %c0_14 = arith.constant 0 : index
    %c0_15 = arith.constant 0 : index
    %29 = vector.load %arg4[%c0_14, %c0_15] : memref<32x64xf32, #tpu.memory_space<vmem>>, vector<32x64xf32>
    tpu.vector_store %arg4[%c0_14, %c0_15], %28 {strides = array<i32>} : memref<32x64xf32, #tpu.memory_space<vmem>>, vector<32x64xf32>,
    return
  }
}

module attributes {stable_mosaic.version = 11 : i64} {
  func.func @_conv_bn_act_kernel(%arg0: memref<2x1024xbf16, #tpu.memory_space<vmem>>, %arg1: memref<1024x64xbf16, #tpu.memory_space<vmem>>, %arg2: memref<1x64xf32, #tpu.memory_space<vmem>>, %arg3: memref<1x64xf32, #tpu.memory_space<vmem>>, %arg4: memref<2x64xf32, #tpu.memory_space<vmem>>) attributes {dimension_semantics = [], scalar_prefetch = 0 : i64, scratch_operands = 0 : i64, tpu.core_type = #tpu.core_type<tc>} {
    %c0 = arith.constant 0 : index
    %c0_0 = arith.constant 0 : index
    %0 = vector.load %arg0[%c0, %c0_0] : memref<2x1024xbf16, #tpu.memory_space<vmem>>, vector<2x1024xbf16>
    %c0_1 = arith.constant 0 : index
    %c0_2 = arith.constant 0 : index
    %1 = vector.load %arg1[%c0_1, %c0_2] : memref<1024x64xbf16, #tpu.memory_space<vmem>>, vector<1024x64xbf16>
    %cst = arith.constant dense<0.000000e+00> : vector<2x64xf32>
    %2 = tpu.matmul %0, %1, %cst {dimension_numbers = #tpu.dot_dimension_numbers<[1], [0], [0], [1], [0, 0, 1, 1], [], []>} : vector<2x1024xbf16>, vector<1024x64xbf16>, vector<2x64xf32> -> vector<2x64xf32>
    %cst_3 = arith.constant dense<0.000000e+00> : vector<64xf32>
    %3 = vector.multi_reduction <add>, %2, %cst_3 [0] : vector<2x64xf32> to vector<64xf32>
    %4 = vector.shape_cast %3 : vector<64xf32> to vector<1x64xf32>
    %cst_4 = arith.constant 5.000000e-01 : f32
    %5 = vector.broadcast %cst_4 : f32 to vector<1x64xf32>
    %6 = arith.mulf %4, %5 : vector<1x64xf32>
    %7 = vector.broadcast %6 : vector<1x64xf32> to vector<2x64xf32>
    %8 = arith.subf %2, %7 : vector<2x64xf32>
    %9 = arith.mulf %8, %8 : vector<2x64xf32>
    %cst_5 = arith.constant dense<0.000000e+00> : vector<64xf32>
    %10 = vector.multi_reduction <add>, %9, %cst_5 [0] : vector<2x64xf32> to vector<64xf32>
    %11 = vector.shape_cast %10 : vector<64xf32> to vector<1x64xf32>
    %cst_6 = arith.constant 5.000000e-01 : f32
    %12 = vector.broadcast %cst_6 : f32 to vector<1x64xf32>
    %13 = arith.mulf %11, %12 : vector<1x64xf32>
    %cst_7 = arith.constant 9.99999974E-6 : f32
    %14 = vector.broadcast %cst_7 : f32 to vector<1x64xf32>
    %15 = arith.addf %13, %14 : vector<1x64xf32>
    %16 = math.rsqrt %15 : vector<1x64xf32>
    %c0_8 = arith.constant 0 : index
    %c0_9 = arith.constant 0 : index
    %17 = vector.load %arg2[%c0_8, %c0_9] : memref<1x64xf32, #tpu.memory_space<vmem>>, vector<1x64xf32>
    %18 = arith.mulf %16, %17 : vector<1x64xf32>
    %19 = vector.broadcast %18 : vector<1x64xf32> to vector<2x64xf32>
    %20 = arith.mulf %8, %19 : vector<2x64xf32>
    %c0_10 = arith.constant 0 : index
    %c0_11 = arith.constant 0 : index
    %21 = vector.load %arg3[%c0_10, %c0_11] : memref<1x64xf32, #tpu.memory_space<vmem>>, vector<1x64xf32>
    %22 = vector.broadcast %21 : vector<1x64xf32> to vector<2x64xf32>
    %23 = arith.addf %20, %22 : vector<2x64xf32>
    %cst_12 = arith.constant 0.000000e+00 : f32
    %24 = vector.broadcast %cst_12 : f32 to vector<2x64xf32>
    %25 = arith.cmpf oge, %23, %24 : vector<2x64xf32>
    %cst_13 = arith.constant 2.000000e-01 : f32
    %26 = vector.broadcast %cst_13 : f32 to vector<2x64xf32>
    %27 = arith.mulf %26, %23 : vector<2x64xf32>
    %28 = arith.select %25, %23, %27 : vector<2x64xi1>, vector<2x64xf32>
    %c0_14 = arith.constant 0 : index
    %c0_15 = arith.constant 0 : index
    %29 = vector.load %arg4[%c0_14, %c0_15] : memref<2x64xf32, #tpu.memory_space<vmem>>, vector<2x64xf32>
    tpu.vector_store %arg4[%c0_14, %c0_15], %28 {strides = array<i32>} : memref<2x64xf32, #tpu.memory_space<vmem>>, vector<2x64xf32>,
    return
  }
}

module attributes {stable_mosaic.version = 11 : i64} {
  func.func @_fc_reparam_kernel(%arg0: memref<2x64xf32, #tpu.memory_space<vmem>>, %arg1: memref<64x128xf32, #tpu.memory_space<vmem>>, %arg2: memref<1x128xf32, #tpu.memory_space<vmem>>, %arg3: memref<2x64xf32, #tpu.memory_space<vmem>>, %arg4: memref<2x128xf32, #tpu.memory_space<vmem>>, %arg5: memref<2x64xf32, #tpu.memory_space<vmem>>) attributes {dimension_semantics = [], scalar_prefetch = 0 : i64, scratch_operands = 0 : i64, tpu.core_type = #tpu.core_type<tc>} {
    %c0 = arith.constant 0 : index
    %c0_0 = arith.constant 0 : index
    %0 = vector.load %arg0[%c0, %c0_0] : memref<2x64xf32, #tpu.memory_space<vmem>>, vector<2x64xf32>
    %c0_1 = arith.constant 0 : index
    %c0_2 = arith.constant 0 : index
    %1 = vector.load %arg1[%c0_1, %c0_2] : memref<64x128xf32, #tpu.memory_space<vmem>>, vector<64x128xf32>
    %cst = arith.constant dense<0.000000e+00> : vector<2x128xf32>
    %2 = tpu.matmul %0, %1, %cst {dimension_numbers = #tpu.dot_dimension_numbers<[1], [0], [0], [1], [0, 0, 1, 1], [], []>} : vector<2x64xf32>, vector<64x128xf32>, vector<2x128xf32> -> vector<2x128xf32>
    %c0_3 = arith.constant 0 : index
    %c0_4 = arith.constant 0 : index
    %3 = vector.load %arg2[%c0_3, %c0_4] : memref<1x128xf32, #tpu.memory_space<vmem>>, vector<1x128xf32>
    %4 = vector.broadcast %3 : vector<1x128xf32> to vector<2x128xf32>
    %5 = arith.addf %2, %4 : vector<2x128xf32>
    %c0_5 = arith.constant 0 : index
    %c0_6 = arith.constant 0 : index
    %6 = vector.load %arg4[%c0_5, %c0_6] : memref<2x128xf32, #tpu.memory_space<vmem>>, vector<2x128xf32>
    tpu.vector_store %arg4[%c0_5, %c0_6], %5 {strides = array<i32>} : memref<2x128xf32, #tpu.memory_space<vmem>>, vector<2x128xf32>,
    %7 = vector.extract_strided_slice %5 {offsets = [0, 0], sizes = [2, 64], strides = [1, 1]} : vector<2x128xf32> to vector<2x64xf32>
    %8 = vector.extract_strided_slice %5 {offsets = [0, 64], sizes = [2, 64], strides = [1, 1]} : vector<2x128xf32> to vector<2x64xf32>
    %c0_7 = arith.constant 0 : index
    %c0_8 = arith.constant 0 : index
    %9 = vector.load %arg3[%c0_7, %c0_8] : memref<2x64xf32, #tpu.memory_space<vmem>>, vector<2x64xf32>
    %cst_9 = arith.constant 5.000000e-01 : f32
    %10 = vector.broadcast %cst_9 : f32 to vector<2x64xf32>
    %11 = arith.mulf %10, %8 : vector<2x64xf32>
    %12 = math.exp %11 : vector<2x64xf32>
    %13 = arith.mulf %9, %12 : vector<2x64xf32>
    %14 = arith.addf %7, %13 : vector<2x64xf32>
    %c0_10 = arith.constant 0 : index
    %c0_11 = arith.constant 0 : index
    %15 = vector.load %arg5[%c0_10, %c0_11] : memref<2x64xf32, #tpu.memory_space<vmem>>, vector<2x64xf32>
    tpu.vector_store %arg5[%c0_10, %c0_11], %14 {strides = array<i32>} : memref<2x64xf32, #tpu.memory_space<vmem>>, vector<2x64xf32>,
    return
  }
}

module attributes {stable_mosaic.version = 11 : i64} {
  func.func @_deconv_bn_relu_kernel(%arg0: memref<4x8x256xbf16, #tpu.memory_space<vmem>>, %arg1: memref<4x256x64xbf16, #tpu.memory_space<vmem>>, %arg2: memref<1x64xf32, #tpu.memory_space<vmem>>, %arg3: memref<1x64xf32, #tpu.memory_space<vmem>>, %arg4: memref<32x64xf32, #tpu.memory_space<vmem>>) attributes {dimension_semantics = [], scalar_prefetch = 0 : i64, scratch_operands = 0 : i64, tpu.core_type = #tpu.core_type<tc>} {
    %c0 = arith.constant 0 : index
    %c0_0 = arith.constant 0 : index
    %c0_1 = arith.constant 0 : index
    %0 = vector.load %arg0[%c0, %c0_0, %c0_1] : memref<4x8x256xbf16, #tpu.memory_space<vmem>>, vector<1x8x256xbf16>
    %1 = vector.shape_cast %0 : vector<1x8x256xbf16> to vector<8x256xbf16>
    %c0_2 = arith.constant 0 : index
    %c0_3 = arith.constant 0 : index
    %c0_4 = arith.constant 0 : index
    %2 = vector.load %arg1[%c0_2, %c0_3, %c0_4] : memref<4x256x64xbf16, #tpu.memory_space<vmem>>, vector<1x256x64xbf16>
    %3 = vector.shape_cast %2 : vector<1x256x64xbf16> to vector<256x64xbf16>
    %cst = arith.constant dense<0.000000e+00> : vector<8x64xf32>
    %4 = tpu.matmul %1, %3, %cst {dimension_numbers = #tpu.dot_dimension_numbers<[1], [0], [0], [1], [0, 0, 1, 1], [], []>} : vector<8x256xbf16>, vector<256x64xbf16>, vector<8x64xf32> -> vector<8x64xf32>
    %c1 = arith.constant 1 : index
    %c0_5 = arith.constant 0 : index
    %c0_6 = arith.constant 0 : index
    %5 = vector.load %arg0[%c1, %c0_5, %c0_6] : memref<4x8x256xbf16, #tpu.memory_space<vmem>>, vector<1x8x256xbf16>
    %6 = vector.shape_cast %5 : vector<1x8x256xbf16> to vector<8x256xbf16>
    %c1_7 = arith.constant 1 : index
    %c0_8 = arith.constant 0 : index
    %c0_9 = arith.constant 0 : index
    %7 = vector.load %arg1[%c1_7, %c0_8, %c0_9] : memref<4x256x64xbf16, #tpu.memory_space<vmem>>, vector<1x256x64xbf16>
    %8 = vector.shape_cast %7 : vector<1x256x64xbf16> to vector<256x64xbf16>
    %cst_10 = arith.constant dense<0.000000e+00> : vector<8x64xf32>
    %9 = tpu.matmul %6, %8, %cst_10 {dimension_numbers = #tpu.dot_dimension_numbers<[1], [0], [0], [1], [0, 0, 1, 1], [], []>} : vector<8x256xbf16>, vector<256x64xbf16>, vector<8x64xf32> -> vector<8x64xf32>
    %c2 = arith.constant 2 : index
    %c0_11 = arith.constant 0 : index
    %c0_12 = arith.constant 0 : index
    %10 = vector.load %arg0[%c2, %c0_11, %c0_12] : memref<4x8x256xbf16, #tpu.memory_space<vmem>>, vector<1x8x256xbf16>
    %11 = vector.shape_cast %10 : vector<1x8x256xbf16> to vector<8x256xbf16>
    %c2_13 = arith.constant 2 : index
    %c0_14 = arith.constant 0 : index
    %c0_15 = arith.constant 0 : index
    %12 = vector.load %arg1[%c2_13, %c0_14, %c0_15] : memref<4x256x64xbf16, #tpu.memory_space<vmem>>, vector<1x256x64xbf16>
    %13 = vector.shape_cast %12 : vector<1x256x64xbf16> to vector<256x64xbf16>
    %cst_16 = arith.constant dense<0.000000e+00> : vector<8x64xf32>
    %14 = tpu.matmul %11, %13, %cst_16 {dimension_numbers = #tpu.dot_dimension_numbers<[1], [0], [0], [1], [0, 0, 1, 1], [], []>} : vector<8x256xbf16>, vector<256x64xbf16>, vector<8x64xf32> -> vector<8x64xf32>
    %c3 = arith.constant 3 : index
    %c0_17 = arith.constant 0 : index
    %c0_18 = arith.constant 0 : index
    %15 = vector.load %arg0[%c3, %c0_17, %c0_18] : memref<4x8x256xbf16, #tpu.memory_space<vmem>>, vector<1x8x256xbf16>
    %16 = vector.shape_cast %15 : vector<1x8x256xbf16> to vector<8x256xbf16>
    %c3_19 = arith.constant 3 : index
    %c0_20 = arith.constant 0 : index
    %c0_21 = arith.constant 0 : index
    %17 = vector.load %arg1[%c3_19, %c0_20, %c0_21] : memref<4x256x64xbf16, #tpu.memory_space<vmem>>, vector<1x256x64xbf16>
    %18 = vector.shape_cast %17 : vector<1x256x64xbf16> to vector<256x64xbf16>
    %cst_22 = arith.constant dense<0.000000e+00> : vector<8x64xf32>
    %19 = tpu.matmul %16, %18, %cst_22 {dimension_numbers = #tpu.dot_dimension_numbers<[1], [0], [0], [1], [0, 0, 1, 1], [], []>} : vector<8x256xbf16>, vector<256x64xbf16>, vector<8x64xf32> -> vector<8x64xf32>
    %20 = tpu.concatenate %4, %9, %14, %19 in 0 : vector<8x64xf32>, vector<8x64xf32>, vector<8x64xf32>, vector<8x64xf32> -> vector<32x64xf32>
    %cst_23 = arith.constant dense<0.000000e+00> : vector<64xf32>
    %21 = vector.multi_reduction <add>, %20, %cst_23 [0] : vector<32x64xf32> to vector<64xf32>
    %22 = vector.shape_cast %21 : vector<64xf32> to vector<1x64xf32>
    %cst_24 = arith.constant 3.125000e-02 : f32
    %23 = vector.broadcast %cst_24 : f32 to vector<1x64xf32>
    %24 = arith.mulf %22, %23 : vector<1x64xf32>
    %25 = vector.broadcast %24 : vector<1x64xf32> to vector<32x64xf32>
    %26 = arith.subf %20, %25 : vector<32x64xf32>
    %27 = arith.mulf %26, %26 : vector<32x64xf32>
    %cst_25 = arith.constant dense<0.000000e+00> : vector<64xf32>
    %28 = vector.multi_reduction <add>, %27, %cst_25 [0] : vector<32x64xf32> to vector<64xf32>
    %29 = vector.shape_cast %28 : vector<64xf32> to vector<1x64xf32>
    %cst_26 = arith.constant 3.125000e-02 : f32
    %30 = vector.broadcast %cst_26 : f32 to vector<1x64xf32>
    %31 = arith.mulf %29, %30 : vector<1x64xf32>
    %cst_27 = arith.constant 9.99999974E-6 : f32
    %32 = vector.broadcast %cst_27 : f32 to vector<1x64xf32>
    %33 = arith.addf %31, %32 : vector<1x64xf32>
    %34 = math.rsqrt %33 : vector<1x64xf32>
    %c0_28 = arith.constant 0 : index
    %c0_29 = arith.constant 0 : index
    %35 = vector.load %arg2[%c0_28, %c0_29] : memref<1x64xf32, #tpu.memory_space<vmem>>, vector<1x64xf32>
    %36 = arith.mulf %34, %35 : vector<1x64xf32>
    %37 = vector.broadcast %36 : vector<1x64xf32> to vector<32x64xf32>
    %38 = arith.mulf %26, %37 : vector<32x64xf32>
    %c0_30 = arith.constant 0 : index
    %c0_31 = arith.constant 0 : index
    %39 = vector.load %arg3[%c0_30, %c0_31] : memref<1x64xf32, #tpu.memory_space<vmem>>, vector<1x64xf32>
    %40 = vector.broadcast %39 : vector<1x64xf32> to vector<32x64xf32>
    %41 = arith.addf %38, %40 : vector<32x64xf32>
    %cst_32 = arith.constant 0.000000e+00 : f32
    %42 = vector.broadcast %cst_32 : f32 to vector<32x64xf32>
    %43 = arith.maximumf %41, %42 : vector<32x64xf32>
    %c0_33 = arith.constant 0 : index
    %c0_34 = arith.constant 0 : index
    %44 = vector.load %arg4[%c0_33, %c0_34] : memref<32x64xf32, #tpu.memory_space<vmem>>, vector<32x64xf32>
    tpu.vector_store %arg4[%c0_33, %c0_34], %43 {strides = array<i32>} : memref<32x64xf32, #tpu.memory_space<vmem>>, vector<32x64xf32>,
    return
  }
}

module attributes {stable_mosaic.version = 11 : i64} {
  func.func @_deconv_bn_relu_kernel(%arg0: memref<4x32x256xbf16, #tpu.memory_space<vmem>>, %arg1: memref<4x256x32xbf16, #tpu.memory_space<vmem>>, %arg2: memref<1x32xf32, #tpu.memory_space<vmem>>, %arg3: memref<1x32xf32, #tpu.memory_space<vmem>>, %arg4: memref<128x32xf32, #tpu.memory_space<vmem>>) attributes {dimension_semantics = [], scalar_prefetch = 0 : i64, scratch_operands = 0 : i64, tpu.core_type = #tpu.core_type<tc>} {
    %c0 = arith.constant 0 : index
    %c0_0 = arith.constant 0 : index
    %c0_1 = arith.constant 0 : index
    %0 = vector.load %arg0[%c0, %c0_0, %c0_1] : memref<4x32x256xbf16, #tpu.memory_space<vmem>>, vector<1x32x256xbf16>
    %1 = vector.shape_cast %0 : vector<1x32x256xbf16> to vector<32x256xbf16>
    %c0_2 = arith.constant 0 : index
    %c0_3 = arith.constant 0 : index
    %c0_4 = arith.constant 0 : index
    %2 = vector.load %arg1[%c0_2, %c0_3, %c0_4] : memref<4x256x32xbf16, #tpu.memory_space<vmem>>, vector<1x256x32xbf16>
    %3 = vector.shape_cast %2 : vector<1x256x32xbf16> to vector<256x32xbf16>
    %cst = arith.constant dense<0.000000e+00> : vector<32x32xf32>
    %4 = tpu.matmul %1, %3, %cst {dimension_numbers = #tpu.dot_dimension_numbers<[1], [0], [0], [1], [0, 0, 1, 1], [], []>} : vector<32x256xbf16>, vector<256x32xbf16>, vector<32x32xf32> -> vector<32x32xf32>
    %c1 = arith.constant 1 : index
    %c0_5 = arith.constant 0 : index
    %c0_6 = arith.constant 0 : index
    %5 = vector.load %arg0[%c1, %c0_5, %c0_6] : memref<4x32x256xbf16, #tpu.memory_space<vmem>>, vector<1x32x256xbf16>
    %6 = vector.shape_cast %5 : vector<1x32x256xbf16> to vector<32x256xbf16>
    %c1_7 = arith.constant 1 : index
    %c0_8 = arith.constant 0 : index
    %c0_9 = arith.constant 0 : index
    %7 = vector.load %arg1[%c1_7, %c0_8, %c0_9] : memref<4x256x32xbf16, #tpu.memory_space<vmem>>, vector<1x256x32xbf16>
    %8 = vector.shape_cast %7 : vector<1x256x32xbf16> to vector<256x32xbf16>
    %cst_10 = arith.constant dense<0.000000e+00> : vector<32x32xf32>
    %9 = tpu.matmul %6, %8, %cst_10 {dimension_numbers = #tpu.dot_dimension_numbers<[1], [0], [0], [1], [0, 0, 1, 1], [], []>} : vector<32x256xbf16>, vector<256x32xbf16>, vector<32x32xf32> -> vector<32x32xf32>
    %c2 = arith.constant 2 : index
    %c0_11 = arith.constant 0 : index
    %c0_12 = arith.constant 0 : index
    %10 = vector.load %arg0[%c2, %c0_11, %c0_12] : memref<4x32x256xbf16, #tpu.memory_space<vmem>>, vector<1x32x256xbf16>
    %11 = vector.shape_cast %10 : vector<1x32x256xbf16> to vector<32x256xbf16>
    %c2_13 = arith.constant 2 : index
    %c0_14 = arith.constant 0 : index
    %c0_15 = arith.constant 0 : index
    %12 = vector.load %arg1[%c2_13, %c0_14, %c0_15] : memref<4x256x32xbf16, #tpu.memory_space<vmem>>, vector<1x256x32xbf16>
    %13 = vector.shape_cast %12 : vector<1x256x32xbf16> to vector<256x32xbf16>
    %cst_16 = arith.constant dense<0.000000e+00> : vector<32x32xf32>
    %14 = tpu.matmul %11, %13, %cst_16 {dimension_numbers = #tpu.dot_dimension_numbers<[1], [0], [0], [1], [0, 0, 1, 1], [], []>} : vector<32x256xbf16>, vector<256x32xbf16>, vector<32x32xf32> -> vector<32x32xf32>
    %c3 = arith.constant 3 : index
    %c0_17 = arith.constant 0 : index
    %c0_18 = arith.constant 0 : index
    %15 = vector.load %arg0[%c3, %c0_17, %c0_18] : memref<4x32x256xbf16, #tpu.memory_space<vmem>>, vector<1x32x256xbf16>
    %16 = vector.shape_cast %15 : vector<1x32x256xbf16> to vector<32x256xbf16>
    %c3_19 = arith.constant 3 : index
    %c0_20 = arith.constant 0 : index
    %c0_21 = arith.constant 0 : index
    %17 = vector.load %arg1[%c3_19, %c0_20, %c0_21] : memref<4x256x32xbf16, #tpu.memory_space<vmem>>, vector<1x256x32xbf16>
    %18 = vector.shape_cast %17 : vector<1x256x32xbf16> to vector<256x32xbf16>
    %cst_22 = arith.constant dense<0.000000e+00> : vector<32x32xf32>
    %19 = tpu.matmul %16, %18, %cst_22 {dimension_numbers = #tpu.dot_dimension_numbers<[1], [0], [0], [1], [0, 0, 1, 1], [], []>} : vector<32x256xbf16>, vector<256x32xbf16>, vector<32x32xf32> -> vector<32x32xf32>
    %20 = tpu.concatenate %4, %9, %14, %19 in 0 : vector<32x32xf32>, vector<32x32xf32>, vector<32x32xf32>, vector<32x32xf32> -> vector<128x32xf32>
    %cst_23 = arith.constant dense<0.000000e+00> : vector<32xf32>
    %21 = vector.multi_reduction <add>, %20, %cst_23 [0] : vector<128x32xf32> to vector<32xf32>
    %22 = vector.shape_cast %21 : vector<32xf32> to vector<1x32xf32>
    %cst_24 = arith.constant 7.812500e-03 : f32
    %23 = vector.broadcast %cst_24 : f32 to vector<1x32xf32>
    %24 = arith.mulf %22, %23 : vector<1x32xf32>
    %25 = vector.broadcast %24 : vector<1x32xf32> to vector<128x32xf32>
    %26 = arith.subf %20, %25 : vector<128x32xf32>
    %27 = arith.mulf %26, %26 : vector<128x32xf32>
    %cst_25 = arith.constant dense<0.000000e+00> : vector<32xf32>
    %28 = vector.multi_reduction <add>, %27, %cst_25 [0] : vector<128x32xf32> to vector<32xf32>
    %29 = vector.shape_cast %28 : vector<32xf32> to vector<1x32xf32>
    %cst_26 = arith.constant 7.812500e-03 : f32
    %30 = vector.broadcast %cst_26 : f32 to vector<1x32xf32>
    %31 = arith.mulf %29, %30 : vector<1x32xf32>
    %cst_27 = arith.constant 9.99999974E-6 : f32
    %32 = vector.broadcast %cst_27 : f32 to vector<1x32xf32>
    %33 = arith.addf %31, %32 : vector<1x32xf32>
    %34 = math.rsqrt %33 : vector<1x32xf32>
    %c0_28 = arith.constant 0 : index
    %c0_29 = arith.constant 0 : index
    %35 = vector.load %arg2[%c0_28, %c0_29] : memref<1x32xf32, #tpu.memory_space<vmem>>, vector<1x32xf32>
    %36 = arith.mulf %34, %35 : vector<1x32xf32>
    %37 = vector.broadcast %36 : vector<1x32xf32> to vector<128x32xf32>
    %38 = arith.mulf %26, %37 : vector<128x32xf32>
    %c0_30 = arith.constant 0 : index
    %c0_31 = arith.constant 0 : index
    %39 = vector.load %arg3[%c0_30, %c0_31] : memref<1x32xf32, #tpu.memory_space<vmem>>, vector<1x32xf32>
    %40 = vector.broadcast %39 : vector<1x32xf32> to vector<128x32xf32>
    %41 = arith.addf %38, %40 : vector<128x32xf32>
    %cst_32 = arith.constant 0.000000e+00 : f32
    %42 = vector.broadcast %cst_32 : f32 to vector<128x32xf32>
    %43 = arith.maximumf %41, %42 : vector<128x32xf32>
    %c0_33 = arith.constant 0 : index
    %c0_34 = arith.constant 0 : index
    %44 = vector.load %arg4[%c0_33, %c0_34] : memref<128x32xf32, #tpu.memory_space<vmem>>, vector<128x32xf32>
    tpu.vector_store %arg4[%c0_33, %c0_34], %43 {strides = array<i32>} : memref<128x32xf32, #tpu.memory_space<vmem>>, vector<128x32xf32>,
    return
  }
}

module attributes {stable_mosaic.version = 11 : i64} {
  func.func @_deconv_bn_relu_kernel(%arg0: memref<4x128x128xbf16, #tpu.memory_space<vmem>>, %arg1: memref<4x128x16xbf16, #tpu.memory_space<vmem>>, %arg2: memref<1x16xf32, #tpu.memory_space<vmem>>, %arg3: memref<1x16xf32, #tpu.memory_space<vmem>>, %arg4: memref<512x16xf32, #tpu.memory_space<vmem>>) attributes {dimension_semantics = [], scalar_prefetch = 0 : i64, scratch_operands = 0 : i64, tpu.core_type = #tpu.core_type<tc>} {
    %c0 = arith.constant 0 : index
    %c0_0 = arith.constant 0 : index
    %c0_1 = arith.constant 0 : index
    %0 = vector.load %arg0[%c0, %c0_0, %c0_1] : memref<4x128x128xbf16, #tpu.memory_space<vmem>>, vector<1x128x128xbf16>
    %1 = vector.shape_cast %0 : vector<1x128x128xbf16> to vector<128x128xbf16>
    %c0_2 = arith.constant 0 : index
    %c0_3 = arith.constant 0 : index
    %c0_4 = arith.constant 0 : index
    %2 = vector.load %arg1[%c0_2, %c0_3, %c0_4] : memref<4x128x16xbf16, #tpu.memory_space<vmem>>, vector<1x128x16xbf16>
    %3 = vector.shape_cast %2 : vector<1x128x16xbf16> to vector<128x16xbf16>
    %cst = arith.constant dense<0.000000e+00> : vector<128x16xf32>
    %4 = tpu.matmul %1, %3, %cst {dimension_numbers = #tpu.dot_dimension_numbers<[1], [0], [0], [1], [0, 0, 1, 1], [], []>} : vector<128x128xbf16>, vector<128x16xbf16>, vector<128x16xf32> -> vector<128x16xf32>
    %c1 = arith.constant 1 : index
    %c0_5 = arith.constant 0 : index
    %c0_6 = arith.constant 0 : index
    %5 = vector.load %arg0[%c1, %c0_5, %c0_6] : memref<4x128x128xbf16, #tpu.memory_space<vmem>>, vector<1x128x128xbf16>
    %6 = vector.shape_cast %5 : vector<1x128x128xbf16> to vector<128x128xbf16>
    %c1_7 = arith.constant 1 : index
    %c0_8 = arith.constant 0 : index
    %c0_9 = arith.constant 0 : index
    %7 = vector.load %arg1[%c1_7, %c0_8, %c0_9] : memref<4x128x16xbf16, #tpu.memory_space<vmem>>, vector<1x128x16xbf16>
    %8 = vector.shape_cast %7 : vector<1x128x16xbf16> to vector<128x16xbf16>
    %cst_10 = arith.constant dense<0.000000e+00> : vector<128x16xf32>
    %9 = tpu.matmul %6, %8, %cst_10 {dimension_numbers = #tpu.dot_dimension_numbers<[1], [0], [0], [1], [0, 0, 1, 1], [], []>} : vector<128x128xbf16>, vector<128x16xbf16>, vector<128x16xf32> -> vector<128x16xf32>
    %c2 = arith.constant 2 : index
    %c0_11 = arith.constant 0 : index
    %c0_12 = arith.constant 0 : index
    %10 = vector.load %arg0[%c2, %c0_11, %c0_12] : memref<4x128x128xbf16, #tpu.memory_space<vmem>>, vector<1x128x128xbf16>
    %11 = vector.shape_cast %10 : vector<1x128x128xbf16> to vector<128x128xbf16>
    %c2_13 = arith.constant 2 : index
    %c0_14 = arith.constant 0 : index
    %c0_15 = arith.constant 0 : index
    %12 = vector.load %arg1[%c2_13, %c0_14, %c0_15] : memref<4x128x16xbf16, #tpu.memory_space<vmem>>, vector<1x128x16xbf16>
    %13 = vector.shape_cast %12 : vector<1x128x16xbf16> to vector<128x16xbf16>
    %cst_16 = arith.constant dense<0.000000e+00> : vector<128x16xf32>
    %14 = tpu.matmul %11, %13, %cst_16 {dimension_numbers = #tpu.dot_dimension_numbers<[1], [0], [0], [1], [0, 0, 1, 1], [], []>} : vector<128x128xbf16>, vector<128x16xbf16>, vector<128x16xf32> -> vector<128x16xf32>
    %c3 = arith.constant 3 : index
    %c0_17 = arith.constant 0 : index
    %c0_18 = arith.constant 0 : index
    %15 = vector.load %arg0[%c3, %c0_17, %c0_18] : memref<4x128x128xbf16, #tpu.memory_space<vmem>>, vector<1x128x128xbf16>
    %16 = vector.shape_cast %15 : vector<1x128x128xbf16> to vector<128x128xbf16>
    %c3_19 = arith.constant 3 : index
    %c0_20 = arith.constant 0 : index
    %c0_21 = arith.constant 0 : index
    %17 = vector.load %arg1[%c3_19, %c0_20, %c0_21] : memref<4x128x16xbf16, #tpu.memory_space<vmem>>, vector<1x128x16xbf16>
    %18 = vector.shape_cast %17 : vector<1x128x16xbf16> to vector<128x16xbf16>
    %cst_22 = arith.constant dense<0.000000e+00> : vector<128x16xf32>
    %19 = tpu.matmul %16, %18, %cst_22 {dimension_numbers = #tpu.dot_dimension_numbers<[1], [0], [0], [1], [0, 0, 1, 1], [], []>} : vector<128x128xbf16>, vector<128x16xbf16>, vector<128x16xf32> -> vector<128x16xf32>
    %20 = tpu.concatenate %4, %9, %14, %19 in 0 : vector<128x16xf32>, vector<128x16xf32>, vector<128x16xf32>, vector<128x16xf32> -> vector<512x16xf32>
    %cst_23 = arith.constant dense<0.000000e+00> : vector<16xf32>
    %21 = vector.multi_reduction <add>, %20, %cst_23 [0] : vector<512x16xf32> to vector<16xf32>
    %22 = vector.shape_cast %21 : vector<16xf32> to vector<1x16xf32>
    %cst_24 = arith.constant 0.001953125 : f32
    %23 = vector.broadcast %cst_24 : f32 to vector<1x16xf32>
    %24 = arith.mulf %22, %23 : vector<1x16xf32>
    %25 = vector.broadcast %24 : vector<1x16xf32> to vector<512x16xf32>
    %26 = arith.subf %20, %25 : vector<512x16xf32>
    %27 = arith.mulf %26, %26 : vector<512x16xf32>
    %cst_25 = arith.constant dense<0.000000e+00> : vector<16xf32>
    %28 = vector.multi_reduction <add>, %27, %cst_25 [0] : vector<512x16xf32> to vector<16xf32>
    %29 = vector.shape_cast %28 : vector<16xf32> to vector<1x16xf32>
    %cst_26 = arith.constant 0.001953125 : f32
    %30 = vector.broadcast %cst_26 : f32 to vector<1x16xf32>
    %31 = arith.mulf %29, %30 : vector<1x16xf32>
    %cst_27 = arith.constant 9.99999974E-6 : f32
    %32 = vector.broadcast %cst_27 : f32 to vector<1x16xf32>
    %33 = arith.addf %31, %32 : vector<1x16xf32>
    %34 = math.rsqrt %33 : vector<1x16xf32>
    %c0_28 = arith.constant 0 : index
    %c0_29 = arith.constant 0 : index
    %35 = vector.load %arg2[%c0_28, %c0_29] : memref<1x16xf32, #tpu.memory_space<vmem>>, vector<1x16xf32>
    %36 = arith.mulf %34, %35 : vector<1x16xf32>
    %37 = vector.broadcast %36 : vector<1x16xf32> to vector<512x16xf32>
    %38 = arith.mulf %26, %37 : vector<512x16xf32>
    %c0_30 = arith.constant 0 : index
    %c0_31 = arith.constant 0 : index
    %39 = vector.load %arg3[%c0_30, %c0_31] : memref<1x16xf32, #tpu.memory_space<vmem>>, vector<1x16xf32>
    %40 = vector.broadcast %39 : vector<1x16xf32> to vector<512x16xf32>
    %41 = arith.addf %38, %40 : vector<512x16xf32>
    %cst_32 = arith.constant 0.000000e+00 : f32
    %42 = vector.broadcast %cst_32 : f32 to vector<512x16xf32>
    %43 = arith.maximumf %41, %42 : vector<512x16xf32>
    %c0_33 = arith.constant 0 : index
    %c0_34 = arith.constant 0 : index
    %44 = vector.load %arg4[%c0_33, %c0_34] : memref<512x16xf32, #tpu.memory_space<vmem>>, vector<512x16xf32>
    tpu.vector_store %arg4[%c0_33, %c0_34], %43 {strides = array<i32>} : memref<512x16xf32, #tpu.memory_space<vmem>>, vector<512x16xf32>,
    return
  }
}

module attributes {stable_mosaic.version = 11 : i64} {
  func.func @_deconv_bias_tanh_kernel(%arg0: memref<4x512x64xbf16, #tpu.memory_space<vmem>>, %arg1: memref<4x64x2xbf16, #tpu.memory_space<vmem>>, %arg2: memref<1x2xf32, #tpu.memory_space<vmem>>, %arg3: memref<2048x2xf32, #tpu.memory_space<vmem>>) attributes {dimension_semantics = [], scalar_prefetch = 0 : i64, scratch_operands = 0 : i64, tpu.core_type = #tpu.core_type<tc>} {
    %c0 = arith.constant 0 : index
    %c0_0 = arith.constant 0 : index
    %c0_1 = arith.constant 0 : index
    %0 = vector.load %arg0[%c0, %c0_0, %c0_1] : memref<4x512x64xbf16, #tpu.memory_space<vmem>>, vector<1x512x64xbf16>
    %1 = vector.shape_cast %0 : vector<1x512x64xbf16> to vector<512x64xbf16>
    %c0_2 = arith.constant 0 : index
    %c0_3 = arith.constant 0 : index
    %c0_4 = arith.constant 0 : index
    %2 = vector.load %arg1[%c0_2, %c0_3, %c0_4] : memref<4x64x2xbf16, #tpu.memory_space<vmem>>, vector<1x64x2xbf16>
    %3 = vector.shape_cast %2 : vector<1x64x2xbf16> to vector<64x2xbf16>
    %cst = arith.constant dense<0.000000e+00> : vector<512x2xf32>
    %4 = tpu.matmul %1, %3, %cst {dimension_numbers = #tpu.dot_dimension_numbers<[1], [0], [0], [1], [0, 0, 1, 1], [], []>} : vector<512x64xbf16>, vector<64x2xbf16>, vector<512x2xf32> -> vector<512x2xf32>
    %c1 = arith.constant 1 : index
    %c0_5 = arith.constant 0 : index
    %c0_6 = arith.constant 0 : index
    %5 = vector.load %arg0[%c1, %c0_5, %c0_6] : memref<4x512x64xbf16, #tpu.memory_space<vmem>>, vector<1x512x64xbf16>
    %6 = vector.shape_cast %5 : vector<1x512x64xbf16> to vector<512x64xbf16>
    %c1_7 = arith.constant 1 : index
    %c0_8 = arith.constant 0 : index
    %c0_9 = arith.constant 0 : index
    %7 = vector.load %arg1[%c1_7, %c0_8, %c0_9] : memref<4x64x2xbf16, #tpu.memory_space<vmem>>, vector<1x64x2xbf16>
    %8 = vector.shape_cast %7 : vector<1x64x2xbf16> to vector<64x2xbf16>
    %cst_10 = arith.constant dense<0.000000e+00> : vector<512x2xf32>
    %9 = tpu.matmul %6, %8, %cst_10 {dimension_numbers = #tpu.dot_dimension_numbers<[1], [0], [0], [1], [0, 0, 1, 1], [], []>} : vector<512x64xbf16>, vector<64x2xbf16>, vector<512x2xf32> -> vector<512x2xf32>
    %c2 = arith.constant 2 : index
    %c0_11 = arith.constant 0 : index
    %c0_12 = arith.constant 0 : index
    %10 = vector.load %arg0[%c2, %c0_11, %c0_12] : memref<4x512x64xbf16, #tpu.memory_space<vmem>>, vector<1x512x64xbf16>
    %11 = vector.shape_cast %10 : vector<1x512x64xbf16> to vector<512x64xbf16>
    %c2_13 = arith.constant 2 : index
    %c0_14 = arith.constant 0 : index
    %c0_15 = arith.constant 0 : index
    %12 = vector.load %arg1[%c2_13, %c0_14, %c0_15] : memref<4x64x2xbf16, #tpu.memory_space<vmem>>, vector<1x64x2xbf16>
    %13 = vector.shape_cast %12 : vector<1x64x2xbf16> to vector<64x2xbf16>
    %cst_16 = arith.constant dense<0.000000e+00> : vector<512x2xf32>
    %14 = tpu.matmul %11, %13, %cst_16 {dimension_numbers = #tpu.dot_dimension_numbers<[1], [0], [0], [1], [0, 0, 1, 1], [], []>} : vector<512x64xbf16>, vector<64x2xbf16>, vector<512x2xf32> -> vector<512x2xf32>
    %c3 = arith.constant 3 : index
    %c0_17 = arith.constant 0 : index
    %c0_18 = arith.constant 0 : index
    %15 = vector.load %arg0[%c3, %c0_17, %c0_18] : memref<4x512x64xbf16, #tpu.memory_space<vmem>>, vector<1x512x64xbf16>
    %16 = vector.shape_cast %15 : vector<1x512x64xbf16> to vector<512x64xbf16>
    %c3_19 = arith.constant 3 : index
    %c0_20 = arith.constant 0 : index
    %c0_21 = arith.constant 0 : index
    %17 = vector.load %arg1[%c3_19, %c0_20, %c0_21] : memref<4x64x2xbf16, #tpu.memory_space<vmem>>, vector<1x64x2xbf16>
    %18 = vector.shape_cast %17 : vector<1x64x2xbf16> to vector<64x2xbf16>
    %cst_22 = arith.constant dense<0.000000e+00> : vector<512x2xf32>
    %19 = tpu.matmul %16, %18, %cst_22 {dimension_numbers = #tpu.dot_dimension_numbers<[1], [0], [0], [1], [0, 0, 1, 1], [], []>} : vector<512x64xbf16>, vector<64x2xbf16>, vector<512x2xf32> -> vector<512x2xf32>
    %20 = tpu.concatenate %4, %9, %14, %19 in 0 : vector<512x2xf32>, vector<512x2xf32>, vector<512x2xf32>, vector<512x2xf32> -> vector<2048x2xf32>
    %c0_23 = arith.constant 0 : index
    %c0_24 = arith.constant 0 : index
    %21 = vector.load %arg2[%c0_23, %c0_24] : memref<1x2xf32, #tpu.memory_space<vmem>>, vector<1x2xf32>
    %22 = vector.broadcast %21 : vector<1x2xf32> to vector<2048x2xf32>
    %23 = arith.addf %20, %22 : vector<2048x2xf32>
    %24 = math.tanh %23 : vector<2048x2xf32>
    %c0_25 = arith.constant 0 : index
    %c0_26 = arith.constant 0 : index
    %25 = vector.load %arg3[%c0_25, %c0_26] : memref<2048x2xf32, #tpu.memory_space<vmem>>, vector<2048x2xf32>
    tpu.vector_store %arg3[%c0_25, %c0_26], %24 {strides = array<i32>} : memref<2048x2xf32, #tpu.memory_space<vmem>>, vector<2048x2xf32>,
    return
  }
}

</mosaic_0001>

<bundles_post_ra>
// kernel: vae_forward.9
= control target key start
LH: loop header
LB: loop body
LE: loop exit
PB: predicated region body
PF: predicated region fallthrough
CT: control target
= control target key end

     0   :  { %vm258_vm0 = vcmask 261120   ;;  %vm644_vm1 = vcmask 130048   ;;  %s3778_s1 = inlined_call_operand.vmem [shape: bf16[32,16], index: 1, kind: input, shape index: {}]   ;;  %s3779_s0 = inlined_call_operand.vmem [shape: bf16[512,32], index: 0, kind: input, shape index: {}]   ;;  %s3780_s2 = inlined_call_operand.vmem [shape: f32[1,16], index: 2, kind: input, shape index: {}]   ;;  %s3781_s3 = inlined_call_operand.vmem [shape: f32[1,16], index: 3, kind: input, shape index: {}]   ;;  %s3782_s4 = inlined_call_operand.vmem [shape: f32[512,16], index: 4, kind: output, shape index: {}]  }
   0x1   :  { %v1617_v0 = vld [vmem:[%s3778_s1] sm:$0xff]   ;;  %v1618_v1 = vld [vmem:[%s3778_s1 + $0x8] sm:$0xff]   ;;  %v1621_v4 = vld [vmem:[%s3779_s0 + $0x10] sm:$0xff]  }
   0x2   :  { %1545 = vmatprep.subr.bf16.mxu0 %v1617_v0  ;;  %v1619_v2 = vld [vmem:[%s3779_s0] sm:$0xff]   ;;  %1613 = vmatprep.subr.bf16.mxu1 %v1617_v0  ;;  %v1620_v3 = vld [vmem:[%s3779_s0 + $0x8] sm:$0xff]   ;;  %v1622_v5 = vld [vmem:[%s3779_s0 + $0x18] sm:$0xff]  }
   0x3   :  { %1546 = vmatpush3.bf16.msra.mxu0 %v1617_v0  ;;  %1615 = vmatpush3.bf16.msra.mxu1 %v1617_v0  ;;  %v1623_v6 = vld [vmem:[%s3779_s0 + $0x20] sm:$0xff]   ;;  %v1636_v8 = vld [vmem:[%s3779_s0 + $0x88] sm:$0xff]   ;;  %v1637_v9 = vld [vmem:[%s3779_s0 + $0x90] sm:$0xff]  }
   0x4   :  { %1547 = vmatprep.subr.bf16.mxu0 %v1618_v1  ;;  %1549 = vmatprep.mubr.msk.bf16.mxu0 %vm258_vm0, %v1619_v2  ;;  %v1635_v7 = vld [vmem:[%s3779_s0 + $0x80] sm:$0xff]   ;;  %v1624_v10 = vld [vmem:[%s3779_s0 + $0x28] sm:$0xff]   ;;  %v1625_v11 = vld [vmem:[%s3779_s0 + $0x30] sm:$0xff]  }
   0x5   :  { %1614 = vmatprep.subr.bf16.mxu1 %v1618_v1  ;;  %1581 = vmatprep.mubr.msk.bf16.mxu1 %vm258_vm0, %v1635_v7  ;;  %v1638_v12 = vld [vmem:[%s3779_s0 + $0x98] sm:$0xff]   ;;  %v1639_v13 = vld [vmem:[%s3779_s0 + $0xa0] sm:$0xff]   ;;  %v1640_v16 = vld [vmem:[%s3779_s0 + $0xa8] sm:$0xff]  }
   0x6   :  { %v1626_v14 = vld [vmem:[%s3779_s0 + $0x38] sm:$0xff]   ;;  %v1627_v15 = vld [vmem:[%s3779_s0 + $0x40] sm:$0xff]   ;;  %v1641_v17 = vld [vmem:[%s3779_s0 + $0xb0] sm:$0xff]  }
   0x7   :  { %1548 = vmatpush3.bf16.msra.mxu0 %v1618_v1  ;;  %1616 = vmatpush3.bf16.msra.mxu1 %v1618_v1  ;;  %v1628_v18 = vld [vmem:[%s3779_s0 + $0x48] sm:$0xff]   ;;  %v1629_v19 = vld [vmem:[%s3779_s0 + $0x50] sm:$0xff]   ;;  %v1642_v20 = vld [vmem:[%s3779_s0 + $0xb8] sm:$0xff]  }
   0x8   :  { %v1643_v21 = vld [vmem:[%s3779_s0 + $0xc0] sm:$0xff]   ;;  %v1630_v22 = vld [vmem:[%s3779_s0 + $0x58] sm:$0xff]   ;;  %v1644_v24 = vld [vmem:[%s3779_s0 + $0xc8] sm:$0xff]  }
   0x9   :  { %v1631_v23 = vld [vmem:[%s3779_s0 + $0x60] sm:$0xff]   ;;  %v1645_v25 = vld [vmem:[%s3779_s0 + $0xd0] sm:$0xff]   ;;  %v1632_v26 = vld [vmem:[%s3779_s0 + $0x68] sm:$0xff]  }
   0xa   :  { %1550 = vmatmul.mubr.msk.bf16.vlgmr.msra.gmra.mrb[0].mxu0 %vm258_vm0, %v1620_v3  ;;  %1582 = vmatmul.mubr.msk.bf16.vlgmr.msra.gmra.mrb[0].mxu1 %vm258_vm0, %v1636_v8  ;;  %v1633_v27 = vld [vmem:[%s3779_s0 + $0x70] sm:$0xff]   ;;  %v1646_v28 = vld [vmem:[%s3779_s0 + $0xd8] sm:$0xff]   ;;  %v1647_v29 = vld [vmem:[%s3779_s0 + $0xe0] sm:$0xff]  }
   0xb   :  { %1553 = vmatprep.mubr.msk.bf16.mxu0 %vm258_vm0, %v1621_v4  ;;  %1585 = vmatprep.mubr.msk.bf16.mxu1 %vm258_vm0, %v1637_v9  ;;  %v1634_v30 = vld [vmem:[%s3779_s0 + $0x78] sm:$0xff]   ;;  %v1648_v31 = vld [vmem:[%s3779_s0 + $0xe8] sm:$0xff]   ;;  %v1649_v32 = vld [vmem:[%s3779_s0 + $0xf0] sm:$0xff]  }
   0xc   :  { %v1650_v33 = vld [vmem:[%s3779_s0 + $0xf8] sm:$0xff]  }
  0x12   :  { %1554 = vmatmul.mubr.msk.bf16.gmra.mrb[4].mxu0 %vm258_vm0, %v1622_v5  ;;  %1586 = vmatmul.mubr.msk.bf16.gmra.mrb[4].mxu1 %vm258_vm0, %v1638_v12 }
  0x13   :  { %1557 = vmatprep.mubr.msk.bf16.mxu0 %vm258_vm0, %v1623_v6  ;;  %1589 = vmatprep.mubr.msk.bf16.mxu1 %vm258_vm0, %v1639_v13 }
  0x1a   :  { %1558 = vmatmul.mubr.msk.bf16.gmra.mrb[8].mxu0 %vm258_vm0, %v1624_v10  ;;  %1590 = vmatmul.mubr.msk.bf16.gmra.mrb[8].mxu1 %vm258_vm0, %v1640_v16 }
  0x1b   :  { %1561 = vmatprep.mubr.msk.bf16.mxu0 %vm258_vm0, %v1625_v11  ;;  %1593 = vmatprep.mubr.msk.bf16.mxu1 %vm258_vm0, %v1641_v17 }
  0x22   :  { %1562 = vmatmul.mubr.msk.bf16.gmra.mrb[12].mxu0 %vm258_vm0, %v1626_v14  ;;  %1594 = vmatmul.mubr.msk.bf16.gmra.mrb[12].mxu1 %vm258_vm0, %v1642_v20 }
  0x23   :  { %1565 = vmatprep.mubr.msk.bf16.mxu0 %vm258_vm0, %v1627_v15  ;;  %1597 = vmatprep.mubr.msk.bf16.mxu1 %vm258_vm0, %v1643_v21 }
  0x2a   :  { %1566 = vmatmul.mubr.msk.bf16.gmra.mrb[16].mxu0 %vm258_vm0, %v1628_v18  ;;  %1598 = vmatmul.mubr.msk.bf16.gmra.mrb[16].mxu1 %vm258_vm0, %v1644_v24 }
  0x2b   :  { %1569 = vmatprep.mubr.msk.bf16.mxu0 %vm258_vm0, %v1629_v19  ;;  %1601 = vmatprep.mubr.msk.bf16.mxu1 %vm258_vm0, %v1645_v25 }
  0x32   :  { %1570 = vmatmul.mubr.msk.bf16.gmra.mrb[20].mxu0 %vm258_vm0, %v1630_v22  ;;  %1602 = vmatmul.mubr.msk.bf16.gmra.mrb[20].mxu1 %vm258_vm0, %v1646_v28 }
  0x33   :  { %1573 = vmatprep.mubr.msk.bf16.mxu0 %vm258_vm0, %v1631_v23  ;;  %1605 = vmatprep.mubr.msk.bf16.mxu1 %vm258_vm0, %v1647_v29 }
  0x3a   :  { %1574 = vmatmul.mubr.msk.bf16.gmra.mrb[24].mxu0 %vm258_vm0, %v1632_v26  ;;  %1606 = vmatmul.mubr.msk.bf16.gmra.mrb[24].mxu1 %vm258_vm0, %v1648_v31 }
  0x3b   :  { %1577 = vmatprep.mubr.msk.bf16.mxu0 %vm258_vm0, %v1633_v27  ;;  %1609 = vmatprep.mubr.msk.bf16.mxu1 %vm258_vm0, %v1649_v32 }
  0x42   :  { %1578 = vmatmul.mubr.msk.bf16.gmra.mrb[28].mxu0 %vm258_vm0, %v1634_v30  ;;  %1610 = vmatmul.mubr.msk.bf16.gmra.mrb[28].mxu1 %vm258_vm0, %v1650_v33 }
  0xdd   :  { %v1812_v34 = vpop.f32.mrb[0].mxu0  ;;  %v1838_v51 = vpop.f32.mrb[0].mxu1 }
  0xde   :  { %v1814_v35 = vpop.f32.mrb[1].mxu0  ;;  %v648_v41 = vsel %vm644_vm1, %v1812_v34, 0.0  ;;  %3846 = vst [vmem:[#allocation2_spill] sm:$0xff] %v1838_v51  ;;  %v1842_v53 = vpop.f32.mrb[1].mxu1 }
  0xdf   :  { %v1816_v36 = vpop.f32.mrb[2].mxu0  ;;  %v645_v38 = vsel %vm644_vm1, %v1814_v35, 0.0  ;;  %3847 = vst [vmem:[#allocation3_spill] sm:$0xff] %v1842_v53  ;;  %v1844_v55 = vpop.f32.mrb[2].mxu1 }
  0xe0   :  { %v1818_v37 = vpop.f32.mrb[3].mxu0  ;;  %v650_v43 = vsel %vm644_vm1, %v1816_v36, 0.0  ;;  %3848 = vst [vmem:[#allocation4_spill] sm:$0xff] %v1844_v55  ;;  %v1848_v57 = vpop.f32.mrb[3].mxu1 }
  0xe1   :  { %v646_v39 = vsel %vm644_vm1, %v1818_v37, 0.0  ;;  %3849 = vst [vmem:[#allocation5_spill] sm:$0xff] %v1848_v57 }
  0xe2   :  { %v647_v40 = vadd.f32 %v646_v39, %v645_v38 }
  0xe4   :  { %v649_v42 = vadd.f32 %v648_v41, %v647_v40 }
  0xe5   :  { %v1828_v44 = vpop.f32.mrb[4].mxu0  ;;  %v1862_v3 = vpop.f32.mrb[4].mxu1 }
  0xe6   :  { %v1830_v45 = vpop.f32.mrb[5].mxu0  ;;  %v651_v46 = vadd.f32 %v650_v43, %v649_v42  ;;  %v656_v56 = vsel %vm644_vm1, %v1828_v44, 0.0  ;;  %v1866_v5 = vpop.f32.mrb[5].mxu1 }
  0xe7   :  { %v652_v47 = vsel %vm644_vm1, %v1830_v45, 0.0  ;;  %v1834_v48 = vpop.f32.mrb[6].mxu0  ;;  %v1868_v7 = vpop.f32.mrb[6].mxu1 }
  0xe8   :  { %v653_v49 = vadd.f32 %v652_v47, %v651_v46  ;;  %v1836_v50 = vpop.f32.mrb[7].mxu0  ;;  %v658_v59 = vsel %vm644_vm1, %v1834_v48, 0.0  ;;  %v1872_v9 = vpop.f32.mrb[7].mxu1 }
  0xe9   :  { %v654_v52 = vsel %vm644_vm1, %v1836_v50, 0.0 }
  0xea   :  { %v655_v54 = vadd.f32 %v654_v52, %v653_v49 }
  0xec   :  { %v657_v58 = vadd.f32 %v656_v56, %v655_v54 }
  0xed   :  { %v1852_v60 = vpop.f32.mrb[8].mxu0  ;;  %v1886_v19 = vpop.f32.mrb[8].mxu1 }
  0xee   :  { %v1854_v61 = vpop.f32.mrb[9].mxu0  ;;  %v659_v62 = vadd.f32 %v658_v59, %v657_v58  ;;  %v664_v8 = vsel %vm644_vm1, %v1852_v60, 0.0  ;;  %v1890_v21 = vpop.f32.mrb[9].mxu1 }
  0xef   :  { %v660_v63 = vsel %vm644_vm1, %v1854_v61, 0.0  ;;  %v1858_v0 = vpop.f32.mrb[10].mxu0  ;;  %v1892_v23 = vpop.f32.mrb[10].mxu1 }
  0xf0   :  { %v661_v1 = vadd.f32 %v660_v63, %v659_v62  ;;  %v1860_v2 = vpop.f32.mrb[11].mxu0  ;;  %v666_v11 = vsel %vm644_vm1, %v1858_v0, 0.0  ;;  %v1896_v25 = vpop.f32.mrb[11].mxu1 }
  0xf1   :  { %v662_v4 = vsel %vm644_vm1, %v1860_v2, 0.0 }
  0xf2   :  { %v663_v6 = vadd.f32 %v662_v4, %v661_v1 }
  0xf4   :  { %v665_v10 = vadd.f32 %v664_v8, %v663_v6 }
  0xf5   :  { %v1876_v12 = vpop.f32.mrb[12].mxu0  ;;  %v1910_v39 = vpop.f32.mrb[12].mxu1 }
  0xf6   :  { %v1878_v13 = vpop.f32.mrb[13].mxu0  ;;  %v667_v14 = vadd.f32 %v666_v11, %v665_v10  ;;  %v672_v24 = vsel %vm644_vm1, %v1876_v12, 0.0  ;;  %v1914_v41 = vpop.f32.mrb[13].mxu1 }
  0xf7   :  { %v668_v15 = vsel %vm644_vm1, %v1878_v13, 0.0  ;;  %v1882_v16 = vpop.f32.mrb[14].mxu0  ;;  %v1916_v43 = vpop.f32.mrb[14].mxu1 }
  0xf8   :  { %v669_v17 = vadd.f32 %v668_v15, %v667_v14  ;;  %v1884_v18 = vpop.f32.mrb[15].mxu0  ;;  %v674_v27 = vsel %vm644_vm1, %v1882_v16, 0.0  ;;  %v1920_v47 = vpop.f32.mrb[15].mxu1 }
  0xf9   :  { %v670_v20 = vsel %vm644_vm1, %v1884_v18, 0.0 }
  0xfa   :  { %v671_v22 = vadd.f32 %v670_v20, %v669_v17 }
  0xfc   :  { %v673_v26 = vadd.f32 %v672_v24, %v671_v22 }
  0xfd   :  { %v1900_v28 = vpop.f32.mrb[16].mxu0  ;;  %v1934_v4 = vpop.f32.mrb[16].mxu1 }
  0xfe   :  { %v1902_v29 = vpop.f32.mrb[17].mxu0  ;;  %v675_v30 = vadd.f32 %v674_v27, %v673_v26  ;;  %v680_v46 = vsel %vm644_vm1, %v1900_v28, 0.0  ;;  %v1938_v8 = vpop.f32.mrb[17].mxu1 }
  0xff   :  { %v676_v31 = vsel %vm644_vm1, %v1902_v29, 0.0  ;;  %v1906_v32 = vpop.f32.mrb[18].mxu0  ;;  %v1940_v11 = vpop.f32.mrb[18].mxu1 }
 0x100   :  { %v677_v33 = vadd.f32 %v676_v31, %v675_v30  ;;  %v1908_v38 = vpop.f32.mrb[19].mxu0  ;;  %v682_v52 = vsel %vm644_vm1, %v1906_v32, 0.0  ;;  %v1944_v15 = vpop.f32.mrb[19].mxu1 }
 0x101   :  { %v678_v40 = vsel %vm644_vm1, %v1908_v38, 0.0 }
 0x102   :  { %v679_v42 = vadd.f32 %v678_v40, %v677_v33 }
 0x104   :  { %v681_v49 = vadd.f32 %v680_v46, %v679_v42 }
 0x105   :  { %v1924_v54 = vpop.f32.mrb[20].mxu0  ;;  %v1958_v40 = vpop.f32.mrb[20].mxu1 }
 0x106   :  { %v1926_v56 = vpop.f32.mrb[21].mxu0  ;;  %v683_v58 = vadd.f32 %v682_v52, %v681_v49  ;;  %v688_v14 = vsel %vm644_vm1, %v1924_v54, 0.0  ;;  %v1962_v46 = vpop.f32.mrb[21].mxu1 }
 0x107   :  { %v684_v59 = vsel %vm644_vm1, %v1926_v56, 0.0  ;;  %v1930_v62 = vpop.f32.mrb[22].mxu0  ;;  %v1964_v52 = vpop.f32.mrb[22].mxu1 }
 0x108   :  { %3850 = vst [vmem:[#allocation6_spill] sm:$0xff] %v1930_v62  ;;  %v685_v63 = vadd.f32 %v684_v59, %v683_v58  ;;  %v1932_v1 = vpop.f32.mrb[23].mxu0  ;;  %v690_v20 = vsel %vm644_vm1, %v1930_v62, 0.0  ;;  %v1968_v59 = vpop.f32.mrb[23].mxu1 }
 0x109   :  { %v686_v6 = vsel %vm644_vm1, %v1932_v1, 0.0 }
 0x10a   :  { %v687_v10 = vadd.f32 %v686_v6, %v685_v63 }
 0x10c   :  { %v689_v17 = vadd.f32 %v688_v14, %v687_v10 }
 0x10d   :  { %v1948_v22 = vpop.f32.mrb[24].mxu0 }
 0x10e   :  { %3851 = vst [vmem:[#allocation7_spill] sm:$0xff] %v1948_v22  ;;  %v1950_v24 = vpop.f32.mrb[25].mxu0  ;;  %v691_v26 = vadd.f32 %v690_v20, %v689_v17  ;;  %v696_v58 = vsel %vm644_vm1, %v1948_v22, 0.0 }
 0x10f   :  { %3852 = vst [vmem:[#allocation8_spill] sm:$0xff] %v1950_v24  ;;  %v692_v27 = vsel %vm644_vm1, %v1950_v24, 0.0  ;;  %v1954_v30 = vpop.f32.mrb[26].mxu0 }
 0x110   :  { %3853 = vst [vmem:[#allocation9_spill] sm:$0xff] %v1954_v30  ;;  %v693_v31 = vadd.f32 %v692_v27, %v691_v26  ;;  %v1956_v33 = vpop.f32.mrb[27].mxu0  ;;  %v698_v6 = vsel %vm644_vm1, %v1954_v30, 0.0 }
 0x111   :  { %3854 = vst [vmem:[#allocation10_spill] sm:$0xff] %v1956_v33  ;;  %v694_v42 = vsel %vm644_vm1, %v1956_v33, 0.0 }
 0x112   :  { %v695_v49 = vadd.f32 %v694_v42, %v693_v31  ;;  %v1982_v42 = vpop.f32.mrb[24].mxu1 }
 0x113   :  { %3859 = vst [vmem:[#allocation15_spill] sm:$0xff] %v1982_v42 }
 0x114   :  { %v697_v63 = vadd.f32 %v696_v58, %v695_v49  ;;  %v1986_v58 = vpop.f32.mrb[25].mxu1 }
 0x115   :  { %v1972_v10 = vpop.f32.mrb[28].mxu0  ;;  %v1988_v22 = vpop.f32.mrb[26].mxu1 }
 0x116   :  { %3855 = vst [vmem:[#allocation11_spill] sm:$0xff] %v1972_v10  ;;  %v1974_v14 = vpop.f32.mrb[29].mxu0  ;;  %v699_v17 = vadd.f32 %v698_v6, %v697_v63  ;;  %3860 = vst [vmem:[#allocation16_spill] sm:$0xff] %v1988_v22  ;;  %v704_v63 = vsel %vm644_vm1, %v1972_v10, 0.0  ;;  %v1992_v6 = vpop.f32.mrb[27].mxu1 }
 0x117   :  { %3856 = vst [vmem:[#allocation12_spill] sm:$0xff] %v1974_v14  ;;  %v700_v20 = vsel %vm644_vm1, %v1974_v14, 0.0  ;;  %v1978_v26 = vpop.f32.mrb[30].mxu0  ;;  %3861 = vst [vmem:[#allocation17_spill] sm:$0xff] %v1992_v6 }
 0x118   :  { %3857 = vst [vmem:[#allocation13_spill] sm:$0xff] %v1978_v26  ;;  %v701_v27 = vadd.f32 %v700_v20, %v699_v17  ;;  %v1980_v31 = vpop.f32.mrb[31].mxu0  ;;  %v706_v17 = vsel %vm644_vm1, %v1978_v26, 0.0  ;;  %v708_v20 = vsel %vm644_vm1, %v1842_v53, 0.0 }
 0x119   :  { %3858 = vst [vmem:[#allocation14_spill] sm:$0xff] %v1980_v31  ;;  %v702_v49 = vsel %vm644_vm1, %v1980_v31, 0.0  ;;  %v1998_v31 = vpop.f32.mrb[28].mxu1 }
 0x11a   :  { %v703_v30 = vadd.f32 %v702_v49, %v701_v27  ;;  %v710_v27 = vsel %vm644_vm1, %v1848_v57, 0.0  ;;  %v2002_v49 = vpop.f32.mrb[29].mxu1  ;;  %v718_v57 = vsel %vm644_vm1, %v1872_v9, 0.0 }
 0x11b   :  { %3862 = vst [vmem:[#allocation18_spill] sm:$0xff] %v2002_v49  ;;  %v2004_v10 = vpop.f32.mrb[30].mxu1 }
 0x11c   :  { %v705_v14 = vadd.f32 %v704_v63, %v703_v30  ;;  %v712_v30 = vsel %vm644_vm1, %v1838_v51, 0.0  ;;  %v2008_v63 = vpop.f32.mrb[31].mxu1  ;;  %v722_v51 = vsel %vm644_vm1, %v1868_v7, 0.0 }
 0x11e   :  { %v707_v33 = vadd.f32 %v706_v17, %v705_v14  ;;  %v714_v14 = vsel %vm644_vm1, %v1844_v55, 0.0 }
 0x120   :  { %v709_v24 = vadd.f32 %v708_v20, %v707_v33  ;;  %v716_v33 = vsel %vm644_vm1, %v1866_v5, 0.0 }
 0x122   :  { %v711_v62 = vadd.f32 %v710_v27, %v709_v24  ;;  %v720_v27 = vsel %vm644_vm1, %v1862_v3, 0.0 }
 0x124   :  { %v713_v26 = vadd.f32 %v712_v30, %v711_v62  ;;  %v724_v62 = vsel %vm644_vm1, %v1890_v21, 0.0 }
 0x126   :  { %v715_v17 = vadd.f32 %v714_v14, %v713_v26  ;;  %v726_v26 = vsel %vm644_vm1, %v1896_v25, 0.0 }
 0x128   :  { %v717_v20 = vadd.f32 %v716_v33, %v715_v17  ;;  %v728_v33 = vsel %vm644_vm1, %v1886_v19, 0.0  ;;  %v730_v17 = vsel %vm644_vm1, %v1892_v23, 0.0 }
 0x12a   :  { %v719_v24 = vadd.f32 %v718_v57, %v717_v20  ;;  %v732_v20 = vsel %vm644_vm1, %v1914_v41, 0.0 }
 0x12c   :  { %v721_v53 = vadd.f32 %v720_v27, %v719_v24 }
 0x12e   :  { %v723_v30 = vadd.f32 %v722_v51, %v721_v53  ;;  %v734_v51 = vsel %vm644_vm1, %v1920_v47, 0.0 }
 0x130   :  { %v725_v55 = vadd.f32 %v724_v62, %v723_v30  ;;  %v736_v62 = vsel %vm644_vm1, %v1910_v39, 0.0  ;;  %v738_v30 = vsel %vm644_vm1, %v1916_v43, 0.0 }
 0x132   :  { %v727_v14 = vadd.f32 %v726_v26, %v725_v55  ;;  %v740_v26 = vsel %vm644_vm1, %v1938_v8, 0.0 }
 0x134   :  { %v729_v57 = vadd.f32 %v728_v33, %v727_v14 }
 0x136   :  { %v731_v24 = vadd.f32 %v730_v17, %v729_v57  ;;  %v742_v57 = vsel %vm644_vm1, %v1944_v15, 0.0 }
 0x138   :  { %v733_v27 = vadd.f32 %v732_v20, %v731_v24  ;;  %v744_v20 = vsel %vm644_vm1, %v1934_v4, 0.0 }
 0x13a   :  { %v735_v53 = vadd.f32 %v734_v51, %v733_v27  ;;  %v746_v27 = vsel %vm644_vm1, %v1940_v11, 0.0  ;;  %v748_v51 = vsel %vm644_vm1, %v1962_v46, 0.0 }
 0x13c   :  { %v737_v55 = vadd.f32 %v736_v62, %v735_v53 }
 0x13e   :  { %v739_v14 = vadd.f32 %v738_v30, %v737_v55  ;;  %v750_v55 = vsel %vm644_vm1, %v1968_v59, 0.0 }
 0x140   :  { %v741_v33 = vadd.f32 %v740_v26, %v739_v14  ;;  %v752_v26 = vsel %vm644_vm1, %v1958_v40, 0.0 }
 0x142   :  { %v743_v17 = vadd.f32 %v742_v57, %v741_v33  ;;  %v754_v33 = vsel %vm644_vm1, %v1964_v52, 0.0  ;;  %v756_v57 = vsel %vm644_vm1, %v1986_v58, 0.0 }
 0x144   :  { %v745_v24 = vadd.f32 %v744_v20, %v743_v17 }
 0x146   :  { %v747_v53 = vadd.f32 %v746_v27, %v745_v24  ;;  %v758_v24 = vsel %vm644_vm1, %v1992_v6, 0.0 }
 0x148   :  { %v749_v62 = vadd.f32 %v748_v51, %v747_v53  ;;  %v760_v51 = vsel %vm644_vm1, %v1982_v42, 0.0 }
 0x14a   :  { %v751_v30 = vadd.f32 %v750_v55, %v749_v62  ;;  %v762_v62 = vsel %vm644_vm1, %v1988_v22, 0.0  ;;  %v764_v55 = vsel %vm644_vm1, %v2002_v49, 0.0 }
 0x14c   :  { %v753_v14 = vadd.f32 %v752_v26, %v751_v30 }
 0x14e   :  { %v755_v17 = vadd.f32 %v754_v33, %v753_v14  ;;  %v766_v14 = vsel %vm644_vm1, %v2008_v63, 0.0 }
 0x150   :  { %v757_v20 = vadd.f32 %v756_v57, %v755_v17  ;;  %v768_v57 = vsel %vm644_vm1, %v1998_v31, 0.0 }
 0x152   :  { %v759_v27 = vadd.f32 %v758_v24, %v757_v20  ;;  %v770_v20 = vsel %vm644_vm1, %v2004_v10, 0.0 }
 0x154   :  { %v761_v53 = vadd.f32 %v760_v51, %v759_v27 }
 0x156   :  { %v763_v30 = vadd.f32 %v762_v62, %v761_v53 }
 0x158   :  { %v765_v26 = vadd.f32 %v764_v55, %v763_v30 }
 0x15a   :  { %v767_v33 = vadd.f32 %v766_v14, %v765_v26  ;;  %v3871_v14 = vld [vmem:[#allocation7_spill] sm:$0xff] }
 0x15c   :  { %v769_v17 = vadd.f32 %v768_v57, %v767_v33  ;;  %v3873_v33 = vld [vmem:[#allocation9_spill] sm:$0xff]  ;;  %v3874_v57 = vld [vmem:[#allocation12_spill] sm:$0xff] }
 0x15e   :  { %v771_v24 = vadd.f32 %v770_v20, %v769_v17  ;;  %v3876_v20 = vld [vmem:[#allocation14_spill] sm:$0xff] }
 0x160   :  { %v772_v27 = vrot.slane %v771_v24, 4 }
 0x162   :  { %v773_v51 = vadd.f32 %v772_v27, %v771_v24  ;;  %v3878_v27 = vld [vmem:[#allocation11_spill] sm:$0xff] }
 0x164   :  { %v774_v22 = vrot.slane %v773_v51, 2 }
 0x166   :  { %v775_v42 = vadd.f32 %v774_v22, %v773_v51 }
 0x168   :  { %v776_v6 = vrot.slane %v775_v42, 1 }
 0x16a   :  { %v777_v49 = vadd.f32 %v776_v6, %v775_v42  ;;  %v3867_v42 = vld [vmem:[#allocation6_spill] sm:$0xff]  ;;  %v3868_v6 = vld [vmem:[#allocation8_spill] sm:$0xff] }
 0x16c   :  { %v2068_v53 = vmul.f32 0.001953125, %v777_v49  ;;  %v3869_v49 = vld [vmem:[#allocation10_spill] sm:$0xff] }
 0x16e   :  { %v2072_v62 = vsub.f32 %v1814_v35, %v2068_v53  ;;  %v2076_v55 = vsub.f32 %v1818_v37, %v2068_v53  ;;  %v2080_v30 = vsub.f32 %v1812_v34, %v2068_v53  ;;  %v2084_v26 = vsub.f32 %v1816_v36, %v2068_v53 }
 0x16f   :  { %v2088_v22 = vsub.f32 %v1830_v45, %v2068_v53  ;;  %v2092_v35 = vsub.f32 %v1836_v50, %v2068_v53  ;;  %v2096_v37 = vsub.f32 %v1828_v44, %v2068_v53  ;;  %v2100_v34 = vsub.f32 %v1834_v48, %v2068_v53 }
 0x170   :  { %3863 = vst [vmem:[#allocation19_spill] sm:$0xff] %v2072_v62  ;;  %3864 = vst [vmem:[#allocation20_spill] sm:$0xff] %v2076_v55  ;;  %v2104_v36 = vsub.f32 %v1854_v61, %v2068_v53  ;;  %v2108_v45 = vsub.f32 %v1860_v2, %v2068_v53  ;;  %v2112_v50 = vsub.f32 %v1852_v60, %v2068_v53 }
 0x171   :  { %3865 = vst [vmem:[#allocation21_spill] sm:$0xff] %v2080_v30  ;;  %3866 = vst [vmem:[#allocation22_spill] sm:$0xff] %v2084_v26  ;;  %v2116_v44 = vsub.f32 %v1858_v0, %v2068_v53  ;;  %v2120_v48 = vsub.f32 %v1878_v13, %v2068_v53  ;;  %v2124_v61 = vsub.f32 %v1884_v18, %v2068_v53 }
 0x172   :  { %v2128_v2 = vsub.f32 %v1876_v12, %v2068_v53  ;;  %v2132_v60 = vsub.f32 %v1882_v16, %v2068_v53  ;;  %v2136_v0 = vsub.f32 %v1902_v29, %v2068_v53  ;;  %v2140_v13 = vsub.f32 %v1908_v38, %v2068_v53 }
 0x173   :  { %v2144_v18 = vsub.f32 %v1900_v28, %v2068_v53  ;;  %v2148_v12 = vsub.f32 %v1906_v32, %v2068_v53  ;;  %v2152_v16 = vsub.f32 %v1926_v56, %v2068_v53  ;;  %v2156_v29 = vsub.f32 %v1932_v1, %v2068_v53 }
 0x174   :  { %v2160_v38 = vsub.f32 %v1924_v54, %v2068_v53  ;;  %v2164_v28 = vsub.f32 %v3867_v42, %v2068_v53  ;;  %v2168_v32 = vsub.f32 %v3868_v6, %v2068_v53  ;;  %v2172_v56 = vsub.f32 %v3869_v49, %v2068_v53  ;;  %v3879_v42 = vld [vmem:[#allocation13_spill] sm:$0xff]  ;;  %v3880_v49 = vld [vmem:[#allocation3_spill] sm:$0xff] }
 0x175   :  { %v2176_v1 = vsub.f32 %v3871_v14, %v2068_v53  ;;  %v2180_v54 = vsub.f32 %v3873_v33, %v2068_v53  ;;  %v2184_v17 = vsub.f32 %v3874_v57, %v2068_v53  ;;  %v2188_v24 = vsub.f32 %v3876_v20, %v2068_v53  ;;  %v3881_v33 = vld [vmem:[#allocation5_spill] sm:$0xff] }
 0x176   :  { %3870 = vst [vmem:[#allocation6_spill] sm:$0xff] %v2172_v56  ;;  %v2192_v51 = vsub.f32 %v3878_v27, %v2068_v53  ;;  %v2196_v6 = vsub.f32 %v3879_v42, %v2068_v53  ;;  %v2200_v14 = vsub.f32 %v3880_v49, %v2068_v53  ;;  %v2204_v57 = vsub.f32 %v3881_v33, %v2068_v53 }
 0x177   :  { %3872 = vst [vmem:[#allocation8_spill] sm:$0xff] %v2176_v1  ;;  %3875 = vst [vmem:[#allocation10_spill] sm:$0xff] %v2184_v17  ;;  %v3882_v17 = vld [vmem:[#allocation2_spill] sm:$0xff]  ;;  %v2216_v42 = vsub.f32 %v1866_v5, %v2068_v53  ;;  %v2220_v49 = vsub.f32 %v1872_v9, %v2068_v53  ;;  %v2224_v33 = vsub.f32 %v1862_v3, %v2068_v53 }
 0x178   :  { %3877 = vst [vmem:[#allocation7_spill] sm:$0xff] %v2188_v24  ;;  %v2208_v20 = vsub.f32 %v3882_v17, %v2068_v53  ;;  %v3883_v24 = vld [vmem:[#allocation4_spill] sm:$0xff]  ;;  %v2228_v17 = vsub.f32 %v1868_v7, %v2068_v53  ;;  %v2236_v5 = vsub.f32 %v1896_v25, %v2068_v53  ;;  %v2240_v9 = vsub.f32 %v1886_v19, %v2068_v53 }
 0x179   :  { %v2212_v27 = vsub.f32 %v3883_v24, %v2068_v53  ;;  %v2232_v24 = vsub.f32 %v1890_v21, %v2068_v53  ;;  %v2244_v3 = vsub.f32 %v1892_v23, %v2068_v53  ;;  %v2248_v7 = vsub.f32 %v1914_v41, %v2068_v53 }
 0x17a   :  { %v2252_v21 = vsub.f32 %v1920_v47, %v2068_v53  ;;  %v2256_v25 = vsub.f32 %v1910_v39, %v2068_v53  ;;  %v2260_v19 = vsub.f32 %v1916_v43, %v2068_v53  ;;  %v2264_v23 = vsub.f32 %v1938_v8, %v2068_v53 }
 0x17b   :  { %v2268_v41 = vsub.f32 %v1944_v15, %v2068_v53  ;;  %v2272_v47 = vsub.f32 %v1934_v4, %v2068_v53  ;;  %v2276_v39 = vsub.f32 %v1940_v11, %v2068_v53  ;;  %v2280_v43 = vsub.f32 %v1962_v46, %v2068_v53 }
 0x17c   :  { %3884 = vst [vmem:[#allocation9_spill] sm:$0xff] %v2264_v23  ;;  %v2284_v8 = vsub.f32 %v1968_v59, %v2068_v53  ;;  %v2288_v15 = vsub.f32 %v1958_v40, %v2068_v53  ;;  %v2292_v4 = vsub.f32 %v1964_v52, %v2068_v53  ;;  %v2296_v11 = vsub.f32 %v1986_v58, %v2068_v53 }
 0x17d   :  { %3885 = vst [vmem:[#allocation12_spill] sm:$0xff] %v2268_v41  ;;  %3886 = vst [vmem:[#allocation14_spill] sm:$0xff] %v2272_v47  ;;  %v2316_v58 = vsub.f32 %v2008_v63, %v2068_v53  ;;  %v846_v63 = vmul.f32 %v2084_v26, %v2084_v26  ;;  %v849_v26 = vmul.f32 %v2096_v37, %v2096_v37 }
 0x17e   :  { %3887 = vst [vmem:[#allocation11_spill] sm:$0xff] %v2276_v39  ;;  %3888 = vst [vmem:[#allocation13_spill] sm:$0xff] %v2280_v43  ;;  %v3893_v39 = vld [vmem:[#allocation17_spill] sm:$0xff]  ;;  %v3895_v43 = vld [vmem:[#allocation15_spill] sm:$0xff] }
 0x17f   :  { %3889 = vst [vmem:[#allocation3_spill] sm:$0xff] %v2284_v8  ;;  %3890 = vst [vmem:[#allocation5_spill] sm:$0xff] %v2288_v15  ;;  %v2300_v46 = vsub.f32 %v3893_v39, %v2068_v53  ;;  %v2304_v59 = vsub.f32 %v3895_v43, %v2068_v53  ;;  %v3897_v8 = vld [vmem:[#allocation16_spill] sm:$0xff]  ;;  %v3899_v15 = vld [vmem:[#allocation18_spill] sm:$0xff]  ;;  %v2320_v39 = vsub.f32 %v1998_v31, %v2068_v53 }
 0x180   :  { %3891 = vst [vmem:[#allocation2_spill] sm:$0xff] %v2292_v4  ;;  %3892 = vst [vmem:[#allocation4_spill] sm:$0xff] %v2296_v11  ;;  %v2308_v40 = vsub.f32 %v3897_v8, %v2068_v53  ;;  %v2312_v52 = vsub.f32 %v3899_v15, %v2068_v53  ;;  %v2324_v43 = vsub.f32 %v2004_v10, %v2068_v53 }
 0x181   :  { %3894 = vst [vmem:[#allocation17_spill] sm:$0xff] %v2300_v46  ;;  %3896 = vst [vmem:[#allocation15_spill] sm:$0xff] %v2304_v59  ;;  %v843_v8 = vmul.f32 %v2072_v62, %v2072_v62  ;;  %v845_v15 = vmul.f32 %v2080_v30, %v2080_v30  ;;  %v847_v10 = vmul.f32 %v2088_v22, %v2088_v22 }
 0x182   :  { %3898 = vst [vmem:[#allocation16_spill] sm:$0xff] %v2308_v40  ;;  %3900 = vst [vmem:[#allocation18_spill] sm:$0xff] %v2312_v52  ;;  %v844_v40 = vmul.f32 %v2076_v55, %v2076_v55  ;;  %v848_v55 = vmul.f32 %v2092_v35, %v2092_v35 }
 0x183   :  { %3901 = vst [vmem:[#allocation23_spill] sm:$0xff] %v2316_v58  ;;  %3902 = vst [vmem:[#allocation24_spill] sm:$0xff] %v2320_v39  ;;  %v907_v58 = vsel %vm644_vm1, %v843_v8, 0.0  ;;  %v910_v53 = vsel %vm644_vm1, %v845_v15, 0.0  ;;  %v914_v8 = vsel %vm644_vm1, %v847_v10, 0.0  ;;  %v918_v15 = vsel %vm644_vm1, %v849_v26, 0.0 }
 0x184   :  { %3903 = vst [vmem:[#allocation25_spill] sm:$0xff] %v2324_v43  ;;  %v908_v31 = vsel %vm644_vm1, %v844_v40, 0.0  ;;  %v912_v43 = vsel %vm644_vm1, %v846_v63, 0.0  ;;  %v850_v40 = vmul.f32 %v2100_v34, %v2100_v34  ;;  %v855_v26 = vmul.f32 %v2120_v48, %v2120_v48 }
 0x185   :  { %v909_v39 = vadd.f32 %v908_v31, %v907_v58  ;;  %v916_v58 = vsel %vm644_vm1, %v848_v55, 0.0  ;;  %v854_v55 = vmul.f32 %v2116_v44, %v2116_v44 }
 0x187   :  { %v911_v62 = vadd.f32 %v910_v53, %v909_v39  ;;  %v851_v39 = vmul.f32 %v2104_v36, %v2104_v36 }
 0x189   :  { %v913_v30 = vadd.f32 %v912_v43, %v911_v62  ;;  %v852_v62 = vmul.f32 %v2108_v45, %v2108_v45  ;;  %v920_v43 = vsel %vm644_vm1, %v850_v40, 0.0  ;;  %v922_v10 = vsel %vm644_vm1, %v851_v39, 0.0 }
 0x18a   :  { %v856_v40 = vmul.f32 %v2124_v61, %v2124_v61  ;;  %v857_v39 = vmul.f32 %v2128_v2, %v2128_v2 }
 0x18b   :  { %v915_v52 = vadd.f32 %v914_v8, %v913_v30  ;;  %v853_v30 = vmul.f32 %v2112_v50, %v2112_v50 }
 0x18d   :  { %v917_v31 = vadd.f32 %v916_v58, %v915_v52  ;;  %v924_v52 = vsel %vm644_vm1, %v852_v62, 0.0  ;;  %v858_v62 = vmul.f32 %v2132_v60, %v2132_v60 }
 0x18f   :  { %v919_v53 = vadd.f32 %v918_v15, %v917_v31  ;;  %v926_v31 = vsel %vm644_vm1, %v853_v30, 0.0  ;;  %v859_v30 = vmul.f32 %v2136_v0, %v2136_v0 }
 0x191   :  { %v921_v63 = vadd.f32 %v920_v43, %v919_v53  ;;  %v928_v53 = vsel %vm644_vm1, %v854_v55, 0.0  ;;  %v860_v55 = vmul.f32 %v2140_v13, %v2140_v13 }
 0x193   :  { %v923_v8 = vadd.f32 %v922_v10, %v921_v63  ;;  %v930_v63 = vsel %vm644_vm1, %v855_v26, 0.0  ;;  %v861_v26 = vmul.f32 %v2144_v18, %v2144_v18 }
 0x195   :  { %v925_v58 = vadd.f32 %v924_v52, %v923_v8  ;;  %v932_v8 = vsel %vm644_vm1, %v856_v40, 0.0  ;;  %v862_v40 = vmul.f32 %v2148_v12, %v2148_v12 }
 0x197   :  { %v927_v15 = vadd.f32 %v926_v31, %v925_v58  ;;  %v934_v58 = vsel %vm644_vm1, %v857_v39, 0.0  ;;  %v863_v39 = vmul.f32 %v2152_v16, %v2152_v16 }
 0x199   :  { %v929_v43 = vadd.f32 %v928_v53, %v927_v15  ;;  %v936_v15 = vsel %vm644_vm1, %v858_v62, 0.0  ;;  %v864_v62 = vmul.f32 %v2156_v29, %v2156_v29 }
 0x19b   :  { %v931_v10 = vadd.f32 %v930_v63, %v929_v43  ;;  %v938_v43 = vsel %vm644_vm1, %v859_v30, 0.0  ;;  %v865_v30 = vmul.f32 %v2160_v38, %v2160_v38 }
 0x19d   :  { %v933_v52 = vadd.f32 %v932_v8, %v931_v10  ;;  %v940_v10 = vsel %vm644_vm1, %v860_v55, 0.0  ;;  %v866_v55 = vmul.f32 %v2164_v28, %v2164_v28 }
 0x19f   :  { %v935_v31 = vadd.f32 %v934_v58, %v933_v52  ;;  %v942_v52 = vsel %vm644_vm1, %v861_v26, 0.0  ;;  %v867_v26 = vmul.f32 %v2168_v32, %v2168_v32 }
 0x1a1   :  { %v937_v53 = vadd.f32 %v936_v15, %v935_v31  ;;  %v944_v31 = vsel %vm644_vm1, %v862_v40, 0.0  ;;  %v868_v40 = vmul.f32 %v2172_v56, %v2172_v56 }
 0x1a3   :  { %v939_v63 = vadd.f32 %v938_v43, %v937_v53  ;;  %v946_v53 = vsel %vm644_vm1, %v863_v39, 0.0  ;;  %v869_v39 = vmul.f32 %v2176_v1, %v2176_v1 }
 0x1a5   :  { %v941_v8 = vadd.f32 %v940_v10, %v939_v63  ;;  %v948_v63 = vsel %vm644_vm1, %v864_v62, 0.0  ;;  %v870_v62 = vmul.f32 %v2180_v54, %v2180_v54 }
 0x1a7   :  { %v943_v58 = vadd.f32 %v942_v52, %v941_v8  ;;  %v950_v8 = vsel %vm644_vm1, %v865_v30, 0.0  ;;  %v3904_v30 = vld [vmem:[#allocation10_spill] sm:$0xff] }
 0x1a9   :  { %v945_v15 = vadd.f32 %v944_v31, %v943_v58  ;;  %v952_v58 = vsel %vm644_vm1, %v866_v55, 0.0  ;;  %v3905_v55 = vld [vmem:[#allocation7_spill] sm:$0xff] }
 0x1ab   :  { %v947_v43 = vadd.f32 %v946_v53, %v945_v15  ;;  %v954_v15 = vsel %vm644_vm1, %v867_v26, 0.0  ;;  %v873_v26 = vmul.f32 %v2192_v51, %v2192_v51 }
 0x1ad   :  { %v949_v10 = vadd.f32 %v948_v63, %v947_v43  ;;  %v956_v43 = vsel %vm644_vm1, %v868_v40, 0.0  ;;  %v874_v40 = vmul.f32 %v2196_v6, %v2196_v6 }
 0x1af   :  { %v951_v52 = vadd.f32 %v950_v8, %v949_v10  ;;  %v871_v10 = vmul.f32 %v3904_v30, %v3904_v30  ;;  %v958_v8 = vsel %vm644_vm1, %v869_v39, 0.0  ;;  %v875_v39 = vmul.f32 %v2200_v14, %v2200_v14 }
 0x1b1   :  { %v953_v31 = vadd.f32 %v952_v58, %v951_v52  ;;  %v872_v52 = vmul.f32 %v3905_v55, %v3905_v55  ;;  %v960_v58 = vsel %vm644_vm1, %v870_v62, 0.0  ;;  %v968_v62 = vsel %vm644_vm1, %v874_v40, 0.0 }
 0x1b2   :  { %v880_v40 = vmul.f32 %v2220_v49, %v2220_v49 }
 0x1b3   :  { %v955_v53 = vadd.f32 %v954_v15, %v953_v31  ;;  %v962_v31 = vsel %vm644_vm1, %v871_v10, 0.0  ;;  %v970_v10 = vsel %vm644_vm1, %v875_v39, 0.0  ;;  %v881_v39 = vmul.f32 %v2224_v33, %v2224_v33 }
 0x1b5   :  { %v957_v63 = vadd.f32 %v956_v43, %v955_v53  ;;  %v964_v53 = vsel %vm644_vm1, %v872_v52, 0.0  ;;  %v878_v52 = vmul.f32 %v2212_v27, %v2212_v27 }
 0x1b7   :  { %v959_v56 = vadd.f32 %v958_v8, %v957_v63  ;;  %v966_v63 = vsel %vm644_vm1, %v873_v26, 0.0  ;;  %v879_v26 = vmul.f32 %v2216_v42, %v2216_v42 }
 0x1b9   :  { %v961_v1 = vadd.f32 %v960_v58, %v959_v56  ;;  %v876_v56 = vmul.f32 %v2204_v57, %v2204_v57 }
 0x1bb   :  { %v963_v15 = vadd.f32 %v962_v31, %v961_v1  ;;  %v877_v1 = vmul.f32 %v2208_v20, %v2208_v20 }
 0x1bd   :  { %v965_v43 = vadd.f32 %v964_v53, %v963_v15  ;;  %v972_v15 = vsel %vm644_vm1, %v876_v56, 0.0  ;;  %v882_v56 = vmul.f32 %v2228_v17, %v2228_v17 }
 0x1bf   :  { %v967_v8 = vadd.f32 %v966_v63, %v965_v43  ;;  %v974_v43 = vsel %vm644_vm1, %v877_v1, 0.0  ;;  %v883_v1 = vmul.f32 %v2232_v24, %v2232_v24 }
 0x1c1   :  { %v969_v58 = vadd.f32 %v968_v62, %v967_v8  ;;  %v976_v8 = vsel %vm644_vm1, %v878_v52, 0.0  ;;  %v884_v52 = vmul.f32 %v2236_v5, %v2236_v5 }
 0x1c3   :  { %v971_v31 = vadd.f32 %v970_v10, %v969_v58  ;;  %v978_v58 = vsel %vm644_vm1, %v879_v26, 0.0  ;;  %v885_v26 = vmul.f32 %v2240_v9, %v2240_v9 }
 0x1c5   :  { %v973_v53 = vadd.f32 %v972_v15, %v971_v31  ;;  %v980_v31 = vsel %vm644_vm1, %v880_v40, 0.0  ;;  %v886_v40 = vmul.f32 %v2244_v3, %v2244_v3 }
 0x1c7   :  { %v975_v63 = vadd.f32 %v974_v43, %v973_v53  ;;  %v982_v53 = vsel %vm644_vm1, %v881_v39, 0.0  ;;  %v887_v39 = vmul.f32 %v2248_v7, %v2248_v7 }
 0x1c9   :  { %v977_v62 = vadd.f32 %v976_v8, %v975_v63  ;;  %v984_v63 = vsel %vm644_vm1, %v882_v56, 0.0  ;;  %v888_v56 = vmul.f32 %v2252_v21, %v2252_v21 }
 0x1cb   :  { %v979_v10 = vadd.f32 %v978_v58, %v977_v62  ;;  %v986_v62 = vsel %vm644_vm1, %v883_v1, 0.0  ;;  %v889_v1 = vmul.f32 %v2256_v25, %v2256_v25 }
 0x1cd   :  { %v981_v15 = vadd.f32 %v980_v31, %v979_v10  ;;  %v988_v10 = vsel %vm644_vm1, %v884_v52, 0.0  ;;  %v890_v52 = vmul.f32 %v2260_v19, %v2260_v19 }
 0x1cf   :  { %v983_v43 = vadd.f32 %v982_v53, %v981_v15  ;;  %v990_v15 = vsel %vm644_vm1, %v885_v26, 0.0  ;;  %v891_v26 = vmul.f32 %v2264_v23, %v2264_v23 }
 0x1d1   :  { %v985_v8 = vadd.f32 %v984_v63, %v983_v43  ;;  %v992_v43 = vsel %vm644_vm1, %v886_v40, 0.0  ;;  %v892_v40 = vmul.f32 %v2268_v41, %v2268_v41 }
 0x1d3   :  { %v987_v58 = vadd.f32 %v986_v62, %v985_v8  ;;  %v994_v8 = vsel %vm644_vm1, %v887_v39, 0.0  ;;  %v893_v39 = vmul.f32 %v2272_v47, %v2272_v47 }
 0x1d5   :  { %v989_v31 = vadd.f32 %v988_v10, %v987_v58  ;;  %v996_v58 = vsel %vm644_vm1, %v888_v56, 0.0  ;;  %v3906_v56 = vld [vmem:[#allocation11_spill] sm:$0xff] }
 0x1d7   :  { %v991_v53 = vadd.f32 %v990_v15, %v989_v31  ;;  %v998_v31 = vsel %vm644_vm1, %v889_v1, 0.0  ;;  %v3907_v1 = vld [vmem:[#allocation13_spill] sm:$0xff] }
 0x1d9   :  { %v993_v63 = vadd.f32 %v992_v43, %v991_v53  ;;  %v1000_v53 = vsel %vm644_vm1, %v890_v52, 0.0  ;;  %v3908_v52 = vld [vmem:[#allocation3_spill] sm:$0xff] }
 0x1db   :  { %v995_v62 = vadd.f32 %v994_v8, %v993_v63  ;;  %v1002_v63 = vsel %vm644_vm1, %v891_v26, 0.0  ;;  %v3909_v26 = vld [vmem:[#allocation5_spill] sm:$0xff] }
 0x1dd   :  { %v997_v10 = vadd.f32 %v996_v58, %v995_v62  ;;  %v894_v62 = vmul.f32 %v3906_v56, %v3906_v56  ;;  %v1004_v58 = vsel %vm644_vm1, %v892_v40, 0.0  ;;  %v898_v40 = vmul.f32 %v2292_v4, %v2292_v4 }
 0x1df   :  { %v999_v15 = vadd.f32 %v998_v31, %v997_v10  ;;  %v895_v10 = vmul.f32 %v3907_v1, %v3907_v1  ;;  %v1006_v31 = vsel %vm644_vm1, %v893_v39, 0.0 }
 0x1e1   :  { %v1001_v43 = vadd.f32 %v1000_v53, %v999_v15  ;;  %v896_v15 = vmul.f32 %v3908_v52, %v3908_v52  ;;  %v1008_v53 = vsel %vm644_vm1, %v894_v62, 0.0  ;;  %v1016_v62 = vsel %vm644_vm1, %v898_v40, 0.0  ;;  %v3912_v40 = vld [vmem:[#allocation23_spill] sm:$0xff] }
 0x1e3   :  { %v1003_v8 = vadd.f32 %v1002_v63, %v1001_v43  ;;  %v897_v43 = vmul.f32 %v3909_v26, %v3909_v26  ;;  %v1010_v63 = vsel %vm644_vm1, %v895_v10, 0.0 }
 0x1e5   :  { %v1005_v23 = vadd.f32 %v1004_v58, %v1003_v8  ;;  %v1012_v8 = vsel %vm644_vm1, %v896_v15, 0.0  ;;  %v1014_v39 = vsel %vm644_vm1, %v897_v43, 0.0  ;;  %v3910_v15 = vld [vmem:[#allocation16_spill] sm:$0xff]  ;;  %v3911_v43 = vld [vmem:[#allocation18_spill] sm:$0xff] }
 0x1e7   :  { %v1007_v41 = vadd.f32 %v1006_v31, %v1005_v23  ;;  %v899_v23 = vmul.f32 %v2296_v11, %v2296_v11 }
 0x1e9   :  { %v1009_v47 = vadd.f32 %v1008_v53, %v1007_v41  ;;  %v900_v41 = vmul.f32 %v2300_v46, %v2300_v46  ;;  %v1018_v10 = vsel %vm644_vm1, %v899_v23, 0.0  ;;  %v3913_v23 = vld [vmem:[#allocation24_spill] sm:$0xff] }
 0x1eb   :  { %v1011_v56 = vadd.f32 %v1010_v63, %v1009_v47  ;;  %v901_v47 = vmul.f32 %v2304_v59, %v2304_v59 }
 0x1ed   :  { %v1013_v58 = vadd.f32 %v1012_v8, %v1011_v56  ;;  %v902_v56 = vmul.f32 %v3910_v15, %v3910_v15  ;;  %v1020_v8 = vsel %vm644_vm1, %v900_v41, 0.0  ;;  %v3914_v41 = vld [vmem:[#allocation25_spill] sm:$0xff] }
 0x1ef   :  { %v1015_v31 = vadd.f32 %v1014_v39, %v1013_v58  ;;  %v903_v58 = vmul.f32 %v3911_v43, %v3911_v43  ;;  %v1022_v39 = vsel %vm644_vm1, %v901_v47, 0.0 }
 0x1f1   :  { %v1017_v53 = vadd.f32 %v1016_v62, %v1015_v31  ;;  %v904_v31 = vmul.f32 %v3912_v40, %v3912_v40  ;;  %v1024_v62 = vsel %vm644_vm1, %v902_v56, 0.0 }
 0x1f3   :  { %v1019_v63 = vadd.f32 %v1018_v10, %v1017_v53  ;;  %v905_v53 = vmul.f32 %v3913_v23, %v3913_v23  ;;  %v1026_v10 = vsel %vm644_vm1, %v903_v58, 0.0 }
 0x1f5   :  { %v1021_v11 = vadd.f32 %v1020_v8, %v1019_v63  ;;  %v906_v63 = vmul.f32 %v3914_v41, %v3914_v41  ;;  %v1028_v8 = vsel %vm644_vm1, %v904_v31, 0.0 }
 0x1f7   :  { %v1023_v46 = vadd.f32 %v1022_v39, %v1021_v11  ;;  %v1030_v11 = vsel %vm644_vm1, %v905_v53, 0.0  ;;  %v1032_v39 = vsel %vm644_vm1, %v906_v63, 0.0  ;;  %v3915_v63 = vld [vmem:[#allocation19_spill] sm:$0xff] }
 0x1f9   :  { %v1025_v59 = vadd.f32 %v1024_v62, %v1023_v46 }
 0x1fb   :  { %v1027_v15 = vadd.f32 %v1026_v10, %v1025_v59  ;;  %v1045_v10 = vlaneseq }
 0x1fd   :  { %v1029_v43 = vadd.f32 %v1028_v8, %v1027_v15  ;;  %v1046_v41 = vshrl.u32 %v1045_v10, 7  ;;  %v1043_v15 = vld [vmem:[%s3780_s2] sm:$0x1]  ;;  %v3916_v8 = vld [vmem:[#allocation20_spill] sm:$0xff] }
 0x1ff   :  { %v1031_v47 = vadd.f32 %v1030_v11, %v1029_v43  ;;  %v1047_v31 = vsub.s32 0, %v1046_v41  ;;  %v3918_v11 = vld [vmem:[#allocation22_spill] sm:$0xff] }
 0x201   :  { %v1033_v40 = vadd.f32 %v1032_v39, %v1031_v47 }
 0x203   :  { %v1034_v56 = vrot.slane %v1033_v40, 4 }
 0x205   :  { %v1035_v46 = vadd.f32 %v1034_v56, %v1033_v40 }
 0x207   :  { %v1036_v62 = vrot.slane %v1035_v46, 2 }
 0x209   :  { %v1037_v4 = vadd.f32 %v1036_v62, %v1035_v46  ;;  %v3919_v62 = vld [vmem:[#allocation6_spill] sm:$0xff] }
 0x20b   :  { %v1038_v23 = vrot.slane %v1037_v4, 1 }
 0x20d   :  { %v1039_v26 = vadd.f32 %v1038_v23, %v1037_v4 }
 0x20f   :  { %v1040_v58 = vmul.f32 0.001953125, %v1039_v26  ;;  %v3917_v26 = vld [vmem:[#allocation21_spill] sm:$0xff] }
 0x211   :  { %v1041_v59 = vadd.f32 1e-05, %v1040_v58  ;;  %v3920_v58 = vld [vmem:[#allocation8_spill] sm:$0xff] }
 0x213   :  { %1651 = vrsqrt.f32 %v1041_v59 }
 0x21d   :  { %v1652_v52 = vpop.eup %1651 }
 0x21e   :  { %v1044_v43 = vmul.f32 %v1652_v52, %v1043_v15  ;;  %v3921_v15 = vld [vmem:[#allocation9_spill] sm:$0xff] }
 0x220   :  { %v2521_v53 = vrot.slane %v1044_v43, %v1047_v31  ;;  %v3922_v43 = vld [vmem:[#allocation12_spill] sm:$0xff]  ;;  %v3923_v31 = vld [vmem:[#allocation14_spill] sm:$0xff] }
 0x222   :  { %v2525_v40 = vmul.f32 %v2521_v53, %v3915_v63  ;;  %v2529_v4 = vmul.f32 %v2521_v53, %v3916_v8  ;;  %v2533_v23 = vmul.f32 %v2521_v53, %v3917_v26  ;;  %v2537_v47 = vmul.f32 %v2521_v53, %v3918_v11  ;;  %v3924_v63 = vld [vmem:[#allocation11_spill] sm:$0xff]  ;;  %v3929_v11 = vld [vmem:[#allocation5_spill] sm:$0xff] }
 0x223   :  { %v2541_v52 = vmul.f32 %v2521_v53, %v2088_v22  ;;  %v2545_v41 = vmul.f32 %v2521_v53, %v2092_v35  ;;  %v2549_v39 = vmul.f32 %v2521_v53, %v2096_v37  ;;  %v2553_v56 = vmul.f32 %v2521_v53, %v2100_v34  ;;  %v3927_v8 = vld [vmem:[#allocation3_spill] sm:$0xff] }
 0x224   :  { %v2557_v46 = vmul.f32 %v2521_v53, %v2104_v36  ;;  %v2561_v22 = vmul.f32 %v2521_v53, %v2108_v45  ;;  %v2565_v35 = vmul.f32 %v2521_v53, %v2112_v50  ;;  %v2569_v37 = vmul.f32 %v2521_v53, %v2116_v44 }
 0x225   :  { %v2573_v34 = vmul.f32 %v2521_v53, %v2120_v48  ;;  %v2577_v36 = vmul.f32 %v2521_v53, %v2124_v61  ;;  %v2581_v45 = vmul.f32 %v2521_v53, %v2128_v2  ;;  %v2585_v50 = vmul.f32 %v2521_v53, %v2132_v60 }
 0x226   :  { %v2589_v44 = vmul.f32 %v2521_v53, %v2136_v0  ;;  %v2593_v48 = vmul.f32 %v2521_v53, %v2140_v13  ;;  %v2597_v61 = vmul.f32 %v2521_v53, %v2144_v18  ;;  %v2601_v2 = vmul.f32 %v2521_v53, %v2148_v12 }
 0x227   :  { %v2605_v60 = vmul.f32 %v2521_v53, %v2152_v16  ;;  %v2609_v0 = vmul.f32 %v2521_v53, %v2156_v29  ;;  %v2613_v13 = vmul.f32 %v2521_v53, %v2160_v38  ;;  %v2617_v18 = vmul.f32 %v2521_v53, %v2164_v28 }
 0x228   :  { %v2621_v12 = vmul.f32 %v2521_v53, %v2168_v32  ;;  %v2625_v16 = vmul.f32 %v2521_v53, %v3919_v62  ;;  %v2629_v29 = vmul.f32 %v2521_v53, %v3920_v58  ;;  %v2633_v38 = vmul.f32 %v2521_v53, %v2180_v54  ;;  %v2746_v58 = vld [vmem:[%s3781_s3] ss:$0 sm:$0xff] }
 0x229   :  { %v2637_v28 = vmul.f32 %v2521_v53, %v3904_v30  ;;  %v2641_v32 = vmul.f32 %v2521_v53, %v3905_v55  ;;  %v2645_v59 = vmul.f32 %v2521_v53, %v2192_v51  ;;  %v2649_v10 = vmul.f32 %v2521_v53, %v2196_v6 }
 0x22a   :  { %v2653_v54 = vmul.f32 %v2521_v53, %v2200_v14  ;;  %v2657_v30 = vmul.f32 %v2521_v53, %v2204_v57  ;;  %v2661_v55 = vmul.f32 %v2521_v53, %v2208_v20  ;;  %v2665_v51 = vmul.f32 %v2521_v53, %v2212_v27 }
 0x22b   :  { %v2669_v6 = vmul.f32 %v2521_v53, %v2216_v42  ;;  %v2673_v14 = vmul.f32 %v2521_v53, %v2220_v49  ;;  %v2677_v57 = vmul.f32 %v2521_v53, %v2224_v33  ;;  %v2681_v20 = vmul.f32 %v2521_v53, %v2228_v17 }
 0x22c   :  { %v2685_v27 = vmul.f32 %v2521_v53, %v2232_v24  ;;  %v2689_v42 = vmul.f32 %v2521_v53, %v2236_v5  ;;  %v2693_v49 = vmul.f32 %v2521_v53, %v2240_v9  ;;  %v2697_v33 = vmul.f32 %v2521_v53, %v2244_v3 }
 0x22d   :  { %v2701_v17 = vmul.f32 %v2521_v53, %v2248_v7  ;;  %v2705_v24 = vmul.f32 %v2521_v53, %v2252_v21  ;;  %v2709_v5 = vmul.f32 %v2521_v53, %v2256_v25  ;;  %v2713_v9 = vmul.f32 %v2521_v53, %v2260_v19 }
 0x22e   :  { %v2717_v3 = vmul.f32 %v2521_v53, %v3921_v15  ;;  %v2721_v7 = vmul.f32 %v2521_v53, %v3922_v43  ;;  %v2725_v21 = vmul.f32 %v2521_v53, %v3923_v31  ;;  %v2729_v25 = vmul.f32 %v2521_v53, %v3924_v63  ;;  %v3931_v15 = vld [vmem:[#allocation2_spill] sm:$0xff]  ;;  %v3933_v31 = vld [vmem:[#allocation4_spill] sm:$0xff]  ;;  %v3935_v63 = vld [vmem:[#allocation17_spill] sm:$0xff] }
 0x22f   :  { %v2733_v19 = vmul.f32 %v2521_v53, %v3907_v1  ;;  %v2737_v26 = vmul.f32 %v2521_v53, %v3927_v8  ;;  %v2741_v62 = vmul.f32 %v2521_v53, %v3929_v11  ;;  %v2750_v43 = vmul.f32 %v2521_v53, %v3931_v15 }
 0x230   :  { %3925 = vst [vmem:[#allocation10_spill] sm:$0xff] %v2729_v25  ;;  %v2754_v1 = vmul.f32 %v2521_v53, %v3933_v31  ;;  %v2758_v8 = vmul.f32 %v2521_v53, %v3935_v63  ;;  %v3939_v25 = vld [vmem:[#allocation18_spill] sm:$0xff] }
 0x231   :  { %3926 = vst [vmem:[#allocation7_spill] sm:$0xff] %v2733_v19  ;;  %3928 = vst [vmem:[#allocation13_spill] sm:$0xff] %v2737_v26  ;;  %v3937_v26 = vld [vmem:[#allocation15_spill] sm:$0xff]  ;;  %v2770_v15 = vmul.f32 %v2521_v53, %v3939_v25  ;;  %v2790_v25 = vadd.f32 %v2746_v58, %v2529_v4  ;;  %v2810_v4 = vadd.f32 %v2746_v58, %v2549_v39 }
 0x232   :  { %3930 = vst [vmem:[#allocation19_spill] sm:$0xff] %v2741_v62  ;;  %3932 = vst [vmem:[#allocation20_spill] sm:$0xff] %v2750_v43  ;;  %v2762_v11 = vmul.f32 %v2521_v53, %v3937_v26  ;;  %v3938_v62 = vld [vmem:[#allocation16_spill] sm:$0xff]  ;;  %v3940_v43 = vld [vmem:[#allocation23_spill] sm:$0xff]  ;;  %v2830_v39 = vadd.f32 %v2746_v58, %v2569_v37  ;;  %v2850_v37 = vadd.f32 %v2746_v58, %v2589_v44 }
 0x233   :  { %3934 = vst [vmem:[#allocation21_spill] sm:$0xff] %v2754_v1  ;;  %3936 = vst [vmem:[#allocation22_spill] sm:$0xff] %v2758_v8  ;;  %v2766_v19 = vmul.f32 %v2521_v53, %v3938_v62  ;;  %v2774_v31 = vmul.f32 %v2521_v53, %v3940_v43  ;;  %v3941_v1 = vld [vmem:[#allocation24_spill] sm:$0xff]  ;;  %v3942_v8 = vld [vmem:[#allocation25_spill] sm:$0xff]  ;;  %v2786_v62 = vadd.f32 %v2746_v58, %v2525_v40  ;;  %vm1185_vm3 = vcmp.ge.f32.partialorder %v2790_v25, 0.0 }
 0x234   :  { %v2778_v63 = vmul.f32 %v2521_v53, %v3941_v1  ;;  %v2782_v26 = vmul.f32 %v2521_v53, %v3942_v8  ;;  %v2794_v43 = vadd.f32 %v2746_v58, %v2533_v23  ;;  %v2798_v1 = vadd.f32 %v2746_v58, %v2537_v47 }
 0x235   :  { %v2802_v53 = vadd.f32 %v2746_v58, %v2541_v52  ;;  %v2806_v40 = vadd.f32 %v2746_v58, %v2545_v41  ;;  %v2814_v23 = vadd.f32 %v2746_v58, %v2553_v56  ;;  %v2818_v47 = vadd.f32 %v2746_v58, %v2557_v46 }
 0x236   :  { %v2822_v52 = vadd.f32 %v2746_v58, %v2561_v22  ;;  %v2826_v41 = vadd.f32 %v2746_v58, %v2565_v35  ;;  %v2834_v56 = vadd.f32 %v2746_v58, %v2573_v34  ;;  %v2838_v46 = vadd.f32 %v2746_v58, %v2577_v36 }
 0x237   :  { %v2842_v22 = vadd.f32 %v2746_v58, %v2581_v45  ;;  %v2846_v35 = vadd.f32 %v2746_v58, %v2585_v50  ;;  %v2854_v34 = vadd.f32 %v2746_v58, %v2593_v48  ;;  %v2858_v36 = vadd.f32 %v2746_v58, %v2597_v61  ;;  %v3948_v8 = vld [vmem:[#allocation10_spill] sm:$0xff] }
 0x238   :  { %v2862_v45 = vadd.f32 %v2746_v58, %v2601_v2  ;;  %v2866_v50 = vadd.f32 %v2746_v58, %v2605_v60  ;;  %v2870_v44 = vadd.f32 %v2746_v58, %v2609_v0  ;;  %v2874_v48 = vadd.f32 %v2746_v58, %v2613_v13 }
 0x239   :  { %v2878_v61 = vadd.f32 %v2746_v58, %v2617_v18  ;;  %v2882_v2 = vadd.f32 %v2746_v58, %v2621_v12  ;;  %v2886_v60 = vadd.f32 %v2746_v58, %v2625_v16  ;;  %v2890_v0 = vadd.f32 %v2746_v58, %v2629_v29 }
 0x23a   :  { %v2894_v13 = vadd.f32 %v2746_v58, %v2633_v38  ;;  %v2898_v18 = vadd.f32 %v2746_v58, %v2637_v28  ;;  %v2902_v12 = vadd.f32 %v2746_v58, %v2641_v32  ;;  %v2906_v16 = vadd.f32 %v2746_v58, %v2645_v59 }
 0x23b   :  { %v2910_v29 = vadd.f32 %v2746_v58, %v2649_v10  ;;  %v2914_v38 = vadd.f32 %v2746_v58, %v2653_v54  ;;  %v2918_v28 = vadd.f32 %v2746_v58, %v2657_v30  ;;  %v2922_v32 = vadd.f32 %v2746_v58, %v2661_v55 }
 0x23c   :  { %v2926_v59 = vadd.f32 %v2746_v58, %v2665_v51  ;;  %v2930_v10 = vadd.f32 %v2746_v58, %v2669_v6  ;;  %v2934_v54 = vadd.f32 %v2746_v58, %v2673_v14  ;;  %v2938_v30 = vadd.f32 %v2746_v58, %v2677_v57 }
 0x23d   :  { %v2942_v55 = vadd.f32 %v2746_v58, %v2681_v20  ;;  %v2946_v51 = vadd.f32 %v2746_v58, %v2685_v27  ;;  %v2950_v6 = vadd.f32 %v2746_v58, %v2689_v42  ;;  %v2954_v14 = vadd.f32 %v2746_v58, %v2693_v49 }
 0x23e   :  { %v2958_v57 = vadd.f32 %v2746_v58, %v2697_v33  ;;  %v2962_v20 = vadd.f32 %v2746_v58, %v2701_v17  ;;  %v2966_v27 = vadd.f32 %v2746_v58, %v2705_v24  ;;  %v2970_v42 = vadd.f32 %v2746_v58, %v2709_v5 }
 0x23f   :  { %v2974_v49 = vadd.f32 %v2746_v58, %v2713_v9  ;;  %v2978_v33 = vadd.f32 %v2746_v58, %v2717_v3  ;;  %v2982_v17 = vadd.f32 %v2746_v58, %v2721_v7  ;;  %v2986_v24 = vadd.f32 %v2746_v58, %v2725_v21 }
 0x240   :  { %3943 = vst [vmem:[#allocation6_spill] sm:$0xff] %v2970_v42  ;;  %v2990_v5 = vadd.f32 %v2746_v58, %v3948_v8  ;;  %v3950_v42 = vld [vmem:[#allocation7_spill] sm:$0xff]  ;;  %vm1184_vm2 = vcmp.ge.f32.partialorder %v2786_v62, 0.0  ;;  %vm1186_vm4 = vcmp.ge.f32.partialorder %v2794_v43, 0.0  ;;  %vm1187_vm5 = vcmp.ge.f32.partialorder %v2798_v1, 0.0 }
 0x241   :  { %3944 = vst [vmem:[#allocation8_spill] sm:$0xff] %v2974_v49  ;;  %3945 = vst [vmem:[#allocation9_spill] sm:$0xff] %v2978_v33  ;;  %v2994_v9 = vadd.f32 %v2746_v58, %v3950_v42  ;;  %v3951_v49 = vld [vmem:[#allocation13_spill] sm:$0xff]  ;;  %v3953_v33 = vld [vmem:[#allocation19_spill] sm:$0xff]  ;;  %vm1188_vm6 = vcmp.ge.f32.partialorder %v2802_v53, 0.0  ;;  %vm1189_vm7 = vcmp.ge.f32.partialorder %v2806_v40, 0.0 }
 0x242   :  { %3946 = vst [vmem:[#allocation12_spill] sm:$0xff] %v2982_v17  ;;  %3947 = vst [vmem:[#allocation14_spill] sm:$0xff] %v2986_v24  ;;  %v2998_v3 = vadd.f32 %v2746_v58, %v3951_v49  ;;  %v3002_v7 = vadd.f32 %v2746_v58, %v3953_v33  ;;  %v3955_v17 = vld [vmem:[#allocation20_spill] sm:$0xff]  ;;  %v3957_v24 = vld [vmem:[#allocation21_spill] sm:$0xff]  ;;  %v3018_v49 = vadd.f32 %v2746_v58, %v2762_v11  ;;  %vm1190_vm8 = vcmp.ge.f32.partialorder %v2810_v4, 0.0 }
 0x243   :  { %3949 = vst [vmem:[#allocation11_spill] sm:$0xff] %v2990_v5  ;;  %v3006_v21 = vadd.f32 %v2746_v58, %v3955_v17  ;;  %v3010_v8 = vadd.f32 %v2746_v58, %v3957_v24  ;;  %v3959_v5 = vld [vmem:[#allocation22_spill] sm:$0xff]  ;;  %v3022_v33 = vadd.f32 %v2746_v58, %v2766_v19  ;;  %v3026_v17 = vadd.f32 %v2746_v58, %v2770_v15 }
 0x244   :  { %3952 = vst [vmem:[#allocation3_spill] sm:$0xff] %v2998_v3  ;;  %3954 = vst [vmem:[#allocation5_spill] sm:$0xff] %v3002_v7  ;;  %v3014_v42 = vadd.f32 %v2746_v58, %v3959_v5  ;;  %v3030_v24 = vadd.f32 %v2746_v58, %v2774_v31  ;;  %vm1191_vm9 = vcmp.ge.f32.partialorder %v2814_v23, 0.0  ;;  %vm1192_vm10 = vcmp.ge.f32.partialorder %v2818_v47, 0.0 }
 0x245   :  { %3956 = vst [vmem:[#allocation2_spill] sm:$0xff] %v3006_v21  ;;  %3958 = vst [vmem:[#allocation4_spill] sm:$0xff] %v3010_v8  ;;  %v3043_v19 = vadd.f32 %v2746_v58, %v2778_v63  ;;  %vm1193_vm11 = vcmp.ge.f32.partialorder %v2822_v52, 0.0  ;;  %v1248_v11 = vmul.f32 0.2, %v2786_v62  ;;  %v3051_v5 = vadd.f32 %v2746_v58, %v2782_v26 }
 0x246   :  { %3960 = vst [vmem:[#allocation17_spill] sm:$0xff] %v3014_v42  ;;  %3961 = vst [vmem:[#allocation15_spill] sm:$0xff] %v3018_v49  ;;  %v1249_v15 = vmul.f32 0.2, %v2790_v25  ;;  %v1250_v31 = vmul.f32 0.2, %v2794_v43 }
 0x247   :  { %3962 = vst [vmem:[#allocation16_spill] sm:$0xff] %v3022_v33  ;;  %3963 = vst [vmem:[#allocation18_spill] sm:$0xff] %v3026_v17  ;;  %vm1194_vm12 = vcmp.ge.f32.partialorder %v2826_v41, 0.0  ;;  %v1252_v17 = vmul.f32 0.2, %v2802_v53  ;;  %vm1195_vm13 = vcmp.ge.f32.partialorder %v2830_v39, 0.0  ;;  %v1312_v58 = vsel %vm1184_vm2, %v2786_v62, %v1248_v11 }
 0x248   :  { %3964 = vst [vmem:[#allocation23_spill] sm:$0xff] %v3030_v24  ;;  %3965 = vst [vmem:[#allocation24_spill] sm:$0xff] %v3043_v19  ;;  %v1251_v24 = vmul.f32 0.2, %v2798_v1  ;;  %v1253_v63 = vmul.f32 0.2, %v2806_v40  ;;  %v1313_v8 = vsel %vm1185_vm3, %v2790_v25, %v1249_v15  ;;  %v1314_v25 = vsel %vm1186_vm4, %v2794_v43, %v1250_v31 }
 0x249   :  { %3966 = vst [vmem:[#allocation25_spill] sm:$0xff] %v3051_v5  ;;  %v1254_v19 = vmul.f32 0.2, %v2810_v4  ;;  %v1255_v33 = vmul.f32 0.2, %v2814_v23  ;;  %vm1196_vm14 = vcmp.ge.f32.partialorder %v2834_v56, 0.0 }
 0x24a   :  { %v1256_v49 = vmul.f32 0.2, %v2818_v47  ;;  %v1257_v26 = vmul.f32 0.2, %v2822_v52  ;;  %v3067_v5 = vmul.f32 0.2, %v2826_v41  ;;  %v1315_v43 = vsel %vm1187_vm5, %v2798_v1, %v1251_v24 }
 0x24b   :  { %v3070_v42 = vmul.f32 0.2, %v2830_v39  ;;  %1376 = vst.msk [vmem:[%s3782_s4] sm:$0xff] %vm644_vm1, %v1312_v58  ;;  %vm1197_vm15 = vcmp.ge.f32.partialorder %v2838_v46, 0.0  ;;  %v3081_v62 = vmul.f32 0.2, %v2834_v56  ;;  %v1316_v1 = vsel %vm1188_vm6, %v2802_v53, %v1252_v17 }
 0x24c   :  { %v3084_v11 = vmul.f32 0.2, %v2838_v46  ;;  %v3087_v21 = vmul.f32 0.2, %v2842_v22  ;;  %1377 = vst.msk [vmem:[%s3782_s4 + $0x8] sm:$0xff] %vm644_vm1, %v1313_v8  ;;  %vm1198_vm0 = vcmp.ge.f32.partialorder %v2842_v22, 0.0  ;;  %v1317_v53 = vsel %vm1189_vm7, %v2806_v40, %v1253_v63 }
 0x24d   :  { %v3098_v15 = vmul.f32 0.2, %v2846_v35  ;;  %v3101_v58 = vmul.f32 0.2, %v2850_v37  ;;  %v3104_v7 = vmul.f32 0.2, %v2854_v34  ;;  %v1318_v40 = vsel %vm1190_vm8, %v2810_v4, %v1254_v19 }
 0x24e   :  { %1378 = vst.msk [vmem:[%s3782_s4 + $0x10] sm:$0xff] %vm644_vm1, %v1314_v25  ;;  %vm1199_vm2 = vcmp.ge.f32.partialorder %v2846_v35, 0.0  ;;  %v3115_v8 = vmul.f32 0.2, %v2858_v36  ;;  %v3118_v31 = vmul.f32 0.2, %v2862_v45  ;;  %v1319_v4 = vsel %vm1191_vm9, %v2814_v23, %v1255_v33 }
 0x24f   :  { %3967 = vst [vmem:[#allocation10_spill] sm:$0xff] %v3101_v58  ;;  %v3121_v58 = vmul.f32 0.2, %v2866_v50  ;;  %1379 = vst.msk [vmem:[%s3782_s4 + $0x18] sm:$0xff] %vm644_vm1, %v1315_v43  ;;  %vm1200_vm3 = vcmp.ge.f32.partialorder %v2850_v37, 0.0  ;;  %vm1201_vm4 = vcmp.ge.f32.partialorder %v2854_v34, 0.0  ;;  %v1320_v23 = vsel %vm1192_vm10, %v2818_v47, %v1256_v49 }
 0x250   :  { %3968 = vst [vmem:[#allocation7_spill] sm:$0xff] %v3118_v31  ;;  %v3132_v24 = vmul.f32 0.2, %v2870_v44  ;;  %v3135_v25 = vmul.f32 0.2, %v2874_v48  ;;  %1380 = vst.msk [vmem:[%s3782_s4 + $0x20] sm:$0xff] %vm644_vm1, %v1316_v1  ;;  %v1321_v49 = vsel %vm1193_vm11, %v2822_v52, %v1257_v26  ;;  %v1322_v26 = vsel %vm1194_vm12, %v2826_v41, %v3067_v5 }
 0x251   :  { %v3138_v31 = vmul.f32 0.2, %v2878_v61  ;;  %v3149_v17 = vmul.f32 0.2, %v2882_v2  ;;  %v3152_v43 = vmul.f32 0.2, %v2886_v60  ;;  %v1323_v5 = vsel %vm1195_vm13, %v2830_v39, %v3070_v42 }
 0x252   :  { %3969 = vst [vmem:[#allocation13_spill] sm:$0xff] %v3135_v25  ;;  %v3155_v25 = vmul.f32 0.2, %v2890_v0  ;;  %1381 = vst.msk [vmem:[%s3782_s4 + $0x28] sm:$0xff] %vm644_vm1, %v1317_v53  ;;  %vm1202_vm5 = vcmp.ge.f32.partialorder %v2858_v36, 0.0  ;;  %vm1206_vm9 = vcmp.ge.f32.partialorder %v2874_v48, 0.0  ;;  %v1324_v42 = vsel %vm1196_vm14, %v2834_v56, %v3081_v62 }
 0x253   :  { %3970 = vst [vmem:[#allocation19_spill] sm:$0xff] %v3152_v43  ;;  %v3166_v63 = vmul.f32 0.2, %v2894_v13  ;;  %v3169_v1 = vmul.f32 0.2, %v2898_v18  ;;  %1382 = vst.msk [vmem:[%s3782_s4 + $0x30] sm:$0xff] %vm644_vm1, %v1318_v40 }
 0x254   :  { %v3172_v43 = vmul.f32 0.2, %v2902_v12  ;;  %v3185_v19 = vmul.f32 0.2, %v2906_v16  ;;  %v3188_v53 = vmul.f32 0.2, %v2910_v29 }
 0x255   :  { %1383 = vst.msk [vmem:[%s3782_s4 + $0x38] sm:$0xff] %vm644_vm1, %v1319_v4  ;;  %v3205_v33 = vmul.f32 0.2, %v2918_v28  ;;  %v3208_v40 = vmul.f32 0.2, %v2922_v32  ;;  %1384 = vst.msk [vmem:[%s3782_s4 + $0x40] sm:$0xff] %vm644_vm1, %v1320_v23 }
 0x256   :  { %3971 = vst [vmem:[#allocation20_spill] sm:$0xff] %v3172_v43  ;;  %v3191_v43 = vmul.f32 0.2, %v2914_v38  ;;  %v3211_v47 = vmul.f32 0.2, %v2926_v59  ;;  %vm1210_vm10 = vcmp.ge.f32.partialorder %v2890_v0, 0.0 }
 0x257   :  { %v3225_v4 = vmul.f32 0.2, %v2930_v10  ;;  %v3231_v52 = vmul.f32 0.2, %v2938_v30  ;;  %1385 = vst.msk [vmem:[%s3782_s4 + $0x48] sm:$0xff] %vm644_vm1, %v1321_v49  ;;  %vm1214_vm11 = vcmp.ge.f32.partialorder %v2906_v16, 0.0 }
 0x258   :  { %3972 = vst [vmem:[#allocation21_spill] sm:$0xff] %v3211_v47  ;;  %v3228_v47 = vmul.f32 0.2, %v2934_v54  ;;  %v3246_v23 = vmul.f32 0.2, %v2942_v55  ;;  %1386 = vst.msk [vmem:[%s3782_s4 + $0x50] sm:$0xff] %vm644_vm1, %v1322_v26 }
 0x259   :  { %3973 = vst [vmem:[#allocation22_spill] sm:$0xff] %v3231_v52  ;;  %v3249_v52 = vmul.f32 0.2, %v2946_v51  ;;  %v3252_v41 = vmul.f32 0.2, %v2950_v6  ;;  %vm1218_vm12 = vcmp.ge.f32.partialorder %v2922_v32, 0.0 }
 0x25a   :  { %v3267_v49 = vmul.f32 0.2, %v2954_v14  ;;  %v3273_v39 = vmul.f32 0.2, %v2962_v20  ;;  %1387 = vst.msk [vmem:[%s3782_s4 + $0x58] sm:$0xff] %vm644_vm1, %v1323_v5  ;;  %vm1222_vm13 = vcmp.ge.f32.partialorder %v2938_v30, 0.0  ;;  %v1325_v5 = vsel %vm1197_vm15, %v2838_v46, %v3084_v11 }
 0x25b   :  { %3974 = vst [vmem:[#allocation26_spill] sm:$0xff] %v3252_v41  ;;  %v3270_v41 = vmul.f32 0.2, %v2958_v57  ;;  %v3288_v26 = vmul.f32 0.2, %v2966_v27  ;;  %v3981_v56 = vld [vmem:[#allocation8_spill] sm:$0xff] }
 0x25c   :  { %3975 = vst [vmem:[#allocation27_spill] sm:$0xff] %v3267_v49  ;;  %3977 = vst [vmem:[#allocation29_spill] sm:$0xff] %v3273_v39  ;;  %v3979_v39 = vld [vmem:[#allocation6_spill] sm:$0xff]  ;;  %v3294_v62 = vmul.f32 0.2, %v3981_v56  ;;  %vm1226_vm14 = vcmp.ge.f32.partialorder %v2954_v14, 0.0 }
 0x25d   :  { %3976 = vst [vmem:[#allocation28_spill] sm:$0xff] %v3270_v41  ;;  %3978 = vst [vmem:[#allocation30_spill] sm:$0xff] %v3288_v26  ;;  %v3291_v41 = vmul.f32 0.2, %v3979_v39  ;;  %v3985_v26 = vld [vmem:[#allocation12_spill] sm:$0xff]  ;;  %v3987_v46 = vld [vmem:[#allocation14_spill] sm:$0xff] }
 0x25e   :  { %3982 = vst [vmem:[#allocation8_spill] sm:$0xff] %v3294_v62  ;;  %1388 = vst.msk [vmem:[%s3782_s4 + $0x60] sm:$0xff] %vm644_vm1, %v1324_v42  ;;  %v3312_v49 = vmul.f32 0.2, %v3985_v26  ;;  %v3315_v11 = vmul.f32 0.2, %v3987_v46  ;;  %v1326_v42 = vsel %vm1198_vm0, %v2842_v22, %v3087_v21  ;;  %v1327_v21 = vsel %vm1199_vm2, %v2846_v35, %v3098_v15 }
 0x25f   :  { %3980 = vst [vmem:[#allocation6_spill] sm:$0xff] %v3291_v41  ;;  %v3983_v41 = vld [vmem:[#allocation9_spill] sm:$0xff]  ;;  %1389 = vst.msk [vmem:[%s3782_s4 + $0x68] sm:$0xff] %vm644_vm1, %v1325_v5  ;;  %vm1230_vm15 = vcmp.ge.f32.partialorder %v3979_v39, 0.0  ;;  %v3336_v22 = vmul.f32 0.2, %v2998_v3 }
 0x260   :  { %v3309_v62 = vmul.f32 0.2, %v3983_v41  ;;  %3986 = vst [vmem:[#allocation31_spill] sm:$0xff] %v3312_v49  ;;  %3988 = vst [vmem:[#allocation14_spill] sm:$0xff] %v3315_v11  ;;  %v3989_v49 = vld [vmem:[#allocation11_spill] sm:$0xff]  ;;  %vm1234_vm0 = vcmp.ge.f32.partialorder %v3987_v46, 0.0 }
 0x261   :  { %v3330_v11 = vmul.f32 0.2, %v3989_v49  ;;  %3992 = vst [vmem:[#allocation33_spill] sm:$0xff] %v3336_v22  ;;  %1390 = vst.msk [vmem:[%s3782_s4 + $0x70] sm:$0xff] %vm644_vm1, %v1326_v42  ;;  %v3993_v5 = vld [vmem:[#allocation5_spill] sm:$0xff]  ;;  %v3997_v35 = vld [vmem:[#allocation4_spill] sm:$0xff] }
 0x262   :  { %3984 = vst [vmem:[#allocation9_spill] sm:$0xff] %v3309_v62  ;;  %v3333_v62 = vmul.f32 0.2, %v2994_v9  ;;  %v3351_v22 = vmul.f32 0.2, %v3993_v5  ;;  %v3999_v26 = vld [vmem:[#allocation10_spill] sm:$0xff] }
 0x263   :  { %3990 = vst [vmem:[#allocation11_spill] sm:$0xff] %v3330_v11  ;;  %v3357_v15 = vmul.f32 0.2, %v3997_v35  ;;  %v1328_v42 = vsel %vm1200_vm3, %v2850_v37, %v3999_v26  ;;  %1391 = vst.msk [vmem:[%s3782_s4 + $0x78] sm:$0xff] %vm644_vm1, %v1327_v21  ;;  %vm1238_vm2 = vcmp.ge.f32.partialorder %v3993_v5, 0.0  ;;  %v4004_v37 = vld [vmem:[#allocation16_spill] sm:$0xff]  ;;  %v1329_v21 = vsel %vm1201_vm4, %v2854_v34, %v3104_v7 }
 0x264   :  { %3991 = vst [vmem:[#allocation32_spill] sm:$0xff] %v3333_v62  ;;  %3994 = vst [vmem:[#allocation5_spill] sm:$0xff] %v3351_v22  ;;  %v3995_v62 = vld [vmem:[#allocation2_spill] sm:$0xff]  ;;  %v4002_v22 = vld [vmem:[#allocation15_spill] sm:$0xff]  ;;  %v3378_v26 = vmul.f32 0.2, %v4004_v37 }
 0x265   :  { %v3354_v11 = vmul.f32 0.2, %v3995_v62  ;;  %3998 = vst [vmem:[#allocation4_spill] sm:$0xff] %v3357_v15  ;;  %v3375_v3 = vmul.f32 0.2, %v4002_v22  ;;  %1392 = vst.msk [vmem:[%s3782_s4 + $0x80] sm:$0xff] %vm644_vm1, %v1328_v42  ;;  %v1330_v42 = vsel %vm1202_vm5, %v2858_v36, %v3115_v8 }
 0x266   :  { %4005 = vst [vmem:[#allocation16_spill] sm:$0xff] %v3378_v26  ;;  %vm1242_vm3 = vcmp.ge.f32.partialorder %v4002_v22, 0.0  ;;  %v4009_v34 = vld [vmem:[#allocation24_spill] sm:$0xff]  ;;  %1393 = vst.msk [vmem:[%s3782_s4 + $0x88] sm:$0xff] %vm644_vm1, %v1329_v21  ;;  %vm4013_vm7 = vcmp.ge.f32.partialorder %v2862_v45, 0.0  ;;  %vm4014_vm5 = vcmp.ge.f32.partialorder %v2866_v50, 0.0 }
 0x267   :  { %3996 = vst [vmem:[#allocation2_spill] sm:$0xff] %v3354_v11  ;;  %v4000_v11 = vld [vmem:[#allocation17_spill] sm:$0xff]  ;;  %4003 = vst [vmem:[#allocation15_spill] sm:$0xff] %v3375_v3  ;;  %v4007_v3 = vld [vmem:[#allocation23_spill] sm:$0xff]  ;;  %v3399_v7 = vmul.f32 0.2, %v4009_v34  ;;  %v1332_v36 = vsel %vm4014_vm5, %v2866_v50, %v3121_v58 }
 0x268   :  { %v3372_v15 = vmul.f32 0.2, %v4000_v11  ;;  %v4006_v11 = vld [vmem:[#allocation18_spill] sm:$0xff]  ;;  %vm1246_vm4 = vcmp.ge.f32.partialorder %v4009_v34, 0.0  ;;  %vm4015_vm6 = vcmp.ge.f32.partialorder %v2870_v44, 0.0  ;;  %1394 = vst.msk [vmem:[%s3782_s4 + $0x90] sm:$0xff] %vm644_vm1, %v1330_v42 }
 0x269   :  { %v3393_v26 = vmul.f32 0.2, %v4006_v11  ;;  %4010 = vst [vmem:[#allocation24_spill] sm:$0xff] %v3399_v7  ;;  %v4011_v11 = vld [vmem:[#allocation25_spill] sm:$0xff]  ;;  %v1333_v8 = vsel %vm4015_vm6, %v2870_v44, %v3132_v24  ;;  %vm4018_vm5 = vcmp.ge.f32.partialorder %v2882_v2, 0.0  ;;  %v4019_v58 = vld [vmem:[#allocation19_spill] sm:$0xff] }
 0x26a   :  { %4001 = vst [vmem:[#allocation10_spill] sm:$0xff] %v3372_v15  ;;  %v3396_v15 = vmul.f32 0.2, %v4007_v3  ;;  %vm1247_vm8 = vcmp.ge.f32.partialorder %v4011_v11, 0.0  ;;  %v3412_v3 = vmul.f32 0.2, %v4011_v11  ;;  %v1336_v44 = vsel %vm4018_vm5, %v2882_v2, %v3149_v17 }
 0x26b   :  { %v4016_v21 = vld [vmem:[#allocation13_spill] sm:$0xff]  ;;  %vm4020_vm6 = vcmp.ge.f32.partialorder %v2886_v60, 0.0  ;;  %1396 = vst.msk [vmem:[%s3782_s4 + $0xa0] sm:$0xff] %vm644_vm1, %v1332_v36  ;;  %1397 = vst.msk [vmem:[%s3782_s4 + $0xa8] sm:$0xff] %vm644_vm1, %v1333_v8  ;;  %vm4024_vm5 = vcmp.ge.f32.partialorder %v2902_v12, 0.0  ;;  %v4035_v17 = vld [vmem:[#allocation26_spill] sm:$0xff] }
 0x26c   :  { %4008 = vst [vmem:[#allocation34_spill] sm:$0xff] %v3396_v15  ;;  %v4012_v15 = vld [vmem:[#allocation7_spill] sm:$0xff]  ;;  %v1337_v24 = vsel %vm4020_vm6, %v2886_v60, %v4019_v58  ;;  %v4023_v60 = vld [vmem:[#allocation20_spill] sm:$0xff]  ;;  %1400 = vst.msk [vmem:[%s3782_s4 + $0xc0] sm:$0xff] %vm644_vm1, %v1336_v44  ;;  %vm4026_vm6 = vcmp.ge.f32.partialorder %v2914_v38, 0.0 }
 0x26d   :  { %v1331_v7 = vsel %vm4013_vm7, %v2862_v45, %v4012_v15  ;;  %v1334_v45 = vsel %vm1206_vm9, %v2874_v48, %v4016_v21  ;;  %vm4017_vm7 = vcmp.ge.f32.partialorder %v2878_v61, 0.0  ;;  %v1338_v48 = vsel %vm1210_vm10, %v2890_v0, %v3155_v25  ;;  %1401 = vst.msk [vmem:[%s3782_s4 + $0xc8] sm:$0xff] %vm644_vm1, %v1337_v24  ;;  %v4055_v15 = vld [vmem:[#allocation32_spill] sm:$0xff]  ;;  %v4057_v42 = vld [vmem:[#allocation33_spill] sm:$0xff]  ;;  %v4058_v36 = vld [vmem:[#allocation3_spill] sm:$0xff] }
 0x26e   :  { %v1335_v50 = vsel %vm4017_vm7, %v2878_v61, %v3138_v31  ;;  %1395 = vst.msk [vmem:[%s3782_s4 + $0x98] sm:$0xff] %vm644_vm1, %v1331_v7  ;;  %vm4021_vm9 = vcmp.ge.f32.partialorder %v2894_v13, 0.0  ;;  %vm4022_vm7 = vcmp.ge.f32.partialorder %v2898_v18, 0.0  ;;  %v1341_v31 = vsel %vm4024_vm5, %v2902_v12, %v4023_v60  ;;  %1398 = vst.msk [vmem:[%s3782_s4 + $0xb0] sm:$0xff] %vm644_vm1, %v1334_v45  ;;  %v4063_v45 = vld [vmem:[#allocation4_spill] sm:$0xff]  ;;  %v4066_v58 = vld [vmem:[#allocation17_spill] sm:$0xff] }
 0x26f   :  { %v1339_v61 = vsel %vm4021_vm9, %v2894_v13, %v3166_v63  ;;  %v1340_v2 = vsel %vm4022_vm7, %v2898_v18, %v3169_v1  ;;  %1399 = vst.msk [vmem:[%s3782_s4 + $0xb8] sm:$0xff] %vm644_vm1, %v1335_v50  ;;  %v1342_v0 = vsel %vm1214_vm11, %v2906_v16, %v3185_v19  ;;  %vm4025_vm10 = vcmp.ge.f32.partialorder %v2910_v29, 0.0  ;;  %1402 = vst.msk [vmem:[%s3782_s4 + $0xd0] sm:$0xff] %vm644_vm1, %v1338_v48  ;;  %v4040_v63 = vld [vmem:[#allocation29_spill] sm:$0xff]  ;;  %v4042_v19 = vld [vmem:[#allocation30_spill] sm:$0xff] }
 0x270   :  { %v1343_v13 = vsel %vm4025_vm10, %v2910_v29, %v3188_v53  ;;  %v1344_v18 = vsel %vm4026_vm6, %v2914_v38, %v3191_v43  ;;  %vm4027_vm9 = vcmp.ge.f32.partialorder %v2918_v28, 0.0  ;;  %1403 = vst.msk [vmem:[%s3782_s4 + $0xd8] sm:$0xff] %vm644_vm1, %v1339_v61  ;;  %1404 = vst.msk [vmem:[%s3782_s4 + $0xe0] sm:$0xff] %vm644_vm1, %v1340_v2  ;;  %v1346_v16 = vsel %vm1218_vm12, %v2922_v32, %v3208_v40  ;;  %v4028_v29 = vld [vmem:[#allocation21_spill] sm:$0xff]  ;;  %v4032_v32 = vld [vmem:[#allocation22_spill] sm:$0xff] }
 0x271   :  { %v1345_v12 = vsel %vm4027_vm9, %v2918_v28, %v3205_v33  ;;  %1405 = vst.msk [vmem:[%s3782_s4 + $0xe8] sm:$0xff] %vm644_vm1, %v1341_v31  ;;  %vm4029_vm11 = vcmp.ge.f32.partialorder %v2926_v59, 0.0  ;;  %vm4030_vm7 = vcmp.ge.f32.partialorder %v2930_v10, 0.0  ;;  %vm4031_vm5 = vcmp.ge.f32.partialorder %v2934_v54, 0.0  ;;  %1406 = vst.msk [vmem:[%s3782_s4 + $0xf0] sm:$0xff] %vm644_vm1, %v1342_v0  ;;  %v4047_v33 = vld [vmem:[#allocation9_spill] sm:$0xff] }
 0x272   :  { %v1347_v38 = vsel %vm4029_vm11, %v2926_v59, %v4028_v29  ;;  %v1348_v28 = vsel %vm4030_vm7, %v2930_v10, %v3225_v4  ;;  %v1349_v25 = vsel %vm4031_vm5, %v2934_v54, %v3228_v47  ;;  %1407 = vst.msk [vmem:[%s3782_s4 + $0xf8] sm:$0xff] %vm644_vm1, %v1343_v13  ;;  %1408 = vst.msk [vmem:[%s3782_s4 + $0x100] sm:$0xff] %vm644_vm1, %v1344_v18  ;;  %vm4033_vm12 = vcmp.ge.f32.partialorder %v2942_v55, 0.0  ;;  %v4049_v47 = vld [vmem:[#allocation31_spill] sm:$0xff]  ;;  %v4050_v4 = vld [vmem:[#allocation12_spill] sm:$0xff] }
 0x273   :  { %1409 = vst.msk [vmem:[%s3782_s4 + $0x108] sm:$0xff] %vm644_vm1, %v1345_v12  ;;  %v1350_v59 = vsel %vm1222_vm13, %v2938_v30, %v4032_v32  ;;  %v1351_v10 = vsel %vm4033_vm12, %v2942_v55, %v3246_v23  ;;  %vm4034_vm10 = vcmp.ge.f32.partialorder %v2946_v51, 0.0  ;;  %vm4036_vm6 = vcmp.ge.f32.partialorder %v2950_v6, 0.0  ;;  %1410 = vst.msk [vmem:[%s3782_s4 + $0x110] sm:$0xff] %vm644_vm1, %v1346_v16  ;;  %v4037_v30 = vld [vmem:[#allocation27_spill] sm:$0xff]  ;;  %v4052_v23 = vld [vmem:[#allocation14_spill] sm:$0xff] }
 0x274   :  { %v1352_v54 = vsel %vm4034_vm10, %v2946_v51, %v3249_v52  ;;  %v1353_v43 = vsel %vm4036_vm6, %v2950_v6, %v4035_v17  ;;  %1411 = vst.msk [vmem:[%s3782_s4 + $0x118] sm:$0xff] %vm644_vm1, %v1347_v38  ;;  %1412 = vst.msk [vmem:[%s3782_s4 + $0x120] sm:$0xff] %vm644_vm1, %v1348_v28  ;;  %v1354_v55 = vsel %vm1226_vm14, %v2954_v14, %v4037_v30  ;;  %v4038_v51 = vld [vmem:[#allocation28_spill] sm:$0xff]  ;;  %vm4039_vm13 = vcmp.ge.f32.partialorder %v2958_v57, 0.0  ;;  %v4044_v14 = vld [vmem:[#allocation6_spill] sm:$0xff] }
 0x275   :  { %1413 = vst.msk [vmem:[%s3782_s4 + $0x128] sm:$0xff] %vm644_vm1, %v1349_v25  ;;  %v1355_v6 = vsel %vm4039_vm13, %v2958_v57, %v4038_v51  ;;  %vm4041_vm9 = vcmp.ge.f32.partialorder %v2962_v20, 0.0  ;;  %vm4043_vm11 = vcmp.ge.f32.partialorder %v2966_v27, 0.0  ;;  %1414 = vst.msk [vmem:[%s3782_s4 + $0x130] sm:$0xff] %vm644_vm1, %v1350_v59  ;;  %v1358_v57 = vsel %vm1230_vm15, %v3979_v39, %v4044_v14  ;;  %v4053_v39 = vld [vmem:[#allocation11_spill] sm:$0xff]  ;;  %v4065_v44 = vld [vmem:[#allocation10_spill] sm:$0xff] }
 0x276   :  { %v1356_v1 = vsel %vm4041_vm9, %v2962_v20, %v4040_v63  ;;  %v1357_v53 = vsel %vm4043_vm11, %v2966_v27, %v4042_v19  ;;  %1415 = vst.msk [vmem:[%s3782_s4 + $0x138] sm:$0xff] %vm644_vm1, %v1351_v10  ;;  %1416 = vst.msk [vmem:[%s3782_s4 + $0x140] sm:$0xff] %vm644_vm1, %v1352_v54  ;;  %v4045_v20 = vld [vmem:[#allocation8_spill] sm:$0xff]  ;;  %vm4046_vm14 = vcmp.ge.f32.partialorder %v3981_v56, 0.0  ;;  %vm4048_vm7 = vcmp.ge.f32.partialorder %v3983_v41, 0.0  ;;  %v4071_v61 = vld [vmem:[#allocation18_spill] sm:$0xff] }
 0x277   :  { %1417 = vst.msk [vmem:[%s3782_s4 + $0x148] sm:$0xff] %vm644_vm1, %v1353_v43  ;;  %v1359_v27 = vsel %vm4046_vm14, %v3981_v56, %v4045_v20  ;;  %v1360_v40 = vsel %vm4048_vm7, %v3983_v41, %v4047_v33  ;;  %vm4051_vm5 = vcmp.ge.f32.partialorder %v4050_v4, 0.0  ;;  %1418 = vst.msk [vmem:[%s3782_s4 + $0x150] sm:$0xff] %vm644_vm1, %v1354_v55  ;;  %v1362_v41 = vsel %vm1234_vm0, %v3987_v46, %v4052_v23  ;;  %v4061_v46 = vld [vmem:[#allocation2_spill] sm:$0xff]  ;;  %v4074_v31 = vld [vmem:[#allocation23_spill] sm:$0xff] }
 0x278   :  { %v1361_v52 = vsel %vm4051_vm5, %v4050_v4, %v4049_v47  ;;  %1419 = vst.msk [vmem:[%s3782_s4 + $0x158] sm:$0xff] %vm644_vm1, %v1355_v6  ;;  %1420 = vst.msk [vmem:[%s3782_s4 + $0x160] sm:$0xff] %vm644_vm1, %v1356_v1  ;;  %vm4054_vm15 = vcmp.ge.f32.partialorder %v3989_v49, 0.0  ;;  %vm4056_vm12 = vcmp.ge.f32.partialorder %v2994_v9, 0.0  ;;  %vm4059_vm10 = vcmp.ge.f32.partialorder %v4058_v36, 0.0  ;;  %v4073_v60 = vld [vmem:[#allocation34_spill] sm:$0xff] }
 0x279   :  { %1421 = vst.msk [vmem:[%s3782_s4 + $0x168] sm:$0xff] %vm644_vm1, %v1357_v53  ;;  %v1363_v56 = vsel %vm4054_vm15, %v3989_v49, %v4053_v39  ;;  %v1364_v7 = vsel %vm4056_vm12, %v2994_v9, %v4055_v15  ;;  %v1365_v8 = vsel %vm4059_vm10, %v4058_v36, %v4057_v42  ;;  %1422 = vst.msk [vmem:[%s3782_s4 + $0x170] sm:$0xff] %vm644_vm1, %v1358_v57  ;;  %v4060_v9 = vld [vmem:[#allocation5_spill] sm:$0xff]  ;;  %vm4062_vm0 = vcmp.ge.f32.partialorder %v3995_v62, 0.0 }
 0x27a   :  { %1423 = vst.msk [vmem:[%s3782_s4 + $0x178] sm:$0xff] %vm644_vm1, %v1359_v27  ;;  %1424 = vst.msk [vmem:[%s3782_s4 + $0x180] sm:$0xff] %vm644_vm1, %v1360_v40  ;;  %v1366_v49 = vsel %vm1238_vm2, %v3993_v5, %v4060_v9  ;;  %v1367_v21 = vsel %vm4062_vm0, %v3995_v62, %v4061_v46  ;;  %vm4064_vm6 = vcmp.ge.f32.partialorder %v3997_v35, 0.0  ;;  %vm4067_vm13 = vcmp.ge.f32.partialorder %v4066_v58, 0.0  ;;  %v4068_v62 = vld [vmem:[#allocation15_spill] sm:$0xff] }
 0x27b   :  { %1425 = vst.msk [vmem:[%s3782_s4 + $0x188] sm:$0xff] %vm644_vm1, %v1361_v52  ;;  %v1368_v50 = vsel %vm4064_vm6, %v3997_v35, %v4063_v45  ;;  %v1369_v24 = vsel %vm4067_vm13, %v4066_v58, %v4065_v44  ;;  %1426 = vst.msk [vmem:[%s3782_s4 + $0x190] sm:$0xff] %vm644_vm1, %v1362_v41  ;;  %v1370_v5 = vsel %vm1242_vm3, %v4002_v22, %v4068_v62  ;;  %v4069_v35 = vld [vmem:[#allocation16_spill] sm:$0xff]  ;;  %vm4070_vm2 = vcmp.ge.f32.partialorder %v4004_v37, 0.0 }
 0x27c   :  { %1427 = vst.msk [vmem:[%s3782_s4 + $0x198] sm:$0xff] %vm644_vm1, %v1363_v56  ;;  %1428 = vst.msk [vmem:[%s3782_s4 + $0x1a0] sm:$0xff] %vm644_vm1, %v1364_v7  ;;  %v1371_v48 = vsel %vm4070_vm2, %v4004_v37, %v4069_v35  ;;  %vm4072_vm9 = vcmp.ge.f32.partialorder %v4071_v61, 0.0  ;;  %vm4075_vm11 = vcmp.ge.f32.partialorder %v4074_v31, 0.0  ;;  %v4076_v22 = vld [vmem:[#allocation24_spill] sm:$0xff] }
 0x27d   :  { %1429 = vst.msk [vmem:[%s3782_s4 + $0x1a8] sm:$0xff] %vm644_vm1, %v1365_v8  ;;  %v1372_v2 = vsel %vm4072_vm9, %v4071_v61, %v3393_v26  ;;  %v1373_v0 = vsel %vm4075_vm11, %v4074_v31, %v4073_v60  ;;  %1430 = vst.msk [vmem:[%s3782_s4 + $0x1b0] sm:$0xff] %vm644_vm1, %v1366_v49  ;;  %v1374_v37 = vsel %vm1246_vm4, %v4009_v34, %v4076_v22 }
 0x27e   :  { %1431 = vst.msk [vmem:[%s3782_s4 + $0x1b8] sm:$0xff] %vm644_vm1, %v1367_v21  ;;  %1432 = vst.msk [vmem:[%s3782_s4 + $0x1c0] sm:$0xff] %vm644_vm1, %v1368_v50  ;;  %v1375_v26 = vsel %vm1247_vm8, %v4011_v11, %v3412_v3 }
 0x27f   :  { %1433 = vst.msk [vmem:[%s3782_s4 + $0x1c8] sm:$0xff] %vm644_vm1, %v1369_v24  ;;  %1434 = vst.msk [vmem:[%s3782_s4 + $0x1d0] sm:$0xff] %vm644_vm1, %v1370_v5 }
 0x280   :  { %1435 = vst.msk [vmem:[%s3782_s4 + $0x1d8] sm:$0xff] %vm644_vm1, %v1371_v48  ;;  %1436 = vst.msk [vmem:[%s3782_s4 + $0x1e0] sm:$0xff] %vm644_vm1, %v1372_v2 }
 0x281   :  { %1437 = vst.msk [vmem:[%s3782_s4 + $0x1e8] sm:$0xff] %vm644_vm1, %v1373_v0  ;;  %1438 = vst.msk [vmem:[%s3782_s4 + $0x1f0] sm:$0xff] %vm644_vm1, %v1374_v37 }
 0x282   :  { %1439 = vst.msk [vmem:[%s3782_s4 + $0x1f8] sm:$0xff] %vm644_vm1, %v1375_v26 }

// kernel: vae_forward.10
= control target key start
LH: loop header
LB: loop body
LE: loop exit
PB: predicated region body
PF: predicated region fallthrough
CT: control target
= control target key end

     0   :  { %vm1074_vm0 = vcmask 261120   ;;  %vm1075_vm13 = vcmask 261120   ;;  %s1069_s1 = inlined_call_operand.vmem [shape: bf16[256,32], index: 1, kind: input, shape index: {}]   ;;  %s1070_s0 = inlined_call_operand.vmem [shape: bf16[128,256], index: 0, kind: input, shape index: {}]   ;;  %s1071_s2 = inlined_call_operand.vmem [shape: f32[1,32], index: 2, kind: input, shape index: {}]   ;;  %s1072_s3 = inlined_call_operand.vmem [shape: f32[1,32], index: 3, kind: input, shape index: {}]   ;;  %s1073_s4 = inlined_call_operand.vmem [shape: f32[128,32], index: 4, kind: output, shape index: {}]  }
   0x1   :  { %v676_v0 = vld [vmem:[%s1069_s1 + $0x40] sm:$0xff]   ;;  %v678_v2 = vld [vmem:[%s1069_s1 + $0x48] sm:$0xff]   ;;  %v680_v4 = vld [vmem:[%s1069_s1 + $0x50] sm:$0xff]  }
   0x2   :  { %v677_v1 = vld [vmem:[%s1069_s1] sm:$0xff]   ;;  %596 = vmatprep.subr.bf16.mxu0 %v676_v0  ;;  %660 = vmatprep.subr.bf16.mxu1 %v676_v0  ;;  %v679_v3 = vld [vmem:[%s1069_s1 + $0x8] sm:$0xff]   ;;  %v681_v5 = vld [vmem:[%s1069_s1 + $0x10] sm:$0xff]  }
   0x3   :  { %597 = vmatpush3.bf16.msra.mxu0 %v677_v1  ;;  %668 = vmatpush3.bf16.msra.mxu1 %v677_v1  ;;  %v682_v6 = vld [vmem:[%s1069_s1 + $0x58] sm:$0xff]   ;;  %v684_v8 = vld [vmem:[%s1069_s1 + $0x60] sm:$0xff]   ;;  %v686_v10 = vld [vmem:[%s1069_s1 + $0x68] sm:$0xff]  }
   0x4   :  { %598 = vmatprep.subr.bf16.mxu0 %v678_v2  ;;  %661 = vmatprep.subr.bf16.mxu1 %v678_v2  ;;  %v683_v7 = vld [vmem:[%s1069_s1 + $0x18] sm:$0xff]   ;;  %v685_v9 = vld [vmem:[%s1069_s1 + $0x20] sm:$0xff]   ;;  %v687_v12 = vld [vmem:[%s1069_s1 + $0x28] sm:$0xff]  }
   0x5   :  { %v694_v11 = vld [vmem:[%s1070_s0 + $0x4] ss:$8 sps:$4 sm:$0xff]   ;;  %v688_v14 = vld [vmem:[%s1069_s1 + $0x70] sm:$0xff]   ;;  %v690_v16 = vld [vmem:[%s1069_s1 + $0x78] sm:$0xff]  }
   0x6   :  { %v700_v13 = vld [vmem:[%s1070_s0 + $0x44] ss:$8 sps:$4 sm:$0xff]   ;;  %274 = vmatprep.mubr.bf16.mxu0 %v694_v11  ;;  %v689_v15 = vld [vmem:[%s1069_s1 + $0x30] sm:$0xff]   ;;  %v691_v17 = vld [vmem:[%s1069_s1 + $0x38] sm:$0xff]  }
   0x7   :  { %599 = vmatpush3.bf16.msra.mxu0 %v679_v3  ;;  %669 = vmatpush3.bf16.msra.mxu1 %v679_v3  ;;  %v692_v18 = vld [vmem:[%s1070_s0] ss:$8 sps:$4 sm:$0xff]   ;;  %v695_v20 = vld [vmem:[%s1070_s0 + $0x14] ss:$8 sps:$4 sm:$0xff]   ;;  %v697_v22 = vld [vmem:[%s1070_s0 + $0x10] ss:$8 sps:$4 sm:$0xff]  }
   0x8   :  { %600 = vmatprep.subr.bf16.mxu0 %v680_v4  ;;  %662 = vmatprep.subr.bf16.mxu1 %v680_v4  ;;  %v698_v19 = vld [vmem:[%s1070_s0 + $0x40] ss:$8 sps:$4 sm:$0xff]   ;;  %v704_v21 = vld [vmem:[%s1070_s0 + $0x54] ss:$8 sps:$4 sm:$0xff]   ;;  %v706_v23 = vld [vmem:[%s1070_s0 + $0x50] ss:$8 sps:$4 sm:$0xff]  }
   0x9   :  { %306 = vmatprep.mubr.bf16.mxu1 %v700_v13  ;;  %v701_v24 = vld [vmem:[%s1070_s0 + $0x24] ss:$8 sps:$4 sm:$0xff]   ;;  %v703_v26 = vld [vmem:[%s1070_s0 + $0x20] ss:$8 sps:$4 sm:$0xff]   ;;  %v707_v28 = vld [vmem:[%s1070_s0 + $0x34] ss:$8 sps:$4 sm:$0xff]  }
   0xa   :  { %v710_v25 = vld [vmem:[%s1070_s0 + $0x64] ss:$8 sps:$4 sm:$0xff]   ;;  %v712_v27 = vld [vmem:[%s1070_s0 + $0x60] ss:$8 sps:$4 sm:$0xff]   ;;  %v713_v29 = vld [vmem:[%s1070_s0 + $0x74] ss:$8 sps:$4 sm:$0xff]  }
   0xb   :  { %601 = vmatpush3.bf16.msra.mxu0 %v681_v5  ;;  %670 = vmatpush3.bf16.msra.mxu1 %v681_v5  ;;  %v709_v30 = vld [vmem:[%s1070_s0 + $0x30] ss:$8 sps:$4 sm:$0xff]  }
   0xc   :  { %602 = vmatprep.subr.bf16.mxu0 %v682_v6  ;;  %663 = vmatprep.subr.bf16.mxu1 %v682_v6  ;;  %v715_v31 = vld [vmem:[%s1070_s0 + $0x70] ss:$8 sps:$4 sm:$0xff]  }
   0xf   :  { %603 = vmatpush3.bf16.msra.mxu0 %v683_v7  ;;  %671 = vmatpush3.bf16.msra.mxu1 %v683_v7 }
  0x10   :  { %604 = vmatprep.subr.bf16.mxu0 %v684_v8  ;;  %664 = vmatprep.subr.bf16.mxu1 %v684_v8 }
  0x13   :  { %605 = vmatpush3.bf16.msra.mxu0 %v685_v9  ;;  %672 = vmatpush3.bf16.msra.mxu1 %v685_v9 }
  0x14   :  { %606 = vmatprep.subr.bf16.mxu0 %v686_v10  ;;  %665 = vmatprep.subr.bf16.mxu1 %v686_v10 }
  0x17   :  { %607 = vmatpush3.bf16.msra.mxu0 %v687_v12  ;;  %673 = vmatpush3.bf16.msra.mxu1 %v687_v12 }
  0x18   :  { %608 = vmatprep.subr.bf16.mxu0 %v688_v14  ;;  %666 = vmatprep.subr.bf16.mxu1 %v688_v14 }
  0x1b   :  { %609 = vmatpush3.bf16.msra.mxu0 %v689_v15  ;;  %674 = vmatpush3.bf16.msra.mxu1 %v689_v15 }
  0x1c   :  { %610 = vmatprep.subr.bf16.mxu0 %v690_v16  ;;  %667 = vmatprep.subr.bf16.mxu1 %v690_v16 }
  0x1f   :  { %611 = vmatpush3.bf16.msra.mxu0 %v691_v17  ;;  %675 = vmatpush3.bf16.msra.mxu1 %v691_v17 }
  0x22   :  { %275 = vmatmul.mubr.bf16.vlgmr.msra.gmra.mrb[0].mxu0 %v692_v18  ;;  %307 = vmatmul.mubr.bf16.vlgmr.msra.gmra.mrb[0].mxu1 %v698_v19 }
  0x23   :  { %282 = vmatprep.mubr.bf16.mxu0 %v695_v20  ;;  %314 = vmatprep.mubr.bf16.mxu1 %v704_v21 }
  0x2a   :  { %283 = vmatmul.mubr.bf16.gmra.mrb[4].mxu0 %v697_v22  ;;  %315 = vmatmul.mubr.bf16.gmra.mrb[4].mxu1 %v706_v23 }
  0x2b   :  { %290 = vmatprep.mubr.bf16.mxu0 %v701_v24  ;;  %322 = vmatprep.mubr.bf16.mxu1 %v710_v25 }
  0x32   :  { %291 = vmatmul.mubr.bf16.gmra.mrb[8].mxu0 %v703_v26  ;;  %323 = vmatmul.mubr.bf16.gmra.mrb[8].mxu1 %v712_v27 }
  0x33   :  { %298 = vmatprep.mubr.bf16.mxu0 %v707_v28  ;;  %330 = vmatprep.mubr.bf16.mxu1 %v713_v29 }
  0x3a   :  { %299 = vmatmul.mubr.bf16.gmra.mrb[12].mxu0 %v709_v30  ;;  %331 = vmatmul.mubr.bf16.gmra.mrb[12].mxu1 %v715_v31 }
  0xf5   :  { %v612_v32 = vpop.f32.mrb[0].mxu0  ;;  %v636_v33 = vpop.f32.mrb[0].mxu1 }
  0xf6   :  { %v613_v34 = vpop.f32.mrb[1].mxu0  ;;  %v637_v35 = vpop.f32.mrb[1].mxu1 }
  0xf7   :  { %v839_v36 = vadd.f32 %v613_v34, %v612_v32  ;;  %v615_v37 = vpop.f32.mrb[2].mxu0  ;;  %v841_v38 = vadd.f32 %v637_v35, %v636_v33  ;;  %v639_v39 = vpop.f32.mrb[2].mxu1 }
  0xf8   :  { %v616_v40 = vpop.f32.mrb[3].mxu0  ;;  %v640_v41 = vpop.f32.mrb[3].mxu1 }
  0xf9   :  { %v843_v42 = vadd.f32 %v616_v40, %v615_v37  ;;  %v845_v43 = vadd.f32 %v640_v41, %v639_v39  ;;  %v340_v44 = vsel %vm1074_vm0, %v839_v36, 0.0  ;;  %v355_v31 = vsel %vm1074_vm0, %v841_v38, 0.0 }
  0xfb   :  { %v341_v45 = vsel %vm1074_vm0, %v843_v42, 0.0  ;;  %v357_v33 = vsel %vm1074_vm0, %v845_v43, 0.0 }
  0xfc   :  { %v342_v46 = vadd.f32 %v341_v45, %v340_v44 }
  0xfd   :  { %v618_v47 = vpop.f32.mrb[4].mxu0  ;;  %v642_v48 = vpop.f32.mrb[4].mxu1 }
  0xfe   :  { %v619_v49 = vpop.f32.mrb[5].mxu0  ;;  %v643_v50 = vpop.f32.mrb[5].mxu1 }
  0xff   :  { %v851_v51 = vadd.f32 %v619_v49, %v618_v47  ;;  %v621_v52 = vpop.f32.mrb[6].mxu0  ;;  %v853_v53 = vadd.f32 %v643_v50, %v642_v48  ;;  %v645_v54 = vpop.f32.mrb[6].mxu1 }
 0x100   :  { %v622_v55 = vpop.f32.mrb[7].mxu0  ;;  %v646_v56 = vpop.f32.mrb[7].mxu1 }
 0x101   :  { %v343_v57 = vsel %vm1074_vm0, %v851_v51, 0.0  ;;  %v857_v58 = vadd.f32 %v622_v55, %v621_v52  ;;  %v859_v59 = vadd.f32 %v646_v56, %v645_v54  ;;  %v359_v35 = vsel %vm1074_vm0, %v853_v53, 0.0 }
 0x102   :  { %v344_v60 = vadd.f32 %v343_v57, %v342_v46 }
 0x103   :  { %v345_v61 = vsel %vm1074_vm0, %v857_v58, 0.0  ;;  %v361_v39 = vsel %vm1074_vm0, %v859_v59, 0.0 }
 0x104   :  { %v346_v62 = vadd.f32 %v345_v61, %v344_v60 }
 0x105   :  { %v624_v63 = vpop.f32.mrb[8].mxu0  ;;  %v648_v0 = vpop.f32.mrb[8].mxu1 }
 0x106   :  { %v625_v1 = vpop.f32.mrb[9].mxu0  ;;  %v649_v2 = vpop.f32.mrb[9].mxu1 }
 0x107   :  { %v626_v3 = vadd.f32 %v625_v1, %v624_v63  ;;  %v627_v4 = vpop.f32.mrb[10].mxu0  ;;  %v650_v5 = vadd.f32 %v649_v2, %v648_v0  ;;  %v651_v6 = vpop.f32.mrb[10].mxu1 }
 0x108   :  { %v628_v7 = vpop.f32.mrb[11].mxu0  ;;  %v652_v8 = vpop.f32.mrb[11].mxu1 }
 0x109   :  { %v347_v9 = vsel %vm1074_vm0, %v626_v3, 0.0  ;;  %v629_v10 = vadd.f32 %v628_v7, %v627_v4  ;;  %v653_v11 = vadd.f32 %v652_v8, %v651_v6  ;;  %v363_v41 = vsel %vm1074_vm0, %v650_v5, 0.0 }
 0x10a   :  { %v348_v12 = vadd.f32 %v347_v9, %v346_v62 }
 0x10b   :  { %v349_v13 = vsel %vm1074_vm0, %v629_v10, 0.0  ;;  %v365_v45 = vsel %vm1074_vm0, %v653_v11, 0.0 }
 0x10c   :  { %v350_v14 = vadd.f32 %v349_v13, %v348_v12 }
 0x10d   :  { %v630_v15 = vpop.f32.mrb[12].mxu0  ;;  %v654_v16 = vpop.f32.mrb[12].mxu1 }
 0x10e   :  { %v631_v17 = vpop.f32.mrb[13].mxu0  ;;  %v655_v18 = vpop.f32.mrb[13].mxu1 }
 0x10f   :  { %v632_v19 = vadd.f32 %v631_v17, %v630_v15  ;;  %v633_v20 = vpop.f32.mrb[14].mxu0  ;;  %v656_v21 = vadd.f32 %v655_v18, %v654_v16  ;;  %v657_v22 = vpop.f32.mrb[14].mxu1 }
 0x110   :  { %v634_v23 = vpop.f32.mrb[15].mxu0  ;;  %v658_v24 = vpop.f32.mrb[15].mxu1 }
 0x111   :  { %v351_v25 = vsel %vm1074_vm0, %v632_v19, 0.0  ;;  %v635_v26 = vadd.f32 %v634_v23, %v633_v20  ;;  %v659_v27 = vadd.f32 %v658_v24, %v657_v22  ;;  %v367_v46 = vsel %vm1074_vm0, %v656_v21, 0.0 }
 0x112   :  { %v352_v28 = vadd.f32 %v351_v25, %v350_v14 }
 0x113   :  { %v353_v29 = vsel %vm1074_vm0, %v635_v26, 0.0  ;;  %v369_v49 = vsel %vm1074_vm0, %v659_v27, 0.0 }
 0x114   :  { %v354_v30 = vadd.f32 %v353_v29, %v352_v28 }
 0x116   :  { %v356_v32 = vadd.f32 %v355_v31, %v354_v30 }
 0x118   :  { %v358_v34 = vadd.f32 %v357_v33, %v356_v32 }
 0x11a   :  { %v360_v37 = vadd.f32 %v359_v35, %v358_v34 }
 0x11c   :  { %v362_v40 = vadd.f32 %v361_v39, %v360_v37 }
 0x11e   :  { %v364_v44 = vadd.f32 %v363_v41, %v362_v40 }
 0x120   :  { %v366_v47 = vadd.f32 %v365_v45, %v364_v44 }
 0x122   :  { %v368_v48 = vadd.f32 %v367_v46, %v366_v47 }
 0x124   :  { %v370_v50 = vadd.f32 %v369_v49, %v368_v48 }
 0x126   :  { %v371_v52 = vrot.slane %v370_v50, 4 }
 0x128   :  { %v372_v54 = vadd.f32 %v371_v52, %v370_v50 }
 0x12a   :  { %v373_v55 = vrot.slane %v372_v54, 2 }
 0x12c   :  { %v374_v56 = vadd.f32 %v373_v55, %v372_v54 }
 0x12e   :  { %v375_v57 = vrot.slane %v374_v56, 1 }
 0x130   :  { %v376_v60 = vadd.f32 %v375_v57, %v374_v56 }
 0x132   :  { %v377_v61 = vmul.f32 0.0078125, %v376_v60 }
 0x134   :  { %v880_v62 = vsub.f32 %v839_v36, %v377_v61  ;;  %v883_v63 = vsub.f32 %v843_v42, %v377_v61  ;;  %v886_v0 = vsub.f32 %v851_v51, %v377_v61  ;;  %v889_v1 = vsub.f32 %v857_v58, %v377_v61 }
 0x135   :  { %v891_v2 = vsub.f32 %v626_v3, %v377_v61  ;;  %v893_v4 = vsub.f32 %v629_v10, %v377_v61  ;;  %v895_v6 = vsub.f32 %v632_v19, %v377_v61  ;;  %v897_v7 = vsub.f32 %v635_v26, %v377_v61 }
 0x136   :  { %v900_v36 = vsub.f32 %v841_v38, %v377_v61  ;;  %v903_v42 = vsub.f32 %v845_v43, %v377_v61  ;;  %v906_v51 = vsub.f32 %v853_v53, %v377_v61  ;;  %v909_v58 = vsub.f32 %v859_v59, %v377_v61 }
 0x137   :  { %v911_v3 = vsub.f32 %v650_v5, %v377_v61  ;;  %v913_v8 = vsub.f32 %v653_v11, %v377_v61  ;;  %v915_v9 = vsub.f32 %v656_v21, %v377_v61  ;;  %v917_v10 = vsub.f32 %v659_v27, %v377_v61 }
 0x138   :  { %v394_v38 = vmul.f32 %v880_v62, %v880_v62  ;;  %v395_v43 = vmul.f32 %v883_v63, %v883_v63  ;;  %v396_v53 = vmul.f32 %v886_v0, %v886_v0  ;;  %v397_v59 = vmul.f32 %v889_v1, %v889_v1 }
 0x139   :  { %v398_v13 = vmul.f32 %v891_v2, %v891_v2  ;;  %v399_v16 = vmul.f32 %v893_v4, %v893_v4  ;;  %v400_v19 = vmul.f32 %v895_v6, %v895_v6  ;;  %v401_v22 = vmul.f32 %v897_v7, %v897_v7 }
 0x13a   :  { %v410_v5 = vsel %vm1074_vm0, %v394_v38, 0.0  ;;  %v411_v11 = vsel %vm1074_vm0, %v395_v43, 0.0  ;;  %v413_v14 = vsel %vm1074_vm0, %v396_v53, 0.0  ;;  %v415_v17 = vsel %vm1074_vm0, %v397_v59, 0.0 }
 0x13b   :  { %v412_v12 = vadd.f32 %v411_v11, %v410_v5  ;;  %v417_v20 = vsel %vm1074_vm0, %v398_v13, 0.0  ;;  %v419_v23 = vsel %vm1074_vm0, %v399_v16, 0.0  ;;  %v402_v25 = vmul.f32 %v900_v36, %v900_v36 }
 0x13c   :  { %v421_v26 = vsel %vm1074_vm0, %v400_v19, 0.0  ;;  %v403_v28 = vmul.f32 %v903_v42, %v903_v42  ;;  %v423_v29 = vsel %vm1074_vm0, %v401_v22, 0.0  ;;  %v404_v31 = vmul.f32 %v906_v51, %v906_v51 }
 0x13d   :  { %v414_v15 = vadd.f32 %v413_v14, %v412_v12  ;;  %v425_v32 = vsel %vm1074_vm0, %v402_v25, 0.0  ;;  %v405_v34 = vmul.f32 %v909_v58, %v909_v58  ;;  %v406_v39 = vmul.f32 %v911_v3, %v911_v3 }
 0x13e   :  { %v427_v35 = vsel %vm1074_vm0, %v403_v28, 0.0  ;;  %v429_v40 = vsel %vm1074_vm0, %v404_v31, 0.0  ;;  %v407_v44 = vmul.f32 %v913_v8, %v913_v8  ;;  %v408_v47 = vmul.f32 %v915_v9, %v915_v9  ;;  %v595_v28 = vld [vmem:[%s1072_s3] ss:$0 sm:$0xff] }
 0x13f   :  { %v416_v18 = vadd.f32 %v415_v17, %v414_v15  ;;  %v431_v45 = vsel %vm1074_vm0, %v405_v34, 0.0  ;;  %v433_v48 = vsel %vm1074_vm0, %v406_v39, 0.0  ;;  %v409_v50 = vmul.f32 %v917_v10, %v917_v10  ;;  %v450_v15 = vld [vmem:[%s1071_s2] sm:$0x1] }
 0x140   :  { %v435_v52 = vsel %vm1074_vm0, %v407_v44, 0.0  ;;  %v437_v55 = vsel %vm1074_vm0, %v408_v47, 0.0  ;;  %v452_v13 = vlaneseq }
 0x141   :  { %v418_v21 = vadd.f32 %v417_v20, %v416_v18  ;;  %v439_v57 = vsel %vm1074_vm0, %v409_v50, 0.0  ;;  %vm1076_vm0 = vmmov %vm1075_vm13 }
 0x142   :  { %v453_v14 = vshrl.u32 %v452_v13, 7 }
 0x143   :  { %v420_v24 = vadd.f32 %v419_v23, %v418_v21 }
 0x144   :  { %v454_v16 = vsub.s32 0, %v453_v14 }
 0x145   :  { %v422_v27 = vadd.f32 %v421_v26, %v420_v24 }
 0x147   :  { %v424_v30 = vadd.f32 %v423_v29, %v422_v27 }
 0x149   :  { %v426_v33 = vadd.f32 %v425_v32, %v424_v30 }
 0x14b   :  { %v428_v37 = vadd.f32 %v427_v35, %v426_v33 }
 0x14d   :  { %v430_v41 = vadd.f32 %v429_v40, %v428_v37 }
 0x14f   :  { %v432_v46 = vadd.f32 %v431_v45, %v430_v41 }
 0x151   :  { %v434_v49 = vadd.f32 %v433_v48, %v432_v46 }
 0x153   :  { %v436_v54 = vadd.f32 %v435_v52, %v434_v49 }
 0x155   :  { %v438_v56 = vadd.f32 %v437_v55, %v436_v54 }
 0x157   :  { %v440_v60 = vadd.f32 %v439_v57, %v438_v56 }
 0x159   :  { %v441_v61 = vrot.slane %v440_v60, 4 }
 0x15b   :  { %v442_v38 = vadd.f32 %v441_v61, %v440_v60 }
 0x15d   :  { %v443_v43 = vrot.slane %v442_v38, 2 }
 0x15f   :  { %v444_v53 = vadd.f32 %v443_v43, %v442_v38 }
 0x161   :  { %v445_v59 = vrot.slane %v444_v53, 1 }
 0x163   :  { %v446_v5 = vadd.f32 %v445_v59, %v444_v53 }
 0x165   :  { %v447_v11 = vmul.f32 0.0078125, %v446_v5 }
 0x167   :  { %v448_v12 = vadd.f32 1e-05, %v447_v11 }
 0x169   :  { %716 = vrsqrt.f32 %v448_v12 }
 0x173   :  { %v717_v17 = vpop.eup %716 }
 0x174   :  { %v451_v18 = vmul.f32 %v717_v17, %v450_v15 }
 0x176   :  { %v455_v19 = vrot.slane %v451_v18, %v454_v16 }
 0x178   :  { %v456_v20 = vmul.f32 %v455_v19, %v880_v62  ;;  %v457_v21 = vmul.f32 %v455_v19, %v883_v63  ;;  %v458_v22 = vmul.f32 %v455_v19, %v886_v0  ;;  %v459_v23 = vmul.f32 %v455_v19, %v889_v1 }
 0x179   :  { %v460_v24 = vmul.f32 %v455_v19, %v891_v2  ;;  %v461_v25 = vmul.f32 %v455_v19, %v893_v4  ;;  %v462_v26 = vmul.f32 %v455_v19, %v895_v6  ;;  %v463_v27 = vmul.f32 %v455_v19, %v897_v7 }
 0x17a   :  { %v464_v62 = vmul.f32 %v455_v19, %v900_v36  ;;  %v465_v63 = vmul.f32 %v455_v19, %v903_v42  ;;  %v466_v0 = vmul.f32 %v455_v19, %v906_v51  ;;  %v467_v1 = vmul.f32 %v455_v19, %v909_v58 }
 0x17b   :  { %v468_v2 = vmul.f32 %v455_v19, %v911_v3  ;;  %v469_v4 = vmul.f32 %v455_v19, %v913_v8  ;;  %v470_v6 = vmul.f32 %v455_v19, %v915_v9  ;;  %v471_v7 = vmul.f32 %v455_v19, %v917_v10 }
 0x17c   :  { %v479_v29 = vadd.f32 %v595_v28, %v456_v20  ;;  %v480_v30 = vadd.f32 %v595_v28, %v457_v21  ;;  %v481_v31 = vadd.f32 %v595_v28, %v458_v22  ;;  %v482_v32 = vadd.f32 %v595_v28, %v459_v23 }
 0x17d   :  { %v483_v33 = vadd.f32 %v595_v28, %v460_v24  ;;  %v484_v36 = vadd.f32 %v595_v28, %v461_v25  ;;  %v485_v34 = vadd.f32 %v595_v28, %v462_v26  ;;  %v486_v42 = vadd.f32 %v595_v28, %v463_v27 }
 0x17e   :  { %v487_v35 = vadd.f32 %v595_v28, %v464_v62  ;;  %v488_v51 = vadd.f32 %v595_v28, %v465_v63  ;;  %v489_v37 = vadd.f32 %v595_v28, %v466_v0  ;;  %v490_v58 = vadd.f32 %v595_v28, %v467_v1 }
 0x17f   :  { %v491_v39 = vadd.f32 %v595_v28, %v468_v2  ;;  %v492_v3 = vadd.f32 %v595_v28, %v469_v4  ;;  %v493_v40 = vadd.f32 %v595_v28, %v470_v6  ;;  %v494_v8 = vadd.f32 %v595_v28, %v471_v7 }
 0x180   :  { %vm495_vm1 = vcmp.ge.f32.partialorder %v479_v29, 0.0  ;;  %vm496_vm2 = vcmp.ge.f32.partialorder %v480_v30, 0.0  ;;  %vm497_vm3 = vcmp.ge.f32.partialorder %v481_v31, 0.0  ;;  %vm498_vm4 = vcmp.ge.f32.partialorder %v482_v32, 0.0 }
 0x181   :  { %vm499_vm5 = vcmp.ge.f32.partialorder %v483_v33, 0.0  ;;  %vm500_vm6 = vcmp.ge.f32.partialorder %v484_v36, 0.0  ;;  %vm501_vm7 = vcmp.ge.f32.partialorder %v485_v34, 0.0  ;;  %vm502_vm8 = vcmp.ge.f32.partialorder %v486_v42, 0.0 }
 0x182   :  { %vm503_vm9 = vcmp.ge.f32.partialorder %v487_v35, 0.0  ;;  %vm504_vm10 = vcmp.ge.f32.partialorder %v488_v51, 0.0  ;;  %vm505_vm11 = vcmp.ge.f32.partialorder %v489_v37, 0.0  ;;  %vm506_vm12 = vcmp.ge.f32.partialorder %v490_v58, 0.0 }
 0x183   :  { %vm508_vm14 = vcmp.ge.f32.partialorder %v492_v3, 0.0  ;;  %vm509_vm15 = vcmp.ge.f32.partialorder %v493_v40, 0.0  ;;  %v511_v9 = vmul.f32 0.2, %v479_v29  ;;  %v512_v10 = vmul.f32 0.2, %v480_v30 }
 0x184   :  { %v513_v41 = vmul.f32 0.2, %v481_v31  ;;  %v514_v44 = vmul.f32 0.2, %v482_v32  ;;  %v515_v45 = vmul.f32 0.2, %v483_v33 }
 0x185   :  { %v516_v46 = vmul.f32 0.2, %v484_v36  ;;  %v517_v47 = vmul.f32 0.2, %v485_v34  ;;  %v518_v48 = vmul.f32 0.2, %v486_v42  ;;  %v527_v50 = vsel %vm495_vm1, %v479_v29, %v511_v9  ;;  %vm1077_vm1 = vmmov %vm1076_vm0 }
 0x186   :  { %v519_v49 = vmul.f32 0.2, %v487_v35  ;;  %v520_v52 = vmul.f32 0.2, %v488_v51  ;;  %v521_v54 = vmul.f32 0.2, %v489_v37  ;;  %v528_v56 = vsel %vm496_vm2, %v480_v30, %v512_v10  ;;  %vm1078_vm2 = vmmov %vm1076_vm0 }
 0x187   :  { %v522_v55 = vmul.f32 0.2, %v490_v58  ;;  %543 = vst.msk [vmem:[%s1073_s4] sm:$0xff] %vm1075_vm13, %v527_v50  ;;  %v523_v57 = vmul.f32 0.2, %v491_v39  ;;  %v529_v38 = vsel %vm497_vm3, %v481_v31, %v513_v41  ;;  %v530_v53 = vsel %vm498_vm4, %v482_v32, %v514_v44  ;;  %vm1079_vm3 = vmmov %vm1076_vm0 }
 0x188   :  { %v524_v60 = vmul.f32 0.2, %v492_v3  ;;  %v525_v61 = vmul.f32 0.2, %v493_v40  ;;  %544 = vst.msk [vmem:[%s1073_s4 + $0x8] sm:$0xff] %vm1076_vm0, %v528_v56  ;;  %v531_v59 = vsel %vm499_vm5, %v483_v33, %v515_v45  ;;  %v532_v5 = vsel %vm500_vm6, %v484_v36, %v516_v46  ;;  %546 = vst.msk [vmem:[%s1073_s4 + $0x18] sm:$0xff] %vm1076_vm0, %v530_v53 }
 0x189   :  { %v526_v43 = vmul.f32 0.2, %v494_v8  ;;  %545 = vst.msk [vmem:[%s1073_s4 + $0x10] sm:$0xff] %vm1077_vm1, %v529_v38  ;;  %v533_v11 = vsel %vm501_vm7, %v485_v34, %v517_v47  ;;  %v534_v12 = vsel %vm502_vm8, %v486_v42, %v518_v48  ;;  %v535_v13 = vsel %vm503_vm9, %v487_v35, %v519_v49  ;;  %vm1081_vm5 = vmmov %vm1076_vm0 }
 0x18a   :  { %v536_v14 = vsel %vm504_vm10, %v488_v51, %v520_v52  ;;  %547 = vst.msk [vmem:[%s1073_s4 + $0x20] sm:$0xff] %vm1078_vm2, %v531_v59  ;;  %v537_v15 = vsel %vm505_vm11, %v489_v37, %v521_v54  ;;  %v538_v16 = vsel %vm506_vm12, %v490_v58, %v522_v55  ;;  %vm1080_vm4 = vcmp.ge.f32.partialorder %v491_v39, 0.0  ;;  %vm1082_vm6 = vmmov %vm1076_vm0 }
 0x18b   :  { %548 = vst.msk [vmem:[%s1073_s4 + $0x28] sm:$0xff] %vm1079_vm3, %v532_v5  ;;  %v539_v17 = vsel %vm1080_vm4, %v491_v39, %v523_v57  ;;  %v540_v18 = vsel %vm508_vm14, %v492_v3, %v524_v60  ;;  %vm1083_vm7 = vmmov %vm1076_vm0  ;;  %v541_v19 = vsel %vm509_vm15, %v493_v40, %v525_v61  ;;  %vm1085_vm9 = vcmp.ge.f32.partialorder %v494_v8, 0.0 }
 0x18c   :  { %549 = vst.msk [vmem:[%s1073_s4 + $0x30] sm:$0xff] %vm1081_vm5, %v533_v11  ;;  %vm1084_vm8 = vmmov %vm1076_vm0  ;;  %v542_v20 = vsel %vm1085_vm9, %v494_v8, %v526_v43 }
 0x18d   :  { %550 = vst.msk [vmem:[%s1073_s4 + $0x38] sm:$0xff] %vm1082_vm6, %v534_v12  ;;  %vm1086_vm10 = vmmov %vm1076_vm0 }
 0x18e   :  { %551 = vst.msk [vmem:[%s1073_s4 + $0x40] sm:$0xff] %vm1083_vm7, %v535_v13  ;;  %vm1087_vm11 = vmmov %vm1076_vm0 }
 0x18f   :  { %552 = vst.msk [vmem:[%s1073_s4 + $0x48] sm:$0xff] %vm1084_vm8, %v536_v14  ;;  %vm1088_vm12 = vmmov %vm1076_vm0 }
 0x190   :  { %553 = vst.msk [vmem:[%s1073_s4 + $0x50] sm:$0xff] %vm1086_vm10, %v537_v15  ;;  %vm1089_vm13 = vmmov %vm1076_vm0 }
 0x191   :  { %554 = vst.msk [vmem:[%s1073_s4 + $0x58] sm:$0xff] %vm1087_vm11, %v538_v16  ;;  %vm1090_vm14 = vmmov %vm1076_vm0 }
 0x192   :  { %555 = vst.msk [vmem:[%s1073_s4 + $0x60] sm:$0xff] %vm1088_vm12, %v539_v17  ;;  %vm1091_vm15 = vmmov %vm1076_vm0 }
 0x193   :  { %556 = vst.msk [vmem:[%s1073_s4 + $0x68] sm:$0xff] %vm1089_vm13, %v540_v18 }
 0x194   :  { %557 = vst.msk [vmem:[%s1073_s4 + $0x70] sm:$0xff] %vm1090_vm14, %v541_v19 }
 0x195   :  { %558 = vst.msk [vmem:[%s1073_s4 + $0x78] sm:$0xff] %vm1091_vm15, %v542_v20 }

// kernel: vae_forward.11
= control target key start
LH: loop header
LB: loop body
LE: loop exit
PB: predicated region body
PF: predicated region fallthrough
CT: control target
= control target key end

     0   :  { %vm420_vm0 = vcmask 523264   ;;  %s818_s1 = inlined_call_operand.vmem [shape: bf16[512,64], index: 1, kind: input, shape index: {}]   ;;  %s819_s0 = inlined_call_operand.vmem [shape: bf16[32,512], index: 0, kind: input, shape index: {}]   ;;  %s820_s2 = inlined_call_operand.vmem [shape: f32[1,64], index: 2, kind: input, shape index: {}]   ;;  %s821_s3 = inlined_call_operand.vmem [shape: f32[1,64], index: 3, kind: input, shape index: {}]   ;;  %s822_s4 = inlined_call_operand.vmem [shape: f32[32,64], index: 4, kind: output, shape index: {}]  }
   0x1   :  { %v597_v0 = vld [vmem:[%s818_s1 + $0x40] sm:$0xff]   ;;  %v601_v4 = vld [vmem:[%s818_s1 + $0x48] sm:$0xff]   ;;  %v605_v8 = vld [vmem:[%s818_s1 + $0x50] sm:$0xff]  }
   0x2   :  { %v598_v1 = vld [vmem:[%s818_s1 + $0xc0] sm:$0xff]   ;;  %541 = vmatprep.subr.bf16.mxu0 %v597_v0  ;;  %v602_v5 = vld [vmem:[%s818_s1 + $0xc8] sm:$0xff]   ;;  %v606_v9 = vld [vmem:[%s818_s1 + $0xd0] sm:$0xff]  }
   0x3   :  { %v599_v2 = vld [vmem:[%s818_s1] sm:$0xff]   ;;  %569 = vmatprep.subr.bf16.mxu1 %v598_v1  ;;  %v603_v6 = vld [vmem:[%s818_s1 + $0x8] sm:$0xff]   ;;  %v607_v10 = vld [vmem:[%s818_s1 + $0x10] sm:$0xff]  }
   0x4   :  { %v600_v3 = vld [vmem:[%s818_s1 + $0x80] sm:$0xff]   ;;  %542 = vmatpush3.bf16.msra.mxu0 %v599_v2  ;;  %v604_v7 = vld [vmem:[%s818_s1 + $0x88] sm:$0xff]   ;;  %v608_v11 = vld [vmem:[%s818_s1 + $0x90] sm:$0xff]  }
   0x5   :  { %570 = vmatpush3.bf16.msra.mxu1 %v600_v3  ;;  %543 = vmatprep.subr.bf16.mxu0 %v601_v4  ;;  %v609_v12 = vld [vmem:[%s818_s1 + $0x58] sm:$0xff]   ;;  %v613_v16 = vld [vmem:[%s818_s1 + $0x60] sm:$0xff]   ;;  %v617_v20 = vld [vmem:[%s818_s1 + $0x68] sm:$0xff]  }
   0x6   :  { %571 = vmatprep.subr.bf16.mxu1 %v602_v5  ;;  %v610_v13 = vld [vmem:[%s818_s1 + $0xd8] sm:$0xff]   ;;  %v614_v17 = vld [vmem:[%s818_s1 + $0xe0] sm:$0xff]   ;;  %v618_v21 = vld [vmem:[%s818_s1 + $0xe8] sm:$0xff]  }
   0x7   :  { %v611_v14 = vld [vmem:[%s818_s1 + $0x18] sm:$0xff]   ;;  %v615_v18 = vld [vmem:[%s818_s1 + $0x20] sm:$0xff]   ;;  %v619_v22 = vld [vmem:[%s818_s1 + $0x28] sm:$0xff]  }
   0x8   :  { %544 = vmatpush3.bf16.msra.mxu0 %v603_v6  ;;  %v612_v15 = vld [vmem:[%s818_s1 + $0x98] sm:$0xff]   ;;  %v616_v19 = vld [vmem:[%s818_s1 + $0xa0] sm:$0xff]   ;;  %v620_v23 = vld [vmem:[%s818_s1 + $0xa8] sm:$0xff]  }
   0x9   :  { %572 = vmatpush3.bf16.msra.mxu1 %v604_v7  ;;  %545 = vmatprep.subr.bf16.mxu0 %v605_v8  ;;  %v621_v24 = vld [vmem:[%s818_s1 + $0x70] sm:$0xff]   ;;  %v625_v28 = vld [vmem:[%s818_s1 + $0x78] sm:$0xff]  }
   0xa   :  { %573 = vmatprep.subr.bf16.mxu1 %v606_v9  ;;  %v622_v25 = vld [vmem:[%s818_s1 + $0xf0] sm:$0xff]   ;;  %v626_v29 = vld [vmem:[%s818_s1 + $0xf8] sm:$0xff]  }
   0xb   :  { %v623_v26 = vld [vmem:[%s818_s1 + $0x30] sm:$0xff]   ;;  %v627_v30 = vld [vmem:[%s818_s1 + $0x38] sm:$0xff]  }
   0xc   :  { %546 = vmatpush3.bf16.msra.mxu0 %v607_v10  ;;  %v624_v27 = vld [vmem:[%s818_s1 + $0xb0] sm:$0xff]   ;;  %v628_v31 = vld [vmem:[%s818_s1 + $0xb8] sm:$0xff]  }
   0xd   :  { %574 = vmatpush3.bf16.msra.mxu1 %v608_v11  ;;  %547 = vmatprep.subr.bf16.mxu0 %v609_v12  ;;  %v629_v32 = vld [vmem:[%s819_s0] ss:$16 sps:$4 sm:$0xff]   ;;  %v631_v33 = vld [vmem:[%s819_s0 + $0x4] ss:$16 sps:$4 sm:$0xff]   ;;  %v632_v34 = vld [vmem:[%s819_s0 + $0x8] ss:$16 sps:$4 sm:$0xff]  }
   0xe   :  { %575 = vmatprep.subr.bf16.mxu1 %v610_v13  ;;  %v634_v35 = vld [vmem:[%s819_s0 + $0xc] ss:$16 sps:$4 sm:$0xff]   ;;  %354 = vmatprep.mubr.bf16.mxu0 %v631_v33  ;;  %v635_v36 = vld [vmem:[%s819_s0 + $0x24] ss:$16 sps:$4 sm:$0xff]   ;;  %v639_v38 = vld [vmem:[%s819_s0 + $0x20] ss:$16 sps:$4 sm:$0xff]  }
   0xf   :  { %403 = vmatprep.mubr.bf16.mxu1 %v634_v35  ;;  %v637_v37 = vld [vmem:[%s819_s0 + $0x2c] ss:$16 sps:$4 sm:$0xff]   ;;  %v640_v39 = vld [vmem:[%s819_s0 + $0x28] ss:$16 sps:$4 sm:$0xff]  }
  0x10   :  { %548 = vmatpush3.bf16.msra.mxu0 %v611_v14 }
  0x11   :  { %576 = vmatpush3.bf16.msra.mxu1 %v612_v15  ;;  %549 = vmatprep.subr.bf16.mxu0 %v613_v16 }
  0x12   :  { %577 = vmatprep.subr.bf16.mxu1 %v614_v17 }
  0x14   :  { %550 = vmatpush3.bf16.msra.mxu0 %v615_v18 }
  0x15   :  { %578 = vmatpush3.bf16.msra.mxu1 %v616_v19  ;;  %551 = vmatprep.subr.bf16.mxu0 %v617_v20 }
  0x16   :  { %579 = vmatprep.subr.bf16.mxu1 %v618_v21 }
  0x18   :  { %552 = vmatpush3.bf16.msra.mxu0 %v619_v22 }
  0x19   :  { %580 = vmatpush3.bf16.msra.mxu1 %v620_v23  ;;  %553 = vmatprep.subr.bf16.mxu0 %v621_v24 }
  0x1a   :  { %581 = vmatprep.subr.bf16.mxu1 %v622_v25 }
  0x1c   :  { %554 = vmatpush3.bf16.msra.mxu0 %v623_v26 }
  0x1d   :  { %582 = vmatpush3.bf16.msra.mxu1 %v624_v27  ;;  %555 = vmatprep.subr.bf16.mxu0 %v625_v28 }
  0x1e   :  { %583 = vmatprep.subr.bf16.mxu1 %v626_v29 }
  0x20   :  { %556 = vmatpush3.bf16.msra.mxu0 %v627_v30 }
  0x21   :  { %584 = vmatpush3.bf16.msra.mxu1 %v628_v31 }
  0x23   :  { %355 = vmatmul.mubr.bf16.vlgmr.msra.gmra.mrb[0].mxu0 %v629_v32 }
  0x24   :  { %404 = vmatmul.mubr.bf16.vlgmr.msra.gmra.mrb[0].mxu1 %v632_v34  ;;  %362 = vmatprep.mubr.bf16.mxu0 %v635_v36 }
  0x25   :  { %411 = vmatprep.mubr.bf16.mxu1 %v637_v37 }
  0x2b   :  { %363 = vmatmul.mubr.bf16.gmra.mrb[4].mxu0 %v639_v38 }
  0x2c   :  { %412 = vmatmul.mubr.bf16.gmra.mrb[4].mxu1 %v640_v39 }
  0xf6   :  { %v557_v40 = vpop.f32.mrb[0].mxu0 }
  0xf7   :  { %v585_v41 = vpop.f32.mrb[0].mxu1  ;;  %v558_v42 = vpop.f32.mrb[1].mxu0 }
  0xf8   :  { %v559_v43 = vadd.f32 %v558_v42, %v557_v40  ;;  %v586_v44 = vpop.f32.mrb[1].mxu1  ;;  %v560_v45 = vpop.f32.mrb[2].mxu0 }
  0xf9   :  { %v587_v46 = vadd.f32 %v586_v44, %v585_v41  ;;  %v588_v47 = vpop.f32.mrb[2].mxu1  ;;  %v561_v48 = vpop.f32.mrb[3].mxu0  ;;  %v461_v41 = vlaneseq }
  0xfa   :  { %v562_v49 = vadd.f32 %v561_v48, %v560_v45  ;;  %v589_v50 = vpop.f32.mrb[3].mxu1  ;;  %v540_v48 = vld [vmem:[%s821_s3] ss:$0 sm:$0xff] }
  0xfb   :  { %v406_v51 = vadd.f32 %v587_v46, %v559_v43  ;;  %v590_v52 = vadd.f32 %v589_v50, %v588_v47  ;;  %v462_v42 = vshrl.u32 %v461_v41, 7  ;;  %v459_v43 = vld [vmem:[%s820_s2] sm:$0x1] }
  0xfd   :  { %v409_v53 = vadd.f32 %v590_v52, %v562_v49  ;;  %v421_v55 = vsel %vm420_vm0, %v406_v51, 0.0  ;;  %v463_v44 = vsub.s32 0, %v462_v42 }
  0xfe   :  { %v563_v54 = vpop.f32.mrb[4].mxu0 }
  0xff   :  { %v422_v56 = vsel %vm420_vm0, %v409_v53, 0.0  ;;  %v591_v57 = vpop.f32.mrb[4].mxu1  ;;  %v564_v58 = vpop.f32.mrb[5].mxu0 }
 0x100   :  { %v423_v59 = vadd.f32 %v422_v56, %v421_v55  ;;  %v565_v60 = vadd.f32 %v564_v58, %v563_v54  ;;  %v592_v61 = vpop.f32.mrb[5].mxu1  ;;  %v566_v62 = vpop.f32.mrb[6].mxu0 }
 0x101   :  { %v593_v63 = vadd.f32 %v592_v61, %v591_v57  ;;  %v594_v0 = vpop.f32.mrb[6].mxu1  ;;  %v567_v1 = vpop.f32.mrb[7].mxu0 }
 0x102   :  { %v568_v2 = vadd.f32 %v567_v1, %v566_v62  ;;  %v595_v3 = vpop.f32.mrb[7].mxu1 }
 0x103   :  { %v414_v4 = vadd.f32 %v593_v63, %v565_v60  ;;  %v596_v5 = vadd.f32 %v595_v3, %v594_v0 }
 0x105   :  { %v424_v6 = vsel %vm420_vm0, %v414_v4, 0.0  ;;  %v417_v7 = vadd.f32 %v596_v5, %v568_v2 }
 0x106   :  { %v425_v8 = vadd.f32 %v424_v6, %v423_v59 }
 0x107   :  { %v426_v9 = vsel %vm420_vm0, %v417_v7, 0.0 }
 0x108   :  { %v427_v10 = vadd.f32 %v426_v9, %v425_v8 }
 0x10a   :  { %v428_v11 = vrot.slane %v427_v10, 4 }
 0x10c   :  { %v429_v12 = vadd.f32 %v428_v11, %v427_v10 }
 0x10e   :  { %v430_v13 = vrot.slane %v429_v12, 2 }
 0x110   :  { %v431_v14 = vadd.f32 %v430_v13, %v429_v12 }
 0x112   :  { %v432_v15 = vrot.slane %v431_v14, 1 }
 0x114   :  { %v433_v16 = vadd.f32 %v432_v15, %v431_v14 }
 0x116   :  { %v434_v17 = vmul.f32 0.03125, %v433_v16 }
 0x118   :  { %v435_v18 = vsub.f32 %v406_v51, %v434_v17  ;;  %v436_v19 = vsub.f32 %v409_v53, %v434_v17  ;;  %v437_v20 = vsub.f32 %v414_v4, %v434_v17  ;;  %v438_v21 = vsub.f32 %v417_v7, %v434_v17 }
 0x11a   :  { %v439_v22 = vmul.f32 %v435_v18, %v435_v18  ;;  %v440_v23 = vmul.f32 %v436_v19, %v436_v19  ;;  %v441_v24 = vmul.f32 %v437_v20, %v437_v20  ;;  %v442_v25 = vmul.f32 %v438_v21, %v438_v21 }
 0x11c   :  { %v443_v26 = vsel %vm420_vm0, %v439_v22, 0.0  ;;  %v444_v27 = vsel %vm420_vm0, %v440_v23, 0.0  ;;  %v446_v29 = vsel %vm420_vm0, %v441_v24, 0.0  ;;  %v448_v31 = vsel %vm420_vm0, %v442_v25, 0.0 }
 0x11d   :  { %v445_v28 = vadd.f32 %v444_v27, %v443_v26 }
 0x11f   :  { %v447_v30 = vadd.f32 %v446_v29, %v445_v28 }
 0x121   :  { %v449_v32 = vadd.f32 %v448_v31, %v447_v30 }
 0x123   :  { %v450_v33 = vrot.slane %v449_v32, 4 }
 0x125   :  { %v451_v34 = vadd.f32 %v450_v33, %v449_v32 }
 0x127   :  { %v452_v35 = vrot.slane %v451_v34, 2 }
 0x129   :  { %v453_v36 = vadd.f32 %v452_v35, %v451_v34 }
 0x12b   :  { %v454_v37 = vrot.slane %v453_v36, 1 }
 0x12d   :  { %v455_v38 = vadd.f32 %v454_v37, %v453_v36 }
 0x12f   :  { %v456_v39 = vmul.f32 0.03125, %v455_v38 }
 0x131   :  { %v457_v40 = vadd.f32 1e-05, %v456_v39 }
 0x133   :  { %641 = vrsqrt.f32 %v457_v40 }
 0x13d   :  { %v642_v45 = vpop.eup %641 }
 0x13e   :  { %v460_v46 = vmul.f32 %v642_v45, %v459_v43 }
 0x140   :  { %v464_v47 = vrot.slane %v460_v46, %v463_v44 }
 0x142   :  { %v465_v49 = vmul.f32 %v464_v47, %v435_v18  ;;  %v466_v50 = vmul.f32 %v464_v47, %v436_v19  ;;  %v467_v51 = vmul.f32 %v464_v47, %v437_v20  ;;  %v468_v52 = vmul.f32 %v464_v47, %v438_v21 }
 0x144   :  { %v476_v53 = vadd.f32 %v540_v48, %v465_v49  ;;  %v477_v54 = vadd.f32 %v540_v48, %v466_v50  ;;  %v478_v55 = vadd.f32 %v540_v48, %v467_v51  ;;  %v479_v56 = vadd.f32 %v540_v48, %v468_v52 }
 0x146   :  { %vm480_vm1 = vcmp.ge.f32.partialorder %v476_v53, 0.0  ;;  %vm481_vm2 = vcmp.ge.f32.partialorder %v477_v54, 0.0  ;;  %vm482_vm3 = vcmp.ge.f32.partialorder %v478_v55, 0.0  ;;  %vm483_vm4 = vcmp.ge.f32.partialorder %v479_v56, 0.0 }
 0x147   :  { %v484_v57 = vmul.f32 0.2, %v476_v53  ;;  %v485_v58 = vmul.f32 0.2, %v477_v54  ;;  %v486_v59 = vmul.f32 0.2, %v478_v55 }
 0x148   :  { %v487_v60 = vmul.f32 0.2, %v479_v56 }
 0x149   :  { %v488_v61 = vsel %vm480_vm1, %v476_v53, %v484_v57  ;;  %v489_v62 = vsel %vm481_vm2, %v477_v54, %v485_v58  ;;  %v490_v63 = vsel %vm482_vm3, %v478_v55, %v486_v59 }
 0x14a   :  { %v491_v0 = vsel %vm483_vm4, %v479_v56, %v487_v60  ;;  %492 = vst.msk [vmem:[%s822_s4] sm:$0xff] %vm420_vm0, %v488_v61  ;;  %493 = vst.msk [vmem:[%s822_s4 + $0x8] sm:$0xff] %vm420_vm0, %v489_v62 }
 0x14b   :  { %494 = vst.msk [vmem:[%s822_s4 + $0x10] sm:$0xff] %vm420_vm0, %v490_v63  ;;  %495 = vst.msk [vmem:[%s822_s4 + $0x18] sm:$0xff] %vm420_vm0, %v491_v0 }

// kernel: vae_forward.12
= control target key start
LH: loop header
LB: loop body
LE: loop exit
PB: predicated region body
PF: predicated region fallthrough
CT: control target
= control target key end

     0   :  { %v1014_v22 = vmov 1966171168   ;;  %v152_v24 = vlaneseq  ;;  %vm749_vm0 = vcmask 517120   ;;  %s1264_s1 = inlined_call_operand.vmem [shape: bf16[1024,64], index: 1, kind: input, shape index: {}]   ;;  %s1265_s0 = inlined_call_operand.vmem [shape: bf16[2,1024], index: 0, kind: input, shape index: {}]   ;;  %s1266_s2 = inlined_call_operand.vmem [shape: f32[1,64], index: 2, kind: input, shape index: {}]   ;;  %s1267_s3 = inlined_call_operand.vmem [shape: f32[1,64], index: 3, kind: input, shape index: {}]   ;;  %s1268_s4 = inlined_call_operand.vmem [shape: f32[2,64], index: 4, kind: output, shape index: {}]  }
   0x1   :  { %v947_v0 = vld [vmem:[%s1264_s1 + $0x40] sm:$0xff]   ;;  %v951_v4 = vld [vmem:[%s1264_s1 + $0x48] sm:$0xff]   ;;  %v955_v8 = vld [vmem:[%s1264_s1 + $0x50] sm:$0xff]   ;;  %v150_v23 = vunpack.c.l.s4 %v1014_v22 }
   0x2   :  { %v948_v1 = vld [vmem:[%s1264_s1 + $0xc0] sm:$0xff]   ;;  %858 = vmatprep.subr.bf16.mxu0 %v947_v0  ;;  %v952_v5 = vld [vmem:[%s1264_s1 + $0xc8] sm:$0xff]   ;;  %v956_v9 = vld [vmem:[%s1264_s1 + $0xd0] sm:$0xff]   ;;  %v1118_v30 = vshrl.u32 %v152_v24, 7 }
   0x3   :  { %v949_v2 = vld [vmem:[%s1264_s1] sm:$0xff]   ;;  %880 = vmatprep.subr.bf16.mxu1 %v948_v1  ;;  %v953_v6 = vld [vmem:[%s1264_s1 + $0x8] sm:$0xff]   ;;  %v957_v10 = vld [vmem:[%s1264_s1 + $0x10] sm:$0xff]   ;;  %v151_v29 = vunpack.c.0.s8 %v150_v23 }
   0x4   :  { %v950_v3 = vld [vmem:[%s1264_s1 + $0x80] sm:$0xff]   ;;  %859 = vmatpush3.bf16.msra.mxu0 %v949_v2  ;;  %v954_v7 = vld [vmem:[%s1264_s1 + $0x88] sm:$0xff]   ;;  %v958_v11 = vld [vmem:[%s1264_s1 + $0x90] sm:$0xff]  }
   0x5   :  { %881 = vmatpush3.bf16.msra.mxu1 %v950_v3  ;;  %860 = vmatprep.subr.bf16.mxu0 %v951_v4  ;;  %v959_v12 = vld [vmem:[%s1264_s1 + $0x58] sm:$0xff]   ;;  %v963_v16 = vld [vmem:[%s1264_s1 + $0x60] sm:$0xff]   ;;  %v967_v20 = vld [vmem:[%s1264_s1 + $0x68] sm:$0xff]   ;;  %v1133_v35 = vsub.s32 %v151_v29, %v1118_v30 }
   0x6   :  { %882 = vmatprep.subr.bf16.mxu1 %v952_v5  ;;  %v960_v13 = vld [vmem:[%s1264_s1 + $0xd8] sm:$0xff]   ;;  %v964_v17 = vld [vmem:[%s1264_s1 + $0xe0] sm:$0xff]   ;;  %v968_v21 = vld [vmem:[%s1264_s1 + $0xe8] sm:$0xff]  }
   0x7   :  { %v961_v14 = vld [vmem:[%s1264_s1 + $0x18] sm:$0xff]   ;;  %v965_v18 = vld [vmem:[%s1264_s1 + $0x20] sm:$0xff]   ;;  %v969_v25 = vld [vmem:[%s1264_s1 + $0x28] sm:$0xff]  }
   0x8   :  { %861 = vmatpush3.bf16.msra.mxu0 %v953_v6  ;;  %v962_v15 = vld [vmem:[%s1264_s1 + $0x98] sm:$0xff]   ;;  %v966_v19 = vld [vmem:[%s1264_s1 + $0xa0] sm:$0xff]   ;;  %v970_v26 = vld [vmem:[%s1264_s1 + $0xa8] sm:$0xff]  }
   0x9   :  { %883 = vmatpush3.bf16.msra.mxu1 %v954_v7  ;;  %862 = vmatprep.subr.bf16.mxu0 %v955_v8  ;;  %v971_v27 = vld [vmem:[%s1264_s1 + $0x70] sm:$0xff]   ;;  %v975_v33 = vld [vmem:[%s1264_s1 + $0x78] sm:$0xff]   ;;  %v18_v38 = vld [vmem:[%s1265_s0] sm:$0xff] }
   0xa   :  { %884 = vmatprep.subr.bf16.mxu1 %v956_v9  ;;  %v972_v28 = vld [vmem:[%s1264_s1 + $0xf0] sm:$0xff]   ;;  %v976_v34 = vld [vmem:[%s1264_s1 + $0xf8] sm:$0xff]   ;;  %v148_v39 = vcombine.high %v18_v38, %v18_v38  ;;  %v155_v40 = vrot.slane %v18_v38, %v1133_v35  ;;  %v980_v41 = vld [vmem:[%s1264_s1 + $0x140] sm:$0xff]  }
   0xb   :  { %v973_v31 = vld [vmem:[%s1264_s1 + $0x30] sm:$0xff]   ;;  %v977_v36 = vld [vmem:[%s1264_s1 + $0x38] sm:$0xff]   ;;  %v981_v42 = vld [vmem:[%s1264_s1 + $0x1c0] sm:$0xff]  }
   0xc   :  { %863 = vmatpush3.bf16.msra.mxu0 %v957_v10  ;;  %v974_v32 = vld [vmem:[%s1264_s1 + $0xb0] sm:$0xff]   ;;  %v978_v37 = vld [vmem:[%s1264_s1 + $0xb8] sm:$0xff]   ;;  %v163_v43 = vcombine.high %v155_v40, %v155_v40  ;;  %v171_v44 = vrot.slane %v155_v40, %v1133_v35  ;;  %v1153_v45 = vrot.slane %v148_v39, %v1133_v35  ;;  %v982_v47 = vld [vmem:[%s1264_s1 + $0x100] sm:$0xff]  }
   0xd   :  { %885 = vmatpush3.bf16.msra.mxu1 %v958_v11  ;;  %864 = vmatprep.subr.bf16.mxu0 %v959_v12  ;;  %v984_v50 = vld [vmem:[%s1264_s1 + $0x148] sm:$0xff]   ;;  %v983_v52 = vld [vmem:[%s1264_s1 + $0x180] sm:$0xff]   ;;  %v988_v57 = vld [vmem:[%s1264_s1 + $0x150] sm:$0xff]  }
   0xe   :  { %886 = vmatprep.subr.bf16.mxu1 %v960_v13  ;;  %v185_v46 = vrot.slane %v163_v43, %v1133_v35  ;;  %v164_v48 = vcombine.high %v1153_v45, %v1153_v45  ;;  %v193_v49 = vcombine.high %v171_v44, %v171_v44  ;;  %v985_v54 = vld [vmem:[%s1264_s1 + $0x1c8] sm:$0xff]   ;;  %v989_v59 = vld [vmem:[%s1264_s1 + $0x1d0] sm:$0xff]   ;;  %v992_v61 = vld [vmem:[%s1264_s1 + $0x158] sm:$0xff]  }
   0xf   :  { %v986_v55 = vld [vmem:[%s1264_s1 + $0x108] sm:$0xff]   ;;  %v990_v60 = vld [vmem:[%s1264_s1 + $0x110] sm:$0xff]   ;;  %v993_v63 = vld [vmem:[%s1264_s1 + $0x1d8] sm:$0xff]  }
  0x10   :  { %865 = vmatpush3.bf16.msra.mxu0 %v961_v14  ;;  %621 = vmatprep.mubr.bf16.mxu0 %v185_v46  ;;  %v195_v51 = vcombine.high %v185_v46, %v185_v46  ;;  %v192_v53 = vrot.slane %v164_v48, %v1133_v35  ;;  %v987_v58 = vld [vmem:[%s1264_s1 + $0x188] sm:$0xff]   ;;  %v991_v62 = vld [vmem:[%s1264_s1 + $0x190] sm:$0xff]   ;;  %v994_v0 = vld [vmem:[%s1264_s1 + $0x118] sm:$0xff]  }
  0x11   :  { %887 = vmatpush3.bf16.msra.mxu1 %v962_v15  ;;  %866 = vmatprep.subr.bf16.mxu0 %v963_v16  ;;  %v996_v1 = vld [vmem:[%s1264_s1 + $0x160] sm:$0xff]   ;;  %v995_v2 = vld [vmem:[%s1264_s1 + $0x198] sm:$0xff]   ;;  %v1000_v5 = vld [vmem:[%s1264_s1 + $0x168] sm:$0xff]  }
  0x12   :  { %888 = vmatprep.subr.bf16.mxu1 %v964_v17  ;;  %661 = vmatprep.mubr.bf16.mxu1 %v195_v51  ;;  %v196_v56 = vcombine.high %v192_v53, %v192_v53  ;;  %v997_v3 = vld [vmem:[%s1264_s1 + $0x1e0] sm:$0xff]   ;;  %v1001_v7 = vld [vmem:[%s1264_s1 + $0x1e8] sm:$0xff]   ;;  %v1004_v9 = vld [vmem:[%s1264_s1 + $0x170] sm:$0xff]   ;;  %v178_v17 = vrot.slane %v1153_v45, %v1133_v35 }
  0x13   :  { %v998_v4 = vld [vmem:[%s1264_s1 + $0x120] sm:$0xff]   ;;  %v1002_v8 = vld [vmem:[%s1264_s1 + $0x128] sm:$0xff]   ;;  %v1005_v11 = vld [vmem:[%s1264_s1 + $0x1f0] sm:$0xff]  }
  0x14   :  { %867 = vmatpush3.bf16.msra.mxu0 %v965_v18  ;;  %v999_v6 = vld [vmem:[%s1264_s1 + $0x1a0] sm:$0xff]   ;;  %v1003_v10 = vld [vmem:[%s1264_s1 + $0x1a8] sm:$0xff]   ;;  %v1006_v12 = vld [vmem:[%s1264_s1 + $0x130] sm:$0xff]  }
  0x15   :  { %889 = vmatpush3.bf16.msra.mxu1 %v966_v19  ;;  %868 = vmatprep.subr.bf16.mxu0 %v967_v20  ;;  %v1008_v13 = vld [vmem:[%s1264_s1 + $0x178] sm:$0xff]   ;;  %v1007_v14 = vld [vmem:[%s1264_s1 + $0x1b0] sm:$0xff]   ;;  %v194_v19 = vcombine.high %v178_v17, %v178_v17 }
  0x16   :  { %890 = vmatprep.subr.bf16.mxu1 %v968_v21  ;;  %v1009_v15 = vld [vmem:[%s1264_s1 + $0x1f8] sm:$0xff]  }
  0x17   :  { %v1010_v16 = vld [vmem:[%s1264_s1 + $0x138] sm:$0xff]  }
  0x18   :  { %869 = vmatpush3.bf16.msra.mxu0 %v969_v25  ;;  %v1011_v18 = vld [vmem:[%s1264_s1 + $0x1b8] sm:$0xff]  }
  0x19   :  { %891 = vmatpush3.bf16.msra.mxu1 %v970_v26  ;;  %870 = vmatprep.subr.bf16.mxu0 %v971_v27 }
  0x1a   :  { %892 = vmatprep.subr.bf16.mxu1 %v972_v28 }
  0x1c   :  { %871 = vmatpush3.bf16.msra.mxu0 %v973_v31 }
  0x1d   :  { %893 = vmatpush3.bf16.msra.mxu1 %v974_v32  ;;  %872 = vmatprep.subr.bf16.mxu0 %v975_v33 }
  0x1e   :  { %894 = vmatprep.subr.bf16.mxu1 %v976_v34 }
  0x20   :  { %873 = vmatpush3.bf16.msra.mxu0 %v977_v36 }
  0x21   :  { %895 = vmatpush3.bf16.msra.mxu1 %v978_v37  ;;  %902 = vmatprep.subr.bf16.mxu0 %v980_v41 }
  0x22   :  { %924 = vmatprep.subr.bf16.mxu1 %v981_v42 }
  0x23   :  { %622 = vmatmul.mubr.bf16.vlgmr.msra.gmra.mrb[0].mxu0 %v171_v44 }
  0x24   :  { %903 = vmatpush3.bf16.msra.mxu0 %v982_v47  ;;  %662 = vmatmul.mubr.bf16.vlgmr.msra.gmra.mrb[0].mxu1 %v193_v49 }
  0x25   :  { %904 = vmatprep.subr.bf16.mxu0 %v984_v50  ;;  %925 = vmatpush3.bf16.msra.mxu1 %v983_v52 }
  0x26   :  { %701 = vmatprep.mubr.bf16.mxu0 %v192_v53  ;;  %926 = vmatprep.subr.bf16.mxu1 %v985_v54 }
  0x27   :  { %741 = vmatprep.mubr.bf16.mxu1 %v196_v56 }
  0x28   :  { %905 = vmatpush3.bf16.msra.mxu0 %v986_v55 }
  0x29   :  { %906 = vmatprep.subr.bf16.mxu0 %v988_v57  ;;  %927 = vmatpush3.bf16.msra.mxu1 %v987_v58 }
  0x2a   :  { %928 = vmatprep.subr.bf16.mxu1 %v989_v59 }
  0x2c   :  { %907 = vmatpush3.bf16.msra.mxu0 %v990_v60 }
  0x2d   :  { %908 = vmatprep.subr.bf16.mxu0 %v992_v61  ;;  %929 = vmatpush3.bf16.msra.mxu1 %v991_v62 }
  0x2e   :  { %930 = vmatprep.subr.bf16.mxu1 %v993_v63  ;;  %v770_v63 = vld [vmem:[%s1266_s2] sm:$0x1] }
  0x30   :  { %909 = vmatpush3.bf16.msra.mxu0 %v994_v0  ;;  %v774_v0 = vsub.s32 0, %v1118_v30 }
  0x31   :  { %910 = vmatprep.subr.bf16.mxu0 %v996_v1  ;;  %931 = vmatpush3.bf16.msra.mxu1 %v995_v2 }
  0x32   :  { %932 = vmatprep.subr.bf16.mxu1 %v997_v3 }
  0x34   :  { %911 = vmatpush3.bf16.msra.mxu0 %v998_v4  ;;  %v857_v4 = vld [vmem:[%s1267_s3] ss:$0 sm:$0xff] }
  0x35   :  { %912 = vmatprep.subr.bf16.mxu0 %v1000_v5  ;;  %933 = vmatpush3.bf16.msra.mxu1 %v999_v6 }
  0x36   :  { %934 = vmatprep.subr.bf16.mxu1 %v1001_v7 }
  0x38   :  { %913 = vmatpush3.bf16.msra.mxu0 %v1002_v8 }
  0x39   :  { %914 = vmatprep.subr.bf16.mxu0 %v1004_v9  ;;  %935 = vmatpush3.bf16.msra.mxu1 %v1003_v10 }
  0x3a   :  { %936 = vmatprep.subr.bf16.mxu1 %v1005_v11 }
  0x3c   :  { %915 = vmatpush3.bf16.msra.mxu0 %v1006_v12 }
  0x3d   :  { %916 = vmatprep.subr.bf16.mxu0 %v1008_v13  ;;  %937 = vmatpush3.bf16.msra.mxu1 %v1007_v14 }
  0x3e   :  { %938 = vmatprep.subr.bf16.mxu1 %v1009_v15 }
  0x40   :  { %917 = vmatpush3.bf16.msra.mxu0 %v1010_v16 }
  0x41   :  { %939 = vmatpush3.bf16.msra.mxu1 %v1011_v18 }
  0x43   :  { %702 = vmatmul.mubr.bf16.vlgmr.msra.gmra.mrb[4].mxu0 %v178_v17 }
  0x44   :  { %742 = vmatmul.mubr.bf16.vlgmr.msra.gmra.mrb[4].mxu1 %v194_v19 }
  0xf6   :  { %v874_v20 = vpop.f32.mrb[0].mxu0 }
  0xf7   :  { %v875_v21 = vpop.f32.mrb[1].mxu0  ;;  %v896_v22 = vpop.f32.mrb[0].mxu1 }
  0xf8   :  { %v876_v23 = vadd.f32 %v875_v21, %v874_v20  ;;  %v877_v24 = vpop.f32.mrb[2].mxu0  ;;  %v897_v25 = vpop.f32.mrb[1].mxu1 }
  0xf9   :  { %v878_v26 = vpop.f32.mrb[3].mxu0  ;;  %v898_v27 = vadd.f32 %v897_v25, %v896_v22  ;;  %v899_v28 = vpop.f32.mrb[2].mxu1 }
  0xfa   :  { %v900_v29 = vpop.f32.mrb[3].mxu1 }
  0xfb   :  { %v664_v31 = vadd.f32 %v898_v27, %v876_v23 }
 0x116   :  { %v918_v32 = vpop.f32.mrb[4].mxu0 }
 0x117   :  { %v919_v33 = vpop.f32.mrb[5].mxu0  ;;  %v940_v34 = vpop.f32.mrb[4].mxu1 }
 0x118   :  { %v920_v35 = vadd.f32 %v919_v33, %v918_v32  ;;  %v921_v36 = vpop.f32.mrb[6].mxu0  ;;  %v941_v37 = vpop.f32.mrb[5].mxu1 }
 0x119   :  { %v922_v38 = vpop.f32.mrb[7].mxu0  ;;  %v942_v40 = vadd.f32 %v941_v37, %v940_v34  ;;  %v943_v41 = vpop.f32.mrb[6].mxu1 }
 0x11a   :  { %v704_v39 = vadd.f32 %v920_v35, %v664_v31  ;;  %v944_v42 = vpop.f32.mrb[7].mxu1 }
 0x11c   :  { %v744_v43 = vadd.f32 %v942_v40, %v704_v39 }
 0x11e   :  { %v750_v44 = vsel %vm749_vm0, %v744_v43, 0.0 }
 0x11f   :  { %v751_v45 = vrot.slane %v750_v44, 4 }
 0x121   :  { %v752_v46 = vadd.f32 %v751_v45, %v750_v44 }
 0x123   :  { %v753_v47 = vrot.slane %v752_v46, 2 }
 0x125   :  { %v754_v48 = vadd.f32 %v753_v47, %v752_v46 }
 0x127   :  { %v755_v49 = vrot.slane %v754_v48, 1 }
 0x129   :  { %v756_v50 = vadd.f32 %v755_v49, %v754_v48 }
 0x12b   :  { %v757_v51 = vmul.f32 0.5, %v756_v50 }
 0x12d   :  { %v758_v52 = vsub.f32 %v744_v43, %v757_v51 }
 0x12f   :  { %v759_v53 = vmul.f32 %v758_v52, %v758_v52 }
 0x131   :  { %v760_v54 = vsel %vm749_vm0, %v759_v53, 0.0 }
 0x132   :  { %v761_v55 = vrot.slane %v760_v54, 4 }
 0x134   :  { %v762_v56 = vadd.f32 %v761_v55, %v760_v54 }
 0x136   :  { %v763_v57 = vrot.slane %v762_v56, 2 }
 0x138   :  { %v764_v58 = vadd.f32 %v763_v57, %v762_v56 }
 0x13a   :  { %v765_v59 = vrot.slane %v764_v58, 1 }
 0x13c   :  { %v766_v60 = vadd.f32 %v765_v59, %v764_v58 }
 0x13e   :  { %v767_v61 = vmul.f32 0.5, %v766_v60 }
 0x140   :  { %v768_v62 = vadd.f32 1e-05, %v767_v61 }
 0x142   :  { %1012 = vrsqrt.f32 %v768_v62 }
 0x14c   :  { %v1013_v1 = vpop.eup %1012 }
 0x14d   :  { %v771_v2 = vmul.f32 %v1013_v1, %v770_v63 }
 0x14f   :  { %v775_v3 = vrot.slane %v771_v2, %v774_v0 }
 0x151   :  { %v776_v5 = vmul.f32 %v775_v3, %v758_v52 }
 0x153   :  { %v784_v6 = vadd.f32 %v857_v4, %v776_v5 }
 0x155   :  { %vm785_vm1 = vcmp.ge.f32.partialorder %v784_v6, 0.0  ;;  %v786_v7 = vmul.f32 0.2, %v784_v6 }
 0x157   :  { %v787_v8 = vsel %vm785_vm1, %v784_v6, %v786_v7 }
 0x158   :  { %788 = vst.msk [vmem:[%s1268_s4] sm:$0x3] %vm749_vm0, %v787_v8 }

// kernel: vae_forward.13
= control target key start
LH: loop header
LB: loop body
LE: loop exit
PB: predicated region body
PF: predicated region fallthrough
CT: control target
= control target key end

     0   :  { %v178_v0 = vmov 0.0|0.0   ;;  %vm179_vm0 = vmmov 0   ;;  %v180_v4 = vmov 0.0   ;;  %vm35_vm1 = vcmask 523264   ;;  %s251_s1 = inlined_call_operand.vmem [shape: f32[64,128], index: 1, kind: input, shape index: {}]   ;;  %s252_s0 = inlined_call_operand.vmem [shape: f32[2,64], index: 0, kind: input, shape index: {}]   ;;  %s253_s2 = inlined_call_operand.vmem [shape: f32[1,128], index: 2, kind: input, shape index: {}]   ;;  %s254_s4 = inlined_call_operand.vmem [shape: f32[2,128], index: 4, kind: output, shape index: {0}]   ;;  %s255_s3 = inlined_call_operand.vmem [shape: f32[2,64], index: 3, kind: input, shape index: {}]   ;;  %s256_s5 = inlined_call_operand.vmem [shape: f32[2,64], index: 5, kind: output, shape index: {1}]  }
   0x1   :  { %160 = vmatprep.subr.bf16.mxu0 %v178_v0  ;;  %v20_v1 = vld [vmem:[%s251_s1] sm:$0xff]  ;;  %v21_v2 = vld [vmem:[%s251_s1 + $0x8] sm:$0xff]  ;;  %v22_v3 = vld [vmem:[%s251_s1 + $0x10] sm:$0xff]  ;;  %157 = vmatprep.mubr.msk.f32.mxu0 %vm179_vm0, %v180_v4  ;;  %vm120_vm2 = vcmask 517120  }
   0x2   :  { %v161_v5 = vpack.c.bf16 %v21_v2, %v20_v1  ;;  %v23_v6 = vld [vmem:[%s251_s1 + $0x18] sm:$0xff]  ;;  %v24_v8 = vld [vmem:[%s251_s1 + $0x20] sm:$0xff]  ;;  %v25_v9 = vld [vmem:[%s251_s1 + $0x28] sm:$0xff] }
   0x3   :  { %v164_v7 = vpack.c.bf16 %v23_v6, %v22_v3  ;;  %v167_v10 = vpack.c.bf16 %v25_v9, %v24_v8  ;;  %v26_v11 = vld [vmem:[%s251_s1 + $0x30] sm:$0xff]  ;;  %v27_v12 = vld [vmem:[%s251_s1 + $0x38] sm:$0xff]  ;;  %v19_v14 = vld [vmem:[%s252_s0] sm:$0x3]  ;;  %s181_s1 = smov 64  }
   0x4   :  { %162 = vmatpush3.bf16.msra.mxu0 %v161_v5  ;;  %v170_v13 = vpack.c.bf16 %v27_v12, %v26_v11  ;;  %v130_v15 = vld [vmem:[%s253_s2] ss:$0 sm:$0xff] }
   0x5   :  { %163 = vmatprep.subr.bf16.mxu0 %v178_v0  ;;  %v110_v22 = vld [vmem:[%s255_s3] sm:$0x3] }
   0x8   :  { %165 = vmatpush3.bf16.msra.mxu0 %v164_v7 }
   0x9   :  { %166 = vmatprep.subr.bf16.mxu0 %v178_v0 }
   0xc   :  { %168 = vmatpush3.bf16.msra.mxu0 %v167_v10 }
   0xd   :  { %169 = vmatprep.subr.bf16.mxu0 %v178_v0 }
  0x10   :  { %171 = vmatpush3.bf16.msra.mxu0 %v170_v13 }
  0x13   :  { %158 = vmatmul.mubr.msk.f32.vlgmr.msra.gmra.mrb[0].mxu0 %vm35_vm1, %v19_v14 }
  0xe6   :  { %v105_v16 = vpop.f32.mrb[0].mxu0 }
  0xe7   :  { %v106_v17 = vadd.f32 %v130_v15, %v105_v16  ;;  %v159_v18 = vpop.f32.mrb[1].mxu0 }
  0xe9   :  { %109 = vst [vmem:[%s254_s4] sm:$0x3] %v106_v17  ;;  %v111_v19 = vmul.f32 0.5, %v106_v17 }
  0xeb   :  { %v112_v20 = vmul.f32 1.442695, %v111_v19 }
  0xed   :  { %176 = vpow2.f32 %v112_v20 }
  0xf7   :  { %v177_v21 = vpop.eup %176 }
  0xf8   :  { %115 = vrot.lane.b32.xlu0 %v177_v21, %s181_s1 }
 0x16a   :  { %v116_v23 = vpop.permute.xlu0 %115 }
 0x16b   :  { %v118_v24 = vmul.f32 %v116_v23, %v110_v22 }
 0x16d   :  { %v119_v25 = vadd.f32 %v118_v24, %v106_v17 }
 0x16f   :  { %121 = vst.msk [vmem:[%s256_s5] sm:$0x3] %vm120_vm2, %v119_v25 }

// kernel: vae_forward.14
= control target key start
LH: loop header
LB: loop body
LE: loop exit
PB: predicated region body
PF: predicated region fallthrough
CT: control target
= control target key end

     0   :  { %vm728_vm0 = vcmask 523264   ;;  %s1393_s1 = inlined_call_operand.vmem [shape: bf16[4,256,64], index: 1, kind: input, shape index: {}]   ;;  %s1394_s0 = inlined_call_operand.vmem [shape: bf16[4,8,256], index: 0, kind: input, shape index: {}]   ;;  %s1395_s2 = inlined_call_operand.vmem [shape: f32[1,64], index: 2, kind: input, shape index: {}]   ;;  %s1396_s3 = inlined_call_operand.vmem [shape: f32[1,64], index: 3, kind: input, shape index: {}]   ;;  %s1397_s4 = inlined_call_operand.vmem [shape: f32[32,64], index: 4, kind: output, shape index: {}]  }
   0x1   :  { %v1060_v0 = vld [vmem:[%s1393_s1 + $0x40] sm:$0xff]   ;;  %v1064_v4 = vld [vmem:[%s1393_s1 + $0x48] sm:$0xff]   ;;  %v1068_v8 = vld [vmem:[%s1393_s1 + $0x50] sm:$0xff]  }
   0x2   :  { %v1061_v1 = vld [vmem:[%s1393_s1 + $0xc0] sm:$0xff]   ;;  %972 = vmatprep.subr.bf16.mxu0 %v1060_v0  ;;  %v1065_v5 = vld [vmem:[%s1393_s1 + $0xc8] sm:$0xff]   ;;  %v1069_v9 = vld [vmem:[%s1393_s1 + $0xd0] sm:$0xff]  }
   0x3   :  { %v1062_v2 = vld [vmem:[%s1393_s1] sm:$0xff]   ;;  %994 = vmatprep.subr.bf16.mxu1 %v1061_v1  ;;  %v1066_v6 = vld [vmem:[%s1393_s1 + $0x8] sm:$0xff]   ;;  %v1070_v10 = vld [vmem:[%s1393_s1 + $0x10] sm:$0xff]  }
   0x4   :  { %v1063_v3 = vld [vmem:[%s1393_s1 + $0x80] sm:$0xff]   ;;  %973 = vmatpush3.bf16.msra.mxu0 %v1062_v2  ;;  %v1067_v7 = vld [vmem:[%s1393_s1 + $0x88] sm:$0xff]   ;;  %v1071_v11 = vld [vmem:[%s1393_s1 + $0x90] sm:$0xff]  }
   0x5   :  { %995 = vmatpush3.bf16.msra.mxu1 %v1063_v3  ;;  %974 = vmatprep.subr.bf16.mxu0 %v1064_v4  ;;  %v1072_v12 = vld [vmem:[%s1393_s1 + $0x58] sm:$0xff]   ;;  %v1076_v16 = vld [vmem:[%s1393_s1 + $0x60] sm:$0xff]   ;;  %v1080_v20 = vld [vmem:[%s1393_s1 + $0x68] sm:$0xff]  }
   0x6   :  { %996 = vmatprep.subr.bf16.mxu1 %v1065_v5  ;;  %v1073_v13 = vld [vmem:[%s1393_s1 + $0xd8] sm:$0xff]   ;;  %v1077_v17 = vld [vmem:[%s1393_s1 + $0xe0] sm:$0xff]   ;;  %v1081_v21 = vld [vmem:[%s1393_s1 + $0xe8] sm:$0xff]  }
   0x7   :  { %v1074_v14 = vld [vmem:[%s1393_s1 + $0x18] sm:$0xff]   ;;  %v1078_v18 = vld [vmem:[%s1393_s1 + $0x20] sm:$0xff]   ;;  %v1082_v22 = vld [vmem:[%s1393_s1 + $0x28] sm:$0xff]  }
   0x8   :  { %975 = vmatpush3.bf16.msra.mxu0 %v1066_v6  ;;  %v1075_v15 = vld [vmem:[%s1393_s1 + $0x98] sm:$0xff]   ;;  %v1079_v19 = vld [vmem:[%s1393_s1 + $0xa0] sm:$0xff]   ;;  %v1083_v23 = vld [vmem:[%s1393_s1 + $0xa8] sm:$0xff]  }
   0x9   :  { %997 = vmatpush3.bf16.msra.mxu1 %v1067_v7  ;;  %976 = vmatprep.subr.bf16.mxu0 %v1068_v8  ;;  %v1084_v24 = vld [vmem:[%s1393_s1 + $0x70] sm:$0xff]   ;;  %v1088_v28 = vld [vmem:[%s1393_s1 + $0x78] sm:$0xff]   ;;  %v18_v32 = vld [vmem:[%s1394_s0] sm:$0xff] }
   0xa   :  { %998 = vmatprep.subr.bf16.mxu1 %v1069_v9  ;;  %v1085_v25 = vld [vmem:[%s1393_s1 + $0xf0] sm:$0xff]   ;;  %v1089_v29 = vld [vmem:[%s1393_s1 + $0xf8] sm:$0xff]   ;;  %v818_v33 = vld [vmem:[%s1394_s0 + $0x8] sm:$0xff]  ;;  %v800_v34 = vcombine.low %v18_v32, %v18_v32  ;;  %v801_v35 = vcombine.high %v18_v32, %v18_v32 }
   0xb   :  { %v1086_v26 = vld [vmem:[%s1393_s1 + $0x30] sm:$0xff]   ;;  %v1090_v30 = vld [vmem:[%s1393_s1 + $0x38] sm:$0xff]   ;;  %v851_v36 = vcombine.low %v818_v33, %v818_v33  ;;  %v852_v37 = vcombine.high %v818_v33, %v818_v33  ;;  %v1096_v38 = vld [vmem:[%s1393_s1 + $0x140] sm:$0xff]  }
   0xc   :  { %977 = vmatpush3.bf16.msra.mxu0 %v1070_v10  ;;  %v1087_v27 = vld [vmem:[%s1393_s1 + $0xb0] sm:$0xff]   ;;  %v1091_v31 = vld [vmem:[%s1393_s1 + $0xb8] sm:$0xff]   ;;  %v1097_v39 = vld [vmem:[%s1393_s1 + $0x1c0] sm:$0xff]   ;;  %186 = vmatprep.mubr.bf16.mxu0 %v801_v35 }
   0xd   :  { %999 = vmatpush3.bf16.msra.mxu1 %v1071_v11  ;;  %978 = vmatprep.subr.bf16.mxu0 %v1072_v12  ;;  %v1098_v40 = vld [vmem:[%s1393_s1 + $0x100] sm:$0xff]   ;;  %v1100_v42 = vld [vmem:[%s1393_s1 + $0x148] sm:$0xff]   ;;  %v1104_v46 = vld [vmem:[%s1393_s1 + $0x150] sm:$0xff]  }
   0xe   :  { %1000 = vmatprep.subr.bf16.mxu1 %v1073_v13  ;;  %364 = vmatprep.mubr.bf16.mxu1 %v852_v37  ;;  %v1099_v41 = vld [vmem:[%s1393_s1 + $0x180] sm:$0xff]   ;;  %v1101_v43 = vld [vmem:[%s1393_s1 + $0x1c8] sm:$0xff]   ;;  %v1105_v47 = vld [vmem:[%s1393_s1 + $0x1d0] sm:$0xff]  }
   0xf   :  { %v1102_v44 = vld [vmem:[%s1393_s1 + $0x108] sm:$0xff]   ;;  %v1106_v48 = vld [vmem:[%s1393_s1 + $0x110] sm:$0xff]   ;;  %v1108_v50 = vld [vmem:[%s1393_s1 + $0x158] sm:$0xff]  }
  0x10   :  { %979 = vmatpush3.bf16.msra.mxu0 %v1074_v14  ;;  %v1103_v45 = vld [vmem:[%s1393_s1 + $0x188] sm:$0xff]   ;;  %v1107_v49 = vld [vmem:[%s1393_s1 + $0x190] sm:$0xff]   ;;  %v1109_v51 = vld [vmem:[%s1393_s1 + $0x1d8] sm:$0xff]  }
  0x11   :  { %1001 = vmatpush3.bf16.msra.mxu1 %v1075_v15  ;;  %980 = vmatprep.subr.bf16.mxu0 %v1076_v16  ;;  %v1110_v52 = vld [vmem:[%s1393_s1 + $0x118] sm:$0xff]   ;;  %v1112_v54 = vld [vmem:[%s1393_s1 + $0x160] sm:$0xff]   ;;  %v1116_v58 = vld [vmem:[%s1393_s1 + $0x168] sm:$0xff]  }
  0x12   :  { %1002 = vmatprep.subr.bf16.mxu1 %v1077_v17  ;;  %v1111_v53 = vld [vmem:[%s1393_s1 + $0x198] sm:$0xff]   ;;  %v1113_v55 = vld [vmem:[%s1393_s1 + $0x1e0] sm:$0xff]   ;;  %v1117_v59 = vld [vmem:[%s1393_s1 + $0x1e8] sm:$0xff]  }
  0x13   :  { %v1114_v56 = vld [vmem:[%s1393_s1 + $0x120] sm:$0xff]   ;;  %v1118_v60 = vld [vmem:[%s1393_s1 + $0x128] sm:$0xff]   ;;  %v1120_v62 = vld [vmem:[%s1393_s1 + $0x170] sm:$0xff]  }
  0x14   :  { %981 = vmatpush3.bf16.msra.mxu0 %v1078_v18  ;;  %v1115_v57 = vld [vmem:[%s1393_s1 + $0x1a0] sm:$0xff]   ;;  %v1119_v61 = vld [vmem:[%s1393_s1 + $0x1a8] sm:$0xff]   ;;  %v1121_v63 = vld [vmem:[%s1393_s1 + $0x1f0] sm:$0xff]  }
  0x15   :  { %1003 = vmatpush3.bf16.msra.mxu1 %v1079_v19  ;;  %982 = vmatprep.subr.bf16.mxu0 %v1080_v20  ;;  %v1122_v0 = vld [vmem:[%s1393_s1 + $0x130] sm:$0xff]   ;;  %v1124_v2 = vld [vmem:[%s1393_s1 + $0x178] sm:$0xff]  }
  0x16   :  { %1004 = vmatprep.subr.bf16.mxu1 %v1081_v21  ;;  %v1123_v1 = vld [vmem:[%s1393_s1 + $0x1b0] sm:$0xff]   ;;  %v1125_v3 = vld [vmem:[%s1393_s1 + $0x1f8] sm:$0xff]  }
  0x17   :  { %v1126_v4 = vld [vmem:[%s1393_s1 + $0x138] sm:$0xff]   ;;  %v869_v6 = vld [vmem:[%s1394_s0 + $0x10] sm:$0xff] }
  0x18   :  { %983 = vmatpush3.bf16.msra.mxu0 %v1082_v22  ;;  %v1127_v5 = vld [vmem:[%s1393_s1 + $0x1b8] sm:$0xff]   ;;  %v902_v7 = vcombine.low %v869_v6, %v869_v6  ;;  %v903_v8 = vcombine.high %v869_v6, %v869_v6 }
  0x19   :  { %1005 = vmatpush3.bf16.msra.mxu1 %v1083_v23  ;;  %984 = vmatprep.subr.bf16.mxu0 %v1084_v24  ;;  %v920_v9 = vld [vmem:[%s1394_s0 + $0x18] sm:$0xff] }
  0x1a   :  { %1006 = vmatprep.subr.bf16.mxu1 %v1085_v25  ;;  %v953_v10 = vcombine.low %v920_v9, %v920_v9  ;;  %v954_v11 = vcombine.high %v920_v9, %v920_v9 }
  0x1c   :  { %985 = vmatpush3.bf16.msra.mxu0 %v1086_v26 }
  0x1d   :  { %1007 = vmatpush3.bf16.msra.mxu1 %v1087_v27  ;;  %986 = vmatprep.subr.bf16.mxu0 %v1088_v28 }
  0x1e   :  { %1008 = vmatprep.subr.bf16.mxu1 %v1089_v29 }
  0x20   :  { %987 = vmatpush3.bf16.msra.mxu0 %v1090_v30 }
  0x21   :  { %1009 = vmatpush3.bf16.msra.mxu1 %v1091_v31  ;;  %1016 = vmatprep.subr.bf16.mxu0 %v1096_v38 }
  0x22   :  { %1038 = vmatprep.subr.bf16.mxu1 %v1097_v39 }
  0x23   :  { %187 = vmatmul.mubr.bf16.vlgmr.msra.gmra.mrb[0].mxu0 %v800_v34 }
  0x24   :  { %365 = vmatmul.mubr.bf16.vlgmr.msra.gmra.mrb[0].mxu1 %v851_v36  ;;  %1017 = vmatpush3.bf16.msra.mxu0 %v1098_v40 }
  0x25   :  { %1039 = vmatpush3.bf16.msra.mxu1 %v1099_v41  ;;  %1018 = vmatprep.subr.bf16.mxu0 %v1100_v42 }
  0x26   :  { %1040 = vmatprep.subr.bf16.mxu1 %v1101_v43  ;;  %542 = vmatprep.mubr.bf16.mxu0 %v903_v8 }
  0x27   :  { %720 = vmatprep.mubr.bf16.mxu1 %v954_v11 }
  0x28   :  { %1019 = vmatpush3.bf16.msra.mxu0 %v1102_v44 }
  0x29   :  { %1041 = vmatpush3.bf16.msra.mxu1 %v1103_v45  ;;  %1020 = vmatprep.subr.bf16.mxu0 %v1104_v46 }
  0x2a   :  { %1042 = vmatprep.subr.bf16.mxu1 %v1105_v47 }
  0x2c   :  { %1021 = vmatpush3.bf16.msra.mxu0 %v1106_v48 }
  0x2d   :  { %1043 = vmatpush3.bf16.msra.mxu1 %v1107_v49  ;;  %1022 = vmatprep.subr.bf16.mxu0 %v1108_v50 }
  0x2e   :  { %1044 = vmatprep.subr.bf16.mxu1 %v1109_v51 }
  0x30   :  { %1023 = vmatpush3.bf16.msra.mxu0 %v1110_v52 }
  0x31   :  { %1045 = vmatpush3.bf16.msra.mxu1 %v1111_v53  ;;  %1024 = vmatprep.subr.bf16.mxu0 %v1112_v54 }
  0x32   :  { %1046 = vmatprep.subr.bf16.mxu1 %v1113_v55 }
  0x34   :  { %1025 = vmatpush3.bf16.msra.mxu0 %v1114_v56 }
  0x35   :  { %1047 = vmatpush3.bf16.msra.mxu1 %v1115_v57  ;;  %1026 = vmatprep.subr.bf16.mxu0 %v1116_v58 }
  0x36   :  { %1048 = vmatprep.subr.bf16.mxu1 %v1117_v59 }
  0x38   :  { %1027 = vmatpush3.bf16.msra.mxu0 %v1118_v60 }
  0x39   :  { %1049 = vmatpush3.bf16.msra.mxu1 %v1119_v61  ;;  %1028 = vmatprep.subr.bf16.mxu0 %v1120_v62 }
  0x3a   :  { %1050 = vmatprep.subr.bf16.mxu1 %v1121_v63 }
  0x3c   :  { %1029 = vmatpush3.bf16.msra.mxu0 %v1122_v0 }
  0x3d   :  { %1051 = vmatpush3.bf16.msra.mxu1 %v1123_v1  ;;  %1030 = vmatprep.subr.bf16.mxu0 %v1124_v2 }
  0x3e   :  { %1052 = vmatprep.subr.bf16.mxu1 %v1125_v3 }
  0x40   :  { %1031 = vmatpush3.bf16.msra.mxu0 %v1126_v4 }
  0x41   :  { %1053 = vmatpush3.bf16.msra.mxu1 %v1127_v5  ;;  %v769_v5 = vlaneseq }
  0x43   :  { %543 = vmatmul.mubr.bf16.vlgmr.msra.gmra.mrb[4].mxu0 %v902_v7  ;;  %v770_v6 = vshrl.u32 %v769_v5, 7  ;;  %v767_v7 = vld [vmem:[%s1395_s2] sm:$0x1] }
  0x44   :  { %721 = vmatmul.mubr.bf16.vlgmr.msra.gmra.mrb[4].mxu1 %v953_v10 }
  0x45   :  { %v771_v8 = vsub.s32 0, %v770_v6 }
  0xf6   :  { %v988_v12 = vpop.f32.mrb[0].mxu0 }
  0xf7   :  { %v1010_v13 = vpop.f32.mrb[0].mxu1  ;;  %v989_v14 = vpop.f32.mrb[1].mxu0 }
  0xf8   :  { %v1011_v15 = vpop.f32.mrb[1].mxu1  ;;  %v990_v16 = vadd.f32 %v989_v14, %v988_v12  ;;  %v991_v18 = vpop.f32.mrb[2].mxu0  ;;  %v971_v12 = vld [vmem:[%s1396_s3] ss:$0 sm:$0xff] }
  0xf9   :  { %v1012_v17 = vadd.f32 %v1011_v15, %v1010_v13  ;;  %v1013_v19 = vpop.f32.mrb[2].mxu1  ;;  %v992_v20 = vpop.f32.mrb[3].mxu0 }
  0xfa   :  { %v1014_v21 = vpop.f32.mrb[3].mxu1  ;;  %v729_v22 = vsel %vm728_vm0, %v990_v16, 0.0 }
  0xfb   :  { %v730_v23 = vsel %vm728_vm0, %v1012_v17, 0.0 }
  0xfc   :  { %v731_v24 = vadd.f32 %v730_v23, %v729_v22 }
 0x116   :  { %v1032_v25 = vpop.f32.mrb[4].mxu0 }
 0x117   :  { %v1054_v26 = vpop.f32.mrb[4].mxu1  ;;  %v1033_v27 = vpop.f32.mrb[5].mxu0 }
 0x118   :  { %v1055_v28 = vpop.f32.mrb[5].mxu1  ;;  %v1034_v29 = vadd.f32 %v1033_v27, %v1032_v25  ;;  %v1035_v31 = vpop.f32.mrb[6].mxu0 }
 0x119   :  { %v1056_v30 = vadd.f32 %v1055_v28, %v1054_v26  ;;  %v1057_v32 = vpop.f32.mrb[6].mxu1  ;;  %v1036_v33 = vpop.f32.mrb[7].mxu0 }
 0x11a   :  { %v1058_v34 = vpop.f32.mrb[7].mxu1  ;;  %v732_v35 = vsel %vm728_vm0, %v1034_v29, 0.0 }
 0x11b   :  { %v734_v36 = vsel %vm728_vm0, %v1056_v30, 0.0  ;;  %v733_v37 = vadd.f32 %v732_v35, %v731_v24 }
 0x11d   :  { %v735_v38 = vadd.f32 %v734_v36, %v733_v37 }
 0x11f   :  { %v736_v39 = vrot.slane %v735_v38, 4 }
 0x121   :  { %v737_v40 = vadd.f32 %v736_v39, %v735_v38 }
 0x123   :  { %v738_v41 = vrot.slane %v737_v40, 2 }
 0x125   :  { %v739_v42 = vadd.f32 %v738_v41, %v737_v40 }
 0x127   :  { %v740_v43 = vrot.slane %v739_v42, 1 }
 0x129   :  { %v741_v44 = vadd.f32 %v740_v43, %v739_v42 }
 0x12b   :  { %v742_v45 = vmul.f32 0.03125, %v741_v44 }
 0x12d   :  { %v743_v46 = vsub.f32 %v990_v16, %v742_v45  ;;  %v744_v47 = vsub.f32 %v1012_v17, %v742_v45  ;;  %v745_v48 = vsub.f32 %v1034_v29, %v742_v45  ;;  %v746_v49 = vsub.f32 %v1056_v30, %v742_v45 }
 0x12f   :  { %v747_v50 = vmul.f32 %v743_v46, %v743_v46  ;;  %v748_v51 = vmul.f32 %v744_v47, %v744_v47  ;;  %v749_v52 = vmul.f32 %v745_v48, %v745_v48  ;;  %v750_v53 = vmul.f32 %v746_v49, %v746_v49 }
 0x131   :  { %v751_v54 = vsel %vm728_vm0, %v747_v50, 0.0  ;;  %v752_v55 = vsel %vm728_vm0, %v748_v51, 0.0  ;;  %v754_v57 = vsel %vm728_vm0, %v749_v52, 0.0  ;;  %v756_v59 = vsel %vm728_vm0, %v750_v53, 0.0 }
 0x132   :  { %v753_v56 = vadd.f32 %v752_v55, %v751_v54 }
 0x134   :  { %v755_v58 = vadd.f32 %v754_v57, %v753_v56 }
 0x136   :  { %v757_v60 = vadd.f32 %v756_v59, %v755_v58 }
 0x138   :  { %v758_v61 = vrot.slane %v757_v60, 4 }
 0x13a   :  { %v759_v62 = vadd.f32 %v758_v61, %v757_v60 }
 0x13c   :  { %v760_v63 = vrot.slane %v759_v62, 2 }
 0x13e   :  { %v761_v0 = vadd.f32 %v760_v63, %v759_v62 }
 0x140   :  { %v762_v1 = vrot.slane %v761_v0, 1 }
 0x142   :  { %v763_v2 = vadd.f32 %v762_v1, %v761_v0 }
 0x144   :  { %v764_v3 = vmul.f32 0.03125, %v763_v2 }
 0x146   :  { %v765_v4 = vadd.f32 1e-05, %v764_v3 }
 0x148   :  { %1132 = vrsqrt.f32 %v765_v4 }
 0x152   :  { %v1133_v9 = vpop.eup %1132 }
 0x153   :  { %v768_v10 = vmul.f32 %v1133_v9, %v767_v7 }
 0x155   :  { %v772_v11 = vrot.slane %v768_v10, %v771_v8 }
 0x157   :  { %v773_v13 = vmul.f32 %v772_v11, %v743_v46  ;;  %v774_v14 = vmul.f32 %v772_v11, %v744_v47  ;;  %v775_v15 = vmul.f32 %v772_v11, %v745_v48  ;;  %v776_v16 = vmul.f32 %v772_v11, %v746_v49 }
 0x159   :  { %v784_v17 = vadd.f32 %v971_v12, %v773_v13  ;;  %v785_v18 = vadd.f32 %v971_v12, %v774_v14  ;;  %v786_v19 = vadd.f32 %v971_v12, %v775_v15  ;;  %v787_v20 = vadd.f32 %v971_v12, %v776_v16 }
 0x15b   :  { %v788_v21 = vmax.f32 %v784_v17, 0.0  ;;  %v789_v22 = vmax.f32 %v785_v18, 0.0  ;;  %v790_v23 = vmax.f32 %v786_v19, 0.0  ;;  %v791_v24 = vmax.f32 %v787_v20, 0.0 }
 0x15d   :  { %792 = vst.msk [vmem:[%s1397_s4] sm:$0xff] %vm728_vm0, %v788_v21  ;;  %793 = vst.msk [vmem:[%s1397_s4 + $0x8] sm:$0xff] %vm728_vm0, %v789_v22 }
 0x15e   :  { %794 = vst.msk [vmem:[%s1397_s4 + $0x10] sm:$0xff] %vm728_vm0, %v790_v23  ;;  %795 = vst.msk [vmem:[%s1397_s4 + $0x18] sm:$0xff] %vm728_vm0, %v791_v24 }

// kernel: vae_forward.15
= control target key start
LH: loop header
LB: loop body
LE: loop exit
PB: predicated region body
PF: predicated region fallthrough
CT: control target
= control target key end

     0   :  { %vm828_vm0 = vcmask 261120   ;;  %s1882_s1 = inlined_call_operand.vmem [shape: bf16[4,256,32], index: 1, kind: input, shape index: {}]   ;;  %s1883_s0 = inlined_call_operand.vmem [shape: bf16[4,32,256], index: 0, kind: input, shape index: {}]   ;;  %s1884_s2 = inlined_call_operand.vmem [shape: f32[1,32], index: 2, kind: input, shape index: {}]   ;;  %s1885_s3 = inlined_call_operand.vmem [shape: f32[1,32], index: 3, kind: input, shape index: {}]   ;;  %s1886_s4 = inlined_call_operand.vmem [shape: f32[128,32], index: 4, kind: output, shape index: {}]  }
   0x1   :  { %v1321_v0 = vld [vmem:[%s1882_s1 + $0x40] sm:$0xff]   ;;  %v1323_v2 = vld [vmem:[%s1882_s1 + $0x48] sm:$0xff]   ;;  %v1327_v6 = vld [vmem:[%s1882_s1 + $0x50] sm:$0xff]  }
   0x2   :  { %v1322_v1 = vld [vmem:[%s1882_s1] sm:$0xff]   ;;  %1209 = vmatprep.subr.bf16.mxu0 %v1321_v0  ;;  %v1324_v3 = vld [vmem:[%s1882_s1 + $0x8] sm:$0xff]   ;;  %v1328_v7 = vld [vmem:[%s1882_s1 + $0x10] sm:$0xff]  }
   0x3   :  { %1210 = vmatpush3.bf16.msra.mxu0 %v1322_v1  ;;  %v1325_v4 = vld [vmem:[%s1882_s1 + $0xc0] sm:$0xff]   ;;  %v1329_v8 = vld [vmem:[%s1882_s1 + $0xc8] sm:$0xff]   ;;  %v1331_v10 = vld [vmem:[%s1882_s1 + $0x58] sm:$0xff]  }
   0x4   :  { %1211 = vmatprep.subr.bf16.mxu0 %v1323_v2  ;;  %v1326_v5 = vld [vmem:[%s1882_s1 + $0x80] sm:$0xff]   ;;  %1237 = vmatprep.subr.bf16.mxu1 %v1325_v4  ;;  %v1330_v9 = vld [vmem:[%s1882_s1 + $0x88] sm:$0xff]   ;;  %v1332_v11 = vld [vmem:[%s1882_s1 + $0x18] sm:$0xff]  }
   0x5   :  { %1238 = vmatpush3.bf16.msra.mxu1 %v1326_v5  ;;  %v1333_v12 = vld [vmem:[%s1882_s1 + $0xd0] sm:$0xff]   ;;  %v1335_v14 = vld [vmem:[%s1882_s1 + $0x60] sm:$0xff]   ;;  %v1337_v16 = vld [vmem:[%s1882_s1 + $0xd8] sm:$0xff]  }
   0x6   :  { %1239 = vmatprep.subr.bf16.mxu1 %v1329_v8  ;;  %v1334_v13 = vld [vmem:[%s1882_s1 + $0x90] sm:$0xff]   ;;  %v1336_v15 = vld [vmem:[%s1882_s1 + $0x20] sm:$0xff]   ;;  %v1338_v17 = vld [vmem:[%s1882_s1 + $0x98] sm:$0xff]  }
   0x7   :  { %1212 = vmatpush3.bf16.msra.mxu0 %v1324_v3  ;;  %v1339_v18 = vld [vmem:[%s1882_s1 + $0x68] sm:$0xff]   ;;  %v1341_v20 = vld [vmem:[%s1882_s1 + $0xe0] sm:$0xff]   ;;  %v1343_v22 = vld [vmem:[%s1882_s1 + $0x70] sm:$0xff]  }
   0x8   :  { %1213 = vmatprep.subr.bf16.mxu0 %v1327_v6  ;;  %v1340_v19 = vld [vmem:[%s1882_s1 + $0x28] sm:$0xff]   ;;  %v1342_v21 = vld [vmem:[%s1882_s1 + $0xa0] sm:$0xff]   ;;  %v1344_v23 = vld [vmem:[%s1882_s1 + $0x30] sm:$0xff]  }
   0x9   :  { %1240 = vmatpush3.bf16.msra.mxu1 %v1330_v9  ;;  %v1345_v24 = vld [vmem:[%s1882_s1 + $0xe8] sm:$0xff]   ;;  %v1347_v26 = vld [vmem:[%s1882_s1 + $0x78] sm:$0xff]   ;;  %v1349_v28 = vld [vmem:[%s1882_s1 + $0xf0] sm:$0xff]  }
   0xa   :  { %1241 = vmatprep.subr.bf16.mxu1 %v1333_v12  ;;  %v1346_v25 = vld [vmem:[%s1882_s1 + $0xa8] sm:$0xff]   ;;  %v1348_v27 = vld [vmem:[%s1882_s1 + $0x38] sm:$0xff]   ;;  %v1350_v29 = vld [vmem:[%s1882_s1 + $0xb0] sm:$0xff]  }
   0xb   :  { %1214 = vmatpush3.bf16.msra.mxu0 %v1328_v7  ;;  %v1351_v30 = vld [vmem:[%s1883_s0] ss:$8 sps:$4 sm:$0xff]   ;;  %v1353_v31 = vld [vmem:[%s1883_s0 + $0x4] ss:$8 sps:$4 sm:$0xff]   ;;  %v1355_v33 = vld [vmem:[%s1882_s1 + $0xf8] sm:$0xff]  }
   0xc   :  { %1215 = vmatprep.subr.bf16.mxu0 %v1331_v10  ;;  %v1354_v32 = vld [vmem:[%s1882_s1 + $0x140] sm:$0xff]   ;;  %202 = vmatprep.mubr.bf16.mxu0 %v1353_v31  ;;  %v1357_v35 = vld [vmem:[%s1882_s1 + $0xb8] sm:$0xff]   ;;  %v1358_v36 = vld [vmem:[%s1882_s1 + $0x148] sm:$0xff]  }
   0xd   :  { %1242 = vmatpush3.bf16.msra.mxu1 %v1334_v13  ;;  %v1356_v34 = vld [vmem:[%s1882_s1 + $0x100] sm:$0xff]   ;;  %v1362_v39 = vld [vmem:[%s1882_s1 + $0x108] sm:$0xff]   ;;  %v1365_v42 = vld [vmem:[%s1883_s0 + $0x14] ss:$8 sps:$4 sm:$0xff]  }
   0xe   :  { %1243 = vmatprep.subr.bf16.mxu1 %v1337_v16  ;;  %v1359_v37 = vld [vmem:[%s1883_s0 + $0x20] ss:$8 sps:$4 sm:$0xff]   ;;  %v1361_v38 = vld [vmem:[%s1883_s0 + $0x24] ss:$8 sps:$4 sm:$0xff]   ;;  %v1367_v43 = vld [vmem:[%s1883_s0 + $0x10] ss:$8 sps:$4 sm:$0xff]  }
   0xf   :  { %1216 = vmatpush3.bf16.msra.mxu0 %v1332_v11  ;;  %405 = vmatprep.mubr.bf16.mxu1 %v1361_v38  ;;  %v1363_v40 = vld [vmem:[%s1882_s1 + $0x1c0] sm:$0xff]   ;;  %v1368_v44 = vld [vmem:[%s1882_s1 + $0x150] sm:$0xff]   ;;  %v1370_v46 = vld [vmem:[%s1882_s1 + $0x1c8] sm:$0xff]  }
  0x10   :  { %1217 = vmatprep.subr.bf16.mxu0 %v1335_v14  ;;  %v1364_v41 = vld [vmem:[%s1882_s1 + $0x180] sm:$0xff]   ;;  %v1369_v45 = vld [vmem:[%s1882_s1 + $0x110] sm:$0xff]   ;;  %v1371_v47 = vld [vmem:[%s1882_s1 + $0x188] sm:$0xff]  }
  0x11   :  { %1244 = vmatpush3.bf16.msra.mxu1 %v1338_v17  ;;  %v1372_v48 = vld [vmem:[%s1882_s1 + $0x158] sm:$0xff]   ;;  %v1374_v50 = vld [vmem:[%s1882_s1 + $0x1d0] sm:$0xff]   ;;  %v1379_v54 = vld [vmem:[%s1882_s1 + $0x160] sm:$0xff]  }
  0x12   :  { %1245 = vmatprep.subr.bf16.mxu1 %v1341_v20  ;;  %v1373_v49 = vld [vmem:[%s1882_s1 + $0x118] sm:$0xff]   ;;  %v1375_v51 = vld [vmem:[%s1882_s1 + $0x190] sm:$0xff]   ;;  %v1380_v55 = vld [vmem:[%s1882_s1 + $0x120] sm:$0xff]  }
  0x13   :  { %1218 = vmatpush3.bf16.msra.mxu0 %v1336_v15  ;;  %v1376_v52 = vld [vmem:[%s1883_s0 + $0x34] ss:$8 sps:$4 sm:$0xff]   ;;  %v1378_v53 = vld [vmem:[%s1883_s0 + $0x30] ss:$8 sps:$4 sm:$0xff]   ;;  %v1383_v58 = vld [vmem:[%s1882_s1 + $0x168] sm:$0xff]  }
  0x14   :  { %1219 = vmatprep.subr.bf16.mxu0 %v1339_v18  ;;  %v1381_v56 = vld [vmem:[%s1882_s1 + $0x1d8] sm:$0xff]   ;;  %v1384_v59 = vld [vmem:[%s1882_s1 + $0x128] sm:$0xff]   ;;  %v1385_v60 = vld [vmem:[%s1882_s1 + $0x1e0] sm:$0xff]  }
  0x15   :  { %1246 = vmatpush3.bf16.msra.mxu1 %v1342_v21  ;;  %v1382_v57 = vld [vmem:[%s1882_s1 + $0x198] sm:$0xff]   ;;  %v1386_v61 = vld [vmem:[%s1882_s1 + $0x1a0] sm:$0xff]   ;;  %v1387_v62 = vld [vmem:[%s1882_s1 + $0x170] sm:$0xff]  }
  0x16   :  { %1247 = vmatprep.subr.bf16.mxu1 %v1345_v24  ;;  %v1388_v63 = vld [vmem:[%s1882_s1 + $0x130] sm:$0xff]   ;;  %v1389_v0 = vld [vmem:[%s1882_s1 + $0x1e8] sm:$0xff]   ;;  %v1391_v2 = vld [vmem:[%s1882_s1 + $0x178] sm:$0xff]  }
  0x17   :  { %1220 = vmatpush3.bf16.msra.mxu0 %v1340_v19  ;;  %v1390_v1 = vld [vmem:[%s1882_s1 + $0x1a8] sm:$0xff]   ;;  %v1392_v3 = vld [vmem:[%s1882_s1 + $0x138] sm:$0xff]   ;;  %v1393_v4 = vld [vmem:[%s1882_s1 + $0x1f0] sm:$0xff]  }
  0x18   :  { %1221 = vmatprep.subr.bf16.mxu0 %v1343_v22  ;;  %v1394_v5 = vld [vmem:[%s1882_s1 + $0x1b0] sm:$0xff]   ;;  %v1395_v6 = vld [vmem:[%s1883_s0 + $0x40] ss:$8 sps:$4 sm:$0xff]   ;;  %v1397_v7 = vld [vmem:[%s1883_s0 + $0x44] ss:$8 sps:$4 sm:$0xff]  }
  0x19   :  { %1248 = vmatpush3.bf16.msra.mxu1 %v1346_v25  ;;  %v1398_v8 = vld [vmem:[%s1882_s1 + $0x1f8] sm:$0xff]   ;;  %v1400_v10 = vld [vmem:[%s1883_s0 + $0x60] ss:$8 sps:$4 sm:$0xff]   ;;  %v1402_v11 = vld [vmem:[%s1883_s0 + $0x64] ss:$8 sps:$4 sm:$0xff]  }
  0x1a   :  { %1249 = vmatprep.subr.bf16.mxu1 %v1349_v28  ;;  %v1399_v9 = vld [vmem:[%s1882_s1 + $0x1b8] sm:$0xff]  }
  0x1b   :  { %1222 = vmatpush3.bf16.msra.mxu0 %v1344_v23  ;;  %v1403_v12 = vld [vmem:[%s1883_s0 + $0x54] ss:$8 sps:$4 sm:$0xff]   ;;  %v1405_v14 = vld [vmem:[%s1883_s0 + $0x50] ss:$8 sps:$4 sm:$0xff]  }
  0x1c   :  { %1223 = vmatprep.subr.bf16.mxu0 %v1347_v26  ;;  %v1406_v13 = vld [vmem:[%s1883_s0 + $0x74] ss:$8 sps:$4 sm:$0xff]   ;;  %v1408_v15 = vld [vmem:[%s1883_s0 + $0x70] ss:$8 sps:$4 sm:$0xff]  }
  0x1d   :  { %1250 = vmatpush3.bf16.msra.mxu1 %v1350_v29 }
  0x1e   :  { %1251 = vmatprep.subr.bf16.mxu1 %v1355_v33 }
  0x1f   :  { %1224 = vmatpush3.bf16.msra.mxu0 %v1348_v27 }
  0x20   :  { %1265 = vmatprep.subr.bf16.mxu0 %v1354_v32 }
  0x21   :  { %1252 = vmatpush3.bf16.msra.mxu1 %v1357_v35 }
  0x22   :  { %203 = vmatmul.mubr.bf16.vlgmr.msra.gmra.mrb[0].mxu0 %v1351_v30  ;;  %1293 = vmatprep.subr.bf16.mxu1 %v1363_v40 }
  0x23   :  { %1266 = vmatpush3.bf16.msra.mxu0 %v1356_v34  ;;  %210 = vmatprep.mubr.bf16.mxu0 %v1365_v42 }
  0x24   :  { %1267 = vmatprep.subr.bf16.mxu0 %v1358_v36  ;;  %406 = vmatmul.mubr.bf16.vlgmr.msra.gmra.mrb[0].mxu1 %v1359_v37 }
  0x25   :  { %1294 = vmatpush3.bf16.msra.mxu1 %v1364_v41  ;;  %413 = vmatprep.mubr.bf16.mxu1 %v1376_v52 }
  0x26   :  { %1295 = vmatprep.subr.bf16.mxu1 %v1370_v46 }
  0x27   :  { %1268 = vmatpush3.bf16.msra.mxu0 %v1362_v39 }
  0x28   :  { %1269 = vmatprep.subr.bf16.mxu0 %v1368_v44 }
  0x29   :  { %1296 = vmatpush3.bf16.msra.mxu1 %v1371_v47 }
  0x2a   :  { %211 = vmatmul.mubr.bf16.gmra.mrb[4].mxu0 %v1367_v43  ;;  %1297 = vmatprep.subr.bf16.mxu1 %v1374_v50 }
  0x2b   :  { %1270 = vmatpush3.bf16.msra.mxu0 %v1369_v45  ;;  %608 = vmatprep.mubr.bf16.mxu0 %v1397_v7 }
  0x2c   :  { %1271 = vmatprep.subr.bf16.mxu0 %v1372_v48  ;;  %414 = vmatmul.mubr.bf16.gmra.mrb[4].mxu1 %v1378_v53 }
  0x2d   :  { %1298 = vmatpush3.bf16.msra.mxu1 %v1375_v51  ;;  %811 = vmatprep.mubr.bf16.mxu1 %v1402_v11 }
  0x2e   :  { %1299 = vmatprep.subr.bf16.mxu1 %v1381_v56 }
  0x2f   :  { %1272 = vmatpush3.bf16.msra.mxu0 %v1373_v49 }
  0x30   :  { %1273 = vmatprep.subr.bf16.mxu0 %v1379_v54 }
  0x31   :  { %1300 = vmatpush3.bf16.msra.mxu1 %v1382_v57 }
  0x32   :  { %1301 = vmatprep.subr.bf16.mxu1 %v1385_v60 }
  0x33   :  { %1274 = vmatpush3.bf16.msra.mxu0 %v1380_v55 }
  0x34   :  { %1275 = vmatprep.subr.bf16.mxu0 %v1383_v58 }
  0x35   :  { %1302 = vmatpush3.bf16.msra.mxu1 %v1386_v61 }
  0x36   :  { %1303 = vmatprep.subr.bf16.mxu1 %v1389_v0 }
  0x37   :  { %1276 = vmatpush3.bf16.msra.mxu0 %v1384_v59 }
  0x38   :  { %1277 = vmatprep.subr.bf16.mxu0 %v1387_v62 }
  0x39   :  { %1304 = vmatpush3.bf16.msra.mxu1 %v1390_v1 }
  0x3a   :  { %1305 = vmatprep.subr.bf16.mxu1 %v1393_v4 }
  0x3b   :  { %1278 = vmatpush3.bf16.msra.mxu0 %v1388_v63 }
  0x3c   :  { %1279 = vmatprep.subr.bf16.mxu0 %v1391_v2 }
  0x3d   :  { %1306 = vmatpush3.bf16.msra.mxu1 %v1394_v5 }
  0x3e   :  { %1307 = vmatprep.subr.bf16.mxu1 %v1398_v8 }
  0x3f   :  { %1280 = vmatpush3.bf16.msra.mxu0 %v1392_v3 }
  0x41   :  { %1308 = vmatpush3.bf16.msra.mxu1 %v1399_v9 }
  0x42   :  { %609 = vmatmul.mubr.bf16.vlgmr.msra.gmra.mrb[8].mxu0 %v1395_v6 }
  0x43   :  { %616 = vmatprep.mubr.bf16.mxu0 %v1403_v12 }
  0x44   :  { %812 = vmatmul.mubr.bf16.vlgmr.msra.gmra.mrb[8].mxu1 %v1400_v10 }
  0x45   :  { %819 = vmatprep.mubr.bf16.mxu1 %v1406_v13 }
  0x4a   :  { %617 = vmatmul.mubr.bf16.gmra.mrb[12].mxu0 %v1405_v14 }
  0x4c   :  { %820 = vmatmul.mubr.bf16.gmra.mrb[12].mxu1 %v1408_v15 }
  0xf5   :  { %v1225_v16 = vpop.f32.mrb[0].mxu0 }
  0xf6   :  { %v1226_v17 = vpop.f32.mrb[1].mxu0 }
  0xf7   :  { %v1676_v18 = vadd.f32 %v1226_v17, %v1225_v16  ;;  %v1228_v19 = vpop.f32.mrb[2].mxu0  ;;  %v1253_v24 = vpop.f32.mrb[0].mxu1 }
  0xf8   :  { %v1229_v20 = vpop.f32.mrb[3].mxu0  ;;  %v1254_v26 = vpop.f32.mrb[1].mxu1 }
  0xf9   :  { %v1678_v21 = vadd.f32 %v1229_v20, %v1228_v19  ;;  %v829_v22 = vsel %vm828_vm0, %v1676_v18, 0.0  ;;  %v1684_v27 = vadd.f32 %v1254_v26, %v1253_v24  ;;  %v1256_v28 = vpop.f32.mrb[2].mxu1 }
  0xfa   :  { %v1257_v29 = vpop.f32.mrb[3].mxu1 }
  0xfb   :  { %v830_v23 = vsel %vm828_vm0, %v1678_v21, 0.0  ;;  %v1686_v31 = vadd.f32 %v1257_v29, %v1256_v28  ;;  %v836_v41 = vsel %vm828_vm0, %v1684_v27, 0.0 }
  0xfc   :  { %v831_v25 = vadd.f32 %v830_v23, %v829_v22 }
  0xfd   :  { %v1231_v30 = vpop.f32.mrb[4].mxu0  ;;  %v838_v44 = vsel %vm828_vm0, %v1686_v31, 0.0 }
  0xfe   :  { %v1232_v32 = vpop.f32.mrb[5].mxu0 }
  0xff   :  { %v1688_v33 = vadd.f32 %v1232_v32, %v1231_v30  ;;  %v1234_v34 = vpop.f32.mrb[6].mxu0  ;;  %v1259_v43 = vpop.f32.mrb[4].mxu1 }
 0x100   :  { %v1235_v35 = vpop.f32.mrb[7].mxu0  ;;  %v1260_v45 = vpop.f32.mrb[5].mxu1 }
 0x101   :  { %v832_v36 = vsel %vm828_vm0, %v1688_v33, 0.0  ;;  %v1692_v37 = vadd.f32 %v1235_v35, %v1234_v34  ;;  %v1261_v46 = vadd.f32 %v1260_v45, %v1259_v43  ;;  %v1262_v48 = vpop.f32.mrb[6].mxu1 }
 0x102   :  { %v833_v38 = vadd.f32 %v832_v36, %v831_v25  ;;  %v1263_v49 = vpop.f32.mrb[7].mxu1 }
 0x103   :  { %v834_v39 = vsel %vm828_vm0, %v1692_v37, 0.0  ;;  %v840_v50 = vsel %vm828_vm0, %v1261_v46, 0.0  ;;  %v1264_v51 = vadd.f32 %v1263_v49, %v1262_v48 }
 0x104   :  { %v835_v40 = vadd.f32 %v834_v39, %v833_v38 }
 0x105   :  { %v842_v53 = vsel %vm828_vm0, %v1264_v51, 0.0 }
 0x106   :  { %v837_v42 = vadd.f32 %v836_v41, %v835_v40 }
 0x108   :  { %v839_v47 = vadd.f32 %v838_v44, %v837_v42 }
 0x10a   :  { %v841_v52 = vadd.f32 %v840_v50, %v839_v47 }
 0x10c   :  { %v843_v54 = vadd.f32 %v842_v53, %v841_v52 }
 0x115   :  { %v1281_v55 = vpop.f32.mrb[8].mxu0 }
 0x116   :  { %v1282_v56 = vpop.f32.mrb[9].mxu0 }
 0x117   :  { %v1283_v57 = vadd.f32 %v1282_v56, %v1281_v55  ;;  %v1284_v58 = vpop.f32.mrb[10].mxu0  ;;  %v1309_v63 = vpop.f32.mrb[8].mxu1 }
 0x118   :  { %v1285_v59 = vpop.f32.mrb[11].mxu0  ;;  %v1310_v1 = vpop.f32.mrb[9].mxu1 }
 0x119   :  { %v844_v60 = vsel %vm828_vm0, %v1283_v57, 0.0  ;;  %v1286_v61 = vadd.f32 %v1285_v59, %v1284_v58  ;;  %v1311_v3 = vadd.f32 %v1310_v1, %v1309_v63  ;;  %v1312_v4 = vpop.f32.mrb[10].mxu1 }
 0x11a   :  { %v845_v62 = vadd.f32 %v844_v60, %v843_v54  ;;  %v1313_v6 = vpop.f32.mrb[11].mxu1 }
 0x11b   :  { %v846_v0 = vsel %vm828_vm0, %v1286_v61, 0.0  ;;  %v1314_v7 = vadd.f32 %v1313_v6, %v1312_v4  ;;  %v852_v23 = vsel %vm828_vm0, %v1311_v3, 0.0 }
 0x11c   :  { %v847_v2 = vadd.f32 %v846_v0, %v845_v62 }
 0x11d   :  { %v1287_v5 = vpop.f32.mrb[12].mxu0  ;;  %v854_v28 = vsel %vm828_vm0, %v1314_v7, 0.0 }
 0x11e   :  { %v1288_v8 = vpop.f32.mrb[13].mxu0 }
 0x11f   :  { %v1289_v9 = vadd.f32 %v1288_v8, %v1287_v5  ;;  %v1290_v10 = vpop.f32.mrb[14].mxu0  ;;  %v1315_v15 = vpop.f32.mrb[12].mxu1 }
 0x120   :  { %v1291_v11 = vpop.f32.mrb[15].mxu0  ;;  %v1316_v17 = vpop.f32.mrb[13].mxu1 }
 0x121   :  { %v848_v12 = vsel %vm828_vm0, %v1289_v9, 0.0  ;;  %v1292_v13 = vadd.f32 %v1291_v11, %v1290_v10  ;;  %v1317_v20 = vadd.f32 %v1316_v17, %v1315_v15  ;;  %v1318_v22 = vpop.f32.mrb[14].mxu1 }
 0x122   :  { %v849_v14 = vadd.f32 %v848_v12, %v847_v2  ;;  %v1319_v24 = vpop.f32.mrb[15].mxu1 }
 0x123   :  { %v850_v16 = vsel %vm828_vm0, %v1292_v13, 0.0  ;;  %v1320_v26 = vadd.f32 %v1319_v24, %v1318_v22  ;;  %v856_v29 = vsel %vm828_vm0, %v1317_v20, 0.0 }
 0x124   :  { %v851_v19 = vadd.f32 %v850_v16, %v849_v14 }
 0x125   :  { %v858_v34 = vsel %vm828_vm0, %v1320_v26, 0.0 }
 0x126   :  { %v853_v25 = vadd.f32 %v852_v23, %v851_v19 }
 0x128   :  { %v855_v30 = vadd.f32 %v854_v28, %v853_v25 }
 0x12a   :  { %v857_v32 = vadd.f32 %v856_v29, %v855_v30 }
 0x12c   :  { %v859_v35 = vadd.f32 %v858_v34, %v857_v32 }
 0x12e   :  { %v860_v36 = vrot.slane %v859_v35, 4 }
 0x130   :  { %v861_v38 = vadd.f32 %v860_v36, %v859_v35 }
 0x132   :  { %v862_v39 = vrot.slane %v861_v38, 2 }
 0x134   :  { %v863_v40 = vadd.f32 %v862_v39, %v861_v38 }
 0x136   :  { %v864_v41 = vrot.slane %v863_v40, 1 }
 0x138   :  { %v865_v42 = vadd.f32 %v864_v41, %v863_v40 }
 0x13a   :  { %v866_v43 = vmul.f32 0.0078125, %v865_v42 }
 0x13c   :  { %v1711_v44 = vsub.f32 %v1676_v18, %v866_v43  ;;  %v1714_v45 = vsub.f32 %v1678_v21, %v866_v43  ;;  %v1717_v47 = vsub.f32 %v1688_v33, %v866_v43  ;;  %v1720_v48 = vsub.f32 %v1692_v37, %v866_v43 }
 0x13d   :  { %v1723_v49 = vsub.f32 %v1684_v27, %v866_v43  ;;  %v1726_v50 = vsub.f32 %v1686_v31, %v866_v43  ;;  %v1728_v52 = vsub.f32 %v1261_v46, %v866_v43  ;;  %v1730_v53 = vsub.f32 %v1264_v51, %v866_v43 }
 0x13e   :  { %v1732_v18 = vsub.f32 %v1283_v57, %v866_v43  ;;  %v1734_v21 = vsub.f32 %v1286_v61, %v866_v43  ;;  %v1736_v54 = vsub.f32 %v1289_v9, %v866_v43  ;;  %v1738_v33 = vsub.f32 %v1292_v13, %v866_v43 }
 0x13f   :  { %v1740_v37 = vsub.f32 %v1311_v3, %v866_v43  ;;  %v1742_v55 = vsub.f32 %v1314_v7, %v866_v43  ;;  %v1744_v27 = vsub.f32 %v1317_v20, %v866_v43  ;;  %v1746_v31 = vsub.f32 %v1320_v26, %v866_v43 }
 0x140   :  { %v883_v46 = vmul.f32 %v1711_v44, %v1711_v44  ;;  %v884_v51 = vmul.f32 %v1714_v45, %v1714_v45  ;;  %v885_v56 = vmul.f32 %v1717_v47, %v1717_v47  ;;  %v886_v57 = vmul.f32 %v1720_v48, %v1720_v48 }
 0x141   :  { %v887_v61 = vmul.f32 %v1723_v49, %v1723_v49  ;;  %v888_v0 = vmul.f32 %v1726_v50, %v1726_v50  ;;  %v889_v3 = vmul.f32 %v1728_v52, %v1728_v52  ;;  %v890_v6 = vmul.f32 %v1730_v53, %v1730_v53 }
 0x142   :  { %v899_v58 = vsel %vm828_vm0, %v883_v46, 0.0  ;;  %v900_v59 = vsel %vm828_vm0, %v884_v51, 0.0  ;;  %v902_v62 = vsel %vm828_vm0, %v885_v56, 0.0  ;;  %v904_v1 = vsel %vm828_vm0, %v886_v57, 0.0 }
 0x143   :  { %v901_v60 = vadd.f32 %v900_v59, %v899_v58  ;;  %v906_v4 = vsel %vm828_vm0, %v887_v61, 0.0  ;;  %v908_v7 = vsel %vm828_vm0, %v888_v0, 0.0  ;;  %v891_v9 = vmul.f32 %v1732_v18, %v1732_v18 }
 0x144   :  { %v910_v10 = vsel %vm828_vm0, %v889_v3, 0.0  ;;  %v892_v12 = vmul.f32 %v1734_v21, %v1734_v21  ;;  %v912_v13 = vsel %vm828_vm0, %v890_v6, 0.0  ;;  %v893_v15 = vmul.f32 %v1736_v54, %v1736_v54 }
 0x145   :  { %v903_v63 = vadd.f32 %v902_v62, %v901_v60  ;;  %v914_v16 = vsel %vm828_vm0, %v891_v9, 0.0  ;;  %v894_v19 = vmul.f32 %v1738_v33, %v1738_v33  ;;  %v895_v23 = vmul.f32 %v1740_v37, %v1740_v37 }
 0x146   :  { %v916_v20 = vsel %vm828_vm0, %v892_v12, 0.0  ;;  %v918_v24 = vsel %vm828_vm0, %v893_v15, 0.0  ;;  %v896_v26 = vmul.f32 %v1742_v55, %v1742_v55  ;;  %v897_v30 = vmul.f32 %v1744_v27, %v1744_v27  ;;  %v1208_v12 = vld [vmem:[%s1885_s3] ss:$0 sm:$0xff] }
 0x147   :  { %v905_v2 = vadd.f32 %v904_v1, %v903_v63  ;;  %v920_v28 = vsel %vm828_vm0, %v894_v19, 0.0  ;;  %v922_v32 = vsel %vm828_vm0, %v895_v23, 0.0  ;;  %v898_v35 = vmul.f32 %v1746_v31, %v1746_v31  ;;  %v939_v63 = vld [vmem:[%s1884_s2] sm:$0x1] }
 0x148   :  { %v924_v36 = vsel %vm828_vm0, %v896_v26, 0.0  ;;  %v926_v39 = vsel %vm828_vm0, %v897_v30, 0.0  ;;  %v941_v61 = vlaneseq }
 0x149   :  { %v907_v5 = vadd.f32 %v906_v4, %v905_v2  ;;  %v928_v41 = vsel %vm828_vm0, %v898_v35, 0.0 }
 0x14a   :  { %v942_v62 = vshrl.u32 %v941_v61, 7 }
 0x14b   :  { %v909_v8 = vadd.f32 %v908_v7, %v907_v5 }
 0x14c   :  { %v943_v0 = vsub.s32 0, %v942_v62 }
 0x14d   :  { %v911_v11 = vadd.f32 %v910_v10, %v909_v8 }
 0x14f   :  { %v913_v14 = vadd.f32 %v912_v13, %v911_v11 }
 0x151   :  { %v915_v17 = vadd.f32 %v914_v16, %v913_v14 }
 0x153   :  { %v917_v22 = vadd.f32 %v916_v20, %v915_v17 }
 0x155   :  { %v919_v25 = vadd.f32 %v918_v24, %v917_v22 }
 0x157   :  { %v921_v29 = vadd.f32 %v920_v28, %v919_v25 }
 0x159   :  { %v923_v34 = vadd.f32 %v922_v32, %v921_v29 }
 0x15b   :  { %v925_v38 = vadd.f32 %v924_v36, %v923_v34 }
 0x15d   :  { %v927_v40 = vadd.f32 %v926_v39, %v925_v38 }
 0x15f   :  { %v929_v42 = vadd.f32 %v928_v41, %v927_v40 }
 0x161   :  { %v930_v43 = vrot.slane %v929_v42, 4 }
 0x163   :  { %v931_v46 = vadd.f32 %v930_v43, %v929_v42 }
 0x165   :  { %v932_v51 = vrot.slane %v931_v46, 2 }
 0x167   :  { %v933_v56 = vadd.f32 %v932_v51, %v931_v46 }
 0x169   :  { %v934_v57 = vrot.slane %v933_v56, 1 }
 0x16b   :  { %v935_v58 = vadd.f32 %v934_v57, %v933_v56 }
 0x16d   :  { %v936_v59 = vmul.f32 0.0078125, %v935_v58 }
 0x16f   :  { %v937_v60 = vadd.f32 1e-05, %v936_v59 }
 0x171   :  { %1409 = vrsqrt.f32 %v937_v60 }
 0x17b   :  { %v1410_v1 = vpop.eup %1409 }
 0x17c   :  { %v940_v2 = vmul.f32 %v1410_v1, %v939_v63 }
 0x17e   :  { %v944_v3 = vrot.slane %v940_v2, %v943_v0 }
 0x180   :  { %v945_v4 = vmul.f32 %v944_v3, %v1711_v44  ;;  %v946_v5 = vmul.f32 %v944_v3, %v1714_v45  ;;  %v947_v6 = vmul.f32 %v944_v3, %v1717_v47  ;;  %v948_v7 = vmul.f32 %v944_v3, %v1720_v48 }
 0x181   :  { %v949_v8 = vmul.f32 %v944_v3, %v1723_v49  ;;  %v950_v9 = vmul.f32 %v944_v3, %v1726_v50  ;;  %v951_v10 = vmul.f32 %v944_v3, %v1728_v52  ;;  %v952_v11 = vmul.f32 %v944_v3, %v1730_v53 }
 0x182   :  { %v953_v44 = vmul.f32 %v944_v3, %v1732_v18  ;;  %v954_v45 = vmul.f32 %v944_v3, %v1734_v21  ;;  %v955_v47 = vmul.f32 %v944_v3, %v1736_v54  ;;  %v956_v48 = vmul.f32 %v944_v3, %v1738_v33 }
 0x183   :  { %v957_v49 = vmul.f32 %v944_v3, %v1740_v37  ;;  %v958_v50 = vmul.f32 %v944_v3, %v1742_v55  ;;  %v959_v52 = vmul.f32 %v944_v3, %v1744_v27  ;;  %v960_v53 = vmul.f32 %v944_v3, %v1746_v31 }
 0x184   :  { %v968_v13 = vadd.f32 %v1208_v12, %v945_v4  ;;  %v969_v14 = vadd.f32 %v1208_v12, %v946_v5  ;;  %v970_v15 = vadd.f32 %v1208_v12, %v947_v6  ;;  %v971_v16 = vadd.f32 %v1208_v12, %v948_v7 }
 0x185   :  { %v972_v17 = vadd.f32 %v1208_v12, %v949_v8  ;;  %v973_v18 = vadd.f32 %v1208_v12, %v950_v9  ;;  %v974_v19 = vadd.f32 %v1208_v12, %v951_v10  ;;  %v975_v21 = vadd.f32 %v1208_v12, %v952_v11 }
 0x186   :  { %v976_v20 = vadd.f32 %v1208_v12, %v953_v44  ;;  %v977_v54 = vadd.f32 %v1208_v12, %v954_v45  ;;  %v978_v22 = vadd.f32 %v1208_v12, %v955_v47  ;;  %v979_v33 = vadd.f32 %v1208_v12, %v956_v48 }
 0x187   :  { %v980_v23 = vadd.f32 %v1208_v12, %v957_v49  ;;  %v981_v37 = vadd.f32 %v1208_v12, %v958_v50  ;;  %v982_v24 = vadd.f32 %v1208_v12, %v959_v52  ;;  %v983_v55 = vadd.f32 %v1208_v12, %v960_v53 }
 0x188   :  { %v984_v25 = vmax.f32 %v968_v13, 0.0  ;;  %v985_v27 = vmax.f32 %v969_v14, 0.0  ;;  %v986_v26 = vmax.f32 %v970_v15, 0.0  ;;  %v987_v31 = vmax.f32 %v971_v16, 0.0 }
 0x189   :  { %v988_v28 = vmax.f32 %v972_v17, 0.0  ;;  %v989_v29 = vmax.f32 %v973_v18, 0.0  ;;  %v990_v30 = vmax.f32 %v974_v19, 0.0  ;;  %v991_v32 = vmax.f32 %v975_v21, 0.0 }
 0x18a   :  { %v992_v34 = vmax.f32 %v976_v20, 0.0  ;;  %v993_v35 = vmax.f32 %v977_v54, 0.0  ;;  %v994_v36 = vmax.f32 %v978_v22, 0.0  ;;  %v995_v38 = vmax.f32 %v979_v33, 0.0  ;;  %1000 = vst.msk [vmem:[%s1886_s4] sm:$0xff] %vm828_vm0, %v984_v25  ;;  %1001 = vst.msk [vmem:[%s1886_s4 + $0x8] sm:$0xff] %vm828_vm0, %v985_v27 }
 0x18b   :  { %1002 = vst.msk [vmem:[%s1886_s4 + $0x10] sm:$0xff] %vm828_vm0, %v986_v26  ;;  %1003 = vst.msk [vmem:[%s1886_s4 + $0x18] sm:$0xff] %vm828_vm0, %v987_v31  ;;  %v996_v39 = vmax.f32 %v980_v23, 0.0  ;;  %v997_v40 = vmax.f32 %v981_v37, 0.0  ;;  %v998_v41 = vmax.f32 %v982_v24, 0.0  ;;  %v999_v42 = vmax.f32 %v983_v55, 0.0 }
 0x18c   :  { %1004 = vst.msk [vmem:[%s1886_s4 + $0x20] sm:$0xff] %vm828_vm0, %v988_v28  ;;  %1005 = vst.msk [vmem:[%s1886_s4 + $0x28] sm:$0xff] %vm828_vm0, %v989_v29 }
 0x18d   :  { %1006 = vst.msk [vmem:[%s1886_s4 + $0x30] sm:$0xff] %vm828_vm0, %v990_v30  ;;  %1007 = vst.msk [vmem:[%s1886_s4 + $0x38] sm:$0xff] %vm828_vm0, %v991_v32 }
 0x18e   :  { %1008 = vst.msk [vmem:[%s1886_s4 + $0x40] sm:$0xff] %vm828_vm0, %v992_v34  ;;  %1009 = vst.msk [vmem:[%s1886_s4 + $0x48] sm:$0xff] %vm828_vm0, %v993_v35 }
 0x18f   :  { %1010 = vst.msk [vmem:[%s1886_s4 + $0x50] sm:$0xff] %vm828_vm0, %v994_v36  ;;  %1011 = vst.msk [vmem:[%s1886_s4 + $0x58] sm:$0xff] %vm828_vm0, %v995_v38 }
 0x190   :  { %1012 = vst.msk [vmem:[%s1886_s4 + $0x60] sm:$0xff] %vm828_vm0, %v996_v39  ;;  %1013 = vst.msk [vmem:[%s1886_s4 + $0x68] sm:$0xff] %vm828_vm0, %v997_v40 }
 0x191   :  { %1014 = vst.msk [vmem:[%s1886_s4 + $0x70] sm:$0xff] %vm828_vm0, %v998_v41  ;;  %1015 = vst.msk [vmem:[%s1886_s4 + $0x78] sm:$0xff] %vm828_vm0, %v999_v42 }

// kernel: vae_forward.16
= control target key start
LH: loop header
LB: loop body
LE: loop exit
PB: predicated region body
PF: predicated region fallthrough
CT: control target
= control target key end

     0   :  { %vm924_vm0 = vcmask 130048   ;;  %s3780_s1 = inlined_call_operand.vmem [shape: bf16[4,128,16], index: 1, kind: input, shape index: {}]   ;;  %s3781_s0 = inlined_call_operand.vmem [shape: bf16[4,128,128], index: 0, kind: input, shape index: {}]   ;;  %s3782_s2 = inlined_call_operand.vmem [shape: f32[1,16], index: 2, kind: input, shape index: {}]   ;;  %s3783_s3 = inlined_call_operand.vmem [shape: f32[1,16], index: 3, kind: input, shape index: {}]   ;;  %s3784_s4 = inlined_call_operand.vmem [shape: f32[512,16], index: 4, kind: output, shape index: {}]  }
   0x1   :  { %v1949_v0 = vld [vmem:[%s3780_s1] sm:$0xff]   ;;  %v1950_v1 = vld [vmem:[%s3780_s1 + $0x8] sm:$0xff]   ;;  %v1951_v2 = vld [vmem:[%s3780_s1 + $0x10] sm:$0xff]  }
   0x2   :  { %1821 = vmatprep.subr.bf16.mxu0 %v1949_v0  ;;  %v1952_v3 = vld [vmem:[%s3780_s1 + $0x18] sm:$0xff]   ;;  %v1957_v4 = vld [vmem:[%s3780_s1 + $0x40] sm:$0xff]   ;;  %v1960_v7 = vld [vmem:[%s3780_s1 + $0x48] sm:$0xff]  }
   0x3   :  { %1822 = vmatpush3.bf16.msra.mxu0 %v1949_v0  ;;  %v1958_v5 = vld [vmem:[%s3781_s0] sm:$0xff]   ;;  %1853 = vmatprep.subr.bf16.mxu1 %v1957_v4  ;;  %v1961_v8 = vld [vmem:[%s3780_s1 + $0x50] sm:$0xff]   ;;  %v1954_v9 = vld [vmem:[%s3780_s1 + $0x28] sm:$0xff]  }
   0x4   :  { %1823 = vmatprep.subr.bf16.mxu0 %v1950_v1  ;;  %v1953_v6 = vld [vmem:[%s3780_s1 + $0x20] sm:$0xff]   ;;  %1854 = vmatpush3.bf16.msra.mxu1 %v1957_v4  ;;  %v1964_v10 = vld [vmem:[%s3780_s1 + $0x58] sm:$0xff]   ;;  %v1955_v11 = vld [vmem:[%s3780_s1 + $0x30] sm:$0xff]  }
   0x5   :  { %1837 = vmatprep.mubr.bf16.mxu0 %v1958_v5  ;;  %1855 = vmatprep.subr.bf16.mxu1 %v1960_v7  ;;  %v1965_v12 = vld [vmem:[%s3780_s1 + $0x60] sm:$0xff]   ;;  %v1956_v13 = vld [vmem:[%s3780_s1 + $0x38] sm:$0xff]   ;;  %v1968_v14 = vld [vmem:[%s3780_s1 + $0x68] sm:$0xff]  }
   0x6   :  { %v1973_v15 = vld [vmem:[%s3781_s0 + $0x40] sm:$0xff]   ;;  %v1969_v16 = vld [vmem:[%s3780_s1 + $0x70] sm:$0xff]   ;;  %v1959_v18 = vld [vmem:[%s3781_s0 + $0x8] sm:$0xff]  }
   0x7   :  { %1824 = vmatpush3.bf16.msra.mxu0 %v1950_v1  ;;  %1869 = vmatprep.mubr.bf16.mxu1 %v1973_v15  ;;  %v1975_v17 = vld [vmem:[%s3780_s1 + $0x80] sm:$0xff]   ;;  %v1962_v19 = vld [vmem:[%s3781_s0 + $0x10] sm:$0xff]   ;;  %v1972_v20 = vld [vmem:[%s3780_s1 + $0x78] sm:$0xff]  }
   0x8   :  { %1825 = vmatprep.subr.bf16.mxu0 %v1951_v2  ;;  %1856 = vmatpush3.bf16.msra.mxu1 %v1960_v7  ;;  %v1976_v21 = vld [vmem:[%s3780_s1 + $0x88] sm:$0xff]   ;;  %v1963_v22 = vld [vmem:[%s3781_s0 + $0x18] sm:$0xff]   ;;  %v1966_v23 = vld [vmem:[%s3781_s0 + $0x20] sm:$0xff]  }
   0x9   :  { %1857 = vmatprep.subr.bf16.mxu1 %v1961_v8  ;;  %v1979_v24 = vld [vmem:[%s3780_s1 + $0x90] sm:$0xff]   ;;  %v1974_v25 = vld [vmem:[%s3781_s0 + $0x48] sm:$0xff]   ;;  %v1980_v27 = vld [vmem:[%s3780_s1 + $0x98] sm:$0xff]  }
   0xa   :  { %v1977_v26 = vld [vmem:[%s3781_s0 + $0x50] sm:$0xff]   ;;  %v1991_v28 = vld [vmem:[%s3780_s1 + $0xc0] sm:$0xff]   ;;  %v1992_v29 = vld [vmem:[%s3780_s1 + $0xc8] sm:$0xff]  }
   0xb   :  { %1826 = vmatpush3.bf16.msra.mxu0 %v1951_v2  ;;  %v1967_v30 = vld [vmem:[%s3781_s0 + $0x28] sm:$0xff]   ;;  %v1970_v31 = vld [vmem:[%s3781_s0 + $0x30] sm:$0xff]   ;;  %v1983_v32 = vld [vmem:[%s3780_s1 + $0xa0] sm:$0xff]  }
   0xc   :  { %1827 = vmatprep.subr.bf16.mxu0 %v1952_v3  ;;  %1858 = vmatpush3.bf16.msra.mxu1 %v1961_v8  ;;  %v1978_v33 = vld [vmem:[%s3781_s0 + $0x58] sm:$0xff]   ;;  %v1981_v34 = vld [vmem:[%s3781_s0 + $0x60] sm:$0xff]   ;;  %v1995_v35 = vld [vmem:[%s3780_s1 + $0xd0] sm:$0xff]  }
   0xd   :  { %1859 = vmatprep.subr.bf16.mxu1 %v1964_v10  ;;  %v1984_v36 = vld [vmem:[%s3780_s1 + $0xa8] sm:$0xff]   ;;  %v1996_v37 = vld [vmem:[%s3780_s1 + $0xd8] sm:$0xff]   ;;  %v1987_v40 = vld [vmem:[%s3780_s1 + $0xb0] sm:$0xff]  }
   0xe   :  { %v1971_v38 = vld [vmem:[%s3781_s0 + $0x38] sm:$0xff]   ;;  %v1982_v39 = vld [vmem:[%s3781_s0 + $0x68] sm:$0xff]   ;;  %v1985_v41 = vld [vmem:[%s3781_s0 + $0x70] sm:$0xff]  }
   0xf   :  { %1828 = vmatpush3.bf16.msra.mxu0 %v1952_v3  ;;  %v1989_v42 = vld [vmem:[%s3781_s0 + $0x80] sm:$0xff]   ;;  %v1988_v44 = vld [vmem:[%s3780_s1 + $0xb8] sm:$0xff]   ;;  %v2000_v45 = vld [vmem:[%s3780_s1 + $0xe8] sm:$0xff]  }
  0x10   :  { %1829 = vmatprep.subr.bf16.mxu0 %v1953_v6  ;;  %1860 = vmatpush3.bf16.msra.mxu1 %v1964_v10  ;;  %v1999_v43 = vld [vmem:[%s3780_s1 + $0xe0] sm:$0xff]   ;;  %v1986_v46 = vld [vmem:[%s3781_s0 + $0x78] sm:$0xff]   ;;  %v1990_v47 = vld [vmem:[%s3781_s0 + $0x88] sm:$0xff]  }
  0x11   :  { %1861 = vmatprep.subr.bf16.mxu1 %v1965_v12  ;;  %v2003_v48 = vld [vmem:[%s3780_s1 + $0xf0] sm:$0xff]   ;;  %v2005_v49 = vld [vmem:[%s3781_s0 + $0xc0] sm:$0xff]   ;;  %v2004_v51 = vld [vmem:[%s3780_s1 + $0xf8] sm:$0xff]  }
  0x12   :  { %v1993_v50 = vld [vmem:[%s3781_s0 + $0x90] sm:$0xff]   ;;  %v1994_v52 = vld [vmem:[%s3781_s0 + $0x98] sm:$0xff]   ;;  %v1997_v53 = vld [vmem:[%s3781_s0 + $0xa0] sm:$0xff]  }
  0x13   :  { %1830 = vmatpush3.bf16.msra.mxu0 %v1953_v6  ;;  %v2006_v54 = vld [vmem:[%s3781_s0 + $0xc8] sm:$0xff]   ;;  %v2007_v55 = vld [vmem:[%s3781_s0 + $0xd0] sm:$0xff]   ;;  %v2008_v58 = vld [vmem:[%s3781_s0 + $0xd8] sm:$0xff]  }
  0x14   :  { %1831 = vmatprep.subr.bf16.mxu0 %v1954_v9  ;;  %1862 = vmatpush3.bf16.msra.mxu1 %v1965_v12  ;;  %v1998_v56 = vld [vmem:[%s3781_s0 + $0xa8] sm:$0xff]   ;;  %v2001_v57 = vld [vmem:[%s3781_s0 + $0xb0] sm:$0xff]   ;;  %v2009_v59 = vld [vmem:[%s3781_s0 + $0xe0] sm:$0xff]  }
  0x15   :  { %1863 = vmatprep.subr.bf16.mxu1 %v1968_v14  ;;  %v2002_v60 = vld [vmem:[%s3781_s0 + $0xb8] sm:$0xff]   ;;  %v2010_v61 = vld [vmem:[%s3781_s0 + $0xe8] sm:$0xff]   ;;  %v2011_v62 = vld [vmem:[%s3781_s0 + $0xf0] sm:$0xff]  }
  0x16   :  { %v2012_v63 = vld [vmem:[%s3781_s0 + $0xf8] sm:$0xff]  }
  0x17   :  { %1832 = vmatpush3.bf16.msra.mxu0 %v1954_v9 }
  0x18   :  { %1833 = vmatprep.subr.bf16.mxu0 %v1955_v11  ;;  %1864 = vmatpush3.bf16.msra.mxu1 %v1968_v14 }
  0x19   :  { %1865 = vmatprep.subr.bf16.mxu1 %v1969_v16 }
  0x1b   :  { %1834 = vmatpush3.bf16.msra.mxu0 %v1955_v11 }
  0x1c   :  { %1835 = vmatprep.subr.bf16.mxu0 %v1956_v13  ;;  %1866 = vmatpush3.bf16.msra.mxu1 %v1969_v16 }
  0x1d   :  { %1867 = vmatprep.subr.bf16.mxu1 %v1972_v20 }
  0x1f   :  { %1836 = vmatpush3.bf16.msra.mxu0 %v1956_v13 }
  0x20   :  { %1885 = vmatprep.subr.bf16.mxu0 %v1975_v17  ;;  %1868 = vmatpush3.bf16.msra.mxu1 %v1972_v20 }
  0x21   :  { %1917 = vmatprep.subr.bf16.mxu1 %v1991_v28 }
  0x22   :  { %1838 = vmatmul.mubr.bf16.vlgmr.msra.gmra.mrb[0].mxu0 %v1959_v18 }
  0x23   :  { %1841 = vmatprep.mubr.bf16.mxu0 %v1962_v19  ;;  %1886 = vmatpush3.bf16.msra.mxu0 %v1975_v17 }
  0x24   :  { %1887 = vmatprep.subr.bf16.mxu0 %v1976_v21  ;;  %1870 = vmatmul.mubr.bf16.vlgmr.msra.gmra.mrb[0].mxu1 %v1974_v25 }
  0x25   :  { %1873 = vmatprep.mubr.bf16.mxu1 %v1977_v26  ;;  %1918 = vmatpush3.bf16.msra.mxu1 %v1991_v28 }
  0x26   :  { %1919 = vmatprep.subr.bf16.mxu1 %v1992_v29 }
  0x27   :  { %1888 = vmatpush3.bf16.msra.mxu0 %v1976_v21 }
  0x28   :  { %1889 = vmatprep.subr.bf16.mxu0 %v1979_v24 }
  0x29   :  { %1920 = vmatpush3.bf16.msra.mxu1 %v1992_v29 }
  0x2a   :  { %1842 = vmatmul.mubr.bf16.gmra.mrb[4].mxu0 %v1963_v22  ;;  %1921 = vmatprep.subr.bf16.mxu1 %v1995_v35 }
  0x2b   :  { %1845 = vmatprep.mubr.bf16.mxu0 %v1966_v23  ;;  %1890 = vmatpush3.bf16.msra.mxu0 %v1979_v24 }
  0x2c   :  { %1891 = vmatprep.subr.bf16.mxu0 %v1980_v27  ;;  %1874 = vmatmul.mubr.bf16.gmra.mrb[4].mxu1 %v1978_v33 }
  0x2d   :  { %1877 = vmatprep.mubr.bf16.mxu1 %v1981_v34  ;;  %1922 = vmatpush3.bf16.msra.mxu1 %v1995_v35 }
  0x2e   :  { %1923 = vmatprep.subr.bf16.mxu1 %v1996_v37 }
  0x2f   :  { %1892 = vmatpush3.bf16.msra.mxu0 %v1980_v27 }
  0x30   :  { %1893 = vmatprep.subr.bf16.mxu0 %v1983_v32 }
  0x31   :  { %1924 = vmatpush3.bf16.msra.mxu1 %v1996_v37 }
  0x32   :  { %1846 = vmatmul.mubr.bf16.gmra.mrb[8].mxu0 %v1967_v30  ;;  %1925 = vmatprep.subr.bf16.mxu1 %v1999_v43 }
  0x33   :  { %1849 = vmatprep.mubr.bf16.mxu0 %v1970_v31  ;;  %1894 = vmatpush3.bf16.msra.mxu0 %v1983_v32 }
  0x34   :  { %1895 = vmatprep.subr.bf16.mxu0 %v1984_v36  ;;  %1878 = vmatmul.mubr.bf16.gmra.mrb[8].mxu1 %v1982_v39 }
  0x35   :  { %1881 = vmatprep.mubr.bf16.mxu1 %v1985_v41  ;;  %1926 = vmatpush3.bf16.msra.mxu1 %v1999_v43 }
  0x36   :  { %1927 = vmatprep.subr.bf16.mxu1 %v2000_v45 }
  0x37   :  { %1896 = vmatpush3.bf16.msra.mxu0 %v1984_v36 }
  0x38   :  { %1897 = vmatprep.subr.bf16.mxu0 %v1987_v40 }
  0x39   :  { %1928 = vmatpush3.bf16.msra.mxu1 %v2000_v45 }
  0x3a   :  { %1850 = vmatmul.mubr.bf16.gmra.mrb[12].mxu0 %v1971_v38  ;;  %1929 = vmatprep.subr.bf16.mxu1 %v2003_v48 }
  0x3b   :  { %1901 = vmatprep.mubr.bf16.mxu0 %v1989_v42  ;;  %1898 = vmatpush3.bf16.msra.mxu0 %v1987_v40 }
  0x3c   :  { %1899 = vmatprep.subr.bf16.mxu0 %v1988_v44  ;;  %1882 = vmatmul.mubr.bf16.gmra.mrb[12].mxu1 %v1986_v46 }
  0x3d   :  { %1933 = vmatprep.mubr.bf16.mxu1 %v2005_v49  ;;  %1930 = vmatpush3.bf16.msra.mxu1 %v2003_v48 }
  0x3e   :  { %1931 = vmatprep.subr.bf16.mxu1 %v2004_v51 }
  0x3f   :  { %1900 = vmatpush3.bf16.msra.mxu0 %v1988_v44 }
  0x41   :  { %1932 = vmatpush3.bf16.msra.mxu1 %v2004_v51 }
  0x42   :  { %1902 = vmatmul.mubr.bf16.vlgmr.msra.gmra.mrb[16].mxu0 %v1990_v47 }
  0x43   :  { %1905 = vmatprep.mubr.bf16.mxu0 %v1993_v50 }
  0x44   :  { %1934 = vmatmul.mubr.bf16.vlgmr.msra.gmra.mrb[16].mxu1 %v2006_v54 }
  0x45   :  { %1937 = vmatprep.mubr.bf16.mxu1 %v2007_v55 }
  0x4a   :  { %1906 = vmatmul.mubr.bf16.gmra.mrb[20].mxu0 %v1994_v52 }
  0x4b   :  { %1909 = vmatprep.mubr.bf16.mxu0 %v1997_v53 }
  0x4c   :  { %1938 = vmatmul.mubr.bf16.gmra.mrb[20].mxu1 %v2008_v58 }
  0x4d   :  { %1941 = vmatprep.mubr.bf16.mxu1 %v2009_v59 }
  0x52   :  { %1910 = vmatmul.mubr.bf16.gmra.mrb[24].mxu0 %v1998_v56 }
  0x53   :  { %1913 = vmatprep.mubr.bf16.mxu0 %v2001_v57 }
  0x54   :  { %1942 = vmatmul.mubr.bf16.gmra.mrb[24].mxu1 %v2010_v61 }
  0x55   :  { %1945 = vmatprep.mubr.bf16.mxu1 %v2011_v62 }
  0x5a   :  { %1914 = vmatmul.mubr.bf16.gmra.mrb[28].mxu0 %v2002_v60 }
  0x5c   :  { %1946 = vmatmul.mubr.bf16.gmra.mrb[28].mxu1 %v2012_v63 }
  0xf5   :  { %v2232_v0 = vpop.f32.mrb[0].mxu0 }
  0xf6   :  { %v2234_v1 = vpop.f32.mrb[1].mxu0  ;;  %v928_v7 = vsel %vm924_vm0, %v2232_v0, 0.0 }
  0xf7   :  { %v2236_v2 = vpop.f32.mrb[2].mxu0  ;;  %v925_v4 = vsel %vm924_vm0, %v2234_v1, 0.0  ;;  %v2250_v11 = vpop.f32.mrb[0].mxu1 }
  0xf8   :  { %v2238_v3 = vpop.f32.mrb[3].mxu0  ;;  %v930_v9 = vsel %vm924_vm0, %v2236_v2, 0.0  ;;  %v2254_v14 = vpop.f32.mrb[1].mxu1 }
  0xf9   :  { %v926_v5 = vsel %vm924_vm0, %v2238_v3, 0.0  ;;  %v2260_v17 = vpop.f32.mrb[2].mxu1  ;;  %v956_v58 = vsel %vm924_vm0, %v2254_v14, 0.0 }
  0xfa   :  { %v927_v6 = vadd.f32 %v926_v5, %v925_v4  ;;  %v2264_v20 = vpop.f32.mrb[3].mxu1 }
  0xfc   :  { %v929_v8 = vadd.f32 %v928_v7, %v927_v6 }
  0xfd   :  { %v2248_v10 = vpop.f32.mrb[4].mxu0 }
  0xfe   :  { %v2252_v12 = vpop.f32.mrb[5].mxu0  ;;  %v931_v13 = vadd.f32 %v930_v9, %v929_v8  ;;  %v936_v23 = vsel %vm924_vm0, %v2248_v10, 0.0  ;;  %v958_v8 = vsel %vm924_vm0, %v2264_v20, 0.0 }
  0xff   :  { %v932_v15 = vsel %vm924_vm0, %v2252_v12, 0.0  ;;  %v2258_v16 = vpop.f32.mrb[6].mxu0  ;;  %v2274_v27 = vpop.f32.mrb[4].mxu1 }
 0x100   :  { %v933_v18 = vadd.f32 %v932_v15, %v931_v13  ;;  %v2262_v19 = vpop.f32.mrb[7].mxu0  ;;  %v938_v25 = vsel %vm924_vm0, %v2258_v16, 0.0  ;;  %3826 = vst [vmem:[#allocation2_spill] sm:$0xff] %v2274_v27  ;;  %v2278_v30 = vpop.f32.mrb[5].mxu1  ;;  %v960_v15 = vsel %vm924_vm0, %v2250_v11, 0.0 }
 0x101   :  { %v934_v21 = vsel %vm924_vm0, %v2262_v19, 0.0  ;;  %v2284_v33 = vpop.f32.mrb[6].mxu1 }
 0x102   :  { %v935_v22 = vadd.f32 %v934_v21, %v933_v18  ;;  %3827 = vst [vmem:[#allocation3_spill] sm:$0xff] %v2284_v33  ;;  %v2288_v36 = vpop.f32.mrb[7].mxu1  ;;  %v962_v21 = vsel %vm924_vm0, %v2260_v17, 0.0 }
 0x104   :  { %v937_v24 = vadd.f32 %v936_v23, %v935_v22  ;;  %v964_v22 = vsel %vm924_vm0, %v2278_v30, 0.0 }
 0x105   :  { %v2272_v26 = vpop.f32.mrb[8].mxu0 }
 0x106   :  { %v2276_v28 = vpop.f32.mrb[9].mxu0  ;;  %v939_v29 = vadd.f32 %v938_v25, %v937_v24  ;;  %v944_v39 = vsel %vm924_vm0, %v2272_v26, 0.0 }
 0x107   :  { %v940_v31 = vsel %vm924_vm0, %v2276_v28, 0.0  ;;  %v2282_v32 = vpop.f32.mrb[10].mxu0  ;;  %v2298_v43 = vpop.f32.mrb[8].mxu1 }
 0x108   :  { %v941_v34 = vadd.f32 %v940_v31, %v939_v29  ;;  %v2286_v35 = vpop.f32.mrb[11].mxu0  ;;  %v946_v41 = vsel %vm924_vm0, %v2282_v32, 0.0  ;;  %3828 = vst [vmem:[#allocation4_spill] sm:$0xff] %v2298_v43  ;;  %v2302_v46 = vpop.f32.mrb[9].mxu1 }
 0x109   :  { %v942_v37 = vsel %vm924_vm0, %v2286_v35, 0.0  ;;  %3829 = vst [vmem:[#allocation5_spill] sm:$0xff] %v2302_v46  ;;  %v2308_v49 = vpop.f32.mrb[10].mxu1 }
 0x10a   :  { %v943_v38 = vadd.f32 %v942_v37, %v941_v34  ;;  %3830 = vst [vmem:[#allocation6_spill] sm:$0xff] %v2308_v49  ;;  %v2312_v52 = vpop.f32.mrb[11].mxu1 }
 0x10b   :  { %3831 = vst [vmem:[#allocation7_spill] sm:$0xff] %v2312_v52 }
 0x10c   :  { %v945_v40 = vadd.f32 %v944_v39, %v943_v38  ;;  %v966_v38 = vsel %vm924_vm0, %v2288_v36, 0.0 }
 0x10d   :  { %v2296_v42 = vpop.f32.mrb[12].mxu0 }
 0x10e   :  { %v2300_v44 = vpop.f32.mrb[13].mxu0  ;;  %v947_v45 = vadd.f32 %v946_v41, %v945_v40  ;;  %v952_v55 = vsel %vm924_vm0, %v2296_v42, 0.0 }
 0x10f   :  { %v948_v47 = vsel %vm924_vm0, %v2300_v44, 0.0  ;;  %v2306_v48 = vpop.f32.mrb[14].mxu0  ;;  %v2322_v59 = vpop.f32.mrb[12].mxu1 }
 0x110   :  { %v949_v50 = vadd.f32 %v948_v47, %v947_v45  ;;  %v2310_v51 = vpop.f32.mrb[15].mxu0  ;;  %v954_v57 = vsel %vm924_vm0, %v2306_v48, 0.0  ;;  %3832 = vst [vmem:[#allocation8_spill] sm:$0xff] %v2322_v59  ;;  %v2324_v61 = vpop.f32.mrb[13].mxu1  ;;  %v968_v47 = vsel %vm924_vm0, %v2274_v27, 0.0 }
 0x111   :  { %v950_v53 = vsel %vm924_vm0, %v2310_v51, 0.0  ;;  %3833 = vst [vmem:[#allocation9_spill] sm:$0xff] %v2324_v61  ;;  %v2328_v63 = vpop.f32.mrb[14].mxu1 }
 0x112   :  { %v951_v54 = vadd.f32 %v950_v53, %v949_v50  ;;  %v2332_v6 = vpop.f32.mrb[15].mxu1  ;;  %v970_v53 = vsel %vm924_vm0, %v2284_v33, 0.0 }
 0x113   :  { %3836 = vst [vmem:[#allocation12_spill] sm:$0xff] %v2332_v6 }
 0x114   :  { %v953_v56 = vadd.f32 %v952_v55, %v951_v54  ;;  %v972_v54 = vsel %vm924_vm0, %v2302_v46, 0.0 }
 0x115   :  { %v2326_v62 = vpop.f32.mrb[16].mxu0 }
 0x116   :  { %v955_v60 = vadd.f32 %v954_v57, %v953_v56  ;;  %3834 = vst [vmem:[#allocation10_spill] sm:$0xff] %v2326_v62  ;;  %v2330_v4 = vpop.f32.mrb[17].mxu0 }
 0x117   :  { %3835 = vst [vmem:[#allocation11_spill] sm:$0xff] %v2330_v4  ;;  %v2334_v7 = vpop.f32.mrb[18].mxu0  ;;  %v2350_v29 = vpop.f32.mrb[16].mxu1 }
 0x118   :  { %v957_v5 = vadd.f32 %v956_v58, %v955_v60  ;;  %3837 = vst [vmem:[#allocation13_spill] sm:$0xff] %v2334_v7  ;;  %v2338_v9 = vpop.f32.mrb[19].mxu0  ;;  %v2354_v37 = vpop.f32.mrb[17].mxu1 }
 0x119   :  { %3838 = vst [vmem:[#allocation14_spill] sm:$0xff] %v2338_v9  ;;  %v2360_v40 = vpop.f32.mrb[18].mxu1 }
 0x11a   :  { %v959_v13 = vadd.f32 %v958_v8, %v957_v5  ;;  %v2362_v45 = vpop.f32.mrb[19].mxu1 }
 0x11c   :  { %v961_v18 = vadd.f32 %v960_v15, %v959_v13  ;;  %v974_v13 = vsel %vm924_vm0, %v2312_v52, 0.0 }
 0x11d   :  { %v2346_v24 = vpop.f32.mrb[20].mxu0 }
 0x11e   :  { %v963_v23 = vadd.f32 %v962_v21, %v961_v18  ;;  %v2348_v25 = vpop.f32.mrb[21].mxu0 }
 0x11f   :  { %v2352_v34 = vpop.f32.mrb[22].mxu0  ;;  %v2374_v58 = vpop.f32.mrb[20].mxu1 }
 0x120   :  { %v965_v31 = vadd.f32 %v964_v22, %v963_v23  ;;  %v2358_v39 = vpop.f32.mrb[23].mxu0  ;;  %v2378_v8 = vpop.f32.mrb[21].mxu1  ;;  %v976_v23 = vsel %vm924_vm0, %v2298_v43, 0.0 }
 0x121   :  { %v2384_v18 = vpop.f32.mrb[22].mxu1 }
 0x122   :  { %v967_v41 = vadd.f32 %v966_v38, %v965_v31  ;;  %v2386_v22 = vpop.f32.mrb[23].mxu1  ;;  %v978_v38 = vsel %vm924_vm0, %v2308_v49, 0.0 }
 0x124   :  { %v969_v50 = vadd.f32 %v968_v47, %v967_v41  ;;  %v980_v41 = vsel %vm924_vm0, %v2324_v61, 0.0 }
 0x125   :  { %v2370_v56 = vpop.f32.mrb[24].mxu0 }
 0x126   :  { %v971_v55 = vadd.f32 %v970_v53, %v969_v50  ;;  %v2372_v57 = vpop.f32.mrb[25].mxu0 }
 0x127   :  { %v2376_v5 = vpop.f32.mrb[26].mxu0 }
 0x128   :  { %v973_v60 = vadd.f32 %v972_v54, %v971_v55  ;;  %v2382_v15 = vpop.f32.mrb[27].mxu0  ;;  %v2398_v54 = vpop.f32.mrb[24].mxu1 }
 0x129   :  { %3839 = vst [vmem:[#allocation15_spill] sm:$0xff] %v2398_v54 }
 0x12a   :  { %v975_v21 = vadd.f32 %v974_v13, %v973_v60  ;;  %v2402_v13 = vpop.f32.mrb[25].mxu1 }
 0x12b   :  { %v2408_v49 = vpop.f32.mrb[26].mxu1 }
 0x12c   :  { %v977_v31 = vadd.f32 %v976_v23, %v975_v21  ;;  %v982_v21 = vsel %vm924_vm0, %v2332_v6, 0.0  ;;  %3840 = vst [vmem:[#allocation16_spill] sm:$0xff] %v2408_v49 }
 0x12d   :  { %v2394_v50 = vpop.f32.mrb[28].mxu0 }
 0x12e   :  { %v979_v47 = vadd.f32 %v978_v38, %v977_v31  ;;  %v2396_v53 = vpop.f32.mrb[29].mxu0  ;;  %v2410_v31 = vpop.f32.mrb[27].mxu1  ;;  %v984_v38 = vsel %vm924_vm0, %v2322_v59, 0.0 }
 0x12f   :  { %v2400_v60 = vpop.f32.mrb[30].mxu0  ;;  %3841 = vst [vmem:[#allocation17_spill] sm:$0xff] %v2410_v31  ;;  %v2418_v46 = vpop.f32.mrb[28].mxu1 }
 0x130   :  { %v981_v55 = vadd.f32 %v980_v41, %v979_v47  ;;  %v2406_v23 = vpop.f32.mrb[31].mxu0  ;;  %v986_v41 = vsel %vm924_vm0, %v2328_v63, 0.0  ;;  %v988_v47 = vsel %vm924_vm0, %v2330_v4, 0.0  ;;  %v2420_v33 = vpop.f32.mrb[29].mxu1 }
 0x131   :  { %3842 = vst [vmem:[#allocation18_spill] sm:$0xff] %v2420_v33 }
 0x132   :  { %v983_v61 = vadd.f32 %v982_v21, %v981_v55  ;;  %v990_v55 = vsel %vm924_vm0, %v2338_v9, 0.0  ;;  %v2424_v21 = vpop.f32.mrb[30].mxu1  ;;  %v998_v9 = vsel %vm924_vm0, %v2358_v39, 0.0 }
 0x133   :  { %v2426_v59 = vpop.f32.mrb[31].mxu1 }
 0x134   :  { %v985_v43 = vadd.f32 %v984_v38, %v983_v61  ;;  %v992_v61 = vsel %vm924_vm0, %v2326_v62, 0.0  ;;  %v1002_v62 = vsel %vm924_vm0, %v2352_v34, 0.0 }
 0x136   :  { %v987_v52 = vadd.f32 %v986_v41, %v985_v43  ;;  %v994_v43 = vsel %vm924_vm0, %v2334_v7, 0.0 }
 0x138   :  { %v989_v6 = vadd.f32 %v988_v47, %v987_v52  ;;  %v996_v52 = vsel %vm924_vm0, %v2348_v25, 0.0 }
 0x13a   :  { %v991_v27 = vadd.f32 %v990_v55, %v989_v6  ;;  %v1000_v6 = vsel %vm924_vm0, %v2346_v24, 0.0 }
 0x13c   :  { %v993_v38 = vadd.f32 %v992_v61, %v991_v27  ;;  %v1004_v27 = vsel %vm924_vm0, %v2372_v57, 0.0 }
 0x13e   :  { %v995_v41 = vadd.f32 %v994_v43, %v993_v38  ;;  %v1006_v38 = vsel %vm924_vm0, %v2382_v15, 0.0 }
 0x140   :  { %v997_v47 = vadd.f32 %v996_v52, %v995_v41  ;;  %v1008_v52 = vsel %vm924_vm0, %v2370_v56, 0.0  ;;  %v1010_v41 = vsel %vm924_vm0, %v2376_v5, 0.0 }
 0x142   :  { %v999_v4 = vadd.f32 %v998_v9, %v997_v47 }
 0x144   :  { %v1001_v55 = vadd.f32 %v1000_v6, %v999_v4  ;;  %v1012_v4 = vsel %vm924_vm0, %v2396_v53, 0.0 }
 0x146   :  { %v1003_v61 = vadd.f32 %v1002_v62, %v1001_v55  ;;  %v1014_v62 = vsel %vm924_vm0, %v2406_v23, 0.0 }
 0x148   :  { %v1005_v7 = vadd.f32 %v1004_v27, %v1003_v61  ;;  %v1016_v27 = vsel %vm924_vm0, %v2394_v50, 0.0  ;;  %v1018_v61 = vsel %vm924_vm0, %v2400_v60, 0.0 }
 0x14a   :  { %v1007_v43 = vadd.f32 %v1006_v38, %v1005_v7  ;;  %v1020_v38 = vsel %vm924_vm0, %v2354_v37, 0.0 }
 0x14c   :  { %v1009_v9 = vadd.f32 %v1008_v52, %v1007_v43 }
 0x14e   :  { %v1011_v47 = vadd.f32 %v1010_v41, %v1009_v9  ;;  %v1022_v9 = vsel %vm924_vm0, %v2362_v45, 0.0 }
 0x150   :  { %v1013_v6 = vadd.f32 %v1012_v4, %v1011_v47  ;;  %v1024_v4 = vsel %vm924_vm0, %v2350_v29, 0.0 }
 0x152   :  { %v1015_v55 = vadd.f32 %v1014_v62, %v1013_v6  ;;  %v1026_v6 = vsel %vm924_vm0, %v2360_v40, 0.0  ;;  %v1028_v62 = vsel %vm924_vm0, %v2378_v8, 0.0 }
 0x154   :  { %v1017_v7 = vadd.f32 %v1016_v27, %v1015_v55 }
 0x156   :  { %v1019_v43 = vadd.f32 %v1018_v61, %v1017_v7  ;;  %v1030_v7 = vsel %vm924_vm0, %v2386_v22, 0.0 }
 0x158   :  { %v1021_v52 = vadd.f32 %v1020_v38, %v1019_v43  ;;  %v1032_v38 = vsel %vm924_vm0, %v2374_v58, 0.0 }
 0x15a   :  { %v1023_v41 = vadd.f32 %v1022_v9, %v1021_v52  ;;  %v1034_v52 = vsel %vm924_vm0, %v2384_v18, 0.0  ;;  %v1036_v9 = vsel %vm924_vm0, %v2402_v13, 0.0 }
 0x15c   :  { %v1025_v47 = vadd.f32 %v1024_v4, %v1023_v41 }
 0x15e   :  { %v1027_v55 = vadd.f32 %v1026_v6, %v1025_v47  ;;  %v1038_v47 = vsel %vm924_vm0, %v2410_v31, 0.0 }
 0x160   :  { %v1029_v27 = vadd.f32 %v1028_v62, %v1027_v55  ;;  %v1040_v62 = vsel %vm924_vm0, %v2398_v54, 0.0 }
 0x162   :  { %v1031_v61 = vadd.f32 %v1030_v7, %v1029_v27  ;;  %v1042_v27 = vsel %vm924_vm0, %v2408_v49, 0.0  ;;  %v1044_v7 = vsel %vm924_vm0, %v2420_v33, 0.0 }
 0x164   :  { %v1033_v43 = vadd.f32 %v1032_v38, %v1031_v61 }
 0x166   :  { %v1035_v41 = vadd.f32 %v1034_v52, %v1033_v43  ;;  %v1046_v43 = vsel %vm924_vm0, %v2426_v59, 0.0 }
 0x168   :  { %v1037_v4 = vadd.f32 %v1036_v9, %v1035_v41  ;;  %v1048_v9 = vsel %vm924_vm0, %v2418_v46, 0.0 }
 0x16a   :  { %v1039_v6 = vadd.f32 %v1038_v47, %v1037_v4  ;;  %v1050_v4 = vsel %vm924_vm0, %v2424_v21, 0.0 }
 0x16c   :  { %v1041_v55 = vadd.f32 %v1040_v62, %v1039_v6 }
 0x16e   :  { %v1043_v61 = vadd.f32 %v1042_v27, %v1041_v55 }
 0x170   :  { %v1045_v38 = vadd.f32 %v1044_v7, %v1043_v61 }
 0x172   :  { %v1047_v52 = vadd.f32 %v1046_v43, %v1045_v38  ;;  %v3850_v43 = vld [vmem:[#allocation7_spill] sm:$0xff] }
 0x174   :  { %v1049_v41 = vadd.f32 %v1048_v9, %v1047_v52  ;;  %v3852_v52 = vld [vmem:[#allocation4_spill] sm:$0xff]  ;;  %v3854_v9 = vld [vmem:[#allocation6_spill] sm:$0xff] }
 0x176   :  { %v1051_v47 = vadd.f32 %v1050_v4, %v1049_v41  ;;  %v3855_v4 = vld [vmem:[#allocation9_spill] sm:$0xff] }
 0x178   :  { %v1052_v6 = vrot.slane %v1051_v47, 4 }
 0x17a   :  { %v1053_v62 = vadd.f32 %v1052_v6, %v1051_v47  ;;  %v3857_v6 = vld [vmem:[#allocation12_spill] sm:$0xff] }
 0x17c   :  { %v1054_v49 = vrot.slane %v1053_v62, 2 }
 0x17e   :  { %v1055_v54 = vadd.f32 %v1054_v49, %v1053_v62 }
 0x180   :  { %v1056_v31 = vrot.slane %v1055_v54, 1 }
 0x182   :  { %v1057_v33 = vadd.f32 %v1056_v31, %v1055_v54  ;;  %v3848_v54 = vld [vmem:[#allocation3_spill] sm:$0xff]  ;;  %v3849_v31 = vld [vmem:[#allocation5_spill] sm:$0xff] }
 0x184   :  { %v2488_v55 = vmul.f32 0.001953125, %v1057_v33 }
 0x186   :  { %v2492_v27 = vsub.f32 %v2234_v1, %v2488_v55  ;;  %v2496_v7 = vsub.f32 %v2238_v3, %v2488_v55  ;;  %v2500_v61 = vsub.f32 %v2232_v0, %v2488_v55  ;;  %v2504_v38 = vsub.f32 %v2236_v2, %v2488_v55 }
 0x187   :  { %v2508_v33 = vsub.f32 %v2252_v12, %v2488_v55  ;;  %v2512_v1 = vsub.f32 %v2262_v19, %v2488_v55  ;;  %v2516_v3 = vsub.f32 %v2248_v10, %v2488_v55  ;;  %v2520_v0 = vsub.f32 %v2258_v16, %v2488_v55 }
 0x188   :  { %3843 = vst [vmem:[#allocation19_spill] sm:$0xff] %v2492_v27  ;;  %3844 = vst [vmem:[#allocation20_spill] sm:$0xff] %v2496_v7  ;;  %v2524_v2 = vsub.f32 %v2276_v28, %v2488_v55  ;;  %v2528_v12 = vsub.f32 %v2286_v35, %v2488_v55  ;;  %v2532_v19 = vsub.f32 %v2272_v26, %v2488_v55 }
 0x189   :  { %3845 = vst [vmem:[#allocation21_spill] sm:$0xff] %v2500_v61  ;;  %3846 = vst [vmem:[#allocation22_spill] sm:$0xff] %v2504_v38  ;;  %v2536_v10 = vsub.f32 %v2282_v32, %v2488_v55  ;;  %v2540_v16 = vsub.f32 %v2300_v44, %v2488_v55  ;;  %v2544_v28 = vsub.f32 %v2310_v51, %v2488_v55  ;;  %v3847_v51 = vld [vmem:[#allocation2_spill] sm:$0xff] }
 0x18a   :  { %v2548_v35 = vsub.f32 %v2296_v42, %v2488_v55  ;;  %v2552_v26 = vsub.f32 %v2306_v48, %v2488_v55  ;;  %v2556_v32 = vsub.f32 %v2254_v14, %v2488_v55  ;;  %v2560_v44 = vsub.f32 %v2264_v20, %v2488_v55 }
 0x18b   :  { %v2564_v49 = vsub.f32 %v2250_v11, %v2488_v55  ;;  %v2568_v42 = vsub.f32 %v2260_v17, %v2488_v55  ;;  %v2572_v48 = vsub.f32 %v2278_v30, %v2488_v55  ;;  %v2576_v14 = vsub.f32 %v2288_v36, %v2488_v55 }
 0x18c   :  { %v2580_v20 = vsub.f32 %v3847_v51, %v2488_v55  ;;  %v2584_v11 = vsub.f32 %v3848_v54, %v2488_v55  ;;  %v2588_v17 = vsub.f32 %v3849_v31, %v2488_v55  ;;  %v2592_v30 = vsub.f32 %v3850_v43, %v2488_v55  ;;  %v3859_v51 = vld [vmem:[#allocation8_spill] sm:$0xff]  ;;  %v3860_v43 = vld [vmem:[#allocation11_spill] sm:$0xff] }
 0x18d   :  { %v2596_v36 = vsub.f32 %v3852_v52, %v2488_v55  ;;  %v2600_v41 = vsub.f32 %v3854_v9, %v2488_v55  ;;  %v2604_v47 = vsub.f32 %v3855_v4, %v2488_v55  ;;  %v2608_v62 = vsub.f32 %v3857_v6, %v2488_v55  ;;  %v3861_v9 = vld [vmem:[#allocation14_spill] sm:$0xff] }
 0x18e   :  { %3851 = vst [vmem:[#allocation2_spill] sm:$0xff] %v2592_v30  ;;  %v2612_v54 = vsub.f32 %v3859_v51, %v2488_v55  ;;  %v2616_v31 = vsub.f32 %v2328_v63, %v2488_v55  ;;  %v2620_v52 = vsub.f32 %v3860_v43, %v2488_v55  ;;  %v2624_v4 = vsub.f32 %v3861_v9, %v2488_v55 }
 0x18f   :  { %3853 = vst [vmem:[#allocation3_spill] sm:$0xff] %v2596_v36  ;;  %3856 = vst [vmem:[#allocation5_spill] sm:$0xff] %v2604_v47  ;;  %v3862_v47 = vld [vmem:[#allocation10_spill] sm:$0xff]  ;;  %v2636_v63 = vsub.f32 %v2348_v25, %v2488_v55  ;;  %v2640_v43 = vsub.f32 %v2358_v39, %v2488_v55  ;;  %v2644_v9 = vsub.f32 %v2346_v24, %v2488_v55 }
 0x190   :  { %3858 = vst [vmem:[#allocation7_spill] sm:$0xff] %v2608_v62  ;;  %v2628_v6 = vsub.f32 %v3862_v47, %v2488_v55  ;;  %v3863_v62 = vld [vmem:[#allocation13_spill] sm:$0xff]  ;;  %v2648_v47 = vsub.f32 %v2352_v34, %v2488_v55  ;;  %v2656_v25 = vsub.f32 %v2382_v15, %v2488_v55  ;;  %v2660_v39 = vsub.f32 %v2370_v56, %v2488_v55 }
 0x191   :  { %v2632_v51 = vsub.f32 %v3863_v62, %v2488_v55  ;;  %v2652_v62 = vsub.f32 %v2372_v57, %v2488_v55  ;;  %v2664_v24 = vsub.f32 %v2376_v5, %v2488_v55  ;;  %v2668_v34 = vsub.f32 %v2396_v53, %v2488_v55 }
 0x192   :  { %v2672_v57 = vsub.f32 %v2406_v23, %v2488_v55  ;;  %v2676_v15 = vsub.f32 %v2394_v50, %v2488_v55  ;;  %v2680_v56 = vsub.f32 %v2400_v60, %v2488_v55  ;;  %v2684_v5 = vsub.f32 %v2354_v37, %v2488_v55 }
 0x193   :  { %v2688_v53 = vsub.f32 %v2362_v45, %v2488_v55  ;;  %v2692_v23 = vsub.f32 %v2350_v29, %v2488_v55  ;;  %v2696_v50 = vsub.f32 %v2360_v40, %v2488_v55  ;;  %v2700_v60 = vsub.f32 %v2378_v8, %v2488_v55 }
 0x194   :  { %3864 = vst [vmem:[#allocation4_spill] sm:$0xff] %v2684_v5  ;;  %v2704_v37 = vsub.f32 %v2386_v22, %v2488_v55  ;;  %v2708_v45 = vsub.f32 %v2374_v58, %v2488_v55  ;;  %v2712_v29 = vsub.f32 %v2384_v18, %v2488_v55  ;;  %v2716_v40 = vsub.f32 %v2402_v13, %v2488_v55 }
 0x195   :  { %3865 = vst [vmem:[#allocation6_spill] sm:$0xff] %v2688_v53  ;;  %3866 = vst [vmem:[#allocation9_spill] sm:$0xff] %v2692_v23  ;;  %v2736_v13 = vsub.f32 %v2426_v59, %v2488_v55  ;;  %v1126_v59 = vmul.f32 %v2504_v38, %v2504_v38  ;;  %v1129_v38 = vmul.f32 %v2516_v3, %v2516_v3 }
 0x196   :  { %3867 = vst [vmem:[#allocation12_spill] sm:$0xff] %v2696_v50  ;;  %3868 = vst [vmem:[#allocation8_spill] sm:$0xff] %v2700_v60  ;;  %v3873_v50 = vld [vmem:[#allocation17_spill] sm:$0xff]  ;;  %v3875_v60 = vld [vmem:[#allocation15_spill] sm:$0xff] }
 0x197   :  { %3869 = vst [vmem:[#allocation11_spill] sm:$0xff] %v2704_v37  ;;  %3870 = vst [vmem:[#allocation14_spill] sm:$0xff] %v2708_v45  ;;  %v2720_v8 = vsub.f32 %v3873_v50, %v2488_v55  ;;  %v2724_v22 = vsub.f32 %v3875_v60, %v2488_v55  ;;  %v3877_v37 = vld [vmem:[#allocation16_spill] sm:$0xff]  ;;  %v3879_v45 = vld [vmem:[#allocation18_spill] sm:$0xff]  ;;  %v2740_v50 = vsub.f32 %v2418_v46, %v2488_v55 }
 0x198   :  { %3871 = vst [vmem:[#allocation10_spill] sm:$0xff] %v2712_v29  ;;  %3872 = vst [vmem:[#allocation13_spill] sm:$0xff] %v2716_v40  ;;  %v2728_v58 = vsub.f32 %v3877_v37, %v2488_v55  ;;  %v2732_v18 = vsub.f32 %v3879_v45, %v2488_v55  ;;  %v2744_v60 = vsub.f32 %v2424_v21, %v2488_v55 }
 0x199   :  { %3874 = vst [vmem:[#allocation17_spill] sm:$0xff] %v2720_v8  ;;  %3876 = vst [vmem:[#allocation15_spill] sm:$0xff] %v2724_v22  ;;  %v1123_v37 = vmul.f32 %v2492_v27, %v2492_v27  ;;  %v1125_v45 = vmul.f32 %v2500_v61, %v2500_v61  ;;  %v1127_v21 = vmul.f32 %v2508_v33, %v2508_v33 }
 0x19a   :  { %3878 = vst [vmem:[#allocation16_spill] sm:$0xff] %v2728_v58  ;;  %3880 = vst [vmem:[#allocation18_spill] sm:$0xff] %v2732_v18  ;;  %v1124_v58 = vmul.f32 %v2496_v7, %v2496_v7  ;;  %v1128_v7 = vmul.f32 %v2512_v1, %v2512_v1 }
 0x19b   :  { %3881 = vst [vmem:[#allocation23_spill] sm:$0xff] %v2736_v13  ;;  %3882 = vst [vmem:[#allocation24_spill] sm:$0xff] %v2740_v50  ;;  %v1187_v13 = vsel %vm924_vm0, %v1123_v37, 0.0  ;;  %v1190_v55 = vsel %vm924_vm0, %v1125_v45, 0.0  ;;  %v1194_v37 = vsel %vm924_vm0, %v1127_v21, 0.0  ;;  %v1198_v45 = vsel %vm924_vm0, %v1129_v38, 0.0 }
 0x19c   :  { %3883 = vst [vmem:[#allocation25_spill] sm:$0xff] %v2744_v60  ;;  %v1188_v46 = vsel %vm924_vm0, %v1124_v58, 0.0  ;;  %v1192_v60 = vsel %vm924_vm0, %v1126_v59, 0.0  ;;  %v1130_v58 = vmul.f32 %v2520_v0, %v2520_v0  ;;  %v1135_v38 = vmul.f32 %v2540_v16, %v2540_v16 }
 0x19d   :  { %v1189_v50 = vadd.f32 %v1188_v46, %v1187_v13  ;;  %v1196_v13 = vsel %vm924_vm0, %v1128_v7, 0.0  ;;  %v1134_v7 = vmul.f32 %v2536_v10, %v2536_v10 }
 0x19f   :  { %v1191_v27 = vadd.f32 %v1190_v55, %v1189_v50  ;;  %v1131_v50 = vmul.f32 %v2524_v2, %v2524_v2 }
 0x1a1   :  { %v1193_v61 = vadd.f32 %v1192_v60, %v1191_v27  ;;  %v1132_v27 = vmul.f32 %v2528_v12, %v2528_v12  ;;  %v1200_v60 = vsel %vm924_vm0, %v1130_v58, 0.0  ;;  %v1202_v21 = vsel %vm924_vm0, %v1131_v50, 0.0 }
 0x1a2   :  { %v1136_v58 = vmul.f32 %v2544_v28, %v2544_v28  ;;  %v1137_v50 = vmul.f32 %v2548_v35, %v2548_v35 }
 0x1a3   :  { %v1195_v18 = vadd.f32 %v1194_v37, %v1193_v61  ;;  %v1133_v61 = vmul.f32 %v2532_v19, %v2532_v19 }
 0x1a5   :  { %v1197_v46 = vadd.f32 %v1196_v13, %v1195_v18  ;;  %v1204_v18 = vsel %vm924_vm0, %v1132_v27, 0.0  ;;  %v1138_v27 = vmul.f32 %v2552_v26, %v2552_v26 }
 0x1a7   :  { %v1199_v55 = vadd.f32 %v1198_v45, %v1197_v46  ;;  %v1206_v46 = vsel %vm924_vm0, %v1133_v61, 0.0  ;;  %v1139_v61 = vmul.f32 %v2556_v32, %v2556_v32 }
 0x1a9   :  { %v1201_v59 = vadd.f32 %v1200_v60, %v1199_v55  ;;  %v1208_v55 = vsel %vm924_vm0, %v1134_v7, 0.0  ;;  %v1140_v7 = vmul.f32 %v2560_v44, %v2560_v44 }
 0x1ab   :  { %v1203_v37 = vadd.f32 %v1202_v21, %v1201_v59  ;;  %v1210_v59 = vsel %vm924_vm0, %v1135_v38, 0.0  ;;  %v1141_v38 = vmul.f32 %v2564_v49, %v2564_v49 }
 0x1ad   :  { %v1205_v13 = vadd.f32 %v1204_v18, %v1203_v37  ;;  %v1212_v37 = vsel %vm924_vm0, %v1136_v58, 0.0  ;;  %v1142_v58 = vmul.f32 %v2568_v42, %v2568_v42 }
 0x1af   :  { %v1207_v45 = vadd.f32 %v1206_v46, %v1205_v13  ;;  %v1214_v13 = vsel %vm924_vm0, %v1137_v50, 0.0  ;;  %v1143_v50 = vmul.f32 %v2572_v48, %v2572_v48 }
 0x1b1   :  { %v1209_v60 = vadd.f32 %v1208_v55, %v1207_v45  ;;  %v1216_v45 = vsel %vm924_vm0, %v1138_v27, 0.0  ;;  %v1144_v27 = vmul.f32 %v2576_v14, %v2576_v14 }
 0x1b3   :  { %v1211_v21 = vadd.f32 %v1210_v59, %v1209_v60  ;;  %v1218_v60 = vsel %vm924_vm0, %v1139_v61, 0.0  ;;  %v1145_v61 = vmul.f32 %v2580_v20, %v2580_v20 }
 0x1b5   :  { %v1213_v18 = vadd.f32 %v1212_v37, %v1211_v21  ;;  %v1220_v21 = vsel %vm924_vm0, %v1140_v7, 0.0  ;;  %v1146_v7 = vmul.f32 %v2584_v11, %v2584_v11 }
 0x1b7   :  { %v1215_v46 = vadd.f32 %v1214_v13, %v1213_v18  ;;  %v1222_v18 = vsel %vm924_vm0, %v1141_v38, 0.0  ;;  %v1147_v38 = vmul.f32 %v2588_v17, %v2588_v17 }
 0x1b9   :  { %v1217_v55 = vadd.f32 %v1216_v45, %v1215_v46  ;;  %v1224_v46 = vsel %vm924_vm0, %v1142_v58, 0.0  ;;  %v1148_v58 = vmul.f32 %v2592_v30, %v2592_v30 }
 0x1bb   :  { %v1219_v59 = vadd.f32 %v1218_v60, %v1217_v55  ;;  %v1226_v55 = vsel %vm924_vm0, %v1143_v50, 0.0  ;;  %v1149_v50 = vmul.f32 %v2596_v36, %v2596_v36 }
 0x1bd   :  { %v1221_v37 = vadd.f32 %v1220_v21, %v1219_v59  ;;  %v1228_v59 = vsel %vm924_vm0, %v1144_v27, 0.0  ;;  %v1150_v27 = vmul.f32 %v2600_v41, %v2600_v41 }
 0x1bf   :  { %v1223_v13 = vadd.f32 %v1222_v18, %v1221_v37  ;;  %v1230_v37 = vsel %vm924_vm0, %v1145_v61, 0.0  ;;  %v3884_v61 = vld [vmem:[#allocation5_spill] sm:$0xff] }
 0x1c1   :  { %v1225_v45 = vadd.f32 %v1224_v46, %v1223_v13  ;;  %v1232_v13 = vsel %vm924_vm0, %v1146_v7, 0.0  ;;  %v3885_v7 = vld [vmem:[#allocation7_spill] sm:$0xff] }
 0x1c3   :  { %v1227_v60 = vadd.f32 %v1226_v55, %v1225_v45  ;;  %v1234_v45 = vsel %vm924_vm0, %v1147_v38, 0.0  ;;  %v1153_v38 = vmul.f32 %v2612_v54, %v2612_v54 }
 0x1c5   :  { %v1229_v21 = vadd.f32 %v1228_v59, %v1227_v60  ;;  %v1236_v60 = vsel %vm924_vm0, %v1148_v58, 0.0  ;;  %v1154_v58 = vmul.f32 %v2616_v31, %v2616_v31 }
 0x1c7   :  { %v1231_v18 = vadd.f32 %v1230_v37, %v1229_v21  ;;  %v1151_v21 = vmul.f32 %v3884_v61, %v3884_v61  ;;  %v1238_v37 = vsel %vm924_vm0, %v1149_v50, 0.0  ;;  %v1155_v50 = vmul.f32 %v2620_v52, %v2620_v52 }
 0x1c9   :  { %v1233_v46 = vadd.f32 %v1232_v13, %v1231_v18  ;;  %v1152_v18 = vmul.f32 %v3885_v7, %v3885_v7  ;;  %v1240_v13 = vsel %vm924_vm0, %v1150_v27, 0.0  ;;  %v1248_v27 = vsel %vm924_vm0, %v1154_v58, 0.0 }
 0x1ca   :  { %v1160_v58 = vmul.f32 %v2640_v43, %v2640_v43 }
 0x1cb   :  { %v1235_v55 = vadd.f32 %v1234_v45, %v1233_v46  ;;  %v1242_v46 = vsel %vm924_vm0, %v1151_v21, 0.0  ;;  %v1250_v21 = vsel %vm924_vm0, %v1155_v50, 0.0  ;;  %v1161_v50 = vmul.f32 %v2644_v9, %v2644_v9 }
 0x1cd   :  { %v1237_v59 = vadd.f32 %v1236_v60, %v1235_v55  ;;  %v1244_v55 = vsel %vm924_vm0, %v1152_v18, 0.0  ;;  %v1158_v18 = vmul.f32 %v2632_v51, %v2632_v51 }
 0x1cf   :  { %v1239_v30 = vadd.f32 %v1238_v37, %v1237_v59  ;;  %v1246_v59 = vsel %vm924_vm0, %v1153_v38, 0.0  ;;  %v1159_v38 = vmul.f32 %v2636_v63, %v2636_v63 }
 0x1d1   :  { %v1241_v36 = vadd.f32 %v1240_v13, %v1239_v30  ;;  %v1156_v30 = vmul.f32 %v2624_v4, %v2624_v4 }
 0x1d3   :  { %v1243_v45 = vadd.f32 %v1242_v46, %v1241_v36  ;;  %v1157_v36 = vmul.f32 %v2628_v6, %v2628_v6 }
 0x1d5   :  { %v1245_v60 = vadd.f32 %v1244_v55, %v1243_v45  ;;  %v1252_v45 = vsel %vm924_vm0, %v1156_v30, 0.0  ;;  %v1162_v30 = vmul.f32 %v2648_v47, %v2648_v47 }
 0x1d7   :  { %v1247_v37 = vadd.f32 %v1246_v59, %v1245_v60  ;;  %v1254_v60 = vsel %vm924_vm0, %v1157_v36, 0.0  ;;  %v1163_v36 = vmul.f32 %v2652_v62, %v2652_v62 }
 0x1d9   :  { %v1249_v13 = vadd.f32 %v1248_v27, %v1247_v37  ;;  %v1256_v37 = vsel %vm924_vm0, %v1158_v18, 0.0  ;;  %v1164_v18 = vmul.f32 %v2656_v25, %v2656_v25 }
 0x1db   :  { %v1251_v46 = vadd.f32 %v1250_v21, %v1249_v13  ;;  %v1258_v13 = vsel %vm924_vm0, %v1159_v38, 0.0  ;;  %v1165_v38 = vmul.f32 %v2660_v39, %v2660_v39 }
 0x1dd   :  { %v1253_v55 = vadd.f32 %v1252_v45, %v1251_v46  ;;  %v1260_v46 = vsel %vm924_vm0, %v1160_v58, 0.0  ;;  %v1166_v58 = vmul.f32 %v2664_v24, %v2664_v24 }
 0x1df   :  { %v1255_v59 = vadd.f32 %v1254_v60, %v1253_v55  ;;  %v1262_v55 = vsel %vm924_vm0, %v1161_v50, 0.0  ;;  %v1167_v50 = vmul.f32 %v2668_v34, %v2668_v34 }
 0x1e1   :  { %v1257_v27 = vadd.f32 %v1256_v37, %v1255_v59  ;;  %v1264_v59 = vsel %vm924_vm0, %v1162_v30, 0.0  ;;  %v1168_v30 = vmul.f32 %v2672_v57, %v2672_v57 }
 0x1e3   :  { %v1259_v21 = vadd.f32 %v1258_v13, %v1257_v27  ;;  %v1266_v27 = vsel %vm924_vm0, %v1163_v36, 0.0  ;;  %v1169_v36 = vmul.f32 %v2676_v15, %v2676_v15 }
 0x1e5   :  { %v1261_v45 = vadd.f32 %v1260_v46, %v1259_v21  ;;  %v1268_v21 = vsel %vm924_vm0, %v1164_v18, 0.0  ;;  %v1170_v18 = vmul.f32 %v2680_v56, %v2680_v56 }
 0x1e7   :  { %v1263_v60 = vadd.f32 %v1262_v55, %v1261_v45  ;;  %v1270_v45 = vsel %vm924_vm0, %v1165_v38, 0.0  ;;  %v1171_v38 = vmul.f32 %v2684_v5, %v2684_v5 }
 0x1e9   :  { %v1265_v37 = vadd.f32 %v1264_v59, %v1263_v60  ;;  %v1272_v60 = vsel %vm924_vm0, %v1166_v58, 0.0  ;;  %v1172_v58 = vmul.f32 %v2688_v53, %v2688_v53 }
 0x1eb   :  { %v1267_v13 = vadd.f32 %v1266_v27, %v1265_v37  ;;  %v1274_v37 = vsel %vm924_vm0, %v1167_v50, 0.0  ;;  %v1173_v50 = vmul.f32 %v2692_v23, %v2692_v23 }
 0x1ed   :  { %v1269_v46 = vadd.f32 %v1268_v21, %v1267_v13  ;;  %v1276_v13 = vsel %vm924_vm0, %v1168_v30, 0.0  ;;  %v3886_v30 = vld [vmem:[#allocation12_spill] sm:$0xff] }
 0x1ef   :  { %v1271_v55 = vadd.f32 %v1270_v45, %v1269_v46  ;;  %v1278_v46 = vsel %vm924_vm0, %v1169_v36, 0.0  ;;  %v3887_v36 = vld [vmem:[#allocation8_spill] sm:$0xff] }
 0x1f1   :  { %v1273_v59 = vadd.f32 %v1272_v60, %v1271_v55  ;;  %v1280_v55 = vsel %vm924_vm0, %v1170_v18, 0.0  ;;  %v3888_v18 = vld [vmem:[#allocation11_spill] sm:$0xff] }
 0x1f3   :  { %v1275_v27 = vadd.f32 %v1274_v37, %v1273_v59  ;;  %v1282_v59 = vsel %vm924_vm0, %v1171_v38, 0.0  ;;  %v3889_v38 = vld [vmem:[#allocation14_spill] sm:$0xff] }
 0x1f5   :  { %v1277_v21 = vadd.f32 %v1276_v13, %v1275_v27  ;;  %v1174_v27 = vmul.f32 %v3886_v30, %v3886_v30  ;;  %v1284_v13 = vsel %vm924_vm0, %v1172_v58, 0.0  ;;  %v1178_v58 = vmul.f32 %v2712_v29, %v2712_v29 }
 0x1f7   :  { %v1279_v45 = vadd.f32 %v1278_v46, %v1277_v21  ;;  %v1175_v21 = vmul.f32 %v3887_v36, %v3887_v36  ;;  %v1286_v46 = vsel %vm924_vm0, %v1173_v50, 0.0 }
 0x1f9   :  { %v1281_v60 = vadd.f32 %v1280_v55, %v1279_v45  ;;  %v1176_v45 = vmul.f32 %v3888_v18, %v3888_v18  ;;  %v1288_v55 = vsel %vm924_vm0, %v1174_v27, 0.0  ;;  %v1296_v27 = vsel %vm924_vm0, %v1178_v58, 0.0  ;;  %v3892_v58 = vld [vmem:[#allocation23_spill] sm:$0xff] }
 0x1fb   :  { %v1283_v37 = vadd.f32 %v1282_v59, %v1281_v60  ;;  %v1177_v60 = vmul.f32 %v3889_v38, %v3889_v38  ;;  %v1290_v59 = vsel %vm924_vm0, %v1175_v21, 0.0 }
 0x1fd   :  { %v1285_v5 = vadd.f32 %v1284_v13, %v1283_v37  ;;  %v1292_v37 = vsel %vm924_vm0, %v1176_v45, 0.0  ;;  %v1294_v50 = vsel %vm924_vm0, %v1177_v60, 0.0  ;;  %v3890_v45 = vld [vmem:[#allocation16_spill] sm:$0xff]  ;;  %v3891_v60 = vld [vmem:[#allocation18_spill] sm:$0xff] }
 0x1ff   :  { %v1287_v53 = vadd.f32 %v1286_v46, %v1285_v5  ;;  %v1179_v5 = vmul.f32 %v2716_v40, %v2716_v40 }
 0x201   :  { %v1289_v23 = vadd.f32 %v1288_v55, %v1287_v53  ;;  %v1180_v53 = vmul.f32 %v2720_v8, %v2720_v8  ;;  %v1298_v21 = vsel %vm924_vm0, %v1179_v5, 0.0  ;;  %v3893_v5 = vld [vmem:[#allocation24_spill] sm:$0xff] }
 0x203   :  { %v1291_v30 = vadd.f32 %v1290_v59, %v1289_v23  ;;  %v1181_v23 = vmul.f32 %v2724_v22, %v2724_v22 }
 0x205   :  { %v1293_v13 = vadd.f32 %v1292_v37, %v1291_v30  ;;  %v1182_v30 = vmul.f32 %v3890_v45, %v3890_v45  ;;  %v1300_v37 = vsel %vm924_vm0, %v1180_v53, 0.0  ;;  %v3894_v53 = vld [vmem:[#allocation25_spill] sm:$0xff] }
 0x207   :  { %v1295_v46 = vadd.f32 %v1294_v50, %v1293_v13  ;;  %v1183_v13 = vmul.f32 %v3891_v60, %v3891_v60  ;;  %v1302_v50 = vsel %vm924_vm0, %v1181_v23, 0.0 }
 0x209   :  { %v1297_v55 = vadd.f32 %v1296_v27, %v1295_v46  ;;  %v1184_v46 = vmul.f32 %v3892_v58, %v3892_v58  ;;  %v1304_v27 = vsel %vm924_vm0, %v1182_v30, 0.0 }
 0x20b   :  { %v1299_v59 = vadd.f32 %v1298_v21, %v1297_v55  ;;  %v1185_v55 = vmul.f32 %v3893_v5, %v3893_v5  ;;  %v1306_v21 = vsel %vm924_vm0, %v1183_v13, 0.0 }
 0x20d   :  { %v1301_v40 = vadd.f32 %v1300_v37, %v1299_v59  ;;  %v1186_v59 = vmul.f32 %v3894_v53, %v3894_v53  ;;  %v1308_v37 = vsel %vm924_vm0, %v1184_v46, 0.0 }
 0x20f   :  { %v1303_v8 = vadd.f32 %v1302_v50, %v1301_v40  ;;  %v1310_v40 = vsel %vm924_vm0, %v1185_v55, 0.0  ;;  %v1312_v50 = vsel %vm924_vm0, %v1186_v59, 0.0 }
 0x211   :  { %v1305_v22 = vadd.f32 %v1304_v27, %v1303_v8 }
 0x213   :  { %v1307_v45 = vadd.f32 %v1306_v21, %v1305_v22  ;;  %v1325_v21 = vlaneseq }
 0x215   :  { %v1309_v60 = vadd.f32 %v1308_v37, %v1307_v45  ;;  %v1326_v53 = vshrl.u32 %v1325_v21, 7  ;;  %v1323_v45 = vld [vmem:[%s3782_s2] sm:$0x1]  ;;  %v3895_v37 = vld [vmem:[#allocation19_spill] sm:$0xff] }
 0x216   :  { %v3900_v21 = vld [vmem:[#allocation3_spill] sm:$0xff] }
 0x217   :  { %v1311_v23 = vadd.f32 %v1310_v40, %v1309_v60  ;;  %v1327_v46 = vsub.s32 0, %v1326_v53  ;;  %v3896_v40 = vld [vmem:[#allocation20_spill] sm:$0xff] }
 0x219   :  { %v1313_v58 = vadd.f32 %v1312_v50, %v1311_v23  ;;  %v3898_v23 = vld [vmem:[#allocation22_spill] sm:$0xff] }
 0x21b   :  { %v1314_v30 = vrot.slane %v1313_v58, 4 }
 0x21d   :  { %v1315_v8 = vadd.f32 %v1314_v30, %v1313_v58 }
 0x21f   :  { %v1316_v27 = vrot.slane %v1315_v8, 2 }
 0x221   :  { %v1317_v29 = vadd.f32 %v1316_v27, %v1315_v8 }
 0x223   :  { %v1318_v5 = vrot.slane %v1317_v29, 1 }
 0x225   :  { %v1319_v38 = vadd.f32 %v1318_v5, %v1317_v29 }
 0x227   :  { %v1320_v13 = vmul.f32 0.001953125, %v1319_v38  ;;  %v3897_v38 = vld [vmem:[#allocation21_spill] sm:$0xff] }
 0x229   :  { %v1321_v22 = vadd.f32 1e-05, %v1320_v13 }
 0x22b   :  { %2013 = vrsqrt.f32 %v1321_v22  ;;  %v3899_v22 = vld [vmem:[#allocation2_spill] sm:$0xff] }
 0x235   :  { %v2014_v60 = vpop.eup %2013 }
 0x236   :  { %v1324_v55 = vmul.f32 %v2014_v60, %v1323_v45  ;;  %v3901_v60 = vld [vmem:[#allocation4_spill] sm:$0xff] }
 0x238   :  { %v2941_v59 = vrot.slane %v1324_v55, %v1327_v46  ;;  %v3902_v55 = vld [vmem:[#allocation6_spill] sm:$0xff] }
 0x23a   :  { %v2945_v58 = vmul.f32 %v2941_v59, %v3895_v37  ;;  %v2949_v29 = vmul.f32 %v2941_v59, %v3896_v40  ;;  %v2953_v5 = vmul.f32 %v2941_v59, %v3897_v38  ;;  %v2957_v50 = vmul.f32 %v2941_v59, %v3898_v23  ;;  %v3903_v37 = vld [vmem:[#allocation9_spill] sm:$0xff]  ;;  %v3904_v40 = vld [vmem:[#allocation12_spill] sm:$0xff]  ;;  %v3908_v23 = vld [vmem:[#allocation14_spill] sm:$0xff] }
 0x23b   :  { %v2961_v53 = vmul.f32 %v2941_v59, %v2508_v33  ;;  %v2965_v30 = vmul.f32 %v2941_v59, %v2512_v1  ;;  %v2969_v8 = vmul.f32 %v2941_v59, %v2516_v3  ;;  %v2973_v27 = vmul.f32 %v2941_v59, %v2520_v0 }
 0x23c   :  { %v2977_v13 = vmul.f32 %v2941_v59, %v2524_v2  ;;  %v2981_v33 = vmul.f32 %v2941_v59, %v2528_v12  ;;  %v2985_v1 = vmul.f32 %v2941_v59, %v2532_v19  ;;  %v2989_v3 = vmul.f32 %v2941_v59, %v2536_v10 }
 0x23d   :  { %v2993_v0 = vmul.f32 %v2941_v59, %v2540_v16  ;;  %v2997_v2 = vmul.f32 %v2941_v59, %v2544_v28  ;;  %v3001_v12 = vmul.f32 %v2941_v59, %v2548_v35  ;;  %v3005_v19 = vmul.f32 %v2941_v59, %v2552_v26 }
 0x23e   :  { %v3009_v10 = vmul.f32 %v2941_v59, %v2556_v32  ;;  %v3013_v16 = vmul.f32 %v2941_v59, %v2560_v44  ;;  %v3017_v28 = vmul.f32 %v2941_v59, %v2564_v49  ;;  %v3021_v35 = vmul.f32 %v2941_v59, %v2568_v42 }
 0x23f   :  { %v3025_v26 = vmul.f32 %v2941_v59, %v2572_v48  ;;  %v3029_v32 = vmul.f32 %v2941_v59, %v2576_v14  ;;  %v3033_v44 = vmul.f32 %v2941_v59, %v2580_v20  ;;  %v3037_v49 = vmul.f32 %v2941_v59, %v2584_v11 }
 0x240   :  { %v3041_v42 = vmul.f32 %v2941_v59, %v2588_v17  ;;  %v3045_v48 = vmul.f32 %v2941_v59, %v3899_v22  ;;  %v3049_v14 = vmul.f32 %v2941_v59, %v3900_v21  ;;  %v3053_v20 = vmul.f32 %v2941_v59, %v2600_v41  ;;  %v3910_v21 = vld [vmem:[#allocation10_spill] sm:$0xff] }
 0x241   :  { %v3057_v11 = vmul.f32 %v2941_v59, %v3884_v61  ;;  %v3061_v17 = vmul.f32 %v2941_v59, %v3885_v7  ;;  %v3065_v45 = vmul.f32 %v2941_v59, %v2612_v54  ;;  %v3069_v46 = vmul.f32 %v2941_v59, %v2616_v31 }
 0x242   :  { %v3073_v41 = vmul.f32 %v2941_v59, %v2620_v52  ;;  %v3077_v61 = vmul.f32 %v2941_v59, %v2624_v4  ;;  %v3081_v7 = vmul.f32 %v2941_v59, %v2628_v6  ;;  %v3085_v54 = vmul.f32 %v2941_v59, %v2632_v51 }
 0x243   :  { %v3089_v31 = vmul.f32 %v2941_v59, %v2636_v63  ;;  %v3093_v52 = vmul.f32 %v2941_v59, %v2640_v43  ;;  %v3097_v4 = vmul.f32 %v2941_v59, %v2644_v9  ;;  %v3101_v6 = vmul.f32 %v2941_v59, %v2648_v47 }
 0x244   :  { %v3105_v51 = vmul.f32 %v2941_v59, %v2652_v62  ;;  %v3109_v63 = vmul.f32 %v2941_v59, %v2656_v25  ;;  %v3113_v43 = vmul.f32 %v2941_v59, %v2660_v39  ;;  %v3117_v9 = vmul.f32 %v2941_v59, %v2664_v24 }
 0x245   :  { %v3121_v47 = vmul.f32 %v2941_v59, %v2668_v34  ;;  %v3125_v62 = vmul.f32 %v2941_v59, %v2672_v57  ;;  %v3129_v25 = vmul.f32 %v2941_v59, %v2676_v15  ;;  %v3133_v39 = vmul.f32 %v2941_v59, %v2680_v56 }
 0x246   :  { %v3137_v24 = vmul.f32 %v2941_v59, %v3901_v60  ;;  %v3141_v34 = vmul.f32 %v2941_v59, %v3902_v55  ;;  %v3145_v57 = vmul.f32 %v2941_v59, %v3903_v37  ;;  %v3149_v15 = vmul.f32 %v2941_v59, %v3904_v40  ;;  %v3170_v55 = vld [vmem:[%s3783_s3] ss:$0 sm:$0xff]  ;;  %v3912_v37 = vld [vmem:[#allocation13_spill] sm:$0xff] }
 0x247   :  { %v3153_v56 = vmul.f32 %v2941_v59, %v3887_v36  ;;  %v3157_v38 = vmul.f32 %v2941_v59, %v3888_v18  ;;  %v3161_v22 = vmul.f32 %v2941_v59, %v3908_v23  ;;  %v3165_v60 = vmul.f32 %v2941_v59, %v3910_v21  ;;  %v3914_v40 = vld [vmem:[#allocation17_spill] sm:$0xff] }
 0x248   :  { %3905 = vst [vmem:[#allocation5_spill] sm:$0xff] %v3149_v15  ;;  %v3174_v36 = vmul.f32 %v2941_v59, %v3912_v37  ;;  %v3178_v18 = vmul.f32 %v2941_v59, %v3914_v40  ;;  %v3919_v15 = vld [vmem:[#allocation23_spill] sm:$0xff] }
 0x249   :  { %3906 = vst [vmem:[#allocation7_spill] sm:$0xff] %v3153_v56  ;;  %3907 = vst [vmem:[#allocation8_spill] sm:$0xff] %v3157_v38  ;;  %v3916_v38 = vld [vmem:[#allocation15_spill] sm:$0xff]  ;;  %v3194_v37 = vmul.f32 %v2941_v59, %v3919_v15  ;;  %v3214_v15 = vadd.f32 %v3170_v55, %v2953_v5  ;;  %v3234_v5 = vadd.f32 %v3170_v55, %v2973_v27 }
 0x24a   :  { %3909 = vst [vmem:[#allocation11_spill] sm:$0xff] %v3161_v22  ;;  %3911 = vst [vmem:[#allocation19_spill] sm:$0xff] %v3165_v60  ;;  %v3182_v23 = vmul.f32 %v2941_v59, %v3916_v38  ;;  %v3917_v22 = vld [vmem:[#allocation16_spill] sm:$0xff]  ;;  %v3918_v60 = vld [vmem:[#allocation18_spill] sm:$0xff]  ;;  %v3254_v27 = vadd.f32 %v3170_v55, %v2993_v0  ;;  %v3274_v0 = vadd.f32 %v3170_v55, %v3013_v16 }
 0x24b   :  { %3913 = vst [vmem:[#allocation20_spill] sm:$0xff] %v3174_v36  ;;  %3915 = vst [vmem:[#allocation21_spill] sm:$0xff] %v3178_v18  ;;  %v3186_v21 = vmul.f32 %v2941_v59, %v3917_v22  ;;  %v3190_v56 = vmul.f32 %v2941_v59, %v3918_v60  ;;  %v3920_v36 = vld [vmem:[#allocation24_spill] sm:$0xff]  ;;  %v3921_v18 = vld [vmem:[#allocation25_spill] sm:$0xff]  ;;  %v3206_v22 = vadd.f32 %v3170_v55, %v2945_v58 }
 0x24c   :  { %v3198_v40 = vmul.f32 %v2941_v59, %v3920_v36  ;;  %v3202_v38 = vmul.f32 %v2941_v59, %v3921_v18  ;;  %v3210_v60 = vadd.f32 %v3170_v55, %v2949_v29  ;;  %v3218_v36 = vadd.f32 %v3170_v55, %v2957_v50 }
 0x24d   :  { %v3222_v59 = vadd.f32 %v3170_v55, %v2961_v53  ;;  %v3226_v58 = vadd.f32 %v3170_v55, %v2965_v30  ;;  %v3230_v29 = vadd.f32 %v3170_v55, %v2969_v8  ;;  %v3238_v50 = vadd.f32 %v3170_v55, %v2977_v13 }
 0x24e   :  { %v3242_v53 = vadd.f32 %v3170_v55, %v2981_v33  ;;  %v3246_v30 = vadd.f32 %v3170_v55, %v2985_v1  ;;  %v3250_v8 = vadd.f32 %v3170_v55, %v2989_v3  ;;  %v3258_v13 = vadd.f32 %v3170_v55, %v2997_v2 }
 0x24f   :  { %v3262_v33 = vadd.f32 %v3170_v55, %v3001_v12  ;;  %v3266_v1 = vadd.f32 %v3170_v55, %v3005_v19  ;;  %v3270_v3 = vadd.f32 %v3170_v55, %v3009_v10  ;;  %v3278_v2 = vadd.f32 %v3170_v55, %v3017_v28  ;;  %v3927_v18 = vld [vmem:[#allocation5_spill] sm:$0xff] }
 0x250   :  { %v3282_v12 = vadd.f32 %v3170_v55, %v3021_v35  ;;  %v3286_v19 = vadd.f32 %v3170_v55, %v3025_v26  ;;  %v3290_v10 = vadd.f32 %v3170_v55, %v3029_v32  ;;  %v3294_v16 = vadd.f32 %v3170_v55, %v3033_v44 }
 0x251   :  { %v3298_v28 = vadd.f32 %v3170_v55, %v3037_v49  ;;  %v3302_v35 = vadd.f32 %v3170_v55, %v3041_v42  ;;  %v3306_v26 = vadd.f32 %v3170_v55, %v3045_v48  ;;  %v3310_v32 = vadd.f32 %v3170_v55, %v3049_v14 }
 0x252   :  { %v3314_v44 = vadd.f32 %v3170_v55, %v3053_v20  ;;  %v3318_v49 = vadd.f32 %v3170_v55, %v3057_v11  ;;  %v3322_v42 = vadd.f32 %v3170_v55, %v3061_v17  ;;  %v3326_v48 = vadd.f32 %v3170_v55, %v3065_v45 }
 0x253   :  { %v3330_v14 = vadd.f32 %v3170_v55, %v3069_v46  ;;  %v3334_v20 = vadd.f32 %v3170_v55, %v3073_v41  ;;  %v3338_v11 = vadd.f32 %v3170_v55, %v3077_v61  ;;  %v3342_v17 = vadd.f32 %v3170_v55, %v3081_v7 }
 0x254   :  { %v3346_v45 = vadd.f32 %v3170_v55, %v3085_v54  ;;  %v3350_v46 = vadd.f32 %v3170_v55, %v3089_v31  ;;  %v3354_v41 = vadd.f32 %v3170_v55, %v3093_v52  ;;  %v3358_v61 = vadd.f32 %v3170_v55, %v3097_v4 }
 0x255   :  { %v3362_v7 = vadd.f32 %v3170_v55, %v3101_v6  ;;  %v3366_v54 = vadd.f32 %v3170_v55, %v3105_v51  ;;  %v3370_v31 = vadd.f32 %v3170_v55, %v3109_v63  ;;  %v3374_v52 = vadd.f32 %v3170_v55, %v3113_v43 }
 0x256   :  { %v3378_v4 = vadd.f32 %v3170_v55, %v3117_v9  ;;  %v3382_v6 = vadd.f32 %v3170_v55, %v3121_v47  ;;  %v3386_v51 = vadd.f32 %v3170_v55, %v3125_v62  ;;  %v3390_v63 = vadd.f32 %v3170_v55, %v3129_v25 }
 0x257   :  { %v3394_v43 = vadd.f32 %v3170_v55, %v3133_v39  ;;  %v3398_v9 = vadd.f32 %v3170_v55, %v3137_v24  ;;  %v3402_v47 = vadd.f32 %v3170_v55, %v3141_v34  ;;  %v3406_v62 = vadd.f32 %v3170_v55, %v3145_v57 }
 0x258   :  { %3922 = vst [vmem:[#allocation22_spill] sm:$0xff] %v3390_v63  ;;  %v3410_v25 = vadd.f32 %v3170_v55, %v3927_v18  ;;  %v3929_v63 = vld [vmem:[#allocation7_spill] sm:$0xff] }
 0x259   :  { %3923 = vst [vmem:[#allocation2_spill] sm:$0xff] %v3394_v43  ;;  %3924 = vst [vmem:[#allocation3_spill] sm:$0xff] %v3398_v9  ;;  %v3414_v39 = vadd.f32 %v3170_v55, %v3929_v63  ;;  %v3930_v43 = vld [vmem:[#allocation8_spill] sm:$0xff]  ;;  %v3931_v9 = vld [vmem:[#allocation11_spill] sm:$0xff] }
 0x25a   :  { %3925 = vst [vmem:[#allocation4_spill] sm:$0xff] %v3402_v47  ;;  %3926 = vst [vmem:[#allocation6_spill] sm:$0xff] %v3406_v62  ;;  %v3418_v24 = vadd.f32 %v3170_v55, %v3930_v43  ;;  %v3422_v34 = vadd.f32 %v3170_v55, %v3931_v9  ;;  %v3932_v47 = vld [vmem:[#allocation19_spill] sm:$0xff]  ;;  %v3933_v62 = vld [vmem:[#allocation20_spill] sm:$0xff]  ;;  %v3438_v43 = vadd.f32 %v3170_v55, %v3182_v23 }
 0x25b   :  { %3928 = vst [vmem:[#allocation9_spill] sm:$0xff] %v3410_v25  ;;  %v3426_v57 = vadd.f32 %v3170_v55, %v3932_v47  ;;  %v3430_v18 = vadd.f32 %v3170_v55, %v3933_v62  ;;  %v3934_v25 = vld [vmem:[#allocation21_spill] sm:$0xff]  ;;  %v3442_v9 = vadd.f32 %v3170_v55, %v3186_v21  ;;  %v3446_v47 = vadd.f32 %v3170_v55, %v3190_v56 }
 0x25c   :  { %v3434_v63 = vadd.f32 %v3170_v55, %v3934_v25  ;;  %3935 = vst [vmem:[#allocation12_spill] sm:$0xff] %v3438_v43  ;;  %v3450_v62 = vadd.f32 %v3170_v55, %v3194_v37  ;;  %v3454_v25 = vadd.f32 %v3170_v55, %v3198_v40  ;;  %v3458_v23 = vadd.f32 %v3170_v55, %v3202_v38 }
 0x25d   :  { %3936 = vst [vmem:[#allocation14_spill] sm:$0xff] %v3442_v9  ;;  %3937 = vst [vmem:[#allocation10_spill] sm:$0xff] %v3446_v47  ;;  %v1464_v43 = vmax.f32 %v3206_v22, 0.0  ;;  %v1465_v21 = vmax.f32 %v3210_v60, 0.0  ;;  %v1466_v9 = vmax.f32 %v3214_v15, 0.0  ;;  %v1467_v56 = vmax.f32 %v3218_v36, 0.0 }
 0x25e   :  { %3938 = vst [vmem:[#allocation13_spill] sm:$0xff] %v3450_v62  ;;  %3939 = vst [vmem:[#allocation17_spill] sm:$0xff] %v3454_v25  ;;  %v1468_v47 = vmax.f32 %v3222_v59, 0.0  ;;  %v1469_v37 = vmax.f32 %v3226_v58, 0.0  ;;  %v1470_v62 = vmax.f32 %v3230_v29, 0.0  ;;  %v1471_v40 = vmax.f32 %v3234_v5, 0.0 }
 0x25f   :  { %v1472_v25 = vmax.f32 %v3238_v50, 0.0  ;;  %v1473_v55 = vmax.f32 %v3242_v53, 0.0  ;;  %v1474_v38 = vmax.f32 %v3246_v30, 0.0  ;;  %v1475_v22 = vmax.f32 %v3250_v8, 0.0  ;;  %1528 = vst.msk [vmem:[%s3784_s4] sm:$0xff] %vm924_vm0, %v1464_v43  ;;  %1529 = vst.msk [vmem:[%s3784_s4 + $0x8] sm:$0xff] %vm924_vm0, %v1465_v21 }
 0x260   :  { %1530 = vst.msk [vmem:[%s3784_s4 + $0x10] sm:$0xff] %vm924_vm0, %v1466_v9  ;;  %1531 = vst.msk [vmem:[%s3784_s4 + $0x18] sm:$0xff] %vm924_vm0, %v1467_v56  ;;  %v1476_v60 = vmax.f32 %v3254_v27, 0.0  ;;  %v1477_v15 = vmax.f32 %v3258_v13, 0.0  ;;  %v1478_v36 = vmax.f32 %v3262_v33, 0.0  ;;  %v1479_v59 = vmax.f32 %v3266_v1, 0.0 }
 0x261   :  { %1532 = vst.msk [vmem:[%s3784_s4 + $0x20] sm:$0xff] %vm924_vm0, %v1468_v47  ;;  %1533 = vst.msk [vmem:[%s3784_s4 + $0x28] sm:$0xff] %vm924_vm0, %v1469_v37  ;;  %v1480_v58 = vmax.f32 %v3270_v3, 0.0  ;;  %v1481_v29 = vmax.f32 %v3274_v0, 0.0  ;;  %v1482_v5 = vmax.f32 %v3278_v2, 0.0  ;;  %v1483_v50 = vmax.f32 %v3282_v12, 0.0 }
 0x262   :  { %1534 = vst.msk [vmem:[%s3784_s4 + $0x30] sm:$0xff] %vm924_vm0, %v1470_v62  ;;  %1535 = vst.msk [vmem:[%s3784_s4 + $0x38] sm:$0xff] %vm924_vm0, %v1471_v40  ;;  %v1484_v53 = vmax.f32 %v3286_v19, 0.0  ;;  %v1485_v30 = vmax.f32 %v3290_v10, 0.0  ;;  %v1486_v8 = vmax.f32 %v3294_v16, 0.0  ;;  %v1487_v27 = vmax.f32 %v3298_v28, 0.0 }
 0x263   :  { %1536 = vst.msk [vmem:[%s3784_s4 + $0x40] sm:$0xff] %vm924_vm0, %v1472_v25  ;;  %1537 = vst.msk [vmem:[%s3784_s4 + $0x48] sm:$0xff] %vm924_vm0, %v1473_v55  ;;  %v1488_v13 = vmax.f32 %v3302_v35, 0.0  ;;  %v1489_v33 = vmax.f32 %v3306_v26, 0.0  ;;  %v1490_v1 = vmax.f32 %v3310_v32, 0.0  ;;  %v1491_v3 = vmax.f32 %v3314_v44, 0.0 }
 0x264   :  { %1538 = vst.msk [vmem:[%s3784_s4 + $0x50] sm:$0xff] %vm924_vm0, %v1474_v38  ;;  %1539 = vst.msk [vmem:[%s3784_s4 + $0x58] sm:$0xff] %vm924_vm0, %v1475_v22  ;;  %v1492_v0 = vmax.f32 %v3318_v49, 0.0  ;;  %v1493_v2 = vmax.f32 %v3322_v42, 0.0  ;;  %v1494_v12 = vmax.f32 %v3326_v48, 0.0  ;;  %v1495_v19 = vmax.f32 %v3330_v14, 0.0 }
 0x265   :  { %1540 = vst.msk [vmem:[%s3784_s4 + $0x60] sm:$0xff] %vm924_vm0, %v1476_v60  ;;  %1541 = vst.msk [vmem:[%s3784_s4 + $0x68] sm:$0xff] %vm924_vm0, %v1477_v15  ;;  %v1496_v10 = vmax.f32 %v3334_v20, 0.0  ;;  %v1497_v16 = vmax.f32 %v3338_v11, 0.0  ;;  %v1498_v28 = vmax.f32 %v3342_v17, 0.0  ;;  %v1499_v35 = vmax.f32 %v3346_v45, 0.0 }
 0x266   :  { %1542 = vst.msk [vmem:[%s3784_s4 + $0x70] sm:$0xff] %vm924_vm0, %v1478_v36  ;;  %1543 = vst.msk [vmem:[%s3784_s4 + $0x78] sm:$0xff] %vm924_vm0, %v1479_v59  ;;  %v1500_v26 = vmax.f32 %v3350_v46, 0.0  ;;  %v1501_v32 = vmax.f32 %v3354_v41, 0.0  ;;  %v1502_v44 = vmax.f32 %v3358_v61, 0.0  ;;  %v1503_v49 = vmax.f32 %v3362_v7, 0.0 }
 0x267   :  { %1544 = vst.msk [vmem:[%s3784_s4 + $0x80] sm:$0xff] %vm924_vm0, %v1480_v58  ;;  %1545 = vst.msk [vmem:[%s3784_s4 + $0x88] sm:$0xff] %vm924_vm0, %v1481_v29  ;;  %v1504_v42 = vmax.f32 %v3366_v54, 0.0  ;;  %v1505_v48 = vmax.f32 %v3370_v31, 0.0  ;;  %v1506_v14 = vmax.f32 %v3374_v52, 0.0  ;;  %v1507_v20 = vmax.f32 %v3378_v4, 0.0 }
 0x268   :  { %1546 = vst.msk [vmem:[%s3784_s4 + $0x90] sm:$0xff] %vm924_vm0, %v1482_v5  ;;  %1547 = vst.msk [vmem:[%s3784_s4 + $0x98] sm:$0xff] %vm924_vm0, %v1483_v50  ;;  %v1508_v11 = vmax.f32 %v3382_v6, 0.0  ;;  %v1509_v17 = vmax.f32 %v3386_v51, 0.0  ;;  %v3940_v45 = vld [vmem:[#allocation22_spill] sm:$0xff]  ;;  %v3942_v7 = vld [vmem:[#allocation3_spill] sm:$0xff] }
 0x269   :  { %1548 = vst.msk [vmem:[%s3784_s4 + $0xa0] sm:$0xff] %vm924_vm0, %v1484_v53  ;;  %1549 = vst.msk [vmem:[%s3784_s4 + $0xa8] sm:$0xff] %vm924_vm0, %v1485_v30  ;;  %v1510_v46 = vmax.f32 %v3940_v45, 0.0  ;;  %v3941_v41 = vld [vmem:[#allocation2_spill] sm:$0xff]  ;;  %v1512_v54 = vmax.f32 %v3942_v7, 0.0  ;;  %v3943_v31 = vld [vmem:[#allocation4_spill] sm:$0xff] }
 0x26a   :  { %1550 = vst.msk [vmem:[%s3784_s4 + $0xb0] sm:$0xff] %vm924_vm0, %v1486_v8  ;;  %1551 = vst.msk [vmem:[%s3784_s4 + $0xb8] sm:$0xff] %vm924_vm0, %v1487_v27  ;;  %v1511_v61 = vmax.f32 %v3941_v41, 0.0  ;;  %v1513_v52 = vmax.f32 %v3943_v31, 0.0  ;;  %v3944_v4 = vld [vmem:[#allocation6_spill] sm:$0xff]  ;;  %v3945_v51 = vld [vmem:[#allocation9_spill] sm:$0xff] }
 0x26b   :  { %1552 = vst.msk [vmem:[%s3784_s4 + $0xc0] sm:$0xff] %vm924_vm0, %v1488_v13  ;;  %1553 = vst.msk [vmem:[%s3784_s4 + $0xc8] sm:$0xff] %vm924_vm0, %v1489_v33  ;;  %v1514_v6 = vmax.f32 %v3944_v4, 0.0  ;;  %v1515_v43 = vmax.f32 %v3945_v51, 0.0  ;;  %v1516_v9 = vmax.f32 %v3414_v39, 0.0  ;;  %v1517_v47 = vmax.f32 %v3418_v24, 0.0 }
 0x26c   :  { %1554 = vst.msk [vmem:[%s3784_s4 + $0xd0] sm:$0xff] %vm924_vm0, %v1490_v1  ;;  %1555 = vst.msk [vmem:[%s3784_s4 + $0xd8] sm:$0xff] %vm924_vm0, %v1491_v3  ;;  %v1518_v62 = vmax.f32 %v3422_v34, 0.0  ;;  %v1519_v25 = vmax.f32 %v3426_v57, 0.0  ;;  %v1520_v39 = vmax.f32 %v3430_v18, 0.0  ;;  %v1521_v24 = vmax.f32 %v3434_v63, 0.0 }
 0x26d   :  { %1556 = vst.msk [vmem:[%s3784_s4 + $0xe0] sm:$0xff] %vm924_vm0, %v1492_v0  ;;  %1557 = vst.msk [vmem:[%s3784_s4 + $0xe8] sm:$0xff] %vm924_vm0, %v1493_v2  ;;  %v3946_v34 = vld [vmem:[#allocation12_spill] sm:$0xff]  ;;  %v3947_v21 = vld [vmem:[#allocation14_spill] sm:$0xff]  ;;  %v1527_v22 = vmax.f32 %v3458_v23, 0.0 }
 0x26e   :  { %1558 = vst.msk [vmem:[%s3784_s4 + $0xf0] sm:$0xff] %vm924_vm0, %v1494_v12  ;;  %1559 = vst.msk [vmem:[%s3784_s4 + $0xf8] sm:$0xff] %vm924_vm0, %v1495_v19  ;;  %v1522_v57 = vmax.f32 %v3946_v34, 0.0  ;;  %v1523_v56 = vmax.f32 %v3947_v21, 0.0  ;;  %v3948_v18 = vld [vmem:[#allocation10_spill] sm:$0xff]  ;;  %v3949_v37 = vld [vmem:[#allocation13_spill] sm:$0xff] }
 0x26f   :  { %1560 = vst.msk [vmem:[%s3784_s4 + $0x100] sm:$0xff] %vm924_vm0, %v1496_v10  ;;  %1561 = vst.msk [vmem:[%s3784_s4 + $0x108] sm:$0xff] %vm924_vm0, %v1497_v16  ;;  %v1524_v63 = vmax.f32 %v3948_v18, 0.0  ;;  %v1525_v40 = vmax.f32 %v3949_v37, 0.0  ;;  %v3950_v55 = vld [vmem:[#allocation17_spill] sm:$0xff] }
 0x270   :  { %1562 = vst.msk [vmem:[%s3784_s4 + $0x110] sm:$0xff] %vm924_vm0, %v1498_v28  ;;  %1563 = vst.msk [vmem:[%s3784_s4 + $0x118] sm:$0xff] %vm924_vm0, %v1499_v35  ;;  %v1526_v38 = vmax.f32 %v3950_v55, 0.0 }
 0x271   :  { %1564 = vst.msk [vmem:[%s3784_s4 + $0x120] sm:$0xff] %vm924_vm0, %v1500_v26  ;;  %1565 = vst.msk [vmem:[%s3784_s4 + $0x128] sm:$0xff] %vm924_vm0, %v1501_v32 }
 0x272   :  { %1566 = vst.msk [vmem:[%s3784_s4 + $0x130] sm:$0xff] %vm924_vm0, %v1502_v44  ;;  %1567 = vst.msk [vmem:[%s3784_s4 + $0x138] sm:$0xff] %vm924_vm0, %v1503_v49 }
 0x273   :  { %1568 = vst.msk [vmem:[%s3784_s4 + $0x140] sm:$0xff] %vm924_vm0, %v1504_v42  ;;  %1569 = vst.msk [vmem:[%s3784_s4 + $0x148] sm:$0xff] %vm924_vm0, %v1505_v48 }
 0x274   :  { %1570 = vst.msk [vmem:[%s3784_s4 + $0x150] sm:$0xff] %vm924_vm0, %v1506_v14  ;;  %1571 = vst.msk [vmem:[%s3784_s4 + $0x158] sm:$0xff] %vm924_vm0, %v1507_v20 }
 0x275   :  { %1572 = vst.msk [vmem:[%s3784_s4 + $0x160] sm:$0xff] %vm924_vm0, %v1508_v11  ;;  %1573 = vst.msk [vmem:[%s3784_s4 + $0x168] sm:$0xff] %vm924_vm0, %v1509_v17 }
 0x276   :  { %1574 = vst.msk [vmem:[%s3784_s4 + $0x170] sm:$0xff] %vm924_vm0, %v1510_v46  ;;  %1575 = vst.msk [vmem:[%s3784_s4 + $0x178] sm:$0xff] %vm924_vm0, %v1511_v61 }
 0x277   :  { %1576 = vst.msk [vmem:[%s3784_s4 + $0x180] sm:$0xff] %vm924_vm0, %v1512_v54  ;;  %1577 = vst.msk [vmem:[%s3784_s4 + $0x188] sm:$0xff] %vm924_vm0, %v1513_v52 }
 0x278   :  { %1578 = vst.msk [vmem:[%s3784_s4 + $0x190] sm:$0xff] %vm924_vm0, %v1514_v6  ;;  %1579 = vst.msk [vmem:[%s3784_s4 + $0x198] sm:$0xff] %vm924_vm0, %v1515_v43 }
 0x279   :  { %1580 = vst.msk [vmem:[%s3784_s4 + $0x1a0] sm:$0xff] %vm924_vm0, %v1516_v9  ;;  %1581 = vst.msk [vmem:[%s3784_s4 + $0x1a8] sm:$0xff] %vm924_vm0, %v1517_v47 }
 0x27a   :  { %1582 = vst.msk [vmem:[%s3784_s4 + $0x1b0] sm:$0xff] %vm924_vm0, %v1518_v62  ;;  %1583 = vst.msk [vmem:[%s3784_s4 + $0x1b8] sm:$0xff] %vm924_vm0, %v1519_v25 }
 0x27b   :  { %1584 = vst.msk [vmem:[%s3784_s4 + $0x1c0] sm:$0xff] %vm924_vm0, %v1520_v39  ;;  %1585 = vst.msk [vmem:[%s3784_s4 + $0x1c8] sm:$0xff] %vm924_vm0, %v1521_v24 }
 0x27c   :  { %1586 = vst.msk [vmem:[%s3784_s4 + $0x1d0] sm:$0xff] %vm924_vm0, %v1522_v57  ;;  %1587 = vst.msk [vmem:[%s3784_s4 + $0x1d8] sm:$0xff] %vm924_vm0, %v1523_v56 }
 0x27d   :  { %1588 = vst.msk [vmem:[%s3784_s4 + $0x1e0] sm:$0xff] %vm924_vm0, %v1524_v63  ;;  %1589 = vst.msk [vmem:[%s3784_s4 + $0x1e8] sm:$0xff] %vm924_vm0, %v1525_v40 }
 0x27e   :  { %1590 = vst.msk [vmem:[%s3784_s4 + $0x1f0] sm:$0xff] %vm924_vm0, %v1526_v38  ;;  %1591 = vst.msk [vmem:[%s3784_s4 + $0x1f8] sm:$0xff] %vm924_vm0, %v1527_v22 }

// kernel: vae_forward.17
= control target key start
LH: loop header
LB: loop body
LE: loop exit
PB: predicated region body
PF: predicated region fallthrough
CT: control target
= control target key end

     0   :  { %vm271_vm0 = vcmask 523264   ;;  %vm3105_vm1 = vcmask 15360   ;;  %s6820_s1 = inlined_call_operand.vmem [shape: bf16[4,64,2], index: 1, kind: input, shape index: {}]   ;;  %s6821_s0 = inlined_call_operand.vmem [shape: bf16[4,512,64], index: 0, kind: input, shape index: {}]   ;;  %s6822_s2 = inlined_call_operand.vmem [shape: f32[1,2], index: 2, kind: input, shape index: {}]   ;;  %s6823_s3 = inlined_call_operand.vmem [shape: f32[2048,2], index: 3, kind: output, shape index: {}]  }
   0x1   :  { %v4287_v0 = vld [vmem:[%s6820_s1] sm:$0xff]   ;;  %v4289_v2 = vld [vmem:[%s6820_s1 + $0x8] sm:$0xff]   ;;  %v4291_v4 = vld [vmem:[%s6820_s1 + $0x10] sm:$0xff]  }
   0x2   :  { %v4288_v1 = vld [vmem:[%s6820_s1 + $0x20] sm:$0xff]   ;;  %3999 = vmatprep.subr.bf16.mxu0 %v4287_v0  ;;  %v4290_v3 = vld [vmem:[%s6820_s1 + $0x28] sm:$0xff]   ;;  %v4292_v5 = vld [vmem:[%s6820_s1 + $0x30] sm:$0xff]  }
   0x3   :  { %4071 = vmatprep.subr.bf16.mxu1 %v4288_v1  ;;  %4000 = vmatpush3.bf16.msra.mxu0 %v4287_v0  ;;  %v4293_v6 = vld [vmem:[%s6820_s1 + $0x18] sm:$0xff]   ;;  %v4295_v8 = vld [vmem:[%s6821_s0] sm:$0xff]   ;;  %v4297_v12 = vld [vmem:[%s6821_s0 + $0x8] sm:$0xff]  }
   0x4   :  { %4072 = vmatpush3.bf16.msra.mxu1 %v4288_v1  ;;  %4001 = vmatprep.subr.bf16.mxu0 %v4289_v2  ;;  %v4294_v7 = vld [vmem:[%s6820_s1 + $0x38] sm:$0xff]   ;;  %v4296_v9 = vld [vmem:[%s6821_s0 + $0x100] sm:$0xff]   ;;  %v4298_v13 = vld [vmem:[%s6821_s0 + $0x108] sm:$0xff]  }
   0x5   :  { %4073 = vmatprep.subr.bf16.mxu1 %v4290_v3  ;;  %4007 = vmatprep.mubr.msk.bf16.mxu0 %vm271_vm0, %v4295_v8  ;;  %v4299_v10 = vld [vmem:[%s6820_s1 + $0x40] sm:$0xff]   ;;  %v4301_v14 = vld [vmem:[%s6821_s0 + $0x10] sm:$0xff]   ;;  %v4303_v16 = vld [vmem:[%s6821_s0 + $0x18] sm:$0xff]  }
   0x6   :  { %4079 = vmatprep.mubr.msk.bf16.mxu1 %vm271_vm0, %v4296_v9  ;;  %v4300_v11 = vld [vmem:[%s6820_s1 + $0x60] sm:$0xff]   ;;  %v4302_v15 = vld [vmem:[%s6821_s0 + $0x110] sm:$0xff]   ;;  %v4304_v17 = vld [vmem:[%s6821_s0 + $0x118] sm:$0xff]  }
   0x7   :  { %4002 = vmatpush3.bf16.msra.mxu0 %v4289_v2  ;;  %v4305_v18 = vld [vmem:[%s6821_s0 + $0x20] sm:$0xff]   ;;  %v4307_v20 = vld [vmem:[%s6821_s0 + $0x28] sm:$0xff]   ;;  %v4309_v22 = vld [vmem:[%s6821_s0 + $0x30] sm:$0xff]  }
   0x8   :  { %4074 = vmatpush3.bf16.msra.mxu1 %v4290_v3  ;;  %4003 = vmatprep.subr.bf16.mxu0 %v4291_v4  ;;  %v4306_v19 = vld [vmem:[%s6821_s0 + $0x120] sm:$0xff]   ;;  %v4308_v21 = vld [vmem:[%s6821_s0 + $0x128] sm:$0xff]   ;;  %v4310_v25 = vld [vmem:[%s6821_s0 + $0x130] sm:$0xff]  }
   0x9   :  { %4075 = vmatprep.subr.bf16.mxu1 %v4292_v5  ;;  %v4317_v23 = vld [vmem:[%s6820_s1 + $0x48] sm:$0xff]   ;;  %v4311_v26 = vld [vmem:[%s6821_s0 + $0x38] sm:$0xff]   ;;  %v4313_v28 = vld [vmem:[%s6821_s0 + $0x40] sm:$0xff]  }
   0xa   :  { %v4318_v24 = vld [vmem:[%s6820_s1 + $0x68] sm:$0xff]   ;;  %v4312_v27 = vld [vmem:[%s6821_s0 + $0x138] sm:$0xff]   ;;  %v4314_v29 = vld [vmem:[%s6821_s0 + $0x140] sm:$0xff]  }
   0xb   :  { %4004 = vmatpush3.bf16.msra.mxu0 %v4291_v4  ;;  %v4315_v30 = vld [vmem:[%s6821_s0 + $0x48] sm:$0xff]   ;;  %v4319_v32 = vld [vmem:[%s6821_s0 + $0x50] sm:$0xff]   ;;  %v4321_v36 = vld [vmem:[%s6821_s0 + $0x58] sm:$0xff]  }
   0xc   :  { %4076 = vmatpush3.bf16.msra.mxu1 %v4292_v5  ;;  %4005 = vmatprep.subr.bf16.mxu0 %v4293_v6  ;;  %v4316_v31 = vld [vmem:[%s6821_s0 + $0x148] sm:$0xff]   ;;  %v4320_v33 = vld [vmem:[%s6821_s0 + $0x150] sm:$0xff]   ;;  %v4322_v37 = vld [vmem:[%s6821_s0 + $0x158] sm:$0xff]  }
   0xd   :  { %4077 = vmatprep.subr.bf16.mxu1 %v4294_v7  ;;  %v4335_v34 = vld [vmem:[%s6820_s1 + $0x50] sm:$0xff]   ;;  %v4323_v38 = vld [vmem:[%s6821_s0 + $0x60] sm:$0xff]   ;;  %v4325_v40 = vld [vmem:[%s6821_s0 + $0x68] sm:$0xff]  }
   0xe   :  { %v4336_v35 = vld [vmem:[%s6820_s1 + $0x70] sm:$0xff]   ;;  %v4324_v39 = vld [vmem:[%s6821_s0 + $0x160] sm:$0xff]   ;;  %v4326_v41 = vld [vmem:[%s6821_s0 + $0x168] sm:$0xff]  }
   0xf   :  { %4006 = vmatpush3.bf16.msra.mxu0 %v4293_v6  ;;  %v4327_v42 = vld [vmem:[%s6821_s0 + $0x70] sm:$0xff]   ;;  %v4353_v44 = vld [vmem:[%s6820_s1 + $0x58] sm:$0xff]   ;;  %v4331_v48 = vld [vmem:[%s6821_s0 + $0x80] sm:$0xff]  }
  0x10   :  { %4078 = vmatpush3.bf16.msra.mxu1 %v4294_v7  ;;  %4143 = vmatprep.subr.bf16.mxu0 %v4299_v10  ;;  %v4328_v43 = vld [vmem:[%s6821_s0 + $0x170] sm:$0xff]   ;;  %v4354_v45 = vld [vmem:[%s6820_s1 + $0x78] sm:$0xff]   ;;  %v4332_v49 = vld [vmem:[%s6821_s0 + $0x180] sm:$0xff]  }
  0x11   :  { %4215 = vmatprep.subr.bf16.mxu1 %v4300_v11  ;;  %v4329_v46 = vld [vmem:[%s6821_s0 + $0x78] sm:$0xff]   ;;  %v4333_v50 = vld [vmem:[%s6821_s0 + $0x88] sm:$0xff]   ;;  %v4337_v52 = vld [vmem:[%s6821_s0 + $0x90] sm:$0xff]  }
  0x12   :  { %4008 = vmatmul.mubr.msk.bf16.vlgmr.msra.gmra.mrb[0].mxu0 %vm271_vm0, %v4297_v12  ;;  %v4330_v47 = vld [vmem:[%s6821_s0 + $0x178] sm:$0xff]   ;;  %v4334_v51 = vld [vmem:[%s6821_s0 + $0x188] sm:$0xff]   ;;  %v4338_v53 = vld [vmem:[%s6821_s0 + $0x190] sm:$0xff]  }
  0x13   :  { %4080 = vmatmul.mubr.msk.bf16.vlgmr.msra.gmra.mrb[0].mxu1 %vm271_vm0, %v4298_v13  ;;  %4144 = vmatpush3.bf16.msra.mxu0 %v4299_v10  ;;  %v4339_v54 = vld [vmem:[%s6821_s0 + $0x98] sm:$0xff]   ;;  %v4341_v56 = vld [vmem:[%s6821_s0 + $0xa0] sm:$0xff]   ;;  %v4343_v58 = vld [vmem:[%s6821_s0 + $0xa8] sm:$0xff]  }
  0x14   :  { %4216 = vmatpush3.bf16.msra.mxu1 %v4300_v11  ;;  %4011 = vmatprep.mubr.msk.bf16.mxu0 %vm271_vm0, %v4301_v14  ;;  %v4340_v55 = vld [vmem:[%s6821_s0 + $0x198] sm:$0xff]   ;;  %v4342_v57 = vld [vmem:[%s6821_s0 + $0x1a0] sm:$0xff]   ;;  %v4344_v59 = vld [vmem:[%s6821_s0 + $0x1a8] sm:$0xff]  }
  0x15   :  { %4083 = vmatprep.mubr.msk.bf16.mxu1 %vm271_vm0, %v4302_v15  ;;  %4145 = vmatprep.subr.bf16.mxu0 %v4317_v23  ;;  %v4345_v60 = vld [vmem:[%s6821_s0 + $0xb0] sm:$0xff]   ;;  %v4347_v62 = vld [vmem:[%s6821_s0 + $0xb8] sm:$0xff]   ;;  %v4349_v0 = vld [vmem:[%s6821_s0 + $0xc0] sm:$0xff]  }
  0x16   :  { %4217 = vmatprep.subr.bf16.mxu1 %v4318_v24  ;;  %v4346_v61 = vld [vmem:[%s6821_s0 + $0x1b0] sm:$0xff]   ;;  %v4348_v63 = vld [vmem:[%s6821_s0 + $0x1b8] sm:$0xff]   ;;  %v4350_v1 = vld [vmem:[%s6821_s0 + $0x1c0] sm:$0xff]  }
  0x17   :  { %4146 = vmatpush3.bf16.msra.mxu0 %v4317_v23  ;;  %v4351_v2 = vld [vmem:[%s6821_s0 + $0xc8] sm:$0xff]   ;;  %v4355_v4 = vld [vmem:[%s6821_s0 + $0xd0] sm:$0xff]   ;;  %v4357_v6 = vld [vmem:[%s6821_s0 + $0xd8] sm:$0xff]  }
  0x18   :  { %4218 = vmatpush3.bf16.msra.mxu1 %v4318_v24  ;;  %4147 = vmatprep.subr.bf16.mxu0 %v4335_v34  ;;  %v4352_v3 = vld [vmem:[%s6821_s0 + $0x1c8] sm:$0xff]   ;;  %v4356_v5 = vld [vmem:[%s6821_s0 + $0x1d0] sm:$0xff]   ;;  %v4358_v7 = vld [vmem:[%s6821_s0 + $0x1d8] sm:$0xff]  }
  0x19   :  { %4219 = vmatprep.subr.bf16.mxu1 %v4336_v35  ;;  %v4359_v8 = vld [vmem:[%s6821_s0 + $0xe0] sm:$0xff]   ;;  %v4361_v10 = vld [vmem:[%s6821_s0 + $0xe8] sm:$0xff]   ;;  %v4363_v12 = vld [vmem:[%s6821_s0 + $0xf0] sm:$0xff]  }
  0x1a   :  { %4012 = vmatmul.mubr.msk.bf16.gmra.mrb[4].mxu0 %vm271_vm0, %v4303_v16  ;;  %v4360_v9 = vld [vmem:[%s6821_s0 + $0x1e0] sm:$0xff]   ;;  %v4362_v11 = vld [vmem:[%s6821_s0 + $0x1e8] sm:$0xff]   ;;  %v4364_v13 = vld [vmem:[%s6821_s0 + $0x1f0] sm:$0xff]  }
  0x1b   :  { %4084 = vmatmul.mubr.msk.bf16.gmra.mrb[4].mxu1 %vm271_vm0, %v4304_v17  ;;  %4015 = vmatprep.mubr.msk.bf16.mxu0 %vm271_vm0, %v4305_v18  ;;  %v4365_v14 = vld [vmem:[%s6821_s0 + $0xf8] sm:$0xff]   ;;  %v4367_v16 = vld [vmem:[%s6821_s0 + $0x200] sm:$0xff]   ;;  %v4369_v18 = vld [vmem:[%s6821_s0 + $0x208] sm:$0xff]  }
  0x1c   :  { %4087 = vmatprep.mubr.msk.bf16.mxu1 %vm271_vm0, %v4306_v19  ;;  %4148 = vmatpush3.bf16.msra.mxu0 %v4335_v34  ;;  %v4366_v15 = vld [vmem:[%s6821_s0 + $0x1f8] sm:$0xff]   ;;  %v4368_v17 = vld [vmem:[%s6821_s0 + $0x300] sm:$0xff]   ;;  %v4370_v19 = vld [vmem:[%s6821_s0 + $0x308] sm:$0xff]  }
  0x1d   :  { %4220 = vmatpush3.bf16.msra.mxu1 %v4336_v35  ;;  %4149 = vmatprep.subr.bf16.mxu0 %v4353_v44  ;;  %v4374_v23 = vld [vmem:[%s6821_s0 + $0x318] sm:$0xff]   ;;  %v4375_v24 = vld [vmem:[%s6821_s0 + $0x220] sm:$0xff]   ;;  %v4385_v34 = vld [vmem:[%s6821_s0 + $0x248] sm:$0xff]  }
  0x1e   :  { %4221 = vmatprep.subr.bf16.mxu1 %v4354_v45  ;;  %v4386_v35 = vld [vmem:[%s6821_s0 + $0x348] sm:$0xff]  }
  0x20   :  { %4150 = vmatpush3.bf16.msra.mxu0 %v4353_v44  ;;  %v4395_v44 = vld [vmem:[%s6821_s0 + $0x270] sm:$0xff]  }
  0x21   :  { %4222 = vmatpush3.bf16.msra.mxu1 %v4354_v45  ;;  %v4396_v45 = vld [vmem:[%s6821_s0 + $0x370] sm:$0xff]  }
  0x22   :  { %4016 = vmatmul.mubr.msk.bf16.gmra.mrb[8].mxu0 %vm271_vm0, %v4307_v20  ;;  %v4371_v20 = vld [vmem:[%s6821_s0 + $0x210] sm:$0xff]  }
  0x23   :  { %4088 = vmatmul.mubr.msk.bf16.gmra.mrb[8].mxu1 %vm271_vm0, %v4308_v21  ;;  %4019 = vmatprep.mubr.msk.bf16.mxu0 %vm271_vm0, %v4309_v22  ;;  %v4372_v21 = vld [vmem:[%s6821_s0 + $0x310] sm:$0xff]   ;;  %v4373_v22 = vld [vmem:[%s6821_s0 + $0x218] sm:$0xff]  }
  0x24   :  { %4091 = vmatprep.mubr.msk.bf16.mxu1 %vm271_vm0, %v4310_v25  ;;  %v4376_v25 = vld [vmem:[%s6821_s0 + $0x320] sm:$0xff]  }
  0x2a   :  { %4020 = vmatmul.mubr.msk.bf16.gmra.mrb[12].mxu0 %vm271_vm0, %v4311_v26  ;;  %v4377_v26 = vld [vmem:[%s6821_s0 + $0x228] sm:$0xff]  }
  0x2b   :  { %4092 = vmatmul.mubr.msk.bf16.gmra.mrb[12].mxu1 %vm271_vm0, %v4312_v27  ;;  %4023 = vmatprep.mubr.msk.bf16.mxu0 %vm271_vm0, %v4313_v28  ;;  %v4378_v27 = vld [vmem:[%s6821_s0 + $0x328] sm:$0xff]   ;;  %v4379_v28 = vld [vmem:[%s6821_s0 + $0x230] sm:$0xff]  }
  0x2c   :  { %4095 = vmatprep.mubr.msk.bf16.mxu1 %vm271_vm0, %v4314_v29  ;;  %v4380_v29 = vld [vmem:[%s6821_s0 + $0x330] sm:$0xff]  }
  0x32   :  { %4024 = vmatmul.mubr.msk.bf16.gmra.mrb[16].mxu0 %vm271_vm0, %v4315_v30  ;;  %v4381_v30 = vld [vmem:[%s6821_s0 + $0x238] sm:$0xff]  }
  0x33   :  { %4096 = vmatmul.mubr.msk.bf16.gmra.mrb[16].mxu1 %vm271_vm0, %v4316_v31  ;;  %4027 = vmatprep.mubr.msk.bf16.mxu0 %vm271_vm0, %v4319_v32  ;;  %v4382_v31 = vld [vmem:[%s6821_s0 + $0x338] sm:$0xff]   ;;  %v4383_v32 = vld [vmem:[%s6821_s0 + $0x240] sm:$0xff]  }
  0x34   :  { %4099 = vmatprep.mubr.msk.bf16.mxu1 %vm271_vm0, %v4320_v33  ;;  %v4384_v33 = vld [vmem:[%s6821_s0 + $0x340] sm:$0xff]  }
  0x3a   :  { %4028 = vmatmul.mubr.msk.bf16.gmra.mrb[20].mxu0 %vm271_vm0, %v4321_v36  ;;  %v4387_v36 = vld [vmem:[%s6821_s0 + $0x250] sm:$0xff]  }
  0x3b   :  { %4100 = vmatmul.mubr.msk.bf16.gmra.mrb[20].mxu1 %vm271_vm0, %v4322_v37  ;;  %4031 = vmatprep.mubr.msk.bf16.mxu0 %vm271_vm0, %v4323_v38  ;;  %v4388_v37 = vld [vmem:[%s6821_s0 + $0x350] sm:$0xff]   ;;  %v4389_v38 = vld [vmem:[%s6821_s0 + $0x258] sm:$0xff]  }
  0x3c   :  { %4103 = vmatprep.mubr.msk.bf16.mxu1 %vm271_vm0, %v4324_v39  ;;  %v4390_v39 = vld [vmem:[%s6821_s0 + $0x358] sm:$0xff]  }
  0x42   :  { %4032 = vmatmul.mubr.msk.bf16.gmra.mrb[24].mxu0 %vm271_vm0, %v4325_v40  ;;  %v4391_v40 = vld [vmem:[%s6821_s0 + $0x260] sm:$0xff]  }
  0x43   :  { %4104 = vmatmul.mubr.msk.bf16.gmra.mrb[24].mxu1 %vm271_vm0, %v4326_v41  ;;  %4035 = vmatprep.mubr.msk.bf16.mxu0 %vm271_vm0, %v4327_v42  ;;  %v4392_v41 = vld [vmem:[%s6821_s0 + $0x360] sm:$0xff]   ;;  %v4393_v42 = vld [vmem:[%s6821_s0 + $0x268] sm:$0xff]  }
  0x44   :  { %4107 = vmatprep.mubr.msk.bf16.mxu1 %vm271_vm0, %v4328_v43  ;;  %v4394_v43 = vld [vmem:[%s6821_s0 + $0x368] sm:$0xff]  }
  0x4a   :  { %4036 = vmatmul.mubr.msk.bf16.gmra.mrb[28].mxu0 %vm271_vm0, %v4329_v46  ;;  %v4397_v46 = vld [vmem:[%s6821_s0 + $0x278] sm:$0xff]  }
  0x4b   :  { %4108 = vmatmul.mubr.msk.bf16.gmra.mrb[28].mxu1 %vm271_vm0, %v4330_v47  ;;  %4039 = vmatprep.mubr.msk.bf16.mxu0 %vm271_vm0, %v4331_v48  ;;  %v4398_v47 = vld [vmem:[%s6821_s0 + $0x378] sm:$0xff]   ;;  %v4399_v48 = vld [vmem:[%s6821_s0 + $0x280] sm:$0xff]  }
  0x4c   :  { %4111 = vmatprep.mubr.msk.bf16.mxu1 %vm271_vm0, %v4332_v49  ;;  %v4400_v49 = vld [vmem:[%s6821_s0 + $0x380] sm:$0xff]  }
  0x52   :  { %4040 = vmatmul.mubr.msk.bf16.gmra.mrb[32].mxu0 %vm271_vm0, %v4333_v50  ;;  %v4401_v50 = vld [vmem:[%s6821_s0 + $0x288] sm:$0xff]  }
  0x53   :  { %4112 = vmatmul.mubr.msk.bf16.gmra.mrb[32].mxu1 %vm271_vm0, %v4334_v51  ;;  %4043 = vmatprep.mubr.msk.bf16.mxu0 %vm271_vm0, %v4337_v52  ;;  %v4402_v51 = vld [vmem:[%s6821_s0 + $0x388] sm:$0xff]   ;;  %v4403_v52 = vld [vmem:[%s6821_s0 + $0x290] sm:$0xff]  }
  0x54   :  { %4115 = vmatprep.mubr.msk.bf16.mxu1 %vm271_vm0, %v4338_v53  ;;  %v4404_v53 = vld [vmem:[%s6821_s0 + $0x390] sm:$0xff]  }
  0x5a   :  { %4044 = vmatmul.mubr.msk.bf16.gmra.mrb[36].mxu0 %vm271_vm0, %v4339_v54  ;;  %v4405_v54 = vld [vmem:[%s6821_s0 + $0x298] sm:$0xff]  }
  0x5b   :  { %4116 = vmatmul.mubr.msk.bf16.gmra.mrb[36].mxu1 %vm271_vm0, %v4340_v55  ;;  %4047 = vmatprep.mubr.msk.bf16.mxu0 %vm271_vm0, %v4341_v56  ;;  %v4406_v55 = vld [vmem:[%s6821_s0 + $0x398] sm:$0xff]   ;;  %v4407_v56 = vld [vmem:[%s6821_s0 + $0x2a0] sm:$0xff]  }
  0x5c   :  { %4119 = vmatprep.mubr.msk.bf16.mxu1 %vm271_vm0, %v4342_v57  ;;  %v4408_v57 = vld [vmem:[%s6821_s0 + $0x3a0] sm:$0xff]  }
  0x62   :  { %4048 = vmatmul.mubr.msk.bf16.gmra.mrb[40].mxu0 %vm271_vm0, %v4343_v58  ;;  %v4409_v58 = vld [vmem:[%s6821_s0 + $0x2a8] sm:$0xff]  }
  0x63   :  { %4120 = vmatmul.mubr.msk.bf16.gmra.mrb[40].mxu1 %vm271_vm0, %v4344_v59  ;;  %4051 = vmatprep.mubr.msk.bf16.mxu0 %vm271_vm0, %v4345_v60  ;;  %v4410_v59 = vld [vmem:[%s6821_s0 + $0x3a8] sm:$0xff]   ;;  %v4411_v60 = vld [vmem:[%s6821_s0 + $0x2b0] sm:$0xff]  }
  0x64   :  { %4123 = vmatprep.mubr.msk.bf16.mxu1 %vm271_vm0, %v4346_v61  ;;  %v4412_v61 = vld [vmem:[%s6821_s0 + $0x3b0] sm:$0xff]  }
  0x6a   :  { %4052 = vmatmul.mubr.msk.bf16.gmra.mrb[44].mxu0 %vm271_vm0, %v4347_v62  ;;  %v5454_v62 = vld [vmem:[%s6822_s2] ss:$0 sm:$0xff] }
  0x6b   :  { %4124 = vmatmul.mubr.msk.bf16.gmra.mrb[44].mxu1 %vm271_vm0, %v4348_v63  ;;  %4055 = vmatprep.mubr.msk.bf16.mxu0 %vm271_vm0, %v4349_v0 }
  0x6c   :  { %4127 = vmatprep.mubr.msk.bf16.mxu1 %vm271_vm0, %v4350_v1 }
  0x72   :  { %4056 = vmatmul.mubr.msk.bf16.gmra.mrb[48].mxu0 %vm271_vm0, %v4351_v2 }
  0x73   :  { %4128 = vmatmul.mubr.msk.bf16.gmra.mrb[48].mxu1 %vm271_vm0, %v4352_v3  ;;  %4059 = vmatprep.mubr.msk.bf16.mxu0 %vm271_vm0, %v4355_v4  ;;  %v4413_v3 = vld [vmem:[%s6821_s0 + $0x2b8] sm:$0xff]  }
  0x74   :  { %4131 = vmatprep.mubr.msk.bf16.mxu1 %vm271_vm0, %v4356_v5 }
  0x7a   :  { %4060 = vmatmul.mubr.msk.bf16.gmra.mrb[52].mxu0 %vm271_vm0, %v4357_v6 }
  0x7b   :  { %4132 = vmatmul.mubr.msk.bf16.gmra.mrb[52].mxu1 %vm271_vm0, %v4358_v7  ;;  %4063 = vmatprep.mubr.msk.bf16.mxu0 %vm271_vm0, %v4359_v8  ;;  %v4414_v8 = vld [vmem:[%s6821_s0 + $0x3b8] sm:$0xff]  }
  0x7c   :  { %4135 = vmatprep.mubr.msk.bf16.mxu1 %vm271_vm0, %v4360_v9  ;;  %v4415_v9 = vld [vmem:[%s6821_s0 + $0x2c0] sm:$0xff]  }
  0x82   :  { %4064 = vmatmul.mubr.msk.bf16.gmra.mrb[56].mxu0 %vm271_vm0, %v4361_v10 }
  0x83   :  { %4136 = vmatmul.mubr.msk.bf16.gmra.mrb[56].mxu1 %vm271_vm0, %v4362_v11  ;;  %4067 = vmatprep.mubr.msk.bf16.mxu0 %vm271_vm0, %v4363_v12 }
  0x84   :  { %4139 = vmatprep.mubr.msk.bf16.mxu1 %vm271_vm0, %v4364_v13 }
  0x8a   :  { %4068 = vmatmul.mubr.msk.bf16.gmra.mrb[60].mxu0 %vm271_vm0, %v4365_v14  ;;  %v4416_v14 = vld [vmem:[%s6821_s0 + $0x3c0] sm:$0xff]  }
  0x8b   :  { %4140 = vmatmul.mubr.msk.bf16.gmra.mrb[60].mxu1 %vm271_vm0, %v4366_v15  ;;  %4151 = vmatprep.mubr.msk.bf16.mxu0 %vm271_vm0, %v4367_v16 }
  0x8c   :  { %4223 = vmatprep.mubr.msk.bf16.mxu1 %vm271_vm0, %v4368_v17 }
  0x92   :  { %4152 = vmatmul.mubr.msk.bf16.vlgmr.msra.gmra.mrb[64].mxu0 %vm271_vm0, %v4369_v18 }
  0x93   :  { %4224 = vmatmul.mubr.msk.bf16.vlgmr.msra.gmra.mrb[64].mxu1 %vm271_vm0, %v4370_v19  ;;  %4155 = vmatprep.mubr.msk.bf16.mxu0 %vm271_vm0, %v4371_v20 }
  0x94   :  { %4227 = vmatprep.mubr.msk.bf16.mxu1 %vm271_vm0, %v4372_v21 }
  0x9a   :  { %4156 = vmatmul.mubr.msk.bf16.gmra.mrb[68].mxu0 %vm271_vm0, %v4373_v22 }
  0x9b   :  { %4228 = vmatmul.mubr.msk.bf16.gmra.mrb[68].mxu1 %vm271_vm0, %v4374_v23  ;;  %4159 = vmatprep.mubr.msk.bf16.mxu0 %vm271_vm0, %v4375_v24  ;;  %v4417_v23 = vld [vmem:[%s6821_s0 + $0x2c8] sm:$0xff]  }
  0x9c   :  { %4231 = vmatprep.mubr.msk.bf16.mxu1 %vm271_vm0, %v4376_v25 }
  0xa2   :  { %4160 = vmatmul.mubr.msk.bf16.gmra.mrb[72].mxu0 %vm271_vm0, %v4377_v26 }
  0xa3   :  { %4232 = vmatmul.mubr.msk.bf16.gmra.mrb[72].mxu1 %vm271_vm0, %v4378_v27  ;;  %4163 = vmatprep.mubr.msk.bf16.mxu0 %vm271_vm0, %v4379_v28  ;;  %v4418_v28 = vld [vmem:[%s6821_s0 + $0x3c8] sm:$0xff]  }
  0xa4   :  { %4235 = vmatprep.mubr.msk.bf16.mxu1 %vm271_vm0, %v4380_v29  ;;  %v4419_v29 = vld [vmem:[%s6821_s0 + $0x2d0] sm:$0xff]  }
  0xaa   :  { %4164 = vmatmul.mubr.msk.bf16.gmra.mrb[76].mxu0 %vm271_vm0, %v4381_v30 }
  0xab   :  { %4236 = vmatmul.mubr.msk.bf16.gmra.mrb[76].mxu1 %vm271_vm0, %v4382_v31  ;;  %4167 = vmatprep.mubr.msk.bf16.mxu0 %vm271_vm0, %v4383_v32 }
  0xac   :  { %4239 = vmatprep.mubr.msk.bf16.mxu1 %vm271_vm0, %v4384_v33 }
  0xb2   :  { %4168 = vmatmul.mubr.msk.bf16.gmra.mrb[80].mxu0 %vm271_vm0, %v4385_v34  ;;  %v4420_v34 = vld [vmem:[%s6821_s0 + $0x3d0] sm:$0xff]  }
  0xb3   :  { %4240 = vmatmul.mubr.msk.bf16.gmra.mrb[80].mxu1 %vm271_vm0, %v4386_v35  ;;  %4171 = vmatprep.mubr.msk.bf16.mxu0 %vm271_vm0, %v4387_v36 }
  0xb4   :  { %4243 = vmatprep.mubr.msk.bf16.mxu1 %vm271_vm0, %v4388_v37 }
  0xba   :  { %4172 = vmatmul.mubr.msk.bf16.gmra.mrb[84].mxu0 %vm271_vm0, %v4389_v38 }
  0xbb   :  { %4244 = vmatmul.mubr.msk.bf16.gmra.mrb[84].mxu1 %vm271_vm0, %v4390_v39  ;;  %4175 = vmatprep.mubr.msk.bf16.mxu0 %vm271_vm0, %v4391_v40 }
  0xbc   :  { %4247 = vmatprep.mubr.msk.bf16.mxu1 %vm271_vm0, %v4392_v41 }
  0xc2   :  { %4176 = vmatmul.mubr.msk.bf16.gmra.mrb[88].mxu0 %vm271_vm0, %v4393_v42 }
  0xc3   :  { %4248 = vmatmul.mubr.msk.bf16.gmra.mrb[88].mxu1 %vm271_vm0, %v4394_v43  ;;  %4179 = vmatprep.mubr.msk.bf16.mxu0 %vm271_vm0, %v4395_v44 }
  0xc4   :  { %4251 = vmatprep.mubr.msk.bf16.mxu1 %vm271_vm0, %v4396_v45 }
  0xca   :  { %4180 = vmatmul.mubr.msk.bf16.gmra.mrb[92].mxu0 %vm271_vm0, %v4397_v46 }
  0xcb   :  { %4252 = vmatmul.mubr.msk.bf16.gmra.mrb[92].mxu1 %vm271_vm0, %v4398_v47  ;;  %4183 = vmatprep.mubr.msk.bf16.mxu0 %vm271_vm0, %v4399_v48  ;;  %v4421_v48 = vld [vmem:[%s6821_s0 + $0x2d8] sm:$0xff]  }
  0xcc   :  { %4255 = vmatprep.mubr.msk.bf16.mxu1 %vm271_vm0, %v4400_v49 }
  0xd2   :  { %4184 = vmatmul.mubr.msk.bf16.gmra.mrb[96].mxu0 %vm271_vm0, %v4401_v50 }
  0xd3   :  { %4256 = vmatmul.mubr.msk.bf16.gmra.mrb[96].mxu1 %vm271_vm0, %v4402_v51  ;;  %4187 = vmatprep.mubr.msk.bf16.mxu0 %vm271_vm0, %v4403_v52 }
  0xd4   :  { %4259 = vmatprep.mubr.msk.bf16.mxu1 %vm271_vm0, %v4404_v53 }
  0xda   :  { %4188 = vmatmul.mubr.msk.bf16.gmra.mrb[100].mxu0 %vm271_vm0, %v4405_v54  ;;  %v4422_v54 = vld [vmem:[%s6821_s0 + $0x3d8] sm:$0xff]  }
  0xdb   :  { %4260 = vmatmul.mubr.msk.bf16.gmra.mrb[100].mxu1 %vm271_vm0, %v4406_v55  ;;  %4191 = vmatprep.mubr.msk.bf16.mxu0 %vm271_vm0, %v4407_v56  ;;  %v4423_v55 = vld [vmem:[%s6821_s0 + $0x2e0] sm:$0xff]  }
  0xdc   :  { %4263 = vmatprep.mubr.msk.bf16.mxu1 %vm271_vm0, %v4408_v57 }
  0xe2   :  { %4192 = vmatmul.mubr.msk.bf16.gmra.mrb[104].mxu0 %vm271_vm0, %v4409_v58 }
  0xe3   :  { %4264 = vmatmul.mubr.msk.bf16.gmra.mrb[104].mxu1 %vm271_vm0, %v4410_v59  ;;  %4195 = vmatprep.mubr.msk.bf16.mxu0 %vm271_vm0, %v4411_v60 }
  0xe4   :  { %4267 = vmatprep.mubr.msk.bf16.mxu1 %vm271_vm0, %v4412_v61  ;;  %v4424_v61 = vld [vmem:[%s6821_s0 + $0x3e0] sm:$0xff]  }
  0xe5   :  { %v4009_v63 = vpop.f32.mrb[0].mxu0 }
  0xe6   :  { %v2595_v0 = vadd.f32 %v4009_v63, %v5454_v62  ;;  %v4081_v1 = vpop.f32.mrb[0].mxu1  ;;  %v402_v2 = vpop.f32.mrb[1].mxu0 }
  0xe7   :  { %v2659_v4 = vadd.f32 %v4081_v1, %v5454_v62  ;;  %v2593_v5 = vadd.f32 %v5454_v62, %v402_v2  ;;  %v1045_v6 = vpop.f32.mrb[1].mxu1  ;;  %v4010_v7 = vpop.f32.mrb[2].mxu0 }
  0xe8   :  { %4431 = vtanh.f32 %v2595_v0  ;;  %v2657_v10 = vadd.f32 %v5454_v62, %v1045_v6  ;;  %v2596_v11 = vadd.f32 %v4010_v7, %v5454_v62  ;;  %v4082_v12 = vpop.f32.mrb[2].mxu1  ;;  %v405_v13 = vpop.f32.mrb[3].mxu0 }
  0xe9   :  { %4433 = vtanh.f32 %v2659_v4  ;;  %v2660_v15 = vadd.f32 %v4082_v12, %v5454_v62  ;;  %v1048_v16 = vpop.f32.mrb[3].mxu1  ;;  %v2594_v17 = vadd.f32 %v5454_v62, %v405_v13  ;;  %v4425_v13 = vld [vmem:[%s6821_s0 + $0x2e8] sm:$0xff]  }
  0xea   :  { %4435 = vtanh.f32 %v2593_v5  ;;  %4196 = vmatmul.mubr.msk.bf16.gmra.mrb[108].mxu0 %vm271_vm0, %v4413_v3  ;;  %v2658_v18 = vadd.f32 %v5454_v62, %v1048_v16 }
  0xeb   :  { %4437 = vtanh.f32 %v2657_v10  ;;  %4268 = vmatmul.mubr.msk.bf16.gmra.mrb[108].mxu1 %vm271_vm0, %v4414_v8  ;;  %4199 = vmatprep.mubr.msk.bf16.mxu0 %vm271_vm0, %v4415_v9 }
  0xec   :  { %4439 = vtanh.f32 %v2596_v11  ;;  %4271 = vmatprep.mubr.msk.bf16.mxu1 %vm271_vm0, %v4416_v14 }
  0xed   :  { %4441 = vtanh.f32 %v2660_v15  ;;  %v4013_v19 = vpop.f32.mrb[4].mxu0 }
  0xee   :  { %4443 = vtanh.f32 %v2594_v17  ;;  %v2599_v20 = vadd.f32 %v4013_v19, %v5454_v62  ;;  %v4085_v21 = vpop.f32.mrb[4].mxu1  ;;  %v418_v22 = vpop.f32.mrb[5].mxu0  ;;  %v4426_v19 = vld [vmem:[%s6821_s0 + $0x3e8] sm:$0xff]  }
  0xef   :  { %4445 = vtanh.f32 %v2658_v18  ;;  %v2663_v24 = vadd.f32 %v4085_v21, %v5454_v62  ;;  %v2597_v25 = vadd.f32 %v5454_v62, %v418_v22  ;;  %v1061_v26 = vpop.f32.mrb[5].mxu1  ;;  %v4014_v27 = vpop.f32.mrb[6].mxu0 }
  0xf0   :  { %4447 = vtanh.f32 %v2599_v20  ;;  %v2661_v30 = vadd.f32 %v5454_v62, %v1061_v26  ;;  %v2600_v31 = vadd.f32 %v4014_v27, %v5454_v62  ;;  %v4086_v32 = vpop.f32.mrb[6].mxu1  ;;  %v421_v33 = vpop.f32.mrb[7].mxu0  ;;  %v4427_v20 = vld [vmem:[%s6821_s0 + $0x2f0] sm:$0xff]  }
  0xf1   :  { %4449 = vtanh.f32 %v2663_v24  ;;  %v2664_v35 = vadd.f32 %v4086_v32, %v5454_v62  ;;  %v1064_v36 = vpop.f32.mrb[7].mxu1  ;;  %v2598_v38 = vadd.f32 %v5454_v62, %v421_v33  ;;  %v4428_v26 = vld [vmem:[%s6821_s0 + $0x3f0] sm:$0xff]  }
  0xf2   :  { %v4432_v37 = vpop.eup %4431  ;;  %4451 = vtanh.f32 %v2597_v25  ;;  %4200 = vmatmul.mubr.msk.bf16.gmra.mrb[112].mxu0 %vm271_vm0, %v4417_v23  ;;  %v2662_v40 = vadd.f32 %v5454_v62, %v1064_v36 }
  0xf3   :  { %v4434_v39 = vpop.eup %4433  ;;  %3108 = vst.msk [vmem:[%s6823_s3 + $0x10] sm:$0xff] %vm3105_vm1, %v4432_v37  ;;  %4453 = vtanh.f32 %v2661_v30  ;;  %4272 = vmatmul.mubr.msk.bf16.gmra.mrb[112].mxu1 %vm271_vm0, %v4418_v28  ;;  %4203 = vmatprep.mubr.msk.bf16.mxu0 %vm271_vm0, %v4419_v29 }
  0xf4   :  { %v4436_v41 = vpop.eup %4435  ;;  %3172 = vst.msk [vmem:[%s6823_s3 + $0x210] sm:$0xff] %vm3105_vm1, %v4434_v39  ;;  %4455 = vtanh.f32 %v2600_v31  ;;  %4275 = vmatprep.mubr.msk.bf16.mxu1 %vm271_vm0, %v4420_v34 }
  0xf5   :  { %v4438_v42 = vpop.eup %4437  ;;  %3106 = vst.msk [vmem:[%s6823_s3] sm:$0xff] %vm3105_vm1, %v4436_v41  ;;  %4457 = vtanh.f32 %v2664_v35  ;;  %v4017_v43 = vpop.f32.mrb[8].mxu0  ;;  %v4429_v41 = vld [vmem:[%s6821_s0 + $0x2f8] sm:$0xff]  }
  0xf6   :  { %v4440_v44 = vpop.eup %4439  ;;  %3170 = vst.msk [vmem:[%s6823_s3 + $0x200] sm:$0xff] %vm3105_vm1, %v4438_v42  ;;  %4459 = vtanh.f32 %v2598_v38  ;;  %v2603_v45 = vadd.f32 %v4017_v43, %v5454_v62  ;;  %v4089_v46 = vpop.f32.mrb[8].mxu1 }
  0xf7   :  { %v434_v47 = vpop.f32.mrb[9].mxu0  ;;  %v4442_v49 = vpop.eup %4441  ;;  %3109 = vst.msk [vmem:[%s6823_s3 + $0x18] sm:$0xff] %vm3105_vm1, %v4440_v44  ;;  %4461 = vtanh.f32 %v2662_v40  ;;  %v2667_v50 = vadd.f32 %v4089_v46, %v5454_v62 }
  0xf8   :  { %v2601_v51 = vadd.f32 %v5454_v62, %v434_v47  ;;  %v1077_v52 = vpop.f32.mrb[9].mxu1  ;;  %v4018_v53 = vpop.f32.mrb[10].mxu0  ;;  %3173 = vst.msk [vmem:[%s6823_s3 + $0x218] sm:$0xff] %vm3105_vm1, %v4442_v49  ;;  %4463 = vtanh.f32 %v2603_v45  ;;  %v4430_v47 = vld [vmem:[%s6821_s0 + $0x3f8] sm:$0xff]  }
  0xf9   :  { %v4444_v56 = vpop.eup %4443  ;;  %v2665_v57 = vadd.f32 %v5454_v62, %v1077_v52  ;;  %v2604_v58 = vadd.f32 %v4018_v53, %v5454_v62  ;;  %v4090_v59 = vpop.f32.mrb[10].mxu1  ;;  %4465 = vtanh.f32 %v2667_v50 }
  0xfa   :  { %v437_v60 = vpop.f32.mrb[11].mxu0  ;;  %v4446_v63 = vpop.eup %4445  ;;  %3107 = vst.msk [vmem:[%s6823_s3 + $0x8] sm:$0xff] %vm3105_vm1, %v4444_v56  ;;  %v2668_v0 = vadd.f32 %v4090_v59, %v5454_v62  ;;  %4467 = vtanh.f32 %v2601_v51  ;;  %4204 = vmatmul.mubr.msk.bf16.gmra.mrb[116].mxu0 %vm271_vm0, %v4421_v48 }
  0xfb   :  { %v1080_v1 = vpop.f32.mrb[11].mxu1  ;;  %v4448_v2 = vpop.eup %4447  ;;  %3171 = vst.msk [vmem:[%s6823_s3 + $0x208] sm:$0xff] %vm3105_vm1, %v4446_v63  ;;  %v2602_v3 = vadd.f32 %v5454_v62, %v437_v60  ;;  %4469 = vtanh.f32 %v2665_v57  ;;  %4276 = vmatmul.mubr.msk.bf16.gmra.mrb[116].mxu1 %vm271_vm0, %v4422_v54  ;;  %4207 = vmatprep.mubr.msk.bf16.mxu0 %vm271_vm0, %v4423_v55 }
  0xfc   :  { %v4450_v4 = vpop.eup %4449  ;;  %3112 = vst.msk [vmem:[%s6823_s3 + $0x30] sm:$0xff] %vm3105_vm1, %v4448_v2  ;;  %v2666_v5 = vadd.f32 %v5454_v62, %v1080_v1  ;;  %4471 = vtanh.f32 %v2604_v58  ;;  %4279 = vmatprep.mubr.msk.bf16.mxu1 %vm271_vm0, %v4424_v61 }
  0xfd   :  { %v4452_v6 = vpop.eup %4451  ;;  %3176 = vst.msk [vmem:[%s6823_s3 + $0x230] sm:$0xff] %vm3105_vm1, %v4450_v4  ;;  %4473 = vtanh.f32 %v2668_v0  ;;  %v4021_v8 = vpop.f32.mrb[12].mxu0 }
  0xfe   :  { %v4454_v7 = vpop.eup %4453  ;;  %3110 = vst.msk [vmem:[%s6823_s3 + $0x20] sm:$0xff] %vm3105_vm1, %v4452_v6  ;;  %4475 = vtanh.f32 %v2602_v3  ;;  %v2607_v10 = vadd.f32 %v4021_v8, %v5454_v62  ;;  %v4093_v11 = vpop.f32.mrb[12].mxu1 }
  0xff   :  { %v4456_v9 = vpop.eup %4455  ;;  %3174 = vst.msk [vmem:[%s6823_s3 + $0x220] sm:$0xff] %vm3105_vm1, %v4454_v7  ;;  %v450_v12 = vpop.f32.mrb[13].mxu0  ;;  %4477 = vtanh.f32 %v2666_v5  ;;  %v2671_v15 = vadd.f32 %v4093_v11, %v5454_v62 }
 0x100   :  { %v4458_v14 = vpop.eup %4457  ;;  %3113 = vst.msk [vmem:[%s6823_s3 + $0x38] sm:$0xff] %vm3105_vm1, %v4456_v9  ;;  %v2605_v16 = vadd.f32 %v5454_v62, %v450_v12  ;;  %v1093_v17 = vpop.f32.mrb[13].mxu1  ;;  %4479 = vtanh.f32 %v2607_v10 }
 0x101   :  { %v4022_v18 = vpop.f32.mrb[14].mxu0  ;;  %v4460_v21 = vpop.eup %4459  ;;  %3177 = vst.msk [vmem:[%s6823_s3 + $0x238] sm:$0xff] %vm3105_vm1, %v4458_v14  ;;  %v2669_v22 = vadd.f32 %v5454_v62, %v1093_v17  ;;  %4481 = vtanh.f32 %v2671_v15 }
 0x102   :  { %v2608_v23 = vadd.f32 %v4022_v18, %v5454_v62  ;;  %v4094_v24 = vpop.f32.mrb[14].mxu1  ;;  %v453_v25 = vpop.f32.mrb[15].mxu0  ;;  %3111 = vst.msk [vmem:[%s6823_s3 + $0x28] sm:$0xff] %vm3105_vm1, %v4460_v21  ;;  %4483 = vtanh.f32 %v2605_v16  ;;  %4208 = vmatmul.mubr.msk.bf16.gmra.mrb[120].mxu0 %vm271_vm0, %v4425_v13 }
 0x103   :  { %v4462_v27 = vpop.eup %4461  ;;  %v2672_v28 = vadd.f32 %v4094_v24, %v5454_v62  ;;  %v1096_v29 = vpop.f32.mrb[15].mxu1  ;;  %v2606_v31 = vadd.f32 %v5454_v62, %v453_v25  ;;  %4485 = vtanh.f32 %v2669_v22  ;;  %4280 = vmatmul.mubr.msk.bf16.gmra.mrb[120].mxu1 %vm271_vm0, %v4426_v19  ;;  %4211 = vmatprep.mubr.msk.bf16.mxu0 %vm271_vm0, %v4427_v20 }
 0x104   :  { %v4464_v30 = vpop.eup %4463  ;;  %3175 = vst.msk [vmem:[%s6823_s3 + $0x228] sm:$0xff] %vm3105_vm1, %v4462_v27  ;;  %v2670_v33 = vadd.f32 %v5454_v62, %v1096_v29  ;;  %4487 = vtanh.f32 %v2608_v23  ;;  %4283 = vmatprep.mubr.msk.bf16.mxu1 %vm271_vm0, %v4428_v26 }
 0x105   :  { %v4466_v32 = vpop.eup %4465  ;;  %3116 = vst.msk [vmem:[%s6823_s3 + $0x50] sm:$0xff] %vm3105_vm1, %v4464_v30  ;;  %4489 = vtanh.f32 %v2672_v28  ;;  %v4025_v36 = vpop.f32.mrb[16].mxu0 }
 0x106   :  { %v4468_v34 = vpop.eup %4467  ;;  %3180 = vst.msk [vmem:[%s6823_s3 + $0x250] sm:$0xff] %vm3105_vm1, %v4466_v32  ;;  %4491 = vtanh.f32 %v2606_v31  ;;  %v2611_v38 = vadd.f32 %v4025_v36, %v5454_v62  ;;  %v4097_v39 = vpop.f32.mrb[16].mxu1 }
 0x107   :  { %v4470_v35 = vpop.eup %4469  ;;  %3114 = vst.msk [vmem:[%s6823_s3 + $0x40] sm:$0xff] %vm3105_vm1, %v4468_v34  ;;  %v466_v40 = vpop.f32.mrb[17].mxu0  ;;  %4493 = vtanh.f32 %v2670_v33  ;;  %v2675_v43 = vadd.f32 %v4097_v39, %v5454_v62 }
 0x108   :  { %v4472_v37 = vpop.eup %4471  ;;  %3178 = vst.msk [vmem:[%s6823_s3 + $0x240] sm:$0xff] %vm3105_vm1, %v4470_v35  ;;  %v2609_v44 = vadd.f32 %v5454_v62, %v466_v40  ;;  %v1109_v45 = vpop.f32.mrb[17].mxu1  ;;  %4495 = vtanh.f32 %v2611_v38 }
 0x109   :  { %v4474_v42 = vpop.eup %4473  ;;  %3117 = vst.msk [vmem:[%s6823_s3 + $0x58] sm:$0xff] %vm3105_vm1, %v4472_v37  ;;  %v4026_v46 = vpop.f32.mrb[18].mxu0  ;;  %v2673_v49 = vadd.f32 %v5454_v62, %v1109_v45  ;;  %4497 = vtanh.f32 %v2675_v43 }
 0x10a   :  { %v4476_v48 = vpop.eup %4475  ;;  %3181 = vst.msk [vmem:[%s6823_s3 + $0x258] sm:$0xff] %vm3105_vm1, %v4474_v42  ;;  %v2612_v50 = vadd.f32 %v4026_v46, %v5454_v62  ;;  %v4098_v51 = vpop.f32.mrb[18].mxu1  ;;  %4499 = vtanh.f32 %v2609_v44  ;;  %4212 = vmatmul.mubr.msk.bf16.gmra.mrb[124].mxu0 %vm271_vm0, %v4429_v41 }
 0x10b   :  { %v469_v52 = vpop.f32.mrb[19].mxu0  ;;  %v4478_v53 = vpop.eup %4477  ;;  %3115 = vst.msk [vmem:[%s6823_s3 + $0x48] sm:$0xff] %vm3105_vm1, %v4476_v48  ;;  %v2676_v54 = vadd.f32 %v4098_v51, %v5454_v62  ;;  %4501 = vtanh.f32 %v2673_v49  ;;  %4284 = vmatmul.mubr.msk.bf16.gmra.mrb[124].mxu1 %vm271_vm0, %v4430_v47 }
 0x10c   :  { %v1112_v55 = vpop.f32.mrb[19].mxu1  ;;  %v4480_v56 = vpop.eup %4479  ;;  %3179 = vst.msk [vmem:[%s6823_s3 + $0x248] sm:$0xff] %vm3105_vm1, %v4478_v53  ;;  %v2610_v57 = vadd.f32 %v5454_v62, %v469_v52  ;;  %4503 = vtanh.f32 %v2612_v50 }
 0x10d   :  { %v4482_v58 = vpop.eup %4481  ;;  %3120 = vst.msk [vmem:[%s6823_s3 + $0x70] sm:$0xff] %vm3105_vm1, %v4480_v56  ;;  %v2674_v59 = vadd.f32 %v5454_v62, %v1112_v55  ;;  %4505 = vtanh.f32 %v2676_v54  ;;  %v4029_v63 = vpop.f32.mrb[20].mxu0 }
 0x10e   :  { %v4484_v60 = vpop.eup %4483  ;;  %3184 = vst.msk [vmem:[%s6823_s3 + $0x270] sm:$0xff] %vm3105_vm1, %v4482_v58  ;;  %4507 = vtanh.f32 %v2610_v57  ;;  %v2615_v1 = vadd.f32 %v4029_v63, %v5454_v62  ;;  %v4101_v2 = vpop.f32.mrb[20].mxu1 }
 0x10f   :  { %v4486_v61 = vpop.eup %4485  ;;  %3118 = vst.msk [vmem:[%s6823_s3 + $0x60] sm:$0xff] %vm3105_vm1, %v4484_v60  ;;  %v482_v3 = vpop.f32.mrb[21].mxu0  ;;  %4509 = vtanh.f32 %v2674_v59  ;;  %v2679_v5 = vadd.f32 %v4101_v2, %v5454_v62 }
 0x110   :  { %v4488_v0 = vpop.eup %4487  ;;  %3182 = vst.msk [vmem:[%s6823_s3 + $0x260] sm:$0xff] %vm3105_vm1, %v4486_v61  ;;  %v2613_v6 = vadd.f32 %v5454_v62, %v482_v3  ;;  %v1125_v7 = vpop.f32.mrb[21].mxu1  ;;  %4511 = vtanh.f32 %v2615_v1 }
 0x111   :  { %v4490_v4 = vpop.eup %4489  ;;  %3121 = vst.msk [vmem:[%s6823_s3 + $0x78] sm:$0xff] %vm3105_vm1, %v4488_v0  ;;  %v4030_v8 = vpop.f32.mrb[22].mxu0  ;;  %v2677_v10 = vadd.f32 %v5454_v62, %v1125_v7  ;;  %4513 = vtanh.f32 %v2679_v5 }
 0x112   :  { %v4492_v9 = vpop.eup %4491  ;;  %3185 = vst.msk [vmem:[%s6823_s3 + $0x278] sm:$0xff] %vm3105_vm1, %v4490_v4  ;;  %v2616_v11 = vadd.f32 %v4030_v8, %v5454_v62  ;;  %v4102_v12 = vpop.f32.mrb[22].mxu1  ;;  %4515 = vtanh.f32 %v2613_v6 }
 0x113   :  { %v485_v13 = vpop.f32.mrb[23].mxu0  ;;  %v4494_v14 = vpop.eup %4493  ;;  %3119 = vst.msk [vmem:[%s6823_s3 + $0x68] sm:$0xff] %vm3105_vm1, %v4492_v9  ;;  %v2680_v15 = vadd.f32 %v4102_v12, %v5454_v62  ;;  %4517 = vtanh.f32 %v2677_v10 }
 0x114   :  { %v1128_v16 = vpop.f32.mrb[23].mxu1  ;;  %v4496_v17 = vpop.eup %4495  ;;  %3183 = vst.msk [vmem:[%s6823_s3 + $0x268] sm:$0xff] %vm3105_vm1, %v4494_v14  ;;  %v2614_v18 = vadd.f32 %v5454_v62, %v485_v13  ;;  %4519 = vtanh.f32 %v2616_v11 }
 0x115   :  { %v4498_v19 = vpop.eup %4497  ;;  %3124 = vst.msk [vmem:[%s6823_s3 + $0x90] sm:$0xff] %vm3105_vm1, %v4496_v17  ;;  %v2678_v20 = vadd.f32 %v5454_v62, %v1128_v16  ;;  %4521 = vtanh.f32 %v2680_v15  ;;  %v4033_v23 = vpop.f32.mrb[24].mxu0 }
 0x116   :  { %v4500_v21 = vpop.eup %4499  ;;  %3188 = vst.msk [vmem:[%s6823_s3 + $0x290] sm:$0xff] %vm3105_vm1, %v4498_v19  ;;  %4523 = vtanh.f32 %v2614_v18  ;;  %v2619_v25 = vadd.f32 %v4033_v23, %v5454_v62  ;;  %v4105_v26 = vpop.f32.mrb[24].mxu1 }
 0x117   :  { %v4502_v22 = vpop.eup %4501  ;;  %3122 = vst.msk [vmem:[%s6823_s3 + $0x80] sm:$0xff] %vm3105_vm1, %v4500_v21  ;;  %v498_v27 = vpop.f32.mrb[25].mxu0  ;;  %4525 = vtanh.f32 %v2678_v20  ;;  %v2683_v29 = vadd.f32 %v4105_v26, %v5454_v62 }
 0x118   :  { %v4504_v24 = vpop.eup %4503  ;;  %3186 = vst.msk [vmem:[%s6823_s3 + $0x280] sm:$0xff] %vm3105_vm1, %v4502_v22  ;;  %v2617_v30 = vadd.f32 %v5454_v62, %v498_v27  ;;  %v1141_v31 = vpop.f32.mrb[25].mxu1  ;;  %4527 = vtanh.f32 %v2619_v25 }
 0x119   :  { %v4506_v28 = vpop.eup %4505  ;;  %3125 = vst.msk [vmem:[%s6823_s3 + $0x98] sm:$0xff] %vm3105_vm1, %v4504_v24  ;;  %v4034_v32 = vpop.f32.mrb[26].mxu0  ;;  %v2681_v34 = vadd.f32 %v5454_v62, %v1141_v31  ;;  %4529 = vtanh.f32 %v2683_v29 }
 0x11a   :  { %v4508_v33 = vpop.eup %4507  ;;  %3189 = vst.msk [vmem:[%s6823_s3 + $0x298] sm:$0xff] %vm3105_vm1, %v4506_v28  ;;  %v2620_v35 = vadd.f32 %v4034_v32, %v5454_v62  ;;  %v4106_v36 = vpop.f32.mrb[26].mxu1  ;;  %4531 = vtanh.f32 %v2617_v30 }
 0x11b   :  { %v501_v37 = vpop.f32.mrb[27].mxu0  ;;  %v4510_v38 = vpop.eup %4509  ;;  %3123 = vst.msk [vmem:[%s6823_s3 + $0x88] sm:$0xff] %vm3105_vm1, %v4508_v33  ;;  %v2684_v39 = vadd.f32 %v4106_v36, %v5454_v62  ;;  %4533 = vtanh.f32 %v2681_v34 }
 0x11c   :  { %v1144_v40 = vpop.f32.mrb[27].mxu1  ;;  %v4512_v41 = vpop.eup %4511  ;;  %3187 = vst.msk [vmem:[%s6823_s3 + $0x288] sm:$0xff] %vm3105_vm1, %v4510_v38  ;;  %v2618_v42 = vadd.f32 %v5454_v62, %v501_v37  ;;  %4535 = vtanh.f32 %v2620_v35 }
 0x11d   :  { %v4514_v43 = vpop.eup %4513  ;;  %3128 = vst.msk [vmem:[%s6823_s3 + $0xb0] sm:$0xff] %vm3105_vm1, %v4512_v41  ;;  %v2682_v44 = vadd.f32 %v5454_v62, %v1144_v40  ;;  %4537 = vtanh.f32 %v2684_v39  ;;  %v4037_v47 = vpop.f32.mrb[28].mxu0 }
 0x11e   :  { %v4516_v45 = vpop.eup %4515  ;;  %3192 = vst.msk [vmem:[%s6823_s3 + $0x2b0] sm:$0xff] %vm3105_vm1, %v4514_v43  ;;  %4539 = vtanh.f32 %v2618_v42  ;;  %v2623_v49 = vadd.f32 %v4037_v47, %v5454_v62  ;;  %v4109_v50 = vpop.f32.mrb[28].mxu1 }
 0x11f   :  { %v4518_v46 = vpop.eup %4517  ;;  %3126 = vst.msk [vmem:[%s6823_s3 + $0xa0] sm:$0xff] %vm3105_vm1, %v4516_v45  ;;  %v514_v51 = vpop.f32.mrb[29].mxu0  ;;  %4541 = vtanh.f32 %v2682_v44  ;;  %v2687_v53 = vadd.f32 %v4109_v50, %v5454_v62 }
 0x120   :  { %v4520_v48 = vpop.eup %4519  ;;  %3190 = vst.msk [vmem:[%s6823_s3 + $0x2a0] sm:$0xff] %vm3105_vm1, %v4518_v46  ;;  %v2621_v54 = vadd.f32 %v5454_v62, %v514_v51  ;;  %v1157_v55 = vpop.f32.mrb[29].mxu1  ;;  %4543 = vtanh.f32 %v2623_v49 }
 0x121   :  { %v4522_v52 = vpop.eup %4521  ;;  %3129 = vst.msk [vmem:[%s6823_s3 + $0xb8] sm:$0xff] %vm3105_vm1, %v4520_v48  ;;  %v4038_v56 = vpop.f32.mrb[30].mxu0  ;;  %v2685_v58 = vadd.f32 %v5454_v62, %v1157_v55  ;;  %4545 = vtanh.f32 %v2687_v53 }
 0x122   :  { %v4524_v57 = vpop.eup %4523  ;;  %3193 = vst.msk [vmem:[%s6823_s3 + $0x2b8] sm:$0xff] %vm3105_vm1, %v4522_v52  ;;  %v2624_v59 = vadd.f32 %v4038_v56, %v5454_v62  ;;  %v4110_v60 = vpop.f32.mrb[30].mxu1  ;;  %4547 = vtanh.f32 %v2621_v54 }
 0x123   :  { %v517_v61 = vpop.f32.mrb[31].mxu0  ;;  %v4526_v63 = vpop.eup %4525  ;;  %3127 = vst.msk [vmem:[%s6823_s3 + $0xa8] sm:$0xff] %vm3105_vm1, %v4524_v57  ;;  %v2688_v0 = vadd.f32 %v4110_v60, %v5454_v62  ;;  %4549 = vtanh.f32 %v2685_v58 }
 0x124   :  { %v1160_v1 = vpop.f32.mrb[31].mxu1  ;;  %v4528_v2 = vpop.eup %4527  ;;  %3191 = vst.msk [vmem:[%s6823_s3 + $0x2a8] sm:$0xff] %vm3105_vm1, %v4526_v63  ;;  %v2622_v3 = vadd.f32 %v5454_v62, %v517_v61  ;;  %4551 = vtanh.f32 %v2624_v59 }
 0x125   :  { %v4530_v4 = vpop.eup %4529  ;;  %3132 = vst.msk [vmem:[%s6823_s3 + $0xd0] sm:$0xff] %vm3105_vm1, %v4528_v2  ;;  %v2686_v5 = vadd.f32 %v5454_v62, %v1160_v1  ;;  %4553 = vtanh.f32 %v2688_v0  ;;  %v4041_v8 = vpop.f32.mrb[32].mxu0 }
 0x126   :  { %v4532_v6 = vpop.eup %4531  ;;  %3196 = vst.msk [vmem:[%s6823_s3 + $0x2d0] sm:$0xff] %vm3105_vm1, %v4530_v4  ;;  %4555 = vtanh.f32 %v2622_v3  ;;  %v2627_v10 = vadd.f32 %v4041_v8, %v5454_v62  ;;  %v4113_v11 = vpop.f32.mrb[32].mxu1 }
 0x127   :  { %v4534_v7 = vpop.eup %4533  ;;  %3130 = vst.msk [vmem:[%s6823_s3 + $0xc0] sm:$0xff] %vm3105_vm1, %v4532_v6  ;;  %v530_v12 = vpop.f32.mrb[33].mxu0  ;;  %4557 = vtanh.f32 %v2686_v5  ;;  %v2691_v14 = vadd.f32 %v4113_v11, %v5454_v62 }
 0x128   :  { %v4536_v9 = vpop.eup %4535  ;;  %3194 = vst.msk [vmem:[%s6823_s3 + $0x2c0] sm:$0xff] %vm3105_vm1, %v4534_v7  ;;  %v2625_v15 = vadd.f32 %v5454_v62, %v530_v12  ;;  %v1173_v16 = vpop.f32.mrb[33].mxu1  ;;  %4559 = vtanh.f32 %v2627_v10 }
 0x129   :  { %v4538_v13 = vpop.eup %4537  ;;  %3133 = vst.msk [vmem:[%s6823_s3 + $0xd8] sm:$0xff] %vm3105_vm1, %v4536_v9  ;;  %v4042_v17 = vpop.f32.mrb[34].mxu0  ;;  %v2689_v19 = vadd.f32 %v5454_v62, %v1173_v16  ;;  %4561 = vtanh.f32 %v2691_v14 }
 0x12a   :  { %v4540_v18 = vpop.eup %4539  ;;  %3197 = vst.msk [vmem:[%s6823_s3 + $0x2d8] sm:$0xff] %vm3105_vm1, %v4538_v13  ;;  %v2628_v20 = vadd.f32 %v4042_v17, %v5454_v62  ;;  %v4114_v21 = vpop.f32.mrb[34].mxu1  ;;  %4563 = vtanh.f32 %v2625_v15 }
 0x12b   :  { %v533_v22 = vpop.f32.mrb[35].mxu0  ;;  %v4542_v23 = vpop.eup %4541  ;;  %3131 = vst.msk [vmem:[%s6823_s3 + $0xc8] sm:$0xff] %vm3105_vm1, %v4540_v18  ;;  %v2692_v24 = vadd.f32 %v4114_v21, %v5454_v62  ;;  %4565 = vtanh.f32 %v2689_v19 }
 0x12c   :  { %v1176_v25 = vpop.f32.mrb[35].mxu1  ;;  %v4544_v26 = vpop.eup %4543  ;;  %3195 = vst.msk [vmem:[%s6823_s3 + $0x2c8] sm:$0xff] %vm3105_vm1, %v4542_v23  ;;  %v2626_v27 = vadd.f32 %v5454_v62, %v533_v22  ;;  %4567 = vtanh.f32 %v2628_v20 }
 0x12d   :  { %v4546_v28 = vpop.eup %4545  ;;  %3136 = vst.msk [vmem:[%s6823_s3 + $0xf0] sm:$0xff] %vm3105_vm1, %v4544_v26  ;;  %v2690_v29 = vadd.f32 %v5454_v62, %v1176_v25  ;;  %4569 = vtanh.f32 %v2692_v24  ;;  %v4045_v32 = vpop.f32.mrb[36].mxu0 }
 0x12e   :  { %v4548_v30 = vpop.eup %4547  ;;  %3200 = vst.msk [vmem:[%s6823_s3 + $0x2f0] sm:$0xff] %vm3105_vm1, %v4546_v28  ;;  %4571 = vtanh.f32 %v2626_v27  ;;  %v2631_v34 = vadd.f32 %v4045_v32, %v5454_v62  ;;  %v4117_v35 = vpop.f32.mrb[36].mxu1 }
 0x12f   :  { %v4550_v31 = vpop.eup %4549  ;;  %3134 = vst.msk [vmem:[%s6823_s3 + $0xe0] sm:$0xff] %vm3105_vm1, %v4548_v30  ;;  %v546_v36 = vpop.f32.mrb[37].mxu0  ;;  %4573 = vtanh.f32 %v2690_v29  ;;  %v2695_v38 = vadd.f32 %v4117_v35, %v5454_v62 }
 0x130   :  { %v4552_v33 = vpop.eup %4551  ;;  %3198 = vst.msk [vmem:[%s6823_s3 + $0x2e0] sm:$0xff] %vm3105_vm1, %v4550_v31  ;;  %v2629_v39 = vadd.f32 %v5454_v62, %v546_v36  ;;  %v1189_v40 = vpop.f32.mrb[37].mxu1  ;;  %4575 = vtanh.f32 %v2631_v34 }
 0x131   :  { %v4554_v37 = vpop.eup %4553  ;;  %3137 = vst.msk [vmem:[%s6823_s3 + $0xf8] sm:$0xff] %vm3105_vm1, %v4552_v33  ;;  %v4046_v41 = vpop.f32.mrb[38].mxu0  ;;  %v2693_v43 = vadd.f32 %v5454_v62, %v1189_v40  ;;  %4577 = vtanh.f32 %v2695_v38 }
 0x132   :  { %v4556_v42 = vpop.eup %4555  ;;  %3201 = vst.msk [vmem:[%s6823_s3 + $0x2f8] sm:$0xff] %vm3105_vm1, %v4554_v37  ;;  %v2632_v44 = vadd.f32 %v4046_v41, %v5454_v62  ;;  %v4118_v45 = vpop.f32.mrb[38].mxu1  ;;  %4579 = vtanh.f32 %v2629_v39 }
 0x133   :  { %v549_v46 = vpop.f32.mrb[39].mxu0  ;;  %v4558_v47 = vpop.eup %4557  ;;  %3135 = vst.msk [vmem:[%s6823_s3 + $0xe8] sm:$0xff] %vm3105_vm1, %v4556_v42  ;;  %v2696_v48 = vadd.f32 %v4118_v45, %v5454_v62  ;;  %4581 = vtanh.f32 %v2693_v43 }
 0x134   :  { %v1192_v49 = vpop.f32.mrb[39].mxu1  ;;  %v4560_v50 = vpop.eup %4559  ;;  %3199 = vst.msk [vmem:[%s6823_s3 + $0x2e8] sm:$0xff] %vm3105_vm1, %v4558_v47  ;;  %v2630_v51 = vadd.f32 %v5454_v62, %v549_v46  ;;  %4583 = vtanh.f32 %v2632_v44 }
 0x135   :  { %v4562_v52 = vpop.eup %4561  ;;  %3140 = vst.msk [vmem:[%s6823_s3 + $0x110] sm:$0xff] %vm3105_vm1, %v4560_v50  ;;  %v2694_v53 = vadd.f32 %v5454_v62, %v1192_v49  ;;  %4585 = vtanh.f32 %v2696_v48  ;;  %v4049_v56 = vpop.f32.mrb[40].mxu0 }
 0x136   :  { %v4564_v54 = vpop.eup %4563  ;;  %3204 = vst.msk [vmem:[%s6823_s3 + $0x310] sm:$0xff] %vm3105_vm1, %v4562_v52  ;;  %4587 = vtanh.f32 %v2630_v51  ;;  %v2635_v58 = vadd.f32 %v4049_v56, %v5454_v62  ;;  %v4121_v59 = vpop.f32.mrb[40].mxu1 }
 0x137   :  { %v4566_v55 = vpop.eup %4565  ;;  %3138 = vst.msk [vmem:[%s6823_s3 + $0x100] sm:$0xff] %vm3105_vm1, %v4564_v54  ;;  %v562_v60 = vpop.f32.mrb[41].mxu0  ;;  %4589 = vtanh.f32 %v2694_v53  ;;  %v2699_v63 = vadd.f32 %v4121_v59, %v5454_v62  ;;  %v5977_v53 = vld [vmem:[%s6822_s2] ss:$0 sm:$0xff] }
 0x138   :  { %v4568_v57 = vpop.eup %4567  ;;  %3202 = vst.msk [vmem:[%s6823_s3 + $0x300] sm:$0xff] %vm3105_vm1, %v4566_v55  ;;  %v2633_v0 = vadd.f32 %v5454_v62, %v562_v60  ;;  %v1205_v1 = vpop.f32.mrb[41].mxu1  ;;  %4591 = vtanh.f32 %v2635_v58 }
 0x139   :  { %v4570_v61 = vpop.eup %4569  ;;  %3141 = vst.msk [vmem:[%s6823_s3 + $0x118] sm:$0xff] %vm3105_vm1, %v4568_v57  ;;  %v4050_v2 = vpop.f32.mrb[42].mxu0  ;;  %v2697_v4 = vadd.f32 %v5454_v62, %v1205_v1  ;;  %4593 = vtanh.f32 %v2699_v63 }
 0x13a   :  { %v4572_v3 = vpop.eup %4571  ;;  %3205 = vst.msk [vmem:[%s6823_s3 + $0x318] sm:$0xff] %vm3105_vm1, %v4570_v61  ;;  %v2636_v5 = vadd.f32 %v4050_v2, %v5454_v62  ;;  %v4122_v6 = vpop.f32.mrb[42].mxu1  ;;  %4595 = vtanh.f32 %v2633_v0 }
 0x13b   :  { %v565_v7 = vpop.f32.mrb[43].mxu0  ;;  %v4574_v8 = vpop.eup %4573  ;;  %3139 = vst.msk [vmem:[%s6823_s3 + $0x108] sm:$0xff] %vm3105_vm1, %v4572_v3  ;;  %v2700_v9 = vadd.f32 %v4122_v6, %v5454_v62  ;;  %4597 = vtanh.f32 %v2697_v4 }
 0x13c   :  { %v1208_v10 = vpop.f32.mrb[43].mxu1  ;;  %v4576_v11 = vpop.eup %4575  ;;  %3203 = vst.msk [vmem:[%s6823_s3 + $0x308] sm:$0xff] %vm3105_vm1, %v4574_v8  ;;  %v2634_v12 = vadd.f32 %v5454_v62, %v565_v7  ;;  %4599 = vtanh.f32 %v2636_v5 }
 0x13d   :  { %v4578_v13 = vpop.eup %4577  ;;  %3144 = vst.msk [vmem:[%s6823_s3 + $0x130] sm:$0xff] %vm3105_vm1, %v4576_v11  ;;  %v2698_v14 = vadd.f32 %v5454_v62, %v1208_v10  ;;  %4601 = vtanh.f32 %v2700_v9  ;;  %v4053_v17 = vpop.f32.mrb[44].mxu0 }
 0x13e   :  { %v4580_v15 = vpop.eup %4579  ;;  %3208 = vst.msk [vmem:[%s6823_s3 + $0x330] sm:$0xff] %vm3105_vm1, %v4578_v13  ;;  %4603 = vtanh.f32 %v2634_v12  ;;  %v2639_v19 = vadd.f32 %v4053_v17, %v5454_v62  ;;  %v4125_v20 = vpop.f32.mrb[44].mxu1 }
 0x13f   :  { %v4582_v16 = vpop.eup %4581  ;;  %3142 = vst.msk [vmem:[%s6823_s3 + $0x120] sm:$0xff] %vm3105_vm1, %v4580_v15  ;;  %v578_v21 = vpop.f32.mrb[45].mxu0  ;;  %4605 = vtanh.f32 %v2698_v14  ;;  %v2703_v23 = vadd.f32 %v4125_v20, %v5454_v62 }
 0x140   :  { %v4584_v18 = vpop.eup %4583  ;;  %3206 = vst.msk [vmem:[%s6823_s3 + $0x320] sm:$0xff] %vm3105_vm1, %v4582_v16  ;;  %v2637_v24 = vadd.f32 %v5454_v62, %v578_v21  ;;  %v1221_v25 = vpop.f32.mrb[45].mxu1  ;;  %4607 = vtanh.f32 %v2639_v19 }
 0x141   :  { %v4586_v22 = vpop.eup %4585  ;;  %3145 = vst.msk [vmem:[%s6823_s3 + $0x138] sm:$0xff] %vm3105_vm1, %v4584_v18  ;;  %v4054_v26 = vpop.f32.mrb[46].mxu0  ;;  %v2701_v28 = vadd.f32 %v5454_v62, %v1221_v25  ;;  %4609 = vtanh.f32 %v2703_v23 }
 0x142   :  { %v4588_v27 = vpop.eup %4587  ;;  %3209 = vst.msk [vmem:[%s6823_s3 + $0x338] sm:$0xff] %vm3105_vm1, %v4586_v22  ;;  %v2640_v29 = vadd.f32 %v4054_v26, %v5454_v62  ;;  %v4126_v30 = vpop.f32.mrb[46].mxu1  ;;  %4611 = vtanh.f32 %v2637_v24 }
 0x143   :  { %v581_v31 = vpop.f32.mrb[47].mxu0  ;;  %v4590_v32 = vpop.eup %4589  ;;  %3143 = vst.msk [vmem:[%s6823_s3 + $0x128] sm:$0xff] %vm3105_vm1, %v4588_v27  ;;  %v2704_v33 = vadd.f32 %v4126_v30, %v5454_v62  ;;  %4613 = vtanh.f32 %v2701_v28 }
 0x144   :  { %v1224_v34 = vpop.f32.mrb[47].mxu1  ;;  %v4592_v35 = vpop.eup %4591  ;;  %3207 = vst.msk [vmem:[%s6823_s3 + $0x328] sm:$0xff] %vm3105_vm1, %v4590_v32  ;;  %v2638_v36 = vadd.f32 %v5454_v62, %v581_v31  ;;  %4615 = vtanh.f32 %v2640_v29 }
 0x145   :  { %v4594_v37 = vpop.eup %4593  ;;  %3148 = vst.msk [vmem:[%s6823_s3 + $0x150] sm:$0xff] %vm3105_vm1, %v4592_v35  ;;  %v2702_v38 = vadd.f32 %v5454_v62, %v1224_v34  ;;  %4617 = vtanh.f32 %v2704_v33  ;;  %v4057_v41 = vpop.f32.mrb[48].mxu0 }
 0x146   :  { %v4596_v39 = vpop.eup %4595  ;;  %3212 = vst.msk [vmem:[%s6823_s3 + $0x350] sm:$0xff] %vm3105_vm1, %v4594_v37  ;;  %4619 = vtanh.f32 %v2638_v36  ;;  %v2643_v43 = vadd.f32 %v4057_v41, %v5454_v62  ;;  %v4129_v44 = vpop.f32.mrb[48].mxu1 }
 0x147   :  { %v4598_v40 = vpop.eup %4597  ;;  %3146 = vst.msk [vmem:[%s6823_s3 + $0x140] sm:$0xff] %vm3105_vm1, %v4596_v39  ;;  %v594_v45 = vpop.f32.mrb[49].mxu0  ;;  %4621 = vtanh.f32 %v2702_v38  ;;  %v2707_v47 = vadd.f32 %v4129_v44, %v5454_v62 }
 0x148   :  { %v4600_v42 = vpop.eup %4599  ;;  %3210 = vst.msk [vmem:[%s6823_s3 + $0x340] sm:$0xff] %vm3105_vm1, %v4598_v40  ;;  %v2641_v48 = vadd.f32 %v5454_v62, %v594_v45  ;;  %v1237_v49 = vpop.f32.mrb[49].mxu1  ;;  %4623 = vtanh.f32 %v2643_v43 }
 0x149   :  { %v4602_v46 = vpop.eup %4601  ;;  %3149 = vst.msk [vmem:[%s6823_s3 + $0x158] sm:$0xff] %vm3105_vm1, %v4600_v42  ;;  %v4058_v50 = vpop.f32.mrb[50].mxu0  ;;  %v2705_v52 = vadd.f32 %v5454_v62, %v1237_v49  ;;  %4625 = vtanh.f32 %v2707_v47 }
 0x14a   :  { %v4604_v51 = vpop.eup %4603  ;;  %3213 = vst.msk [vmem:[%s6823_s3 + $0x358] sm:$0xff] %vm3105_vm1, %v4602_v46  ;;  %v2644_v54 = vadd.f32 %v5977_v53, %v4058_v50  ;;  %v4130_v55 = vpop.f32.mrb[50].mxu1  ;;  %4627 = vtanh.f32 %v2641_v48 }
 0x14b   :  { %v597_v56 = vpop.f32.mrb[51].mxu0  ;;  %v4606_v57 = vpop.eup %4605  ;;  %3147 = vst.msk [vmem:[%s6823_s3 + $0x148] sm:$0xff] %vm3105_vm1, %v4604_v51  ;;  %v2708_v58 = vadd.f32 %v5977_v53, %v4130_v55  ;;  %4629 = vtanh.f32 %v2705_v52 }
 0x14c   :  { %v1240_v59 = vpop.f32.mrb[51].mxu1  ;;  %v4608_v62 = vpop.eup %4607  ;;  %3211 = vst.msk [vmem:[%s6823_s3 + $0x348] sm:$0xff] %vm3105_vm1, %v4606_v57  ;;  %v2642_v60 = vadd.f32 %v5977_v53, %v597_v56  ;;  %4631 = vtanh.f32 %v2644_v54 }
 0x14d   :  { %v4610_v61 = vpop.eup %4609  ;;  %3152 = vst.msk [vmem:[%s6823_s3 + $0x170] sm:$0xff] %vm3105_vm1, %v4608_v62  ;;  %v2706_v63 = vadd.f32 %v5977_v53, %v1240_v59  ;;  %4633 = vtanh.f32 %v2708_v58  ;;  %v4061_v2 = vpop.f32.mrb[52].mxu0 }
 0x14e   :  { %v4612_v0 = vpop.eup %4611  ;;  %3216 = vst.msk [vmem:[%s6823_s3 + $0x370] sm:$0xff] %vm3105_vm1, %v4610_v61  ;;  %4635 = vtanh.f32 %v2642_v60  ;;  %v2647_v4 = vadd.f32 %v5977_v53, %v4061_v2  ;;  %v4133_v5 = vpop.f32.mrb[52].mxu1 }
 0x14f   :  { %v4614_v1 = vpop.eup %4613  ;;  %3150 = vst.msk [vmem:[%s6823_s3 + $0x160] sm:$0xff] %vm3105_vm1, %v4612_v0  ;;  %v610_v6 = vpop.f32.mrb[53].mxu0  ;;  %4637 = vtanh.f32 %v2706_v63  ;;  %v2711_v8 = vadd.f32 %v5977_v53, %v4133_v5 }
 0x150   :  { %v4616_v3 = vpop.eup %4615  ;;  %3214 = vst.msk [vmem:[%s6823_s3 + $0x360] sm:$0xff] %vm3105_vm1, %v4614_v1  ;;  %v2645_v9 = vadd.f32 %v5977_v53, %v610_v6  ;;  %v1253_v10 = vpop.f32.mrb[53].mxu1  ;;  %4639 = vtanh.f32 %v2647_v4 }
 0x151   :  { %v4618_v7 = vpop.eup %4617  ;;  %3153 = vst.msk [vmem:[%s6823_s3 + $0x178] sm:$0xff] %vm3105_vm1, %v4616_v3  ;;  %v4062_v11 = vpop.f32.mrb[54].mxu0  ;;  %v2709_v13 = vadd.f32 %v5977_v53, %v1253_v10  ;;  %4641 = vtanh.f32 %v2711_v8 }
 0x152   :  { %v4620_v12 = vpop.eup %4619  ;;  %3217 = vst.msk [vmem:[%s6823_s3 + $0x378] sm:$0xff] %vm3105_vm1, %v4618_v7  ;;  %v2648_v14 = vadd.f32 %v5977_v53, %v4062_v11  ;;  %v4134_v15 = vpop.f32.mrb[54].mxu1  ;;  %4643 = vtanh.f32 %v2645_v9 }
 0x153   :  { %v613_v16 = vpop.f32.mrb[55].mxu0  ;;  %v4622_v17 = vpop.eup %4621  ;;  %3151 = vst.msk [vmem:[%s6823_s3 + $0x168] sm:$0xff] %vm3105_vm1, %v4620_v12  ;;  %v2712_v18 = vadd.f32 %v5977_v53, %v4134_v15  ;;  %4645 = vtanh.f32 %v2709_v13 }
 0x154   :  { %v1256_v19 = vpop.f32.mrb[55].mxu1  ;;  %v4624_v20 = vpop.eup %4623  ;;  %3215 = vst.msk [vmem:[%s6823_s3 + $0x368] sm:$0xff] %vm3105_vm1, %v4622_v17  ;;  %v2646_v21 = vadd.f32 %v5977_v53, %v613_v16  ;;  %4647 = vtanh.f32 %v2648_v14 }
 0x155   :  { %v4626_v22 = vpop.eup %4625  ;;  %3156 = vst.msk [vmem:[%s6823_s3 + $0x190] sm:$0xff] %vm3105_vm1, %v4624_v20  ;;  %v2710_v23 = vadd.f32 %v5977_v53, %v1256_v19  ;;  %4649 = vtanh.f32 %v2712_v18  ;;  %v4065_v26 = vpop.f32.mrb[56].mxu0 }
 0x156   :  { %v4628_v24 = vpop.eup %4627  ;;  %3220 = vst.msk [vmem:[%s6823_s3 + $0x390] sm:$0xff] %vm3105_vm1, %v4626_v22  ;;  %4651 = vtanh.f32 %v2646_v21  ;;  %v2651_v28 = vadd.f32 %v5977_v53, %v4065_v26  ;;  %v4137_v29 = vpop.f32.mrb[56].mxu1 }
 0x157   :  { %v4630_v25 = vpop.eup %4629  ;;  %3154 = vst.msk [vmem:[%s6823_s3 + $0x180] sm:$0xff] %vm3105_vm1, %v4628_v24  ;;  %v626_v30 = vpop.f32.mrb[57].mxu0  ;;  %4653 = vtanh.f32 %v2710_v23  ;;  %v2715_v32 = vadd.f32 %v5977_v53, %v4137_v29 }
 0x158   :  { %v4632_v27 = vpop.eup %4631  ;;  %3218 = vst.msk [vmem:[%s6823_s3 + $0x380] sm:$0xff] %vm3105_vm1, %v4630_v25  ;;  %v2649_v33 = vadd.f32 %v5977_v53, %v626_v30  ;;  %v1269_v34 = vpop.f32.mrb[57].mxu1  ;;  %4655 = vtanh.f32 %v2651_v28 }
 0x159   :  { %v4634_v31 = vpop.eup %4633  ;;  %3157 = vst.msk [vmem:[%s6823_s3 + $0x198] sm:$0xff] %vm3105_vm1, %v4632_v27  ;;  %v4066_v35 = vpop.f32.mrb[58].mxu0  ;;  %v2713_v37 = vadd.f32 %v5977_v53, %v1269_v34  ;;  %4657 = vtanh.f32 %v2715_v32 }
 0x15a   :  { %v4636_v36 = vpop.eup %4635  ;;  %3221 = vst.msk [vmem:[%s6823_s3 + $0x398] sm:$0xff] %vm3105_vm1, %v4634_v31  ;;  %v2652_v38 = vadd.f32 %v5977_v53, %v4066_v35  ;;  %v4138_v39 = vpop.f32.mrb[58].mxu1  ;;  %4659 = vtanh.f32 %v2649_v33 }
 0x15b   :  { %v629_v40 = vpop.f32.mrb[59].mxu0  ;;  %v4638_v41 = vpop.eup %4637  ;;  %3155 = vst.msk [vmem:[%s6823_s3 + $0x188] sm:$0xff] %vm3105_vm1, %v4636_v36  ;;  %v2716_v42 = vadd.f32 %v5977_v53, %v4138_v39  ;;  %4661 = vtanh.f32 %v2713_v37 }
 0x15c   :  { %v1272_v43 = vpop.f32.mrb[59].mxu1  ;;  %v4640_v44 = vpop.eup %4639  ;;  %3219 = vst.msk [vmem:[%s6823_s3 + $0x388] sm:$0xff] %vm3105_vm1, %v4638_v41  ;;  %v2650_v45 = vadd.f32 %v5977_v53, %v629_v40  ;;  %4663 = vtanh.f32 %v2652_v38 }
 0x15d   :  { %v4642_v46 = vpop.eup %4641  ;;  %3160 = vst.msk [vmem:[%s6823_s3 + $0x1b0] sm:$0xff] %vm3105_vm1, %v4640_v44  ;;  %v2714_v47 = vadd.f32 %v5977_v53, %v1272_v43  ;;  %4665 = vtanh.f32 %v2716_v42  ;;  %v4069_v50 = vpop.f32.mrb[60].mxu0 }
 0x15e   :  { %v4644_v48 = vpop.eup %4643  ;;  %3224 = vst.msk [vmem:[%s6823_s3 + $0x3b0] sm:$0xff] %vm3105_vm1, %v4642_v46  ;;  %4667 = vtanh.f32 %v2650_v45  ;;  %v2655_v52 = vadd.f32 %v5977_v53, %v4069_v50  ;;  %v4141_v54 = vpop.f32.mrb[60].mxu1 }
 0x15f   :  { %v4646_v49 = vpop.eup %4645  ;;  %3158 = vst.msk [vmem:[%s6823_s3 + $0x1a0] sm:$0xff] %vm3105_vm1, %v4644_v48  ;;  %v642_v55 = vpop.f32.mrb[61].mxu0  ;;  %4669 = vtanh.f32 %v2714_v47  ;;  %v2719_v57 = vadd.f32 %v5977_v53, %v4141_v54 }
 0x160   :  { %v4648_v51 = vpop.eup %4647  ;;  %3222 = vst.msk [vmem:[%s6823_s3 + $0x3a0] sm:$0xff] %vm3105_vm1, %v4646_v49  ;;  %v2653_v58 = vadd.f32 %v5977_v53, %v642_v55  ;;  %v1285_v59 = vpop.f32.mrb[61].mxu1  ;;  %4671 = vtanh.f32 %v2655_v52 }
 0x161   :  { %v4650_v56 = vpop.eup %4649  ;;  %3161 = vst.msk [vmem:[%s6823_s3 + $0x1b8] sm:$0xff] %vm3105_vm1, %v4648_v51  ;;  %v4070_v62 = vpop.f32.mrb[62].mxu0  ;;  %v2717_v61 = vadd.f32 %v5977_v53, %v1285_v59  ;;  %4673 = vtanh.f32 %v2719_v57 }
 0x162   :  { %v4652_v60 = vpop.eup %4651  ;;  %3225 = vst.msk [vmem:[%s6823_s3 + $0x3b8] sm:$0xff] %vm3105_vm1, %v4650_v56  ;;  %v2656_v63 = vadd.f32 %v5977_v53, %v4070_v62  ;;  %v4142_v0 = vpop.f32.mrb[62].mxu1  ;;  %4675 = vtanh.f32 %v2653_v58 }
 0x163   :  { %v645_v1 = vpop.f32.mrb[63].mxu0  ;;  %v4654_v2 = vpop.eup %4653  ;;  %3159 = vst.msk [vmem:[%s6823_s3 + $0x1a8] sm:$0xff] %vm3105_vm1, %v4652_v60  ;;  %v2720_v3 = vadd.f32 %v5977_v53, %v4142_v0  ;;  %4677 = vtanh.f32 %v2717_v61 }
 0x164   :  { %v1288_v4 = vpop.f32.mrb[63].mxu1  ;;  %v4656_v5 = vpop.eup %4655  ;;  %3223 = vst.msk [vmem:[%s6823_s3 + $0x3a8] sm:$0xff] %vm3105_vm1, %v4654_v2  ;;  %v2654_v6 = vadd.f32 %v5977_v53, %v645_v1  ;;  %4679 = vtanh.f32 %v2656_v63 }
 0x165   :  { %v4658_v7 = vpop.eup %4657  ;;  %3164 = vst.msk [vmem:[%s6823_s3 + $0x1d0] sm:$0xff] %vm3105_vm1, %v4656_v5  ;;  %v2718_v8 = vadd.f32 %v5977_v53, %v1288_v4  ;;  %4681 = vtanh.f32 %v2720_v3  ;;  %v4153_v11 = vpop.f32.mrb[64].mxu0 }
 0x166   :  { %v4660_v9 = vpop.eup %4659  ;;  %3228 = vst.msk [vmem:[%s6823_s3 + $0x3d0] sm:$0xff] %vm3105_vm1, %v4658_v7  ;;  %4683 = vtanh.f32 %v2654_v6  ;;  %v2723_v13 = vadd.f32 %v5977_v53, %v4153_v11  ;;  %v4225_v14 = vpop.f32.mrb[64].mxu1 }
 0x167   :  { %v4662_v10 = vpop.eup %4661  ;;  %3162 = vst.msk [vmem:[%s6823_s3 + $0x1c0] sm:$0xff] %vm3105_vm1, %v4660_v9  ;;  %v1688_v15 = vpop.f32.mrb[65].mxu0  ;;  %4685 = vtanh.f32 %v2718_v8  ;;  %v2787_v17 = vadd.f32 %v5977_v53, %v4225_v14 }
 0x168   :  { %v4664_v12 = vpop.eup %4663  ;;  %3226 = vst.msk [vmem:[%s6823_s3 + $0x3c0] sm:$0xff] %vm3105_vm1, %v4662_v10  ;;  %v2721_v18 = vadd.f32 %v5977_v53, %v1688_v15  ;;  %v2331_v19 = vpop.f32.mrb[65].mxu1  ;;  %4687 = vtanh.f32 %v2723_v13 }
 0x169   :  { %v4666_v16 = vpop.eup %4665  ;;  %3165 = vst.msk [vmem:[%s6823_s3 + $0x1d8] sm:$0xff] %vm3105_vm1, %v4664_v12  ;;  %v4154_v20 = vpop.f32.mrb[66].mxu0  ;;  %v2785_v22 = vadd.f32 %v5977_v53, %v2331_v19  ;;  %4689 = vtanh.f32 %v2787_v17 }
 0x16a   :  { %v4668_v21 = vpop.eup %4667  ;;  %3229 = vst.msk [vmem:[%s6823_s3 + $0x3d8] sm:$0xff] %vm3105_vm1, %v4666_v16  ;;  %v2724_v23 = vadd.f32 %v5977_v53, %v4154_v20  ;;  %v4226_v24 = vpop.f32.mrb[66].mxu1  ;;  %4691 = vtanh.f32 %v2721_v18 }
 0x16b   :  { %v1691_v25 = vpop.f32.mrb[67].mxu0  ;;  %v4670_v26 = vpop.eup %4669  ;;  %3163 = vst.msk [vmem:[%s6823_s3 + $0x1c8] sm:$0xff] %vm3105_vm1, %v4668_v21  ;;  %v2788_v27 = vadd.f32 %v5977_v53, %v4226_v24  ;;  %4693 = vtanh.f32 %v2785_v22 }
 0x16c   :  { %v2334_v28 = vpop.f32.mrb[67].mxu1  ;;  %v4672_v29 = vpop.eup %4671  ;;  %3227 = vst.msk [vmem:[%s6823_s3 + $0x3c8] sm:$0xff] %vm3105_vm1, %v4670_v26  ;;  %v2722_v30 = vadd.f32 %v5977_v53, %v1691_v25  ;;  %4695 = vtanh.f32 %v2724_v23 }
 0x16d   :  { %v4674_v31 = vpop.eup %4673  ;;  %3168 = vst.msk [vmem:[%s6823_s3 + $0x1f0] sm:$0xff] %vm3105_vm1, %v4672_v29  ;;  %v2786_v32 = vadd.f32 %v5977_v53, %v2334_v28  ;;  %4697 = vtanh.f32 %v2788_v27  ;;  %v4157_v35 = vpop.f32.mrb[68].mxu0 }
 0x16e   :  { %v4676_v33 = vpop.eup %4675  ;;  %3232 = vst.msk [vmem:[%s6823_s3 + $0x3f0] sm:$0xff] %vm3105_vm1, %v4674_v31  ;;  %4699 = vtanh.f32 %v2722_v30  ;;  %v2727_v37 = vadd.f32 %v5977_v53, %v4157_v35  ;;  %v4229_v38 = vpop.f32.mrb[68].mxu1 }
 0x16f   :  { %v4678_v34 = vpop.eup %4677  ;;  %3166 = vst.msk [vmem:[%s6823_s3 + $0x1e0] sm:$0xff] %vm3105_vm1, %v4676_v33  ;;  %v1704_v39 = vpop.f32.mrb[69].mxu0  ;;  %4701 = vtanh.f32 %v2786_v32  ;;  %v2791_v41 = vadd.f32 %v5977_v53, %v4229_v38 }
 0x170   :  { %v4680_v36 = vpop.eup %4679  ;;  %3230 = vst.msk [vmem:[%s6823_s3 + $0x3e0] sm:$0xff] %vm3105_vm1, %v4678_v34  ;;  %v2725_v42 = vadd.f32 %v5977_v53, %v1704_v39  ;;  %v2347_v43 = vpop.f32.mrb[69].mxu1  ;;  %4703 = vtanh.f32 %v2727_v37 }
 0x171   :  { %v4682_v40 = vpop.eup %4681  ;;  %3169 = vst.msk [vmem:[%s6823_s3 + $0x1f8] sm:$0xff] %vm3105_vm1, %v4680_v36  ;;  %v4158_v44 = vpop.f32.mrb[70].mxu0  ;;  %v2789_v46 = vadd.f32 %v5977_v53, %v2347_v43  ;;  %4705 = vtanh.f32 %v2791_v41 }
 0x172   :  { %v4684_v45 = vpop.eup %4683  ;;  %3233 = vst.msk [vmem:[%s6823_s3 + $0x3f8] sm:$0xff] %vm3105_vm1, %v4682_v40  ;;  %v2728_v47 = vadd.f32 %v5977_v53, %v4158_v44  ;;  %v4230_v48 = vpop.f32.mrb[70].mxu1  ;;  %4707 = vtanh.f32 %v2725_v42 }
 0x173   :  { %v1707_v49 = vpop.f32.mrb[71].mxu0  ;;  %v4686_v50 = vpop.eup %4685  ;;  %3167 = vst.msk [vmem:[%s6823_s3 + $0x1e8] sm:$0xff] %vm3105_vm1, %v4684_v45  ;;  %v2792_v51 = vadd.f32 %v5977_v53, %v4230_v48  ;;  %4709 = vtanh.f32 %v2789_v46 }
 0x174   :  { %v2350_v52 = vpop.f32.mrb[71].mxu1  ;;  %v4688_v54 = vpop.eup %4687  ;;  %3231 = vst.msk [vmem:[%s6823_s3 + $0x3e8] sm:$0xff] %vm3105_vm1, %v4686_v50  ;;  %v2726_v55 = vadd.f32 %v5977_v53, %v1707_v49  ;;  %4711 = vtanh.f32 %v2728_v47 }
 0x175   :  { %v4690_v56 = vpop.eup %4689  ;;  %3236 = vst.msk [vmem:[%s6823_s3 + $0x410] sm:$0xff] %vm3105_vm1, %v4688_v54  ;;  %v2790_v57 = vadd.f32 %v5977_v53, %v2350_v52  ;;  %4713 = vtanh.f32 %v2792_v51  ;;  %v4161_v62 = vpop.f32.mrb[72].mxu0 }
 0x176   :  { %v4692_v58 = vpop.eup %4691  ;;  %3300 = vst.msk [vmem:[%s6823_s3 + $0x610] sm:$0xff] %vm3105_vm1, %v4690_v56  ;;  %4715 = vtanh.f32 %v2726_v55  ;;  %v2731_v61 = vadd.f32 %v5977_v53, %v4161_v62  ;;  %v4233_v63 = vpop.f32.mrb[72].mxu1 }
 0x177   :  { %v4694_v59 = vpop.eup %4693  ;;  %3234 = vst.msk [vmem:[%s6823_s3 + $0x400] sm:$0xff] %vm3105_vm1, %v4692_v58  ;;  %v1720_v0 = vpop.f32.mrb[73].mxu0  ;;  %4717 = vtanh.f32 %v2790_v57  ;;  %v2795_v2 = vadd.f32 %v5977_v53, %v4233_v63 }
 0x178   :  { %v4696_v60 = vpop.eup %4695  ;;  %3298 = vst.msk [vmem:[%s6823_s3 + $0x600] sm:$0xff] %vm3105_vm1, %v4694_v59  ;;  %v2729_v3 = vadd.f32 %v5977_v53, %v1720_v0  ;;  %v2363_v4 = vpop.f32.mrb[73].mxu1  ;;  %4719 = vtanh.f32 %v2731_v61 }
 0x179   :  { %v4698_v1 = vpop.eup %4697  ;;  %3237 = vst.msk [vmem:[%s6823_s3 + $0x418] sm:$0xff] %vm3105_vm1, %v4696_v60  ;;  %v4162_v5 = vpop.f32.mrb[74].mxu0  ;;  %v2793_v7 = vadd.f32 %v5977_v53, %v2363_v4  ;;  %4721 = vtanh.f32 %v2795_v2 }
 0x17a   :  { %v4700_v6 = vpop.eup %4699  ;;  %3301 = vst.msk [vmem:[%s6823_s3 + $0x618] sm:$0xff] %vm3105_vm1, %v4698_v1  ;;  %v2732_v8 = vadd.f32 %v5977_v53, %v4162_v5  ;;  %v4234_v9 = vpop.f32.mrb[74].mxu1  ;;  %4723 = vtanh.f32 %v2729_v3 }
 0x17b   :  { %v1723_v10 = vpop.f32.mrb[75].mxu0  ;;  %v4702_v11 = vpop.eup %4701  ;;  %3235 = vst.msk [vmem:[%s6823_s3 + $0x408] sm:$0xff] %vm3105_vm1, %v4700_v6  ;;  %v2796_v12 = vadd.f32 %v5977_v53, %v4234_v9  ;;  %4725 = vtanh.f32 %v2793_v7 }
 0x17c   :  { %v2366_v13 = vpop.f32.mrb[75].mxu1  ;;  %v4704_v14 = vpop.eup %4703  ;;  %3299 = vst.msk [vmem:[%s6823_s3 + $0x608] sm:$0xff] %vm3105_vm1, %v4702_v11  ;;  %v2730_v15 = vadd.f32 %v5977_v53, %v1723_v10  ;;  %4727 = vtanh.f32 %v2732_v8 }
 0x17d   :  { %v4706_v16 = vpop.eup %4705  ;;  %3240 = vst.msk [vmem:[%s6823_s3 + $0x430] sm:$0xff] %vm3105_vm1, %v4704_v14  ;;  %v2794_v17 = vadd.f32 %v5977_v53, %v2366_v13  ;;  %4729 = vtanh.f32 %v2796_v12  ;;  %v4165_v20 = vpop.f32.mrb[76].mxu0 }
 0x17e   :  { %v4708_v18 = vpop.eup %4707  ;;  %3304 = vst.msk [vmem:[%s6823_s3 + $0x630] sm:$0xff] %vm3105_vm1, %v4706_v16  ;;  %4731 = vtanh.f32 %v2730_v15  ;;  %v2735_v22 = vadd.f32 %v5977_v53, %v4165_v20  ;;  %v4237_v23 = vpop.f32.mrb[76].mxu1 }
 0x17f   :  { %v4710_v19 = vpop.eup %4709  ;;  %3238 = vst.msk [vmem:[%s6823_s3 + $0x420] sm:$0xff] %vm3105_vm1, %v4708_v18  ;;  %v1736_v24 = vpop.f32.mrb[77].mxu0  ;;  %4733 = vtanh.f32 %v2794_v17  ;;  %v2799_v26 = vadd.f32 %v5977_v53, %v4237_v23 }
 0x180   :  { %v4712_v21 = vpop.eup %4711  ;;  %3302 = vst.msk [vmem:[%s6823_s3 + $0x620] sm:$0xff] %vm3105_vm1, %v4710_v19  ;;  %v2733_v27 = vadd.f32 %v5977_v53, %v1736_v24  ;;  %v2379_v28 = vpop.f32.mrb[77].mxu1  ;;  %4735 = vtanh.f32 %v2735_v22 }
 0x181   :  { %v4714_v25 = vpop.eup %4713  ;;  %3241 = vst.msk [vmem:[%s6823_s3 + $0x438] sm:$0xff] %vm3105_vm1, %v4712_v21  ;;  %v4166_v29 = vpop.f32.mrb[78].mxu0  ;;  %v2797_v31 = vadd.f32 %v5977_v53, %v2379_v28  ;;  %4737 = vtanh.f32 %v2799_v26 }
 0x182   :  { %v4716_v30 = vpop.eup %4715  ;;  %3305 = vst.msk [vmem:[%s6823_s3 + $0x638] sm:$0xff] %vm3105_vm1, %v4714_v25  ;;  %v2736_v32 = vadd.f32 %v5977_v53, %v4166_v29  ;;  %v4238_v33 = vpop.f32.mrb[78].mxu1  ;;  %4739 = vtanh.f32 %v2733_v27 }
 0x183   :  { %v1739_v34 = vpop.f32.mrb[79].mxu0  ;;  %v4718_v35 = vpop.eup %4717  ;;  %3239 = vst.msk [vmem:[%s6823_s3 + $0x428] sm:$0xff] %vm3105_vm1, %v4716_v30  ;;  %v2800_v36 = vadd.f32 %v5977_v53, %v4238_v33  ;;  %4741 = vtanh.f32 %v2797_v31 }
 0x184   :  { %v2382_v37 = vpop.f32.mrb[79].mxu1  ;;  %v4720_v38 = vpop.eup %4719  ;;  %3303 = vst.msk [vmem:[%s6823_s3 + $0x628] sm:$0xff] %vm3105_vm1, %v4718_v35  ;;  %v2734_v39 = vadd.f32 %v5977_v53, %v1739_v34  ;;  %4743 = vtanh.f32 %v2736_v32 }
 0x185   :  { %v4722_v40 = vpop.eup %4721  ;;  %3244 = vst.msk [vmem:[%s6823_s3 + $0x450] sm:$0xff] %vm3105_vm1, %v4720_v38  ;;  %v2798_v41 = vadd.f32 %v5977_v53, %v2382_v37  ;;  %4745 = vtanh.f32 %v2800_v36  ;;  %v4169_v44 = vpop.f32.mrb[80].mxu0 }
 0x186   :  { %v4724_v42 = vpop.eup %4723  ;;  %3308 = vst.msk [vmem:[%s6823_s3 + $0x650] sm:$0xff] %vm3105_vm1, %v4722_v40  ;;  %4747 = vtanh.f32 %v2734_v39  ;;  %v2739_v46 = vadd.f32 %v5977_v53, %v4169_v44  ;;  %v4241_v47 = vpop.f32.mrb[80].mxu1 }
 0x187   :  { %v4726_v43 = vpop.eup %4725  ;;  %3242 = vst.msk [vmem:[%s6823_s3 + $0x440] sm:$0xff] %vm3105_vm1, %v4724_v42  ;;  %v1752_v48 = vpop.f32.mrb[81].mxu0  ;;  %4749 = vtanh.f32 %v2798_v41  ;;  %v2803_v50 = vadd.f32 %v5977_v53, %v4241_v47 }
 0x188   :  { %v4728_v45 = vpop.eup %4727  ;;  %3306 = vst.msk [vmem:[%s6823_s3 + $0x640] sm:$0xff] %vm3105_vm1, %v4726_v43  ;;  %v2737_v51 = vadd.f32 %v5977_v53, %v1752_v48  ;;  %v2395_v52 = vpop.f32.mrb[81].mxu1  ;;  %4751 = vtanh.f32 %v2739_v46 }
 0x189   :  { %v4730_v49 = vpop.eup %4729  ;;  %3245 = vst.msk [vmem:[%s6823_s3 + $0x458] sm:$0xff] %vm3105_vm1, %v4728_v45  ;;  %v4170_v54 = vpop.f32.mrb[82].mxu0  ;;  %v2801_v56 = vadd.f32 %v5977_v53, %v2395_v52  ;;  %4753 = vtanh.f32 %v2803_v50 }
 0x18a   :  { %v4732_v55 = vpop.eup %4731  ;;  %3309 = vst.msk [vmem:[%s6823_s3 + $0x658] sm:$0xff] %vm3105_vm1, %v4730_v49  ;;  %v2740_v57 = vadd.f32 %v5977_v53, %v4170_v54  ;;  %v4242_v58 = vpop.f32.mrb[82].mxu1  ;;  %4755 = vtanh.f32 %v2737_v51 }
 0x18b   :  { %v1755_v59 = vpop.f32.mrb[83].mxu0  ;;  %v4734_v62 = vpop.eup %4733  ;;  %3243 = vst.msk [vmem:[%s6823_s3 + $0x448] sm:$0xff] %vm3105_vm1, %v4732_v55  ;;  %v2804_v60 = vadd.f32 %v5977_v53, %v4242_v58  ;;  %4757 = vtanh.f32 %v2801_v56 }
 0x18c   :  { %v2398_v61 = vpop.f32.mrb[83].mxu1  ;;  %v4736_v63 = vpop.eup %4735  ;;  %3307 = vst.msk [vmem:[%s6823_s3 + $0x648] sm:$0xff] %vm3105_vm1, %v4734_v62  ;;  %v2738_v0 = vadd.f32 %v5977_v53, %v1755_v59  ;;  %4759 = vtanh.f32 %v2740_v57 }
 0x18d   :  { %v4738_v1 = vpop.eup %4737  ;;  %3248 = vst.msk [vmem:[%s6823_s3 + $0x470] sm:$0xff] %vm3105_vm1, %v4736_v63  ;;  %v2802_v2 = vadd.f32 %v5977_v53, %v2398_v61  ;;  %4761 = vtanh.f32 %v2804_v60  ;;  %v4173_v5 = vpop.f32.mrb[84].mxu0 }
 0x18e   :  { %v4740_v3 = vpop.eup %4739  ;;  %3312 = vst.msk [vmem:[%s6823_s3 + $0x670] sm:$0xff] %vm3105_vm1, %v4738_v1  ;;  %4763 = vtanh.f32 %v2738_v0  ;;  %v2743_v7 = vadd.f32 %v5977_v53, %v4173_v5  ;;  %v4245_v8 = vpop.f32.mrb[84].mxu1 }
 0x18f   :  { %v4742_v4 = vpop.eup %4741  ;;  %3246 = vst.msk [vmem:[%s6823_s3 + $0x460] sm:$0xff] %vm3105_vm1, %v4740_v3  ;;  %v1768_v9 = vpop.f32.mrb[85].mxu0  ;;  %4765 = vtanh.f32 %v2802_v2  ;;  %v2807_v11 = vadd.f32 %v5977_v53, %v4245_v8 }
 0x190   :  { %v4744_v6 = vpop.eup %4743  ;;  %3310 = vst.msk [vmem:[%s6823_s3 + $0x660] sm:$0xff] %vm3105_vm1, %v4742_v4  ;;  %v2741_v12 = vadd.f32 %v5977_v53, %v1768_v9  ;;  %v2411_v13 = vpop.f32.mrb[85].mxu1  ;;  %4767 = vtanh.f32 %v2743_v7 }
 0x191   :  { %v4746_v10 = vpop.eup %4745  ;;  %3249 = vst.msk [vmem:[%s6823_s3 + $0x478] sm:$0xff] %vm3105_vm1, %v4744_v6  ;;  %v4174_v14 = vpop.f32.mrb[86].mxu0  ;;  %v2805_v16 = vadd.f32 %v5977_v53, %v2411_v13  ;;  %4769 = vtanh.f32 %v2807_v11 }
 0x192   :  { %v4748_v15 = vpop.eup %4747  ;;  %3313 = vst.msk [vmem:[%s6823_s3 + $0x678] sm:$0xff] %vm3105_vm1, %v4746_v10  ;;  %v2744_v17 = vadd.f32 %v5977_v53, %v4174_v14  ;;  %v4246_v18 = vpop.f32.mrb[86].mxu1  ;;  %4771 = vtanh.f32 %v2741_v12 }
 0x193   :  { %v1771_v19 = vpop.f32.mrb[87].mxu0  ;;  %v4750_v20 = vpop.eup %4749  ;;  %3247 = vst.msk [vmem:[%s6823_s3 + $0x468] sm:$0xff] %vm3105_vm1, %v4748_v15  ;;  %v2808_v21 = vadd.f32 %v5977_v53, %v4246_v18  ;;  %4773 = vtanh.f32 %v2805_v16 }
 0x194   :  { %v2414_v22 = vpop.f32.mrb[87].mxu1  ;;  %v4752_v23 = vpop.eup %4751  ;;  %3311 = vst.msk [vmem:[%s6823_s3 + $0x668] sm:$0xff] %vm3105_vm1, %v4750_v20  ;;  %v2742_v24 = vadd.f32 %v5977_v53, %v1771_v19  ;;  %4775 = vtanh.f32 %v2744_v17 }
 0x195   :  { %v4754_v25 = vpop.eup %4753  ;;  %3252 = vst.msk [vmem:[%s6823_s3 + $0x490] sm:$0xff] %vm3105_vm1, %v4752_v23  ;;  %v2806_v26 = vadd.f32 %v5977_v53, %v2414_v22  ;;  %4777 = vtanh.f32 %v2808_v21  ;;  %v4177_v29 = vpop.f32.mrb[88].mxu0 }
 0x196   :  { %v4756_v27 = vpop.eup %4755  ;;  %3316 = vst.msk [vmem:[%s6823_s3 + $0x690] sm:$0xff] %vm3105_vm1, %v4754_v25  ;;  %4779 = vtanh.f32 %v2742_v24  ;;  %v2747_v31 = vadd.f32 %v5977_v53, %v4177_v29  ;;  %v4249_v32 = vpop.f32.mrb[88].mxu1 }
 0x197   :  { %v4758_v28 = vpop.eup %4757  ;;  %3250 = vst.msk [vmem:[%s6823_s3 + $0x480] sm:$0xff] %vm3105_vm1, %v4756_v27  ;;  %v1784_v33 = vpop.f32.mrb[89].mxu0  ;;  %4781 = vtanh.f32 %v2806_v26  ;;  %v2811_v35 = vadd.f32 %v5977_v53, %v4249_v32 }
 0x198   :  { %v4760_v30 = vpop.eup %4759  ;;  %3314 = vst.msk [vmem:[%s6823_s3 + $0x680] sm:$0xff] %vm3105_vm1, %v4758_v28  ;;  %v2745_v36 = vadd.f32 %v5977_v53, %v1784_v33  ;;  %v2427_v37 = vpop.f32.mrb[89].mxu1  ;;  %4783 = vtanh.f32 %v2747_v31 }
 0x199   :  { %v4762_v34 = vpop.eup %4761  ;;  %3253 = vst.msk [vmem:[%s6823_s3 + $0x498] sm:$0xff] %vm3105_vm1, %v4760_v30  ;;  %v4178_v38 = vpop.f32.mrb[90].mxu0  ;;  %v2809_v40 = vadd.f32 %v5977_v53, %v2427_v37  ;;  %4785 = vtanh.f32 %v2811_v35 }
 0x19a   :  { %v4764_v39 = vpop.eup %4763  ;;  %3317 = vst.msk [vmem:[%s6823_s3 + $0x698] sm:$0xff] %vm3105_vm1, %v4762_v34  ;;  %v2748_v41 = vadd.f32 %v5977_v53, %v4178_v38  ;;  %v4250_v42 = vpop.f32.mrb[90].mxu1  ;;  %4787 = vtanh.f32 %v2745_v36 }
 0x19b   :  { %v1787_v43 = vpop.f32.mrb[91].mxu0  ;;  %v4766_v44 = vpop.eup %4765  ;;  %3251 = vst.msk [vmem:[%s6823_s3 + $0x488] sm:$0xff] %vm3105_vm1, %v4764_v39  ;;  %v2812_v45 = vadd.f32 %v5977_v53, %v4250_v42  ;;  %4789 = vtanh.f32 %v2809_v40 }
 0x19c   :  { %v2430_v46 = vpop.f32.mrb[91].mxu1  ;;  %v4768_v47 = vpop.eup %4767  ;;  %3315 = vst.msk [vmem:[%s6823_s3 + $0x688] sm:$0xff] %vm3105_vm1, %v4766_v44  ;;  %v2746_v48 = vadd.f32 %v5977_v53, %v1787_v43  ;;  %4791 = vtanh.f32 %v2748_v41  ;;  %v6495_v44 = vld [vmem:[%s6822_s2] ss:$0 sm:$0xff] }
 0x19d   :  { %v4770_v49 = vpop.eup %4769  ;;  %3256 = vst.msk [vmem:[%s6823_s3 + $0x4b0] sm:$0xff] %vm3105_vm1, %v4768_v47  ;;  %v2810_v50 = vadd.f32 %v5977_v53, %v2430_v46  ;;  %4793 = vtanh.f32 %v2812_v45  ;;  %v4181_v54 = vpop.f32.mrb[92].mxu0 }
 0x19e   :  { %v4772_v51 = vpop.eup %4771  ;;  %3320 = vst.msk [vmem:[%s6823_s3 + $0x6b0] sm:$0xff] %vm3105_vm1, %v4770_v49  ;;  %4795 = vtanh.f32 %v2746_v48  ;;  %v2751_v56 = vadd.f32 %v5977_v53, %v4181_v54  ;;  %v4253_v57 = vpop.f32.mrb[92].mxu1 }
 0x19f   :  { %v4774_v52 = vpop.eup %4773  ;;  %3254 = vst.msk [vmem:[%s6823_s3 + $0x4a0] sm:$0xff] %vm3105_vm1, %v4772_v51  ;;  %v1800_v58 = vpop.f32.mrb[93].mxu0  ;;  %4797 = vtanh.f32 %v2810_v50  ;;  %v2815_v62 = vadd.f32 %v5977_v53, %v4253_v57 }
 0x1a0   :  { %v4776_v55 = vpop.eup %4775  ;;  %3318 = vst.msk [vmem:[%s6823_s3 + $0x6a0] sm:$0xff] %vm3105_vm1, %v4774_v52  ;;  %v2749_v60 = vadd.f32 %v5977_v53, %v1800_v58  ;;  %v2443_v61 = vpop.f32.mrb[93].mxu1  ;;  %4799 = vtanh.f32 %v2751_v56 }
 0x1a1   :  { %v4778_v59 = vpop.eup %4777  ;;  %3257 = vst.msk [vmem:[%s6823_s3 + $0x4b8] sm:$0xff] %vm3105_vm1, %v4776_v55  ;;  %v4182_v63 = vpop.f32.mrb[94].mxu0  ;;  %v2813_v1 = vadd.f32 %v5977_v53, %v2443_v61  ;;  %4801 = vtanh.f32 %v2815_v62 }
 0x1a2   :  { %v4780_v0 = vpop.eup %4779  ;;  %3321 = vst.msk [vmem:[%s6823_s3 + $0x6b8] sm:$0xff] %vm3105_vm1, %v4778_v59  ;;  %v2752_v2 = vadd.f32 %v5977_v53, %v4182_v63  ;;  %v4254_v3 = vpop.f32.mrb[94].mxu1  ;;  %4803 = vtanh.f32 %v2749_v60 }
 0x1a3   :  { %v1803_v4 = vpop.f32.mrb[95].mxu0  ;;  %v4782_v5 = vpop.eup %4781  ;;  %3255 = vst.msk [vmem:[%s6823_s3 + $0x4a8] sm:$0xff] %vm3105_vm1, %v4780_v0  ;;  %v2816_v6 = vadd.f32 %v5977_v53, %v4254_v3  ;;  %4805 = vtanh.f32 %v2813_v1 }
 0x1a4   :  { %v2446_v7 = vpop.f32.mrb[95].mxu1  ;;  %v4784_v8 = vpop.eup %4783  ;;  %3319 = vst.msk [vmem:[%s6823_s3 + $0x6a8] sm:$0xff] %vm3105_vm1, %v4782_v5  ;;  %v2750_v9 = vadd.f32 %v5977_v53, %v1803_v4  ;;  %4807 = vtanh.f32 %v2752_v2 }
 0x1a5   :  { %v4786_v10 = vpop.eup %4785  ;;  %3260 = vst.msk [vmem:[%s6823_s3 + $0x4d0] sm:$0xff] %vm3105_vm1, %v4784_v8  ;;  %v2814_v11 = vadd.f32 %v5977_v53, %v2446_v7  ;;  %4809 = vtanh.f32 %v2816_v6  ;;  %v4185_v14 = vpop.f32.mrb[96].mxu0 }
 0x1a6   :  { %v4788_v12 = vpop.eup %4787  ;;  %3324 = vst.msk [vmem:[%s6823_s3 + $0x6d0] sm:$0xff] %vm3105_vm1, %v4786_v10  ;;  %4811 = vtanh.f32 %v2750_v9  ;;  %v2755_v16 = vadd.f32 %v5977_v53, %v4185_v14  ;;  %v4257_v17 = vpop.f32.mrb[96].mxu1 }
 0x1a7   :  { %v4790_v13 = vpop.eup %4789  ;;  %3258 = vst.msk [vmem:[%s6823_s3 + $0x4c0] sm:$0xff] %vm3105_vm1, %v4788_v12  ;;  %v1816_v18 = vpop.f32.mrb[97].mxu0  ;;  %4813 = vtanh.f32 %v2814_v11  ;;  %v2819_v20 = vadd.f32 %v5977_v53, %v4257_v17 }
 0x1a8   :  { %v4792_v15 = vpop.eup %4791  ;;  %3322 = vst.msk [vmem:[%s6823_s3 + $0x6c0] sm:$0xff] %vm3105_vm1, %v4790_v13  ;;  %v2753_v21 = vadd.f32 %v5977_v53, %v1816_v18  ;;  %v2459_v22 = vpop.f32.mrb[97].mxu1  ;;  %4815 = vtanh.f32 %v2755_v16 }
 0x1a9   :  { %v4794_v19 = vpop.eup %4793  ;;  %3261 = vst.msk [vmem:[%s6823_s3 + $0x4d8] sm:$0xff] %vm3105_vm1, %v4792_v15  ;;  %v4186_v23 = vpop.f32.mrb[98].mxu0  ;;  %v2817_v25 = vadd.f32 %v5977_v53, %v2459_v22  ;;  %4817 = vtanh.f32 %v2819_v20 }
 0x1aa   :  { %v4796_v24 = vpop.eup %4795  ;;  %3325 = vst.msk [vmem:[%s6823_s3 + $0x6d8] sm:$0xff] %vm3105_vm1, %v4794_v19  ;;  %v2756_v26 = vadd.f32 %v5977_v53, %v4186_v23  ;;  %v4258_v27 = vpop.f32.mrb[98].mxu1  ;;  %4819 = vtanh.f32 %v2753_v21 }
 0x1ab   :  { %v1819_v28 = vpop.f32.mrb[99].mxu0  ;;  %v4798_v29 = vpop.eup %4797  ;;  %3259 = vst.msk [vmem:[%s6823_s3 + $0x4c8] sm:$0xff] %vm3105_vm1, %v4796_v24  ;;  %v2820_v30 = vadd.f32 %v5977_v53, %v4258_v27  ;;  %4821 = vtanh.f32 %v2817_v25 }
 0x1ac   :  { %v2462_v31 = vpop.f32.mrb[99].mxu1  ;;  %v4800_v32 = vpop.eup %4799  ;;  %3323 = vst.msk [vmem:[%s6823_s3 + $0x6c8] sm:$0xff] %vm3105_vm1, %v4798_v29  ;;  %v2754_v33 = vadd.f32 %v5977_v53, %v1819_v28  ;;  %4823 = vtanh.f32 %v2756_v26 }
 0x1ad   :  { %v4802_v34 = vpop.eup %4801  ;;  %3264 = vst.msk [vmem:[%s6823_s3 + $0x4f0] sm:$0xff] %vm3105_vm1, %v4800_v32  ;;  %v2818_v35 = vadd.f32 %v5977_v53, %v2462_v31  ;;  %4825 = vtanh.f32 %v2820_v30  ;;  %v4189_v38 = vpop.f32.mrb[100].mxu0 }
 0x1ae   :  { %v4804_v36 = vpop.eup %4803  ;;  %3328 = vst.msk [vmem:[%s6823_s3 + $0x6f0] sm:$0xff] %vm3105_vm1, %v4802_v34  ;;  %4827 = vtanh.f32 %v2754_v33  ;;  %v2759_v40 = vadd.f32 %v5977_v53, %v4189_v38  ;;  %v4261_v41 = vpop.f32.mrb[100].mxu1 }
 0x1af   :  { %v4806_v37 = vpop.eup %4805  ;;  %3262 = vst.msk [vmem:[%s6823_s3 + $0x4e0] sm:$0xff] %vm3105_vm1, %v4804_v36  ;;  %v1832_v42 = vpop.f32.mrb[101].mxu0  ;;  %4829 = vtanh.f32 %v2818_v35  ;;  %v2823_v45 = vadd.f32 %v6495_v44, %v4261_v41 }
 0x1b0   :  { %v4808_v39 = vpop.eup %4807  ;;  %3326 = vst.msk [vmem:[%s6823_s3 + $0x6e0] sm:$0xff] %vm3105_vm1, %v4806_v37  ;;  %v2757_v46 = vadd.f32 %v6495_v44, %v1832_v42  ;;  %v2475_v47 = vpop.f32.mrb[101].mxu1  ;;  %4831 = vtanh.f32 %v2759_v40 }
 0x1b1   :  { %v4810_v43 = vpop.eup %4809  ;;  %3265 = vst.msk [vmem:[%s6823_s3 + $0x4f8] sm:$0xff] %vm3105_vm1, %v4808_v39  ;;  %v4190_v53 = vpop.f32.mrb[102].mxu0  ;;  %v2821_v49 = vadd.f32 %v6495_v44, %v2475_v47  ;;  %4833 = vtanh.f32 %v2823_v45 }
 0x1b2   :  { %v4812_v48 = vpop.eup %4811  ;;  %3329 = vst.msk [vmem:[%s6823_s3 + $0x6f8] sm:$0xff] %vm3105_vm1, %v4810_v43  ;;  %v2760_v50 = vadd.f32 %v6495_v44, %v4190_v53  ;;  %v4262_v51 = vpop.f32.mrb[102].mxu1  ;;  %4835 = vtanh.f32 %v2757_v46 }
 0x1b3   :  { %v1835_v52 = vpop.f32.mrb[103].mxu0  ;;  %v4814_v54 = vpop.eup %4813  ;;  %3263 = vst.msk [vmem:[%s6823_s3 + $0x4e8] sm:$0xff] %vm3105_vm1, %v4812_v48  ;;  %v2824_v55 = vadd.f32 %v6495_v44, %v4262_v51  ;;  %4837 = vtanh.f32 %v2821_v49 }
 0x1b4   :  { %v2478_v56 = vpop.f32.mrb[103].mxu1  ;;  %v4816_v57 = vpop.eup %4815  ;;  %3327 = vst.msk [vmem:[%s6823_s3 + $0x6e8] sm:$0xff] %vm3105_vm1, %v4814_v54  ;;  %v2758_v58 = vadd.f32 %v6495_v44, %v1835_v52  ;;  %4839 = vtanh.f32 %v2760_v50 }
 0x1b5   :  { %v4818_v59 = vpop.eup %4817  ;;  %3268 = vst.msk [vmem:[%s6823_s3 + $0x510] sm:$0xff] %vm3105_vm1, %v4816_v57  ;;  %v2822_v62 = vadd.f32 %v6495_v44, %v2478_v56  ;;  %4841 = vtanh.f32 %v2824_v55  ;;  %v4193_v63 = vpop.f32.mrb[104].mxu0 }
 0x1b6   :  { %v4820_v60 = vpop.eup %4819  ;;  %3332 = vst.msk [vmem:[%s6823_s3 + $0x710] sm:$0xff] %vm3105_vm1, %v4818_v59  ;;  %4843 = vtanh.f32 %v2758_v58  ;;  %v2763_v1 = vadd.f32 %v6495_v44, %v4193_v63  ;;  %v4265_v2 = vpop.f32.mrb[104].mxu1 }
 0x1b7   :  { %v4822_v61 = vpop.eup %4821  ;;  %3266 = vst.msk [vmem:[%s6823_s3 + $0x500] sm:$0xff] %vm3105_vm1, %v4820_v60  ;;  %v1848_v3 = vpop.f32.mrb[105].mxu0  ;;  %4845 = vtanh.f32 %v2822_v62  ;;  %v2827_v5 = vadd.f32 %v6495_v44, %v4265_v2 }
 0x1b8   :  { %v4824_v0 = vpop.eup %4823  ;;  %3330 = vst.msk [vmem:[%s6823_s3 + $0x700] sm:$0xff] %vm3105_vm1, %v4822_v61  ;;  %v2761_v6 = vadd.f32 %v6495_v44, %v1848_v3  ;;  %v2491_v7 = vpop.f32.mrb[105].mxu1  ;;  %4847 = vtanh.f32 %v2763_v1 }
 0x1b9   :  { %v4826_v4 = vpop.eup %4825  ;;  %3269 = vst.msk [vmem:[%s6823_s3 + $0x518] sm:$0xff] %vm3105_vm1, %v4824_v0  ;;  %v4194_v8 = vpop.f32.mrb[106].mxu0  ;;  %v2825_v10 = vadd.f32 %v6495_v44, %v2491_v7  ;;  %4849 = vtanh.f32 %v2827_v5 }
 0x1ba   :  { %v4828_v9 = vpop.eup %4827  ;;  %3333 = vst.msk [vmem:[%s6823_s3 + $0x718] sm:$0xff] %vm3105_vm1, %v4826_v4  ;;  %v2764_v11 = vadd.f32 %v6495_v44, %v4194_v8  ;;  %v4266_v12 = vpop.f32.mrb[106].mxu1  ;;  %4851 = vtanh.f32 %v2761_v6 }
 0x1bb   :  { %v1851_v13 = vpop.f32.mrb[107].mxu0  ;;  %v4830_v14 = vpop.eup %4829  ;;  %3267 = vst.msk [vmem:[%s6823_s3 + $0x508] sm:$0xff] %vm3105_vm1, %v4828_v9  ;;  %v2828_v15 = vadd.f32 %v6495_v44, %v4266_v12  ;;  %4853 = vtanh.f32 %v2825_v10 }
 0x1bc   :  { %v2494_v16 = vpop.f32.mrb[107].mxu1  ;;  %v4832_v17 = vpop.eup %4831  ;;  %3331 = vst.msk [vmem:[%s6823_s3 + $0x708] sm:$0xff] %vm3105_vm1, %v4830_v14  ;;  %v2762_v18 = vadd.f32 %v6495_v44, %v1851_v13  ;;  %4855 = vtanh.f32 %v2764_v11 }
 0x1bd   :  { %v4834_v19 = vpop.eup %4833  ;;  %3272 = vst.msk [vmem:[%s6823_s3 + $0x530] sm:$0xff] %vm3105_vm1, %v4832_v17  ;;  %v2826_v20 = vadd.f32 %v6495_v44, %v2494_v16  ;;  %4857 = vtanh.f32 %v2828_v15  ;;  %v4197_v23 = vpop.f32.mrb[108].mxu0 }
 0x1be   :  { %v4836_v21 = vpop.eup %4835  ;;  %3336 = vst.msk [vmem:[%s6823_s3 + $0x730] sm:$0xff] %vm3105_vm1, %v4834_v19  ;;  %4859 = vtanh.f32 %v2762_v18  ;;  %v2767_v25 = vadd.f32 %v6495_v44, %v4197_v23  ;;  %v4269_v26 = vpop.f32.mrb[108].mxu1 }
 0x1bf   :  { %v4838_v22 = vpop.eup %4837  ;;  %3270 = vst.msk [vmem:[%s6823_s3 + $0x520] sm:$0xff] %vm3105_vm1, %v4836_v21  ;;  %v1864_v27 = vpop.f32.mrb[109].mxu0  ;;  %4861 = vtanh.f32 %v2826_v20  ;;  %v2831_v29 = vadd.f32 %v6495_v44, %v4269_v26 }
 0x1c0   :  { %v4840_v24 = vpop.eup %4839  ;;  %3334 = vst.msk [vmem:[%s6823_s3 + $0x720] sm:$0xff] %vm3105_vm1, %v4838_v22  ;;  %v2765_v30 = vadd.f32 %v6495_v44, %v1864_v27  ;;  %v2507_v31 = vpop.f32.mrb[109].mxu1  ;;  %4863 = vtanh.f32 %v2767_v25 }
 0x1c1   :  { %v4842_v28 = vpop.eup %4841  ;;  %3273 = vst.msk [vmem:[%s6823_s3 + $0x538] sm:$0xff] %vm3105_vm1, %v4840_v24  ;;  %v4198_v32 = vpop.f32.mrb[110].mxu0  ;;  %v2829_v34 = vadd.f32 %v6495_v44, %v2507_v31  ;;  %4865 = vtanh.f32 %v2831_v29 }
 0x1c2   :  { %v4844_v33 = vpop.eup %4843  ;;  %3337 = vst.msk [vmem:[%s6823_s3 + $0x738] sm:$0xff] %vm3105_vm1, %v4842_v28  ;;  %v2768_v35 = vadd.f32 %v6495_v44, %v4198_v32  ;;  %v4270_v36 = vpop.f32.mrb[110].mxu1  ;;  %4867 = vtanh.f32 %v2765_v30 }
 0x1c3   :  { %v1867_v37 = vpop.f32.mrb[111].mxu0  ;;  %v4846_v38 = vpop.eup %4845  ;;  %3271 = vst.msk [vmem:[%s6823_s3 + $0x528] sm:$0xff] %vm3105_vm1, %v4844_v33  ;;  %v2832_v39 = vadd.f32 %v6495_v44, %v4270_v36  ;;  %4869 = vtanh.f32 %v2829_v34 }
 0x1c4   :  { %v2510_v40 = vpop.f32.mrb[111].mxu1  ;;  %v4848_v41 = vpop.eup %4847  ;;  %3335 = vst.msk [vmem:[%s6823_s3 + $0x728] sm:$0xff] %vm3105_vm1, %v4846_v38  ;;  %v2766_v42 = vadd.f32 %v6495_v44, %v1867_v37  ;;  %4871 = vtanh.f32 %v2768_v35 }
 0x1c5   :  { %v4850_v43 = vpop.eup %4849  ;;  %3276 = vst.msk [vmem:[%s6823_s3 + $0x550] sm:$0xff] %vm3105_vm1, %v4848_v41  ;;  %v2830_v45 = vadd.f32 %v6495_v44, %v2510_v40  ;;  %4873 = vtanh.f32 %v2832_v39  ;;  %v4201_v53 = vpop.f32.mrb[112].mxu0 }
 0x1c6   :  { %v4852_v46 = vpop.eup %4851  ;;  %3340 = vst.msk [vmem:[%s6823_s3 + $0x750] sm:$0xff] %vm3105_vm1, %v4850_v43  ;;  %4875 = vtanh.f32 %v2766_v42  ;;  %v2771_v49 = vadd.f32 %v6495_v44, %v4201_v53  ;;  %v4273_v50 = vpop.f32.mrb[112].mxu1 }
 0x1c7   :  { %v4854_v47 = vpop.eup %4853  ;;  %3274 = vst.msk [vmem:[%s6823_s3 + $0x540] sm:$0xff] %vm3105_vm1, %v4852_v46  ;;  %v1880_v51 = vpop.f32.mrb[113].mxu0  ;;  %4877 = vtanh.f32 %v2830_v45  ;;  %v2835_v54 = vadd.f32 %v6495_v44, %v4273_v50 }
 0x1c8   :  { %v4856_v48 = vpop.eup %4855  ;;  %3338 = vst.msk [vmem:[%s6823_s3 + $0x740] sm:$0xff] %vm3105_vm1, %v4854_v47  ;;  %v2769_v55 = vadd.f32 %v6495_v44, %v1880_v51  ;;  %v2523_v56 = vpop.f32.mrb[113].mxu1  ;;  %4879 = vtanh.f32 %v2771_v49 }
 0x1c9   :  { %v4858_v52 = vpop.eup %4857  ;;  %3277 = vst.msk [vmem:[%s6823_s3 + $0x558] sm:$0xff] %vm3105_vm1, %v4856_v48  ;;  %v4202_v57 = vpop.f32.mrb[114].mxu0  ;;  %v2833_v59 = vadd.f32 %v6495_v44, %v2523_v56  ;;  %4881 = vtanh.f32 %v2835_v54 }
 0x1ca   :  { %v4860_v58 = vpop.eup %4859  ;;  %3341 = vst.msk [vmem:[%s6823_s3 + $0x758] sm:$0xff] %vm3105_vm1, %v4858_v52  ;;  %v2772_v62 = vadd.f32 %v6495_v44, %v4202_v57  ;;  %v4274_v60 = vpop.f32.mrb[114].mxu1  ;;  %4883 = vtanh.f32 %v2769_v55 }
 0x1cb   :  { %v1883_v61 = vpop.f32.mrb[115].mxu0  ;;  %v4862_v63 = vpop.eup %4861  ;;  %3275 = vst.msk [vmem:[%s6823_s3 + $0x548] sm:$0xff] %vm3105_vm1, %v4860_v58  ;;  %v2836_v0 = vadd.f32 %v6495_v44, %v4274_v60  ;;  %4885 = vtanh.f32 %v2833_v59 }
 0x1cc   :  { %v2526_v1 = vpop.f32.mrb[115].mxu1  ;;  %v4864_v2 = vpop.eup %4863  ;;  %3339 = vst.msk [vmem:[%s6823_s3 + $0x748] sm:$0xff] %vm3105_vm1, %v4862_v63  ;;  %v2770_v3 = vadd.f32 %v6495_v44, %v1883_v61  ;;  %4887 = vtanh.f32 %v2772_v62 }
 0x1cd   :  { %v4866_v4 = vpop.eup %4865  ;;  %3280 = vst.msk [vmem:[%s6823_s3 + $0x570] sm:$0xff] %vm3105_vm1, %v4864_v2  ;;  %v2834_v5 = vadd.f32 %v6495_v44, %v2526_v1  ;;  %4889 = vtanh.f32 %v2836_v0  ;;  %v4205_v8 = vpop.f32.mrb[116].mxu0 }
 0x1ce   :  { %v4868_v6 = vpop.eup %4867  ;;  %3344 = vst.msk [vmem:[%s6823_s3 + $0x770] sm:$0xff] %vm3105_vm1, %v4866_v4  ;;  %4891 = vtanh.f32 %v2770_v3  ;;  %v2775_v10 = vadd.f32 %v6495_v44, %v4205_v8  ;;  %v4277_v11 = vpop.f32.mrb[116].mxu1 }
 0x1cf   :  { %v4870_v7 = vpop.eup %4869  ;;  %3278 = vst.msk [vmem:[%s6823_s3 + $0x560] sm:$0xff] %vm3105_vm1, %v4868_v6  ;;  %v1896_v12 = vpop.f32.mrb[117].mxu0  ;;  %4893 = vtanh.f32 %v2834_v5  ;;  %v2839_v14 = vadd.f32 %v6495_v44, %v4277_v11 }
 0x1d0   :  { %v4872_v9 = vpop.eup %4871  ;;  %3342 = vst.msk [vmem:[%s6823_s3 + $0x760] sm:$0xff] %vm3105_vm1, %v4870_v7  ;;  %v2773_v15 = vadd.f32 %v6495_v44, %v1896_v12  ;;  %v2539_v16 = vpop.f32.mrb[117].mxu1  ;;  %4895 = vtanh.f32 %v2775_v10 }
 0x1d1   :  { %v4874_v13 = vpop.eup %4873  ;;  %3281 = vst.msk [vmem:[%s6823_s3 + $0x578] sm:$0xff] %vm3105_vm1, %v4872_v9  ;;  %v4206_v17 = vpop.f32.mrb[118].mxu0  ;;  %v2837_v19 = vadd.f32 %v6495_v44, %v2539_v16  ;;  %4897 = vtanh.f32 %v2839_v14 }
 0x1d2   :  { %v4876_v18 = vpop.eup %4875  ;;  %3345 = vst.msk [vmem:[%s6823_s3 + $0x778] sm:$0xff] %vm3105_vm1, %v4874_v13  ;;  %v2776_v20 = vadd.f32 %v6495_v44, %v4206_v17  ;;  %v4278_v21 = vpop.f32.mrb[118].mxu1  ;;  %4899 = vtanh.f32 %v2773_v15 }
 0x1d3   :  { %v1899_v22 = vpop.f32.mrb[119].mxu0  ;;  %v4878_v23 = vpop.eup %4877  ;;  %3279 = vst.msk [vmem:[%s6823_s3 + $0x568] sm:$0xff] %vm3105_vm1, %v4876_v18  ;;  %v2840_v24 = vadd.f32 %v6495_v44, %v4278_v21  ;;  %4901 = vtanh.f32 %v2837_v19 }
 0x1d4   :  { %v2542_v25 = vpop.f32.mrb[119].mxu1  ;;  %v4880_v26 = vpop.eup %4879  ;;  %3343 = vst.msk [vmem:[%s6823_s3 + $0x768] sm:$0xff] %vm3105_vm1, %v4878_v23  ;;  %v2774_v27 = vadd.f32 %v6495_v44, %v1899_v22  ;;  %4903 = vtanh.f32 %v2776_v20 }
 0x1d5   :  { %v4882_v28 = vpop.eup %4881  ;;  %3284 = vst.msk [vmem:[%s6823_s3 + $0x590] sm:$0xff] %vm3105_vm1, %v4880_v26  ;;  %v2838_v29 = vadd.f32 %v6495_v44, %v2542_v25  ;;  %4905 = vtanh.f32 %v2840_v24  ;;  %v4209_v32 = vpop.f32.mrb[120].mxu0 }
 0x1d6   :  { %v4884_v30 = vpop.eup %4883  ;;  %3348 = vst.msk [vmem:[%s6823_s3 + $0x790] sm:$0xff] %vm3105_vm1, %v4882_v28  ;;  %4907 = vtanh.f32 %v2774_v27  ;;  %v2779_v34 = vadd.f32 %v6495_v44, %v4209_v32  ;;  %v4281_v35 = vpop.f32.mrb[120].mxu1 }
 0x1d7   :  { %v4886_v31 = vpop.eup %4885  ;;  %3282 = vst.msk [vmem:[%s6823_s3 + $0x580] sm:$0xff] %vm3105_vm1, %v4884_v30  ;;  %v1912_v36 = vpop.f32.mrb[121].mxu0  ;;  %4909 = vtanh.f32 %v2838_v29  ;;  %v2843_v38 = vadd.f32 %v6495_v44, %v4281_v35 }
 0x1d8   :  { %v4888_v33 = vpop.eup %4887  ;;  %3346 = vst.msk [vmem:[%s6823_s3 + $0x780] sm:$0xff] %vm3105_vm1, %v4886_v31  ;;  %v2777_v39 = vadd.f32 %v6495_v44, %v1912_v36  ;;  %v2555_v40 = vpop.f32.mrb[121].mxu1  ;;  %4911 = vtanh.f32 %v2779_v34 }
 0x1d9   :  { %v4890_v37 = vpop.eup %4889  ;;  %3285 = vst.msk [vmem:[%s6823_s3 + $0x598] sm:$0xff] %vm3105_vm1, %v4888_v33  ;;  %v4210_v41 = vpop.f32.mrb[122].mxu0  ;;  %v2841_v43 = vadd.f32 %v6495_v44, %v2555_v40  ;;  %4913 = vtanh.f32 %v2843_v38 }
 0x1da   :  { %v4892_v42 = vpop.eup %4891  ;;  %3349 = vst.msk [vmem:[%s6823_s3 + $0x798] sm:$0xff] %vm3105_vm1, %v4890_v37  ;;  %v2780_v45 = vadd.f32 %v6495_v44, %v4210_v41  ;;  %v4282_v46 = vpop.f32.mrb[122].mxu1  ;;  %4915 = vtanh.f32 %v2777_v39 }
 0x1db   :  { %v1915_v47 = vpop.f32.mrb[123].mxu0  ;;  %v4894_v53 = vpop.eup %4893  ;;  %3283 = vst.msk [vmem:[%s6823_s3 + $0x588] sm:$0xff] %vm3105_vm1, %v4892_v42  ;;  %v2844_v48 = vadd.f32 %v6495_v44, %v4282_v46  ;;  %4917 = vtanh.f32 %v2841_v43 }
 0x1dc   :  { %v2558_v49 = vpop.f32.mrb[123].mxu1  ;;  %v4896_v50 = vpop.eup %4895  ;;  %3347 = vst.msk [vmem:[%s6823_s3 + $0x788] sm:$0xff] %vm3105_vm1, %v4894_v53  ;;  %v2778_v51 = vadd.f32 %v6495_v44, %v1915_v47  ;;  %4919 = vtanh.f32 %v2780_v45 }
 0x1dd   :  { %v4898_v52 = vpop.eup %4897  ;;  %3288 = vst.msk [vmem:[%s6823_s3 + $0x5b0] sm:$0xff] %vm3105_vm1, %v4896_v50  ;;  %v2842_v54 = vadd.f32 %v6495_v44, %v2558_v49  ;;  %4921 = vtanh.f32 %v2844_v48  ;;  %v4213_v57 = vpop.f32.mrb[124].mxu0 }
 0x1de   :  { %v4900_v55 = vpop.eup %4899  ;;  %3352 = vst.msk [vmem:[%s6823_s3 + $0x7b0] sm:$0xff] %vm3105_vm1, %v4898_v52  ;;  %4923 = vtanh.f32 %v2778_v51  ;;  %v2783_v59 = vadd.f32 %v6495_v44, %v4213_v57  ;;  %v4285_v62 = vpop.f32.mrb[124].mxu1 }
 0x1df   :  { %v4902_v56 = vpop.eup %4901  ;;  %3286 = vst.msk [vmem:[%s6823_s3 + $0x5a0] sm:$0xff] %vm3105_vm1, %v4900_v55  ;;  %v1928_v60 = vpop.f32.mrb[125].mxu0  ;;  %4925 = vtanh.f32 %v2842_v54  ;;  %v2847_v63 = vadd.f32 %v6495_v44, %v4285_v62 }
 0x1e0   :  { %v4904_v58 = vpop.eup %4903  ;;  %3350 = vst.msk [vmem:[%s6823_s3 + $0x7a0] sm:$0xff] %vm3105_vm1, %v4902_v56  ;;  %v2781_v0 = vadd.f32 %v6495_v44, %v1928_v60  ;;  %v2571_v1 = vpop.f32.mrb[125].mxu1  ;;  %4927 = vtanh.f32 %v2783_v59 }
 0x1e1   :  { %v4906_v61 = vpop.eup %4905  ;;  %3289 = vst.msk [vmem:[%s6823_s3 + $0x5b8] sm:$0xff] %vm3105_vm1, %v4904_v58  ;;  %v4214_v2 = vpop.f32.mrb[126].mxu0  ;;  %v2845_v4 = vadd.f32 %v6495_v44, %v2571_v1  ;;  %4929 = vtanh.f32 %v2847_v63 }
 0x1e2   :  { %v4908_v3 = vpop.eup %4907  ;;  %3353 = vst.msk [vmem:[%s6823_s3 + $0x7b8] sm:$0xff] %vm3105_vm1, %v4906_v61  ;;  %v2784_v5 = vadd.f32 %v6495_v44, %v4214_v2  ;;  %v4286_v6 = vpop.f32.mrb[126].mxu1  ;;  %4931 = vtanh.f32 %v2781_v0 }
 0x1e3   :  { %v1931_v7 = vpop.f32.mrb[127].mxu0  ;;  %v4910_v8 = vpop.eup %4909  ;;  %3287 = vst.msk [vmem:[%s6823_s3 + $0x5a8] sm:$0xff] %vm3105_vm1, %v4908_v3  ;;  %v2848_v9 = vadd.f32 %v6495_v44, %v4286_v6  ;;  %4933 = vtanh.f32 %v2845_v4 }
 0x1e4   :  { %v2574_v10 = vpop.f32.mrb[127].mxu1  ;;  %v4912_v11 = vpop.eup %4911  ;;  %3351 = vst.msk [vmem:[%s6823_s3 + $0x7a8] sm:$0xff] %vm3105_vm1, %v4910_v8  ;;  %v2782_v12 = vadd.f32 %v6495_v44, %v1931_v7  ;;  %4935 = vtanh.f32 %v2784_v5 }
 0x1e5   :  { %v4914_v13 = vpop.eup %4913  ;;  %3292 = vst.msk [vmem:[%s6823_s3 + $0x5d0] sm:$0xff] %vm3105_vm1, %v4912_v11  ;;  %v2846_v14 = vadd.f32 %v6495_v44, %v2574_v10  ;;  %4937 = vtanh.f32 %v2848_v9 }
 0x1e6   :  { %v4916_v15 = vpop.eup %4915  ;;  %3356 = vst.msk [vmem:[%s6823_s3 + $0x7d0] sm:$0xff] %vm3105_vm1, %v4914_v13  ;;  %4939 = vtanh.f32 %v2782_v12 }
 0x1e7   :  { %v4918_v16 = vpop.eup %4917  ;;  %3290 = vst.msk [vmem:[%s6823_s3 + $0x5c0] sm:$0xff] %vm3105_vm1, %v4916_v15  ;;  %4941 = vtanh.f32 %v2846_v14 }
 0x1e8   :  { %v4920_v17 = vpop.eup %4919  ;;  %3354 = vst.msk [vmem:[%s6823_s3 + $0x7c0] sm:$0xff] %vm3105_vm1, %v4918_v16 }
 0x1e9   :  { %v4922_v44 = vpop.eup %4921  ;;  %3293 = vst.msk [vmem:[%s6823_s3 + $0x5d8] sm:$0xff] %vm3105_vm1, %v4920_v17 }
 0x1ea   :  { %v4924_v18 = vpop.eup %4923  ;;  %3357 = vst.msk [vmem:[%s6823_s3 + $0x7d8] sm:$0xff] %vm3105_vm1, %v4922_v44 }
 0x1eb   :  { %v4926_v19 = vpop.eup %4925  ;;  %3291 = vst.msk [vmem:[%s6823_s3 + $0x5c8] sm:$0xff] %vm3105_vm1, %v4924_v18 }
 0x1ec   :  { %v4928_v20 = vpop.eup %4927  ;;  %3355 = vst.msk [vmem:[%s6823_s3 + $0x7c8] sm:$0xff] %vm3105_vm1, %v4926_v19 }
 0x1ed   :  { %v4930_v21 = vpop.eup %4929  ;;  %3296 = vst.msk [vmem:[%s6823_s3 + $0x5f0] sm:$0xff] %vm3105_vm1, %v4928_v20 }
 0x1ee   :  { %v4932_v22 = vpop.eup %4931  ;;  %3360 = vst.msk [vmem:[%s6823_s3 + $0x7f0] sm:$0xff] %vm3105_vm1, %v4930_v21 }
 0x1ef   :  { %v4934_v23 = vpop.eup %4933  ;;  %3294 = vst.msk [vmem:[%s6823_s3 + $0x5e0] sm:$0xff] %vm3105_vm1, %v4932_v22 }
 0x1f0   :  { %v4936_v24 = vpop.eup %4935  ;;  %3358 = vst.msk [vmem:[%s6823_s3 + $0x7e0] sm:$0xff] %vm3105_vm1, %v4934_v23 }
 0x1f1   :  { %v4938_v25 = vpop.eup %4937  ;;  %3297 = vst.msk [vmem:[%s6823_s3 + $0x5f8] sm:$0xff] %vm3105_vm1, %v4936_v24 }
 0x1f2   :  { %v4940_v26 = vpop.eup %4939  ;;  %3361 = vst.msk [vmem:[%s6823_s3 + $0x7f8] sm:$0xff] %vm3105_vm1, %v4938_v25 }
 0x1f3   :  { %v4942_v27 = vpop.eup %4941  ;;  %3295 = vst.msk [vmem:[%s6823_s3 + $0x5e8] sm:$0xff] %vm3105_vm1, %v4940_v26 }
 0x1f4   :  { %3359 = vst.msk [vmem:[%s6823_s3 + $0x7e8] sm:$0xff] %vm3105_vm1, %v4942_v27 }

</bundles_post_ra>
